<compile_context>
chip_gen: v7x
topology: tpu7x:2x2x1
jax: 0.10.0
libtpu: 0.0.40
codegen_flags: <defaults>
</compile_context>

<pallas_src>
import functools

import numpy as np
import jax
import jax.numpy as jnp
from jax.experimental import pallas as pl
from jax.experimental.pallas import tpu as pltpu


def _round_up(v, m):
    return ((v + m - 1) // m) * m


# ----------------------------------------------------------------------------
# In-kernel building blocks
# ----------------------------------------------------------------------------
def _conv3x3_relu_maxpool2(a, bm_ref, bias_ref):
    """Conv2d(3x3,'valid') + bias + ReLU + MaxPool(2,2) as one MXU matmul.

    a        : (Nb, H, L_in) activations; lanes ordered (x, cin) in the first
               W_in*Cin lanes, exact zeros in the padded lanes.
    bm_ref   : (L_in, 3 * 2 * half_pad) bf16 column-stacked banded matrices,
               one 2*half_pad column group per kernel row dh; within a group
               the columns are ordered (pool phase s, x', cout), zero-padded
               up to half_pad (a multiple of 128) per phase.
    bias_ref : (1, half_pad) f32 bias tiled over (x', cout), zero padded.
    returns  : (Nb, Hp, half_pad) pooled activations, f32, zero padded lanes.
    """
    n, h, l_in = a.shape
    half = bias_ref.shape[1]              # padded Wp * Cout (multiple of 128)
    oc2 = 2 * half
    hp = (h - 2) // 2
    he = 2 * hp

    # One wide matmul over all H rows and all 3 kernel-row groups
    # (bf16 operands, f32 accumulation on the MXU).
    p = jnp.dot(a.reshape(n * h, l_in).astype(jnp.bfloat16), bm_ref[...],
                preferred_element_type=jnp.float32)
    p = p.reshape(n, h, 3 * oc2)

    # Combine the three kernel rows: out[y] = P0[y] + P1[y+1] + P2[y+2].
    # Slices are per-sample along axis 1 (no cross-batch bleed) and the lane
    # offsets are multiples of 128, so the column split is vreg-aligned.
    acc = (p[:, 0:he, 0:oc2]
           + p[:, 1:1 + he, oc2:2 * oc2]
           + p[:, 2:2 + he, 2 * oc2:3 * oc2])

    # Horizontal 2-pool: the two x-parity phases are the two column halves.
    acc = jnp.maximum(acc[..., :half], acc[..., half:])
    # Bias + ReLU in f32 (valid after the max: per-channel bias, monotone ReLU).
    acc = jnp.maximum(acc + bias_ref[...], 0.0)
    # Vertical 2-pool: pair adjacent rows.
    acc = acc.reshape(n * hp, 2, half)
    acc = jnp.maximum(acc[:, 0, :], acc[:, 1, :])
    return acc.reshape(n, hp, half)


def network_kernel(x_ref,
                   bm1_ref, bb1_ref, bm2_ref, bb2_ref,
                   bm3_ref, bb3_ref, bm4_ref, bb4_ref,
                   fc1w_ref, fc1b_ref, fc2w_ref, fc2b_ref, mask_ref,
                   out_ref):
    """One batch block of the full Network forward pass (all VMEM resident)."""
    a = x_ref[...]
    for bm_ref, bb_ref in ((bm1_ref, bb1_ref), (bm2_ref, bb2_ref),
                           (bm3_ref, bb3_ref), (bm4_ref, bb4_ref)):
        a = _conv3x3_relu_maxpool2(a, bm_ref, bb_ref)

    n = a.shape[0]
    feat = a.reshape(n, a.shape[1] * a.shape[2])        # (h', lane) flatten
    h1 = jnp.dot(feat.astype(jnp.bfloat16), fc1w_ref[...],
                 preferred_element_type=jnp.float32)
    h1 = jnp.maximum(h1 + fc1b_ref[...], 0.0)
    h1 = h1 * mask_ref[...]                             # inverted dropout
    logits = jnp.dot(h1.astype(jnp.bfloat16), fc2w_ref[...],
                     preferred_element_type=jnp.float32) + fc2b_ref[...]
    z = logits - jnp.max(logits, axis=1, keepdims=True)
    lse = jnp.log(jnp.sum(jnp.exp(z), axis=1, keepdims=True))
    out_ref[...] = (z - lse).astype(out_ref.dtype)


# ----------------------------------------------------------------------------
# One-time weight preparation (numpy glue, done outside the kernel)
# ----------------------------------------------------------------------------
def _banded_conv_matrix(w, w_in, lane_in, half_pad):
    """Column-stacked banded matrices for conv3x3 + horizontal pool phases.

    w : (3, 3, Cin, Cout) HWIO weights.  Returns (lane_in, 3*2*half_pad) with
      m[(2x'+s+dw)*Cin + ci, dh*2*half_pad + s*half_pad + x'*Cout + co]
        = w[dh, dw, ci, co]
    and exact zeros elsewhere (including the lane padding columns/rows).
    """
    _, _, cin, cout = w.shape
    wp = (w_in - 2) // 2
    oc2 = 2 * half_pad
    m = np.zeros((lane_in, 3 * oc2), np.float32)
    for dh in range(3):
        for s in range(2):
            for xp in range(wp):
                col0 = dh * oc2 + s * half_pad + xp * cout
                for dw in range(3):
                    x = 2 * xp + s + dw
                    row0 = x * cin
                    m[row0:row0 + cin, col0:col0 + cout] = w[dh, dw]
    return m


def prepare_kernel_weights(params, shape_in, mm_dtype=jnp.bfloat16):
    """Convert PyTorch-layout parameters into kernel operands (call once)."""
    cin, h, w = shape_in
    prep = {}
    h_cur, w_cur, c_cur = h, w, cin
    lane_in = w * cin
    for i in range(1, 5):
        wl = np.asarray(params[f"conv{i}_w"], np.float32)     # (3,3,cin,cout)
        bl = np.asarray(params[f"conv{i}_b"], np.float32)
        cout = wl.shape[-1]
        hp, wp = (h_cur - 2) // 2, (w_cur - 2) // 2
        assert hp >= 1 and wp >= 1, "input too small for 4 conv+pool stages"
        # When (H-2) is odd the last conv row is dropped: MaxPool floor semantics.
        half_pad = _round_up(wp * cout, 128)
        prep[f"bm{i}"] = jnp.asarray(
            _banded_conv_matrix(wl, w_cur, lane_in, half_pad), mm_dtype)
        bb = np.zeros((1, half_pad), np.float32)
        bb[0, :wp * cout] = np.tile(bl, wp)
        prep[f"bb{i}"] = jnp.asarray(bb)
        h_cur, w_cur, c_cur, lane_in = hp, wp, cout, half_pad

    num_fc1 = int(params["fc1_w"].shape[1])
    num_classes = int(params["fc2_w"].shape[1])
    f1_pad = _round_up(num_fc1, 128)

    # fc1 rows are stored in PyTorch NCHW-flatten order (c, y, x); the kernel
    # flattens (y, lane) with lane = x*Cout + c over the padded lane stride.
    w1 = np.asarray(params["fc1_w"], np.float32)       # (num_flatten, num_fc1)
    assert w1.shape[0] == c_cur * h_cur * w_cur
    fc1 = np.zeros((h_cur * lane_in, f1_pad), np.float32)
    for y in range(h_cur):
        for x in range(w_cur):
            for c in range(c_cur):
                src = c * h_cur * w_cur + y * w_cur + x
                dst = y * lane_in + x * c_cur + c
                fc1[dst, :num_fc1] = w1[src]
    prep["fc1_w"] = jnp.asarray(fc1, mm_dtype)
    b1 = np.zeros((1, f1_pad), np.float32)
    b1[0, :num_fc1] = np.asarray(params["fc1_b"], np.float32)
    prep["fc1_b"] = jnp.asarray(b1)

    w2 = np.zeros((f1_pad, num_classes), np.float32)
    w2[:num_fc1] = np.asarray(params["fc2_w"], np.float32)
    prep["fc2_w"] = jnp.asarray(w2, mm_dtype)
    prep["fc2_b"] = jnp.asarray(
        np.asarray(params["fc2_b"], np.float32).reshape(1, num_classes))
    return prep


# ----------------------------------------------------------------------------
# Forward pass wrapper
# ----------------------------------------------------------------------------
@functools.partial(jax.jit, static_argnames=("dropout_rate", "block_n"))
def forward(prep, x_nchw, rng_key, dropout_rate=0.0, block_n=32):
    n, cin, h, w = x_nchw.shape
    # NCHW -> lane-dense (N, H, W*Cin), lanes ordered (x, cin); bf16 for the MXU.
    x = (jnp.transpose(x_nchw, (0, 2, 3, 1))
         .reshape(n, h, w * cin).astype(jnp.bfloat16))

    f1_pad = prep["fc1_w"].shape[1]
    num_classes = prep["fc2_w"].shape[1]

    if dropout_rate > 0.0:
        # F.dropout default training=True -> inverted dropout at forward time.
        # TODO(synk): mask uses the JAX RNG (outside the kernel), not torch's
        #             RNG stream; the in-kernel TPU hw PRNG crashed earlier runs.
        keep = jax.random.bernoulli(rng_key, 1.0 - dropout_rate, (n, f1_pad))
        mask = keep.astype(jnp.float32) * jnp.float32(1.0 / (1.0 - dropout_rate))
    else:
        mask = jnp.ones((n, f1_pad), jnp.float32)

    nb = min(block_n, n)
    n_pad = ((n + nb - 1) // nb) * nb
    if n_pad != n:
        x = jnp.pad(x, ((0, n_pad - n), (0, 0), (0, 0)))
        mask = jnp.pad(mask, ((0, n_pad - n), (0, 0)), constant_values=1.0)

    def resident(arr):                 # whole-array block, fetched once
        nd = arr.ndim
        return pl.BlockSpec(arr.shape, lambda i, _nd=nd: (0,) * _nd)

    weights = (prep["bm1"], prep["bb1"], prep["bm2"], prep["bb2"],
               prep["bm3"], prep["bb3"], prep["bm4"], prep["bb4"],
               prep["fc1_w"], prep["fc1_b"], prep["fc2_w"], prep["fc2_b"])

    in_specs = ([pl.BlockSpec((nb, h, w * cin), lambda i: (i, 0, 0))]
                + [resident(a) for a in weights]
                + [pl.BlockSpec((nb, f1_pad), lambda i: (i, 0))])
    out_spec = pl.BlockSpec((nb, num_classes), lambda i: (i, 0))

    # Advisory cost estimate (whole call, all batch blocks).
    flops = 0
    h_cur = h
    for i in range(1, 5):
        k_dim, n_dim = prep[f"bm{i}"].shape
        flops += 2 * h_cur * k_dim * n_dim
        h_cur = (h_cur - 2) // 2
    flops += 2 * prep["fc1_w"].shape[0] * prep["fc1_w"].shape[1]
    flops += 2 * prep["fc2_w"].shape[0] * prep["fc2_w"].shape[1]
    flops *= n_pad
    bytes_accessed = int(
        sum(int(a.size) * a.dtype.itemsize for a in weights)
        + int(x.size) * x.dtype.itemsize
        + int(mask.size) * mask.dtype.itemsize
        + n_pad * num_classes * 4)

    out = pl.pallas_call(
        network_kernel,
        out_shape=jax.ShapeDtypeStruct((n_pad, num_classes), jnp.float32),
        grid=(n_pad // nb,),
        in_specs=in_specs,
        out_specs=out_spec,
        compiler_params=pltpu.CompilerParams(
            dimension_semantics=("parallel",),
            vmem_limit_bytes=64 * 1024 * 1024),
        cost_estimate=pl.CostEstimate(
            flops=int(flops),
            transcendentals=int(n_pad * (num_classes + 1)),
            bytes_accessed=bytes_accessed),
    )(x, *weights, mask)
    return out[:n]


# ----------------------------------------------------------------------------
# Deterministic synthetic parameters and pure-JAX references
# ----------------------------------------------------------------------------
def make_params(key, cfg):
    cin, hin, win = cfg["shape_in"]
    f = cfg["initial_filters"]
    chans = [cin, f, 2 * f, 4 * f, 8 * f]
    h, w = hin, win
    keys = jax.random.split(key, 12)
    params, ki = {}, 0
    for layer in range(4):
        ci, co = chans[layer], chans[layer + 1]
        params[f"conv{layer + 1}_w"] = (
            jax.random.normal(keys[ki], (3, 3, ci, co), jnp.float32)
            / jnp.sqrt(9.0 * ci)); ki += 1
        params[f"conv{layer + 1}_b"] = (
            0.01 * jax.random.normal(keys[ki], (co,), jnp.float32)); ki += 1
        h, w = (h - 2) // 2, (w - 2) // 2     # findConv2dOutShape semantics
    num_flatten = h * w * 8 * f
    params["fc1_w"] = (jax.random.normal(keys[ki], (num_flatten, cfg["num_fc1"]),
                                         jnp.float32)
                       / jnp.sqrt(float(num_flatten))); ki += 1
    params["fc1_b"] = 0.01 * jax.random.normal(keys[ki], (cfg["num_fc1"],),
                                               jnp.float32); ki += 1
    params["fc2_w"] = (jax.random.normal(keys[ki],
                                         (cfg["num_fc1"], cfg["num_classes"]),
                                         jnp.float32)
                       / jnp.sqrt(float(cfg["num_fc1"]))); ki += 1
    params["fc2_b"] = 0.01 * jax.random.normal(keys[ki], (cfg["num_classes"],),
                                               jnp.float32); ki += 1
    return params, num_flatten


def reference_forward(params, x_nchw):
    """Pure-JAX f32 (HIGHEST precision) reference, dropout disabled."""
    hi = jax.lax.Precision.HIGHEST
    x = x_nchw
    for layer in range(4):
        w = params[f"conv{layer + 1}_w"]                     # (3,3,Cin,Cout)
        x = jax.lax.conv_general_dilated(
            x, w, (1, 1), "VALID",
            dimension_numbers=("NCHW", "HWIO", "NCHW"), precision=hi)
        x = jnp.maximum(x + params[f"conv{layer + 1}_b"][None, :, None, None],
                        0.0)
        x = jax.lax.reduce_window(x, -jnp.inf, jax.lax.max,
                                  (1, 1, 2, 2), (1, 1, 2, 2), "VALID")
    n = x.shape[0]
    x = x.reshape(n, -1)
    x = jnp.maximum(jnp.dot(x, params["fc1_w"], precision=hi)
                    + params["fc1_b"], 0.0)
    logits = jnp.dot(x, params["fc2_w"], precision=hi) + params["fc2_b"]
    return jax.nn.log_softmax(logits, axis=1)


def reference_forward_mixed(params, x_nchw):
    """Reference matching the kernel's mixed precision (bf16 matmul operands,
    f32 accumulation, f32 elementwise), dropout disabled."""
    x = x_nchw
    for layer in range(4):
        w = params[f"conv{layer + 1}_w"].astype(jnp.bfloat16)
        x = jax.lax.conv_general_dilated(
            x.astype(jnp.bfloat16), w, (1, 1), "VALID",
            dimension_numbers=("NCHW", "HWIO", "NCHW"),
            preferred_element_type=jnp.float32)
        x = jnp.maximum(x + params[f"conv{layer + 1}_b"][None, :, None, None],
                        0.0)
        x = jax.lax.reduce_window(x, -jnp.inf, jax.lax.max,
                                  (1, 1, 2, 2), (1, 1, 2, 2), "VALID")
    n = x.shape[0]
    x = x.reshape(n, -1)
    x = jnp.maximum(
        jnp.dot(x.astype(jnp.bfloat16), params["fc1_w"].astype(jnp.bfloat16),
                preferred_element_type=jnp.float32) + params["fc1_b"], 0.0)
    logits = jnp.dot(x.astype(jnp.bfloat16),
                     params["fc2_w"].astype(jnp.bfloat16),
                     preferred_element_type=jnp.float32) + params["fc2_b"]
    return jax.nn.log_softmax(logits, axis=1)


if __name__ == "__main__":
    cfg = dict(shape_in=(3, 46, 46), initial_filters=8, num_fc1=64,
               num_classes=4, dropout_rate=0.5)
    key = jax.random.PRNGKey(0)
    k_param, k_x, k_drop = jax.random.split(key, 3)
    params, num_flatten = make_params(k_param, cfg)
    assert num_flatten == 64

    prep = prepare_kernel_weights(params, cfg["shape_in"])
    x = jax.random.normal(k_x, (2,) + cfg["shape_in"], jnp.float32)   # NCHW

    # Deterministic path (dropout off) checked against pure-JAX references.
    out_nodrop = jax.block_until_ready(
        forward(prep, x, k_drop, dropout_rate=0.0))
    ref_mixed = jax.block_until_ready(reference_forward_mixed(params, x))
    ref_f32 = jax.block_until_ready(reference_forward(params, x))
    assert out_nodrop.shape == (2, cfg["num_classes"])
    assert jnp.allclose(out_nodrop, ref_mixed, atol=5e-3, rtol=5e-3), (
        "mismatch vs mixed-precision (bf16 operand / f32 accum) reference")
    assert jnp.allclose(out_nodrop, ref_f32, atol=1e-1, rtol=1e-1), (
        "mismatch vs f32 reference")

    # Full forward as in the PyTorch module (F.dropout with training=True).
    out = jax.block_until_ready(
        forward(prep, x, k_drop, dropout_rate=cfg["dropout_rate"]))
    assert out.shape == (2, cfg["num_classes"])
    # log_softmax rows must exponentiate-sum to 1.
    assert jnp.allclose(jnp.exp(out).sum(axis=1), 1.0, atol=1e-4)

    print("KERNEL_OK")
</pallas_src>

<mosaic_0001>
module attributes {stable_mosaic.version = 11 : i64} {
  func.func @network_kernel(%arg0: i32, %arg1: memref<2x46x138xbf16, #tpu.memory_space<vmem>>, %arg2: memref<138x1536xbf16, #tpu.memory_space<vmem>>, %arg3: memref<1x256xf32, #tpu.memory_space<vmem>>, %arg4: memref<256x1536xbf16, #tpu.memory_space<vmem>>, %arg5: memref<1x256xf32, #tpu.memory_space<vmem>>, %arg6: memref<256x768xbf16, #tpu.memory_space<vmem>>, %arg7: memref<1x128xf32, #tpu.memory_space<vmem>>, %arg8: memref<128x768xbf16, #tpu.memory_space<vmem>>, %arg9: memref<1x128xf32, #tpu.memory_space<vmem>>, %arg10: memref<128x128xbf16, #tpu.memory_space<vmem>>, %arg11: memref<1x128xf32, #tpu.memory_space<vmem>>, %arg12: memref<128x4xbf16, #tpu.memory_space<vmem>>, %arg13: memref<1x4xf32, #tpu.memory_space<vmem>>, %arg14: memref<2x128xf32, #tpu.memory_space<vmem>>, %arg15: memref<2x4xf32, #tpu.memory_space<vmem>>) attributes {dimension_semantics = [#tpu.dimension_semantics<parallel>], iteration_bounds = array<i64: 1>, scalar_prefetch = 0 : i64, scratch_operands = 0 : i64, tpu.core_type = #tpu.core_type<tc>, window_params = [{transform_indices = @transform_0, window_bounds = array<i64: 2, 46, 138>}, {pipeline_mode = #tpu.pipeline_mode<synchronous>, transform_indices = @transform_1, window_bounds = array<i64: 138, 1536>}, {pipeline_mode = #tpu.pipeline_mode<synchronous>, transform_indices = @transform_2, window_bounds = array<i64: 1, 256>}, {pipeline_mode = #tpu.pipeline_mode<synchronous>, transform_indices = @transform_3, window_bounds = array<i64: 256, 1536>}, {pipeline_mode = #tpu.pipeline_mode<synchronous>, transform_indices = @transform_4, window_bounds = array<i64: 1, 256>}, {pipeline_mode = #tpu.pipeline_mode<synchronous>, transform_indices = @transform_5, window_bounds = array<i64: 256, 768>}, {pipeline_mode = #tpu.pipeline_mode<synchronous>, transform_indices = @transform_6, window_bounds = array<i64: 1, 128>}, {pipeline_mode = #tpu.pipeline_mode<synchronous>, transform_indices = @transform_7, window_bounds = array<i64: 128, 768>}, {pipeline_mode = #tpu.pipeline_mode<synchronous>, transform_indices = @transform_8, window_bounds = array<i64: 1, 128>}, {pipeline_mode = #tpu.pipeline_mode<synchronous>, transform_indices = @transform_9, window_bounds = array<i64: 128, 128>}, {pipeline_mode = #tpu.pipeline_mode<synchronous>, transform_indices = @transform_10, window_bounds = array<i64: 1, 128>}, {pipeline_mode = #tpu.pipeline_mode<synchronous>, transform_indices = @transform_11, window_bounds = array<i64: 128, 4>}, {pipeline_mode = #tpu.pipeline_mode<synchronous>, transform_indices = @transform_12, window_bounds = array<i64: 1, 4>}, {transform_indices = @transform_13, window_bounds = array<i64: 2, 128>}, {transform_indices = @transform_14, window_bounds = array<i64: 2, 4>}]} {
    %c0 = arith.constant 0 : index
    %c0_0 = arith.constant 0 : index
    %c0_1 = arith.constant 0 : index
    %0 = vector.load %arg1[%c0, %c0_0, %c0_1] : memref<2x46x138xbf16, #tpu.memory_space<vmem>>, vector<2x46x138xbf16>
    %1 = vector.shape_cast %0 : vector<2x46x138xbf16> to vector<92x138xbf16>
    %c0_2 = arith.constant 0 : index
    %c0_3 = arith.constant 0 : index
    %2 = vector.load %arg2[%c0_2, %c0_3] : memref<138x1536xbf16, #tpu.memory_space<vmem>>, vector<138x1536xbf16>
    %cst = arith.constant dense<0.000000e+00> : vector<92x1536xf32>
    %3 = tpu.matmul %1, %2, %cst {dimension_numbers = #tpu.dot_dimension_numbers<[1], [0], [0], [1], [0, 0, 1, 1], [], []>} : vector<92x138xbf16>, vector<138x1536xbf16>, vector<92x1536xf32> -> vector<92x1536xf32>
    %4 = vector.shape_cast %3 : vector<92x1536xf32> to vector<2x46x1536xf32>
    %5 = vector.extract_strided_slice %4 {offsets = [0, 0, 0], sizes = [2, 44, 512], strides = [1, 1, 1]} : vector<2x46x1536xf32> to vector<2x44x512xf32>
    %6 = vector.extract_strided_slice %4 {offsets = [0, 1, 512], sizes = [2, 44, 512], strides = [1, 1, 1]} : vector<2x46x1536xf32> to vector<2x44x512xf32>
    %7 = arith.addf %5, %6 : vector<2x44x512xf32>
    %8 = vector.extract_strided_slice %4 {offsets = [0, 2, 1024], sizes = [2, 44, 512], strides = [1, 1, 1]} : vector<2x46x1536xf32> to vector<2x44x512xf32>
    %9 = arith.addf %7, %8 : vector<2x44x512xf32>
    %10 = vector.extract_strided_slice %9 {offsets = [0, 0, 0], sizes = [2, 44, 256], strides = [1, 1, 1]} : vector<2x44x512xf32> to vector<2x44x256xf32>
    %11 = vector.extract_strided_slice %9 {offsets = [0, 0, 256], sizes = [2, 44, 256], strides = [1, 1, 1]} : vector<2x44x512xf32> to vector<2x44x256xf32>
    %12 = arith.maximumf %10, %11 : vector<2x44x256xf32>
    %c0_4 = arith.constant 0 : index
    %c0_5 = arith.constant 0 : index
    %13 = vector.load %arg3[%c0_4, %c0_5] : memref<1x256xf32, #tpu.memory_space<vmem>>, vector<1x256xf32>
    %14 = vector.shape_cast %13 : vector<1x256xf32> to vector<1x1x256xf32>
    %15 = vector.broadcast %14 : vector<1x1x256xf32> to vector<2x44x256xf32>
    %16 = arith.addf %12, %15 : vector<2x44x256xf32>
    %cst_6 = arith.constant 0.000000e+00 : f32
    %17 = vector.broadcast %cst_6 : f32 to vector<2x44x256xf32>
    %18 = arith.maximumf %16, %17 : vector<2x44x256xf32>
    %19 = vector.shape_cast %18 : vector<2x44x256xf32> to vector<44x2x256xf32>
    %20 = vector.extract_strided_slice %19 {offsets = [0, 0, 0], sizes = [44, 1, 256], strides = [1, 1, 1]} : vector<44x2x256xf32> to vector<44x1x256xf32>
    %21 = vector.shape_cast %20 : vector<44x1x256xf32> to vector<44x256xf32>
    %22 = vector.extract_strided_slice %19 {offsets = [0, 1, 0], sizes = [44, 1, 256], strides = [1, 1, 1]} : vector<44x2x256xf32> to vector<44x1x256xf32>
    %23 = vector.shape_cast %22 : vector<44x1x256xf32> to vector<44x256xf32>
    %24 = arith.maximumf %21, %23 : vector<44x256xf32>
    %25 = vector.shape_cast %24 : vector<44x256xf32> to vector<2x22x256xf32>
    %26 = vector.shape_cast %25 : vector<2x22x256xf32> to vector<44x256xf32>
    %27 = arith.truncf %26 : vector<44x256xf32> to vector<44x256xbf16>
    %c0_7 = arith.constant 0 : index
    %c0_8 = arith.constant 0 : index
    %28 = vector.load %arg4[%c0_7, %c0_8] : memref<256x1536xbf16, #tpu.memory_space<vmem>>, vector<256x1536xbf16>
    %cst_9 = arith.constant dense<0.000000e+00> : vector<44x1536xf32>
    %29 = tpu.matmul %27, %28, %cst_9 {dimension_numbers = #tpu.dot_dimension_numbers<[1], [0], [0], [1], [0, 0, 1, 1], [], []>} : vector<44x256xbf16>, vector<256x1536xbf16>, vector<44x1536xf32> -> vector<44x1536xf32>
    %30 = vector.shape_cast %29 : vector<44x1536xf32> to vector<2x22x1536xf32>
    %31 = vector.extract_strided_slice %30 {offsets = [0, 0, 0], sizes = [2, 20, 512], strides = [1, 1, 1]} : vector<2x22x1536xf32> to vector<2x20x512xf32>
    %32 = vector.extract_strided_slice %30 {offsets = [0, 1, 512], sizes = [2, 20, 512], strides = [1, 1, 1]} : vector<2x22x1536xf32> to vector<2x20x512xf32>
    %33 = arith.addf %31, %32 : vector<2x20x512xf32>
    %34 = vector.extract_strided_slice %30 {offsets = [0, 2, 1024], sizes = [2, 20, 512], strides = [1, 1, 1]} : vector<2x22x1536xf32> to vector<2x20x512xf32>
    %35 = arith.addf %33, %34 : vector<2x20x512xf32>
    %36 = vector.extract_strided_slice %35 {offsets = [0, 0, 0], sizes = [2, 20, 256], strides = [1, 1, 1]} : vector<2x20x512xf32> to vector<2x20x256xf32>
    %37 = vector.extract_strided_slice %35 {offsets = [0, 0, 256], sizes = [2, 20, 256], strides = [1, 1, 1]} : vector<2x20x512xf32> to vector<2x20x256xf32>
    %38 = arith.maximumf %36, %37 : vector<2x20x256xf32>
    %c0_10 = arith.constant 0 : index
    %c0_11 = arith.constant 0 : index
    %39 = vector.load %arg5[%c0_10, %c0_11] : memref<1x256xf32, #tpu.memory_space<vmem>>, vector<1x256xf32>
    %40 = vector.shape_cast %39 : vector<1x256xf32> to vector<1x1x256xf32>
    %41 = vector.broadcast %40 : vector<1x1x256xf32> to vector<2x20x256xf32>
    %42 = arith.addf %38, %41 : vector<2x20x256xf32>
    %cst_12 = arith.constant 0.000000e+00 : f32
    %43 = vector.broadcast %cst_12 : f32 to vector<2x20x256xf32>
    %44 = arith.maximumf %42, %43 : vector<2x20x256xf32>
    %45 = vector.shape_cast %44 : vector<2x20x256xf32> to vector<20x2x256xf32>
    %46 = vector.extract_strided_slice %45 {offsets = [0, 0, 0], sizes = [20, 1, 256], strides = [1, 1, 1]} : vector<20x2x256xf32> to vector<20x1x256xf32>
    %47 = vector.shape_cast %46 : vector<20x1x256xf32> to vector<20x256xf32>
    %48 = vector.extract_strided_slice %45 {offsets = [0, 1, 0], sizes = [20, 1, 256], strides = [1, 1, 1]} : vector<20x2x256xf32> to vector<20x1x256xf32>
    %49 = vector.shape_cast %48 : vector<20x1x256xf32> to vector<20x256xf32>
    %50 = arith.maximumf %47, %49 : vector<20x256xf32>
    %51 = vector.shape_cast %50 : vector<20x256xf32> to vector<2x10x256xf32>
    %52 = vector.shape_cast %51 : vector<2x10x256xf32> to vector<20x256xf32>
    %53 = arith.truncf %52 : vector<20x256xf32> to vector<20x256xbf16>
    %c0_13 = arith.constant 0 : index
    %c0_14 = arith.constant 0 : index
    %54 = vector.load %arg6[%c0_13, %c0_14] : memref<256x768xbf16, #tpu.memory_space<vmem>>, vector<256x768xbf16>
    %cst_15 = arith.constant dense<0.000000e+00> : vector<20x768xf32>
    %55 = tpu.matmul %53, %54, %cst_15 {dimension_numbers = #tpu.dot_dimension_numbers<[1], [0], [0], [1], [0, 0, 1, 1], [], []>} : vector<20x256xbf16>, vector<256x768xbf16>, vector<20x768xf32> -> vector<20x768xf32>
    %56 = vector.shape_cast %55 : vector<20x768xf32> to vector<2x10x768xf32>
    %57 = vector.extract_strided_slice %56 {offsets = [0, 0, 0], sizes = [2, 8, 256], strides = [1, 1, 1]} : vector<2x10x768xf32> to vector<2x8x256xf32>
    %58 = vector.extract_strided_slice %56 {offsets = [0, 1, 256], sizes = [2, 8, 256], strides = [1, 1, 1]} : vector<2x10x768xf32> to vector<2x8x256xf32>
    %59 = arith.addf %57, %58 : vector<2x8x256xf32>
    %60 = vector.extract_strided_slice %56 {offsets = [0, 2, 512], sizes = [2, 8, 256], strides = [1, 1, 1]} : vector<2x10x768xf32> to vector<2x8x256xf32>
    %61 = arith.addf %59, %60 : vector<2x8x256xf32>
    %62 = vector.extract_strided_slice %61 {offsets = [0, 0, 0], sizes = [2, 8, 128], strides = [1, 1, 1]} : vector<2x8x256xf32> to vector<2x8x128xf32>
    %63 = vector.extract_strided_slice %61 {offsets = [0, 0, 128], sizes = [2, 8, 128], strides = [1, 1, 1]} : vector<2x8x256xf32> to vector<2x8x128xf32>
    %64 = arith.maximumf %62, %63 : vector<2x8x128xf32>
    %c0_16 = arith.constant 0 : index
    %c0_17 = arith.constant 0 : index
    %65 = vector.load %arg7[%c0_16, %c0_17] : memref<1x128xf32, #tpu.memory_space<vmem>>, vector<1x128xf32>
    %66 = vector.shape_cast %65 : vector<1x128xf32> to vector<1x1x128xf32>
    %67 = vector.broadcast %66 : vector<1x1x128xf32> to vector<2x8x128xf32>
    %68 = arith.addf %64, %67 : vector<2x8x128xf32>
    %cst_18 = arith.constant 0.000000e+00 : f32
    %69 = vector.broadcast %cst_18 : f32 to vector<2x8x128xf32>
    %70 = arith.maximumf %68, %69 : vector<2x8x128xf32>
    %71 = vector.shape_cast %70 : vector<2x8x128xf32> to vector<8x2x128xf32>
    %72 = vector.extract_strided_slice %71 {offsets = [0, 0, 0], sizes = [8, 1, 128], strides = [1, 1, 1]} : vector<8x2x128xf32> to vector<8x1x128xf32>
    %73 = vector.shape_cast %72 : vector<8x1x128xf32> to vector<8x128xf32>
    %74 = vector.extract_strided_slice %71 {offsets = [0, 1, 0], sizes = [8, 1, 128], strides = [1, 1, 1]} : vector<8x2x128xf32> to vector<8x1x128xf32>
    %75 = vector.shape_cast %74 : vector<8x1x128xf32> to vector<8x128xf32>
    %76 = arith.maximumf %73, %75 : vector<8x128xf32>
    %77 = vector.shape_cast %76 : vector<8x128xf32> to vector<2x4x128xf32>
    %78 = vector.shape_cast %77 : vector<2x4x128xf32> to vector<8x128xf32>
    %79 = arith.truncf %78 : vector<8x128xf32> to vector<8x128xbf16>
    %c0_19 = arith.constant 0 : index
    %c0_20 = arith.constant 0 : index
    %80 = vector.load %arg8[%c0_19, %c0_20] : memref<128x768xbf16, #tpu.memory_space<vmem>>, vector<128x768xbf16>
    %cst_21 = arith.constant dense<0.000000e+00> : vector<8x768xf32>
    %81 = tpu.matmul %79, %80, %cst_21 {dimension_numbers = #tpu.dot_dimension_numbers<[1], [0], [0], [1], [0, 0, 1, 1], [], []>} : vector<8x128xbf16>, vector<128x768xbf16>, vector<8x768xf32> -> vector<8x768xf32>
    %82 = vector.shape_cast %81 : vector<8x768xf32> to vector<2x4x768xf32>
    %83 = vector.extract_strided_slice %82 {offsets = [0, 0, 0], sizes = [2, 2, 256], strides = [1, 1, 1]} : vector<2x4x768xf32> to vector<2x2x256xf32>
    %84 = vector.extract_strided_slice %82 {offsets = [0, 1, 256], sizes = [2, 2, 256], strides = [1, 1, 1]} : vector<2x4x768xf32> to vector<2x2x256xf32>
    %85 = arith.addf %83, %84 : vector<2x2x256xf32>
    %86 = vector.extract_strided_slice %82 {offsets = [0, 2, 512], sizes = [2, 2, 256], strides = [1, 1, 1]} : vector<2x4x768xf32> to vector<2x2x256xf32>
    %87 = arith.addf %85, %86 : vector<2x2x256xf32>
    %88 = vector.extract_strided_slice %87 {offsets = [0, 0, 0], sizes = [2, 2, 128], strides = [1, 1, 1]} : vector<2x2x256xf32> to vector<2x2x128xf32>
    %89 = vector.extract_strided_slice %87 {offsets = [0, 0, 128], sizes = [2, 2, 128], strides = [1, 1, 1]} : vector<2x2x256xf32> to vector<2x2x128xf32>
    %90 = arith.maximumf %88, %89 : vector<2x2x128xf32>
    %c0_22 = arith.constant 0 : index
    %c0_23 = arith.constant 0 : index
    %91 = vector.load %arg9[%c0_22, %c0_23] : memref<1x128xf32, #tpu.memory_space<vmem>>, vector<1x128xf32>
    %92 = vector.shape_cast %91 : vector<1x128xf32> to vector<1x1x128xf32>
    %93 = vector.broadcast %92 : vector<1x1x128xf32> to vector<2x2x128xf32>
    %94 = arith.addf %90, %93 : vector<2x2x128xf32>
    %cst_24 = arith.constant 0.000000e+00 : f32
    %95 = vector.broadcast %cst_24 : f32 to vector<2x2x128xf32>
    %96 = arith.maximumf %94, %95 : vector<2x2x128xf32>
    %97 = vector.extract_strided_slice %96 {offsets = [0, 0, 0], sizes = [2, 1, 128], strides = [1, 1, 1]} : vector<2x2x128xf32> to vector<2x1x128xf32>
    %98 = vector.shape_cast %97 : vector<2x1x128xf32> to vector<2x128xf32>
    %99 = vector.extract_strided_slice %96 {offsets = [0, 1, 0], sizes = [2, 1, 128], strides = [1, 1, 1]} : vector<2x2x128xf32> to vector<2x1x128xf32>
    %100 = vector.shape_cast %99 : vector<2x1x128xf32> to vector<2x128xf32>
    %101 = arith.maximumf %98, %100 : vector<2x128xf32>
    %102 = vector.shape_cast %101 : vector<2x128xf32> to vector<2x1x128xf32>
    %103 = vector.shape_cast %102 : vector<2x1x128xf32> to vector<2x128xf32>
    %104 = arith.truncf %103 : vector<2x128xf32> to vector<2x128xbf16>
    %c0_25 = arith.constant 0 : index
    %c0_26 = arith.constant 0 : index
    %105 = vector.load %arg10[%c0_25, %c0_26] : memref<128x128xbf16, #tpu.memory_space<vmem>>, vector<128x128xbf16>
    %cst_27 = arith.constant dense<0.000000e+00> : vector<2x128xf32>
    %106 = tpu.matmul %104, %105, %cst_27 {dimension_numbers = #tpu.dot_dimension_numbers<[1], [0], [0], [1], [0, 0, 1, 1], [], []>} : vector<2x128xbf16>, vector<128x128xbf16>, vector<2x128xf32> -> vector<2x128xf32>
    %c0_28 = arith.constant 0 : index
    %c0_29 = arith.constant 0 : index
    %107 = vector.load %arg11[%c0_28, %c0_29] : memref<1x128xf32, #tpu.memory_space<vmem>>, vector<1x128xf32>
    %108 = vector.broadcast %107 : vector<1x128xf32> to vector<2x128xf32>
    %109 = arith.addf %106, %108 : vector<2x128xf32>
    %cst_30 = arith.constant 0.000000e+00 : f32
    %110 = vector.broadcast %cst_30 : f32 to vector<2x128xf32>
    %111 = arith.maximumf %109, %110 : vector<2x128xf32>
    %c0_31 = arith.constant 0 : index
    %c0_32 = arith.constant 0 : index
    %112 = vector.load %arg14[%c0_31, %c0_32] : memref<2x128xf32, #tpu.memory_space<vmem>>, vector<2x128xf32>
    %113 = arith.mulf %111, %112 : vector<2x128xf32>
    %114 = arith.truncf %113 : vector<2x128xf32> to vector<2x128xbf16>
    %c0_33 = arith.constant 0 : index
    %c0_34 = arith.constant 0 : index
    %115 = vector.load %arg12[%c0_33, %c0_34] : memref<128x4xbf16, #tpu.memory_space<vmem>>, vector<128x4xbf16>
    %cst_35 = arith.constant dense<0.000000e+00> : vector<2x4xf32>
    %116 = tpu.matmul %114, %115, %cst_35 {dimension_numbers = #tpu.dot_dimension_numbers<[1], [0], [0], [1], [0, 0, 1, 1], [], []>} : vector<2x128xbf16>, vector<128x4xbf16>, vector<2x4xf32> -> vector<2x4xf32>
    %c0_36 = arith.constant 0 : index
    %c0_37 = arith.constant 0 : index
    %117 = vector.load %arg13[%c0_36, %c0_37] : memref<1x4xf32, #tpu.memory_space<vmem>>, vector<1x4xf32>
    %118 = vector.broadcast %117 : vector<1x4xf32> to vector<2x4xf32>
    %119 = arith.addf %116, %118 : vector<2x4xf32>
    %cst_38 = arith.constant dense<0xFF800000> : vector<2xf32>
    %120 = vector.multi_reduction <maximumf>, %119, %cst_38 [1] : vector<2x4xf32> to vector<2xf32>
    %121 = vector.shape_cast %120 : vector<2xf32> to vector<2x1xf32>
    %122 = vector.broadcast %121 : vector<2x1xf32> to vector<2x4xf32>
    %123 = arith.subf %119, %122 : vector<2x4xf32>
    %124 = math.exp %123 : vector<2x4xf32>
    %cst_39 = arith.constant dense<0.000000e+00> : vector<2xf32>
    %125 = vector.multi_reduction <add>, %124, %cst_39 [1] : vector<2x4xf32> to vector<2xf32>
    %126 = vector.shape_cast %125 : vector<2xf32> to vector<2x1xf32>
    %127 = math.log %126 : vector<2x1xf32>
    %128 = vector.broadcast %127 : vector<2x1xf32> to vector<2x4xf32>
    %129 = arith.subf %123, %128 : vector<2x4xf32>
    %c0_40 = arith.constant 0 : index
    %c0_41 = arith.constant 0 : index
    %130 = vector.load %arg15[%c0_40, %c0_41] : memref<2x4xf32, #tpu.memory_space<vmem>>, vector<2x4xf32>
    tpu.vector_store %arg15[%c0_40, %c0_41], %129 {strides = array<i32>} : memref<2x4xf32, #tpu.memory_space<vmem>>, vector<2x4xf32>,
    return
  }
  func.func @transform_0(%arg0: i32) -> (i32, i32, i32) {
    %c0_i32 = arith.constant 0 : i32
    %c0_i32_0 = arith.constant 0 : i32
    %c0_i32_1 = arith.constant 0 : i32
    return %arg0, %c0_i32, %c0_i32_0 : i32, i32, i32
  }
  func.func @transform_1(%arg0: i32) -> (i32, i32) {
    %c0_i32 = arith.constant 0 : i32
    %c0_i32_0 = arith.constant 0 : i32
    %c0_i32_1 = arith.constant 0 : i32
    return %c0_i32, %c0_i32_0 : i32, i32
  }
  func.func @transform_2(%arg0: i32) -> (i32, i32) {
    %c0_i32 = arith.constant 0 : i32
    %c0_i32_0 = arith.constant 0 : i32
    %c0_i32_1 = arith.constant 0 : i32
    return %c0_i32, %c0_i32_0 : i32, i32
  }
  func.func @transform_3(%arg0: i32) -> (i32, i32) {
    %c0_i32 = arith.constant 0 : i32
    %c0_i32_0 = arith.constant 0 : i32
    %c0_i32_1 = arith.constant 0 : i32
    return %c0_i32, %c0_i32_0 : i32, i32
  }
  func.func @transform_4(%arg0: i32) -> (i32, i32) {
    %c0_i32 = arith.constant 0 : i32
    %c0_i32_0 = arith.constant 0 : i32
    %c0_i32_1 = arith.constant 0 : i32
    return %c0_i32, %c0_i32_0 : i32, i32
  }
  func.func @transform_5(%arg0: i32) -> (i32, i32) {
    %c0_i32 = arith.constant 0 : i32
    %c0_i32_0 = arith.constant 0 : i32
    %c0_i32_1 = arith.constant 0 : i32
    return %c0_i32, %c0_i32_0 : i32, i32
  }
  func.func @transform_6(%arg0: i32) -> (i32, i32) {
    %c0_i32 = arith.constant 0 : i32
    %c0_i32_0 = arith.constant 0 : i32
    %c0_i32_1 = arith.constant 0 : i32
    return %c0_i32, %c0_i32_0 : i32, i32
  }
  func.func @transform_7(%arg0: i32) -> (i32, i32) {
    %c0_i32 = arith.constant 0 : i32
    %c0_i32_0 = arith.constant 0 : i32
    %c0_i32_1 = arith.constant 0 : i32
    return %c0_i32, %c0_i32_0 : i32, i32
  }
  func.func @transform_8(%arg0: i32) -> (i32, i32) {
    %c0_i32 = arith.constant 0 : i32
    %c0_i32_0 = arith.constant 0 : i32
    %c0_i32_1 = arith.constant 0 : i32
    return %c0_i32, %c0_i32_0 : i32, i32
  }
  func.func @transform_9(%arg0: i32) -> (i32, i32) {
    %c0_i32 = arith.constant 0 : i32
    %c0_i32_0 = arith.constant 0 : i32
    %c0_i32_1 = arith.constant 0 : i32
    return %c0_i32, %c0_i32_0 : i32, i32
  }
  func.func @transform_10(%arg0: i32) -> (i32, i32) {
    %c0_i32 = arith.constant 0 : i32
    %c0_i32_0 = arith.constant 0 : i32
    %c0_i32_1 = arith.constant 0 : i32
    return %c0_i32, %c0_i32_0 : i32, i32
  }
  func.func @transform_11(%arg0: i32) -> (i32, i32) {
    %c0_i32 = arith.constant 0 : i32
    %c0_i32_0 = arith.constant 0 : i32
    %c0_i32_1 = arith.constant 0 : i32
    return %c0_i32, %c0_i32_0 : i32, i32
  }
  func.func @transform_12(%arg0: i32) -> (i32, i32) {
    %c0_i32 = arith.constant 0 : i32
    %c0_i32_0 = arith.constant 0 : i32
    %c0_i32_1 = arith.constant 0 : i32
    return %c0_i32, %c0_i32_0 : i32, i32
  }
  func.func @transform_13(%arg0: i32) -> (i32, i32) {
    %c0_i32 = arith.constant 0 : i32
    %c0_i32_0 = arith.constant 0 : i32
    return %arg0, %c0_i32 : i32, i32
  }
  func.func @transform_14(%arg0: i32) -> (i32, i32) {
    %c0_i32 = arith.constant 0 : i32
    %c0_i32_0 = arith.constant 0 : i32
    return %arg0, %c0_i32 : i32, i32
  }
}

</mosaic_0001>

<bundles_post_ra>
// kernel: forward.1
= control target key start
LH: loop header
LB: loop body
LE: loop exit
PB: predicated region body
PF: predicated region fallthrough
CT: control target
= control target key end

     0   :  { %19 = vsyncpa [#allocation3], 0  ;;  %s14745_s0 = inlined_call_operand.hbm [shape: bf16[2,46,138], index: 0, kind: input, shape index: {}]   ;;  %s14746_s1 = inlined_call_operand.hbm [shape: bf16[138,1536], index: 1, kind: input, shape index: {}]   ;;  %s14747_s2 = inlined_call_operand.hbm [shape: f32[1,256], index: 2, kind: input, shape index: {}]   ;;  %s14748_s3 = inlined_call_operand.hbm [shape: bf16[256,1536], index: 3, kind: input, shape index: {}]   ;;  %s14749_s4 = inlined_call_operand.hbm [shape: f32[1,256], index: 4, kind: input, shape index: {}]   ;;  %s14750_s5 = inlined_call_operand.hbm [shape: bf16[256,768], index: 5, kind: input, shape index: {}]   ;;  %s14751_s6 = inlined_call_operand.hbm [shape: f32[1,128], index: 6, kind: input, shape index: {}]   ;;  %s14752_s7 = inlined_call_operand.hbm [shape: bf16[128,768], index: 7, kind: input, shape index: {}]   ;;  %s14753_s8 = inlined_call_operand.hbm [shape: f32[1,128], index: 8, kind: input, shape index: {}]   ;;  %s14754_s9 = inlined_call_operand.hbm [shape: bf16[128,128], index: 9, kind: input, shape index: {}]   ;;  %s14755_s10 = inlined_call_operand.hbm [shape: f32[1,128], index: 10, kind: input, shape index: {}]   ;;  %s14756_s11 = inlined_call_operand.hbm [shape: bf16[128,4], index: 11, kind: input, shape index: {}]   ;;  %s14757_s12 = inlined_call_operand.hbm [shape: f32[1,4], index: 12, kind: input, shape index: {}]   ;;  %s14758_s13 = inlined_call_operand.hbm [shape: f32[2,128], index: 13, kind: input, shape index: {}]   ;;  %s14759_s14 = inlined_call_operand.hbm [shape: f32[2,4], index: 14, kind: output, shape index: {}]  }
   0x1   :  { %20 = vsyncpa [#allocation6], 0 }
   0x2   :  { %21 = vsyncpa [#allocation9], 0 }
   0x3   :  { %22 = vsyncpa [#allocation12], 0 }
   0x4   :  { %23 = vsyncpa [#allocation15], 0 }
   0x5   :  { %24 = vsyncpa [#allocation18], 0 }
   0x6   :  { %25 = vsyncpa [#allocation21], 0 }
   0x7   :  { %26 = vsyncpa [#allocation24], 0 }
   0x8   :  { %27 = vsyncpa [#allocation4], 0  ;;  %s11954_s29 = smov [#allocation5]   ;;  %s11606_s17 = scalar_lea.hbm %s14746_s1, 13824 }
   0x9   :  { %s45_s30 = sshll.u32 %s11954_s29, 4  ;;  %p11607_p0 = scmp.ne.s32.totalorder %s14746_s1, %s11606_s17  ;;  %s46_s30 = int_to_ptr.vmem [resolvable:$true] %s45_s30 }
   0xa   :  { %p11610_p1 = scmp.lt.u32.totalorder %s11606_s17, %s14746_s1 }
   0xc   :  { %p11612_p2 = pnand %p11610_p1, %p11607_p0 }
   0xe   :  { %11615 = shalt.err (!%p11612_p2)
}
   0xf   :  { %s11616_s22 = scalar_lea.vmem %s46_s30, 13824  ;;  %p11621_p4 = scmp.lt.s32.totalorder %s46_s30, %s46_s30 }
  0x10   :  { %p11617_p3 = scmp.ne.s32.totalorder %s46_s30, %s11616_s22  ;;  %p11622_p5 = scmp.lt.s32.totalorder %s11616_s22, %s11616_s22 }
  0x12   :  { %p11623_p6 = por %p11622_p5, %p11621_p4 }
  0x14   :  { %p11624_p7 = pnand %p11623_p6, %p11617_p3 }
  0x16   :  { %11627 = shalt.err (!%p11624_p7)
}
  0x17   :  { %s11955_s23 = smov 768   ;;  %s11956_s24 = smov 48  }
  0x18   :  { %51 = dma.hbm_to_vmem [thread:$0]  %s14746_s1, 13824, %s46_s30, [#allocation6], %s11955_s23, %s11955_s23, %s11956_s24  }
  0x19   :  { %s11957_s27 = smov [#allocation8]   ;;  %s11958_s29 = smov [#allocation11]  }
  0x1a   :  { %s67_s28 = sshll.u32 %s11957_s27, 4  ;;  %s89_s15 = sshll.u32 %s11958_s29, 4  ;;  %s68_s28 = int_to_ptr.vmem [resolvable:$true] %s67_s28  ;;  %s90_s15 = int_to_ptr.vmem [resolvable:$true] %s89_s15 }
  0x1b   :  { %s11628_s18 = scalar_lea.hbm %s14748_s3, 24576 }
  0x1c   :  { %p11629_p8 = scmp.ne.s32.totalorder %s14748_s3, %s11628_s18  ;;  %p11632_p9 = scmp.lt.u32.totalorder %s11628_s18, %s14748_s3 }
  0x1e   :  { %p11634_p10 = pnand %p11632_p9, %p11629_p8 }
  0x20   :  { %11637 = shalt.err (!%p11634_p10)
}
  0x21   :  { %s11638_s1 = scalar_lea.vmem %s68_s28, 24576  ;;  %p11643_p12 = scmp.lt.s32.totalorder %s68_s28, %s68_s28 }
  0x22   :  { %p11639_p11 = scmp.ne.s32.totalorder %s68_s28, %s11638_s1  ;;  %p11644_p13 = scmp.lt.s32.totalorder %s11638_s1, %s11638_s1 }
  0x24   :  { %p11645_p0 = por %p11644_p13, %p11643_p12 }
  0x26   :  { %p11646_p1 = pnand %p11645_p0, %p11639_p11 }
  0x28   :  { %11649 = shalt.err (!%p11646_p1)
}
  0x29   :  { %73 = dma.hbm_to_vmem [thread:$0]  %s14748_s3, 24576, %s68_s28, [#allocation9], %s11955_s23, %s11955_s23, %s11956_s24  }
  0x2a   :  { %s11650_s29 = scalar_lea.hbm %s14750_s5, 12288 }
  0x2b   :  { %p11651_p2 = scmp.ne.s32.totalorder %s14750_s5, %s11650_s29  ;;  %p11654_p3 = scmp.lt.u32.totalorder %s11650_s29, %s14750_s5 }
  0x2d   :  { %p11656_p4 = pnand %p11654_p3, %p11651_p2 }
  0x2f   :  { %11659 = shalt.err (!%p11656_p4)
}
  0x30   :  { %s11660_s20 = scalar_lea.vmem %s90_s15, 12288  ;;  %p11665_p6 = scmp.lt.s32.totalorder %s90_s15, %s90_s15 }
  0x31   :  { %p11661_p5 = scmp.ne.s32.totalorder %s90_s15, %s11660_s20  ;;  %p11666_p7 = scmp.lt.s32.totalorder %s11660_s20, %s11660_s20 }
  0x33   :  { %p11667_p8 = por %p11666_p7, %p11665_p6 }
  0x35   :  { %p11668_p9 = pnand %p11667_p8, %p11661_p5 }
  0x37   :  { %11671 = shalt.err (!%p11668_p9)
}
  0x38   :  { %s11959_s3 = smov 384   ;;  %s11960_s23 = smov 24  }
  0x39   :  { %95 = dma.hbm_to_vmem [thread:$0]  %s14750_s5, 12288, %s90_s15, [#allocation12], %s11959_s3, %s11959_s3, %s11960_s23  }
  0x3a   :  { %s11961_s21 = smov [#allocation14]   ;;  %s11962_s1 = smov [#allocation17]  }
  0x3b   :  { %s111_s22 = sshll.u32 %s11961_s21, 4  ;;  %s133_s30 = sshll.u32 %s11962_s1, 4  ;;  %s112_s22 = int_to_ptr.vmem [resolvable:$true] %s111_s22  ;;  %s134_s30 = int_to_ptr.vmem [resolvable:$true] %s133_s30 }
  0x3c   :  { %s11672_s27 = scalar_lea.hbm %s14752_s7, 6144 }
  0x3d   :  { %p11673_p10 = scmp.ne.s32.totalorder %s14752_s7, %s11672_s27  ;;  %p11676_p11 = scmp.lt.u32.totalorder %s11672_s27, %s14752_s7 }
  0x3f   :  { %p11678_p12 = pnand %p11676_p11, %p11673_p10 }
  0x41   :  { %11681 = shalt.err (!%p11678_p12)
}
  0x42   :  { %s11682_s5 = scalar_lea.vmem %s112_s22, 6144  ;;  %p11687_p0 = scmp.lt.s32.totalorder %s112_s22, %s112_s22 }
  0x43   :  { %p11683_p13 = scmp.ne.s32.totalorder %s112_s22, %s11682_s5  ;;  %p11688_p1 = scmp.lt.s32.totalorder %s11682_s5, %s11682_s5 }
  0x45   :  { %p11689_p2 = por %p11688_p1, %p11687_p0 }
  0x47   :  { %p11690_p3 = pnand %p11689_p2, %p11683_p13 }
  0x49   :  { %11693 = shalt.err (!%p11690_p3)
}
  0x4a   :  { %117 = dma.hbm_to_vmem [thread:$0]  %s14752_s7, 6144, %s112_s22, [#allocation15], %s11959_s3, %s11959_s3, %s11960_s23  }
  0x4b   :  { %s11694_s28 = scalar_lea.hbm %s14754_s9, 1024 }
  0x4c   :  { %p11695_p4 = scmp.ne.s32.totalorder %s14754_s9, %s11694_s28  ;;  %p11698_p5 = scmp.lt.u32.totalorder %s11694_s28, %s14754_s9 }
  0x4e   :  { %p11700_p6 = pnand %p11698_p5, %p11695_p4 }
  0x50   :  { %11703 = shalt.err (!%p11700_p6)
}
  0x51   :  { %s11704_s27 = scalar_lea.vmem %s134_s30, 1024  ;;  %p11709_p8 = scmp.lt.s32.totalorder %s134_s30, %s134_s30 }
  0x52   :  { %p11705_p7 = scmp.ne.s32.totalorder %s134_s30, %s11704_s27  ;;  %p11710_p9 = scmp.lt.s32.totalorder %s11704_s27, %s11704_s27 }
  0x54   :  { %p11711_p10 = por %p11710_p9, %p11709_p8 }
  0x56   :  { %p11712_p11 = pnand %p11711_p10, %p11705_p7 }
  0x58   :  { %11715 = shalt.err (!%p11712_p11)
}
  0x59   :  { %s11963_s7 = smov 64   ;;  %s11964_s3 = smov 4  }
  0x5a   :  { %139 = dma.hbm_to_vmem [thread:$0]  %s14754_s9, 1024, %s134_s30, [#allocation18], %s11963_s7, %s11963_s7, %s11964_s3  }
  0x5b   :  { %s11965_s29 = smov [#allocation20]   ;;  %s11966_s17 = smov [#allocation2]  }
  0x5c   :  { %s155_s16 = sshll.u32 %s11965_s29, 4  ;;  %s33_s18 = sshll.u32 %s11966_s17, 4  ;;  %s156_s16 = int_to_ptr.vmem [resolvable:$true] %s155_s16  ;;  %s34_s18 = int_to_ptr.vmem [resolvable:$true] %s33_s18 }
  0x5d   :  { %s11716_s19 = scalar_lea.hbm %s14756_s11, 1024 }
  0x5e   :  { %p11717_p12 = scmp.ne.s32.totalorder %s14756_s11, %s11716_s19  ;;  %p11720_p13 = scmp.lt.u32.totalorder %s11716_s19, %s14756_s11 }
  0x60   :  { %p11722_p0 = pnand %p11720_p13, %p11717_p12 }
  0x62   :  { %11725 = shalt.err (!%p11722_p0)
}
  0x63   :  { %s11726_s9 = scalar_lea.vmem %s156_s16, 1024  ;;  %p11731_p2 = scmp.lt.s32.totalorder %s156_s16, %s156_s16 }
  0x64   :  { %p11727_p1 = scmp.ne.s32.totalorder %s156_s16, %s11726_s9  ;;  %p11732_p3 = scmp.lt.s32.totalorder %s11726_s9, %s11726_s9 }
  0x66   :  { %p11733_p4 = por %p11732_p3, %p11731_p2 }
  0x68   :  { %p11734_p5 = pnand %p11733_p4, %p11727_p1 }
  0x6a   :  { %11737 = shalt.err (!%p11734_p5)
}
  0x6b   :  { %161 = dma.hbm_to_vmem [thread:$0]  %s14756_s11, 1024, %s156_s16, [#allocation21], %s11963_s7, %s11963_s7, %s11964_s3  }
  0x6c   :  { %s11738_s27 = scalar_lea.hbm %s14745_s0, 1536 }
  0x6d   :  { %p11739_p6 = scmp.ne.s32.totalorder %s14745_s0, %s11738_s27  ;;  %p11742_p7 = scmp.lt.u32.totalorder %s11738_s27, %s14745_s0 }
  0x6f   :  { %p11744_p8 = pnand %p11742_p7, %p11739_p6 }
  0x71   :  { %11747 = shalt.err (!%p11744_p8)
}
  0x72   :  { %s11748_s5 = scalar_lea.vmem %s34_s18, 1536  ;;  %p11753_p10 = scmp.lt.s32.totalorder %s34_s18, %s34_s18 }
  0x73   :  { %p11749_p9 = scmp.ne.s32.totalorder %s34_s18, %s11748_s5  ;;  %p11754_p11 = scmp.lt.s32.totalorder %s11748_s5, %s11748_s5 }
  0x75   :  { %p11755_p12 = por %p11754_p11, %p11753_p10 }
  0x77   :  { %p11756_p13 = pnand %p11755_p12, %p11749_p9 }
  0x79   :  { %11759 = shalt.err (!%p11756_p13)
}
  0x7a   :  { %s11967_s11 = smov 128   ;;  %s11968_s7 = smov 8  }
  0x7b   :  { %39 = dma.hbm_to_vmem [thread:$0]  %s14745_s0, 1536, %s34_s18, [#allocation3], %s11967_s11, %s11967_s11, %s11968_s7  }
  0x7c   :  { %s11969_s15 = smov [#allocation7]   ;;  %s11970_s20 = smov [#allocation10]  }
  0x7d   :  { %s58_s19 = sshll.u32 %s11969_s15, 4  ;;  %s80_s24 = sshll.u32 %s11970_s20, 4  ;;  %s59_s19 = int_to_ptr.vmem [resolvable:$true] %s58_s19  ;;  %s81_s24 = int_to_ptr.vmem [resolvable:$true] %s80_s24 }
  0x7e   :  { %s11760_s9 = scalar_lea.hbm %s14747_s2, 32 }
  0x7f   :  { %p11761_p0 = scmp.ne.s32.totalorder %s14747_s2, %s11760_s9  ;;  %p11764_p1 = scmp.lt.u32.totalorder %s11760_s9, %s14747_s2 }
  0x81   :  { %p11766_p2 = pnand %p11764_p1, %p11761_p0 }
  0x83   :  { %11769 = shalt.err (!%p11766_p2)
}
  0x84   :  { %s11770_s0 = scalar_lea.vmem %s59_s19, 32  ;;  %p11775_p4 = scmp.lt.s32.totalorder %s59_s19, %s59_s19 }
  0x85   :  { %p11771_p3 = scmp.ne.s32.totalorder %s59_s19, %s11770_s0  ;;  %p11776_p5 = scmp.lt.s32.totalorder %s11770_s0, %s11770_s0 }
  0x87   :  { %p11777_p6 = por %p11776_p5, %p11775_p4 }
  0x89   :  { %p11778_p7 = pnand %p11777_p6, %p11771_p3 }
  0x8b   :  { %11781 = shalt.err (!%p11778_p7)
}
  0x8c   :  { %61 = dma.hbm_to_vmem [thread:$0]  %s14747_s2, 32, %s59_s19, [#allocation6]  }
  0x8d   :  { %s11782_s29 = scalar_lea.hbm %s14749_s4, 32 }
  0x8e   :  { %p11783_p8 = scmp.ne.s32.totalorder %s14749_s4, %s11782_s29  ;;  %p11786_p9 = scmp.lt.u32.totalorder %s11782_s29, %s14749_s4 }
  0x90   :  { %p11788_p10 = pnand %p11786_p9, %p11783_p8 }
  0x92   :  { %11791 = shalt.err (!%p11788_p10)
}
  0x93   :  { %s11792_s3 = scalar_lea.vmem %s81_s24, 32  ;;  %p11797_p12 = scmp.lt.s32.totalorder %s81_s24, %s81_s24 }
  0x94   :  { %p11793_p11 = scmp.ne.s32.totalorder %s81_s24, %s11792_s3  ;;  %p11798_p13 = scmp.lt.s32.totalorder %s11792_s3, %s11792_s3 }
  0x96   :  { %p11799_p0 = por %p11798_p13, %p11797_p12 }
  0x98   :  { %p11800_p1 = pnand %p11799_p0, %p11793_p11 }
  0x9a   :  { %11803 = shalt.err (!%p11800_p1)
}
  0x9b   :  { %83 = dma.hbm_to_vmem [thread:$0]  %s14749_s4, 32, %s81_s24, [#allocation9]  }
  0x9c   :  { %s11971_s15 = smov [#allocation13]   ;;  %s11972_s20 = smov [#allocation16]  }
  0x9d   :  { %s102_s19 = sshll.u32 %s11971_s15, 4  ;;  %s124_s28 = sshll.u32 %s11972_s20, 4  ;;  %s103_s19 = int_to_ptr.vmem [resolvable:$true] %s102_s19  ;;  %s125_s28 = int_to_ptr.vmem [resolvable:$true] %s124_s28 }
  0x9e   :  { %s11804_s30 = scalar_lea.hbm %s14751_s6, 16 }
  0x9f   :  { %p11805_p2 = scmp.ne.s32.totalorder %s14751_s6, %s11804_s30  ;;  %p11808_p3 = scmp.lt.u32.totalorder %s11804_s30, %s14751_s6 }
  0xa1   :  { %p11810_p4 = pnand %p11808_p3, %p11805_p2 }
  0xa3   :  { %11813 = shalt.err (!%p11810_p4)
}
  0xa4   :  { %s11814_s4 = scalar_lea.vmem %s103_s19, 16  ;;  %s11818_s24 = scalar_lea.vmem %s103_s19, 32 }
  0xa5   :  { %p11815_p5 = scmp.ne.s32.totalorder %s103_s19, %s11814_s4  ;;  %p11819_p6 = scmp.lt.s32.totalorder %s103_s19, %s103_s19 }
  0xa6   :  { %p11820_p7 = scmp.lt.s32.totalorder %s11818_s24, %s11814_s4 }
  0xa8   :  { %p11821_p8 = por %p11820_p7, %p11819_p6 }
  0xaa   :  { %p11822_p9 = pnand %p11821_p8, %p11815_p5 }
  0xac   :  { %11825 = shalt.err (!%p11822_p9)
}
  0xad   :  { %105 = dma.hbm_to_vmem [thread:$0]  %s14751_s6, 16, %s103_s19, [#allocation12]  }
  0xae   :  { %s11826_s29 = scalar_lea.hbm %s14753_s8, 16 }
  0xaf   :  { %p11827_p10 = scmp.ne.s32.totalorder %s14753_s8, %s11826_s29  ;;  %p11830_p11 = scmp.lt.u32.totalorder %s11826_s29, %s14753_s8 }
  0xb1   :  { %p11832_p12 = pnand %p11830_p11, %p11827_p10 }
  0xb3   :  { %11835 = shalt.err (!%p11832_p12)
}
  0xb4   :  { %s11836_s3 = scalar_lea.vmem %s125_s28, 16  ;;  %s11840_s2 = scalar_lea.vmem %s125_s28, 32 }
  0xb5   :  { %p11837_p13 = scmp.ne.s32.totalorder %s125_s28, %s11836_s3  ;;  %p11841_p0 = scmp.lt.s32.totalorder %s125_s28, %s125_s28 }
  0xb6   :  { %p11842_p1 = scmp.lt.s32.totalorder %s11840_s2, %s11836_s3 }
  0xb8   :  { %p11843_p2 = por %p11842_p1, %p11841_p0 }
  0xba   :  { %p11844_p3 = pnand %p11843_p2, %p11837_p13 }
  0xbc   :  { %11847 = shalt.err (!%p11844_p3)
}
  0xbd   :  { %127 = dma.hbm_to_vmem [thread:$0]  %s14753_s8, 16, %s125_s28, [#allocation15]  }
  0xbe   :  { %s11973_s15 = smov [#allocation19]   ;;  %s11974_s20 = smov [#allocation22]  }
  0xbf   :  { %s146_s19 = sshll.u32 %s11973_s15, 4  ;;  %s168_s21 = sshll.u32 %s11974_s20, 4  ;;  %s147_s19 = int_to_ptr.vmem [resolvable:$true] %s146_s19  ;;  %s169_s21 = int_to_ptr.vmem [resolvable:$true] %s168_s21 }
  0xc0   :  { %s11848_s1 = scalar_lea.hbm %s14755_s10, 16 }
  0xc1   :  { %p11849_p4 = scmp.ne.s32.totalorder %s14755_s10, %s11848_s1  ;;  %p11852_p5 = scmp.lt.u32.totalorder %s11848_s1, %s14755_s10 }
  0xc3   :  { %p11854_p6 = pnand %p11852_p5, %p11849_p4 }
  0xc5   :  { %11857 = shalt.err (!%p11854_p6)
}
  0xc6   :  { %s11858_s8 = scalar_lea.vmem %s147_s19, 16  ;;  %s11862_s28 = scalar_lea.vmem %s147_s19, 32 }
  0xc7   :  { %p11859_p7 = scmp.ne.s32.totalorder %s147_s19, %s11858_s8  ;;  %p11863_p8 = scmp.lt.s32.totalorder %s147_s19, %s147_s19 }
  0xc8   :  { %p11864_p9 = scmp.lt.s32.totalorder %s11862_s28, %s11858_s8 }
  0xca   :  { %p11865_p10 = por %p11864_p9, %p11863_p8 }
  0xcc   :  { %p11866_p11 = pnand %p11865_p10, %p11859_p7 }
  0xce   :  { %11869 = shalt.err (!%p11866_p11)
}
  0xcf   :  { %149 = dma.hbm_to_vmem [thread:$0]  %s14755_s10, 16, %s147_s19, [#allocation18]  }
  0xd0   :  { %s11870_s22 = scalar_lea.hbm %s14757_s12, 16 }
  0xd1   :  { %p11871_p12 = scmp.ne.s32.totalorder %s14757_s12, %s11870_s22  ;;  %p11874_p13 = scmp.lt.u32.totalorder %s11870_s22, %s14757_s12 }
  0xd3   :  { %p11876_p0 = pnand %p11874_p13, %p11871_p12 }
  0xd5   :  { %11879 = shalt.err (!%p11876_p0)
}
  0xd6   :  { %s11880_s7 = scalar_lea.vmem %s169_s21, 16  ;;  %s11884_s3 = scalar_lea.vmem %s169_s21, 32 }
  0xd7   :  { %p11881_p1 = scmp.ne.s32.totalorder %s169_s21, %s11880_s7  ;;  %p11885_p2 = scmp.lt.s32.totalorder %s169_s21, %s169_s21 }
  0xd8   :  { %p11886_p3 = scmp.lt.s32.totalorder %s11884_s3, %s11880_s7 }
  0xda   :  { %p11887_p4 = por %p11886_p3, %p11885_p2 }
  0xdc   :  { %p11888_p5 = pnand %p11887_p4, %p11881_p1 }
  0xde   :  { %11891 = shalt.err (!%p11888_p5)
}
  0xdf   :  { %171 = dma.hbm_to_vmem [thread:$0]  %s14757_s12, 16, %s169_s21, [#allocation21]  }
  0xe0   :  { %s11975_s6 = smov [#allocation23]   ;;  %s11892_s20 = scalar_lea.hbm %s14758_s13, 32 }
  0xe1   :  { %s178_s16 = sshll.u32 %s11975_s6, 4  ;;  %p11893_p6 = scmp.ne.s32.totalorder %s14758_s13, %s11892_s20  ;;  %s179_s16 = int_to_ptr.vmem [resolvable:$true] %s178_s16 }
  0xe2   :  { %p11896_p7 = scmp.lt.u32.totalorder %s11892_s20, %s14758_s13 }
  0xe4   :  { %p11898_p8 = pnand %p11896_p7, %p11893_p6 }
  0xe6   :  { %11901 = shalt.err (!%p11898_p8)
}
  0xe7   :  { %s11902_s26 = scalar_lea.vmem %s179_s16, 32  ;;  %p11907_p10 = scmp.lt.s32.totalorder %s179_s16, %s179_s16 }
  0xe8   :  { %p11903_p9 = scmp.ne.s32.totalorder %s179_s16, %s11902_s26  ;;  %p11908_p11 = scmp.lt.s32.totalorder %s11902_s26, %s11902_s26 }
  0xea   :  { %p11909_p12 = por %p11908_p11, %p11907_p10 }
  0xec   :  { %p11910_p13 = pnand %p11909_p12, %p11903_p9 }
  0xee   :  { %11913 = shalt.err (!%p11910_p13)
}
  0xef   :  { %181 = dma.hbm_to_vmem [thread:$0]  %s14758_s13, 32, %s179_s16, [#allocation24]  }
  0xf0   :  { %11936 = dma.done.wait [#allocation3], 1536  }
  0xf1   :  { %11937 = vsyncadd [#allocation3], 4294965760 }
  0xf2   :  { %11938 = dma.done.wait [#allocation6], 13856  }
  0xf3   :  { %11939 = vsyncadd [#allocation6], 4294953440 }
  0xf4   :  { %11940 = dma.done.wait [#allocation9], 24608  }
  0xf5   :  { %11941 = vsyncadd [#allocation9], 4294942688 }
  0xf6   :  { %11942 = dma.done.wait [#allocation12], 12304  }
  0xf7   :  { %11943 = vsyncadd [#allocation12], 4294954992 }
  0xf8   :  { %11944 = dma.done.wait [#allocation15], 6160  }
  0xf9   :  { %11945 = vsyncadd [#allocation15], 4294961136 }
  0xfa   :  { %11946 = dma.done.wait [#allocation18], 1040  }
  0xfb   :  { %11947 = vsyncadd [#allocation18], 4294966256 }
  0xfc   :  { %11948 = dma.done.wait [#allocation21], 1040  }
  0xfd   :  { %11949 = vsyncadd [#allocation21], 4294966256 }
  0xfe   :  { %11950 = dma.done.wait [#allocation24], 32  }
  0xff   :  { %11951 = vsyncadd [#allocation24], 4294967264  ;;  %v10920_v0 = vld [vmem:[#allocation5 + $0x4] ss:$48 sps:$4 sm:$0xff]   ;;  %v10922_v1 = vld [vmem:[#allocation5 + $0xc] ss:$48 sps:$4 sm:$0xff]   ;;  %v260_v20 = vlaneseq }
 0x100   :  { %1620 = vmatprep.subr.bf16.mxu0 %v10920_v0  ;;  %v10924_v2 = vld [vmem:[#allocation5] ss:$48 sps:$4 sm:$0xff]   ;;  %v10925_v3 = vld [vmem:[#allocation5 + $0x8] ss:$48 sps:$4 sm:$0xff]   ;;  %1713 = vmatprep.subr.bf16.mxu1 %v10922_v1  ;;  %v10926_v4 = vld [vmem:[#allocation5 + $0x64] ss:$48 sps:$4 sm:$0xff]  }
 0x101   :  { %1621 = vmatpush1.bf16.msra.mxu0 %v10924_v2  ;;  %1714 = vmatpush1.bf16.msra.mxu1 %v10925_v3  ;;  %v10928_v5 = vld [vmem:[#allocation5 + $0x6c] ss:$48 sps:$4 sm:$0xff]   ;;  %v10930_v6 = vld [vmem:[#allocation5 + $0x60] ss:$48 sps:$4 sm:$0xff]   ;;  %v10931_v7 = vld [vmem:[#allocation5 + $0x68] ss:$48 sps:$4 sm:$0xff]  }
 0x102   :  { %1622 = vmatprep.subr.bf16.mxu0 %v10926_v4  ;;  %1715 = vmatprep.subr.bf16.mxu1 %v10928_v5  ;;  %v10932_v8 = vld [vmem:[#allocation5 + $0xc4] ss:$48 sps:$4 sm:$0xff]   ;;  %v10934_v9 = vld [vmem:[#allocation5 + $0xcc] ss:$48 sps:$4 sm:$0xff]   ;;  %v10936_v10 = vld [vmem:[#allocation5 + $0xc0] ss:$48 sps:$4 sm:$0xff]  }
 0x103   :  { %v10937_v11 = vld [vmem:[#allocation5 + $0xc8] ss:$48 sps:$4 sm:$0xff]   ;;  %v10938_v12 = vld [vmem:[#allocation5 + $0x124] ss:$48 sps:$4 sm:$0xff]   ;;  %v10940_v13 = vld [vmem:[#allocation5 + $0x12c] ss:$48 sps:$4 sm:$0xff]  }
 0x104   :  { %v10942_v14 = vld [vmem:[#allocation5 + $0x120] ss:$48 sps:$4 sm:$0xff]   ;;  %v10943_v15 = vld [vmem:[#allocation5 + $0x128] ss:$48 sps:$4 sm:$0xff]   ;;  %v10944_v16 = vld [vmem:[#allocation5 + $0x184] ss:$48 sps:$4 sm:$0xff]  }
 0x105   :  { %1623 = vmatpush1.bf16.msra.mxu0 %v10930_v6  ;;  %1716 = vmatpush1.bf16.msra.mxu1 %v10931_v7  ;;  %v10946_v17 = vld [vmem:[#allocation5 + $0x18c] ss:$48 sps:$4 sm:$0xff]   ;;  %v11976_v18 = vmov 1966171168   ;;  %v10948_v21 = vld [vmem:[#allocation5 + $0x180] ss:$48 sps:$4 sm:$0xff]  }
 0x106   :  { %1624 = vmatprep.subr.bf16.mxu0 %v10932_v8  ;;  %1717 = vmatprep.subr.bf16.mxu1 %v10934_v9  ;;  %v258_v19 = vunpack.c.l.s4 %v11976_v18  ;;  %v10949_v22 = vld [vmem:[#allocation5 + $0x188] ss:$48 sps:$4 sm:$0xff]   ;;  %v10950_v23 = vld [vmem:[#allocation5 + $0x1e4] ss:$48 sps:$4 sm:$0xff]   ;;  %v10952_v24 = vld [vmem:[#allocation5 + $0x1ec] ss:$48 sps:$4 sm:$0xff]  }
 0x107   :  { %v12225_v26 = vshrl.u32 %v260_v20, 7  ;;  %v10954_v27 = vld [vmem:[#allocation5 + $0x1e0] ss:$48 sps:$4 sm:$0xff]   ;;  %v10955_v28 = vld [vmem:[#allocation5 + $0x1e8] ss:$48 sps:$4 sm:$0xff]   ;;  %vm1583_vm0 = vcmask 1044480  }
 0x108   :  { %v259_v25 = vunpack.c.0.s8 %v258_v19  ;;  %v10956_v29 = vld [vmem:[#allocation5 + $0x244] ss:$48 sps:$4 sm:$0xff]   ;;  %v10958_v30 = vld [vmem:[#allocation5 + $0x24c] ss:$48 sps:$4 sm:$0xff]   ;;  %v10960_v32 = vld [vmem:[#allocation5 + $0x240] ss:$48 sps:$4 sm:$0xff]  }
 0x109   :  { %1625 = vmatpush1.bf16.msra.mxu0 %v10936_v10  ;;  %1718 = vmatpush1.bf16.msra.mxu1 %v10937_v11  ;;  %14913 = vst [vmem:[#allocation35_spill] sm:$0xff] %v12225_v26  ;;  %v10961_v33 = vld [vmem:[#allocation5 + $0x248] ss:$48 sps:$4 sm:$0xff]   ;;  %v10962_v34 = vld [vmem:[#allocation5 + $0x2a4] ss:$48 sps:$4 sm:$0xff]   ;;  %vm1564_vm1 = vcmask 80896  }
 0x10a   :  { %1626 = vmatprep.subr.bf16.mxu0 %v10938_v12  ;;  %1719 = vmatprep.subr.bf16.mxu1 %v10940_v13  ;;  %v12228_v31 = vsub.s32 %v259_v25, %v12225_v26  ;;  %v10964_v35 = vld [vmem:[#allocation5 + $0x2ac] ss:$48 sps:$4 sm:$0xff]   ;;  %v10227_v36 = vld.sshfl [vmem:[#allocation2] sm:$0xff pattern:$0x75316420]  ;;  %vm3648_vm2 = vcmask 1040384  }
 0x10b   :  { %v10228_v37 = vld.sshfl [vmem:[#allocation2 + $0x8] sm:$0xff pattern:$0x75316420]  ;;  %v256_v38 = vcombine.high %v10227_v36, %v10227_v36  ;;  %v10966_v40 = vld [vmem:[#allocation5 + $0x2a0] ss:$48 sps:$4 sm:$0xff]   ;;  %vm3649_vm3 = vcmask 1042434  }
 0x10c   :  { %v263_v39 = vrot.slane %v10227_v36, %v12228_v31  ;;  %v280_v41 = vcombine.high %v10228_v37, %v10228_v37  ;;  %v287_v42 = vrot.slane %v10228_v37, %v12228_v31  ;;  %v10967_v43 = vld [vmem:[#allocation5 + $0x2a8] ss:$48 sps:$4 sm:$0xff]   ;;  %v10968_v44 = vld [vmem:[#allocation5 + $0x304] ss:$48 sps:$4 sm:$0x1f]   ;;  %vm3651_vm4 = vcmask 1044484   ;;  %vm12704_vm6 = vmor %vm3648_vm2, %vm3649_vm3 }
 0x10d   :  { %1627 = vmatpush1.bf16.msra.mxu0 %v10942_v14  ;;  %1720 = vmatpush1.bf16.msra.mxu1 %v10943_v15  ;;  %v10970_v45 = vld [vmem:[#allocation5 + $0x30c] ss:$48 sps:$4 sm:$0x1f]   ;;  %v270_v46 = vrot.slane %v256_v38, %v12228_v31  ;;  %v10972_v47 = vld [vmem:[#allocation5 + $0x300] ss:$48 sps:$4 sm:$0x1f]   ;;  %vm12723_vm7 = vmor %vm12704_vm6, %vm3651_vm4 }
 0x10e   :  { %1628 = vmatprep.subr.bf16.mxu0 %v10944_v16  ;;  %1721 = vmatprep.subr.bf16.mxu1 %v10946_v17  ;;  %v294_v48 = vrot.slane %v280_v41, %v12228_v31  ;;  %v10973_v49 = vld [vmem:[#allocation5 + $0x308] ss:$48 sps:$4 sm:$0x1f]   ;;  %v10229_v56 = vld.sshfl [vmem:[#allocation2 + $0x10] sm:$0xff pattern:$0x75316420] }
 0x10f   :  { %v643_v50 = vcombine.low %v263_v39, %v270_v46  ;;  %v10239_v51 = vcombine.high %v263_v39, %v270_v46  ;;  %v10230_v57 = vld.sshfl [vmem:[#allocation2 + $0x18] sm:$0xff pattern:$0x75316420]  ;;  %v1585_v58 = vsel %vm1583_vm0, %v10972_v47, 0  ;;  %v10976_v61 = vld [vmem:[#allocation5 + $0x14] ss:$48 sps:$4 sm:$0xff]   ;;  %v304_v62 = vcombine.high %v10229_v56, %v10229_v56 }
 0x110   :  { %v645_v52 = vcombine.low %v287_v42, %v294_v48  ;;  %v10240_v53 = vcombine.high %v287_v42, %v294_v48  ;;  %v1591_v63 = vsel %vm1583_vm0, %v10973_v49, 0  ;;  %v10979_v2 = vld [vmem:[#allocation5 + $0x1c] ss:$48 sps:$4 sm:$0xff]   ;;  %v311_v3 = vrot.slane %v10229_v56, %v12228_v31  ;;  %v10231_v8 = vld.sshfl [vmem:[#allocation2 + $0x20] sm:$0xff pattern:$0x75316420] }
 0x111   :  { %1629 = vmatpush1.bf16.msra.mxu0 %v10948_v21  ;;  %1722 = vmatpush1.bf16.msra.mxu1 %v10949_v22  ;;  %v653_v54 = vrot.slane %v643_v50, %v12228_v31  ;;  %v660_v55 = vrot.slane %v10239_v51, %v12228_v31  ;;  %v318_v6 = vrot.slane %v304_v62, %v12228_v31  ;;  %v10232_v16 = vld.sshfl [vmem:[#allocation2 + $0x28] sm:$0x5f pattern:$0x75316420]  ;;  %v10974_v17 = vld [vmem:[#allocation5 + $0x10] ss:$48 sps:$4 sm:$0xff]  }
 0x112   :  { %1630 = vmatprep.subr.bf16.mxu0 %v10950_v23  ;;  %1723 = vmatprep.subr.bf16.mxu1 %v10952_v24  ;;  %v667_v59 = vrot.slane %v645_v52, %v12228_v31  ;;  %v674_v60 = vrot.slane %v10240_v53, %v12228_v31  ;;  %v328_v7 = vcombine.high %v10230_v57, %v10230_v57  ;;  %v10977_v18 = vld [vmem:[#allocation5 + $0x18] ss:$48 sps:$4 sm:$0xff]   ;;  %v10982_v24 = vld [vmem:[#allocation5 + $0x74] ss:$48 sps:$4 sm:$0xff]   ;;  %v10980_v38 = vld [vmem:[#allocation5 + $0x70] ss:$48 sps:$4 sm:$0xff]  }
 0x113   :  { %v676_v0 = vcombine.high %v653_v54, %v660_v55  ;;  %v675_v1 = vcombine.low %v653_v54, %v660_v55  ;;  %v335_v11 = vrot.slane %v10230_v57, %v12228_v31  ;;  %v352_v12 = vcombine.high %v10231_v8, %v10231_v8  ;;  %v10233_v36 = vld.sshfl [vmem:[#allocation2 + $0x30] sm:$0xff pattern:$0x75316420]  ;;  %v10983_v42 = vld [vmem:[#allocation5 + $0x78] ss:$48 sps:$4 sm:$0xff]   ;;  %s11981_s13 = smov [#allocation25]  }
 0x114   :  { %v678_v4 = vcombine.high %v667_v59, %v674_v60  ;;  %v677_v5 = vcombine.low %v667_v59, %v674_v60  ;;  %v342_v15 = vrot.slane %v328_v7, %v12228_v31  ;;  %v709_v19 = vcombine.low %v311_v3, %v318_v6  ;;  %v10991_v49 = vld [vmem:[#allocation5 + $0xdc] ss:$48 sps:$4 sm:$0xff]   ;;  %v10986_v55 = vld [vmem:[#allocation5 + $0xd0] ss:$48 sps:$4 sm:$0xff]   ;;  %s10211_s0 = sshll.u32 %s11981_s13, 4  ;;  %s10212_s0 = int_to_ptr.vmem [resolvable:$true] %s10211_s0 }
 0x115   :  { %1631 = vmatpush1.bf16.msra.mxu0 %v10954_v27  ;;  %1724 = vmatpush1.bf16.msra.mxu1 %v10955_v28  ;;  %v692_v9 = vrot.slane %v676_v0, %v12228_v31  ;;  %v685_v10 = vrot.slane %v675_v1, %v12228_v31  ;;  %v10241_v20 = vcombine.high %v311_v3, %v318_v6  ;;  %v10985_v28 = vld [vmem:[#allocation5 + $0x7c] ss:$48 sps:$4 sm:$0xff]   ;;  %vm3653_vm5 = vcmask 1046534   ;;  %s11914_s4 = scalar_lea.vmem %s10212_s0, 32  ;;  %p11919_p1 = scmp.lt.s32.totalorder %s10212_s0, %s10212_s0 }
 0x116   :  { %1632 = vmatprep.subr.bf16.mxu0 %v10956_v29  ;;  %1725 = vmatprep.subr.bf16.mxu1 %v10958_v30  ;;  %v706_v13 = vrot.slane %v678_v4, %v12228_v31  ;;  %v699_v14 = vrot.slane %v677_v5, %v12228_v31  ;;  %v359_v21 = vrot.slane %v10231_v8, %v12228_v31  ;;  %v10994_v4 = vld [vmem:[#allocation5 + $0x134] ss:$48 sps:$4 sm:$0xff]   ;;  %v10997_v5 = vld [vmem:[#allocation5 + $0x13c] ss:$48 sps:$4 sm:$0xff]   ;;  %vm12742_vm8 = vmor %vm12723_vm7, %vm3653_vm5  ;;  %vm5378_vm9 = vcmask 1041409   ;;  %p11915_p0 = scmp.ne.s32.totalorder %s10212_s0, %s11914_s4  ;;  %p11920_p2 = scmp.lt.s32.totalorder %s11914_s4, %s11914_s4 }
 0x117   :  { %v711_v25 = vcombine.low %v335_v11, %v342_v15  ;;  %v10242_v27 = vcombine.high %v335_v11, %v342_v15  ;;  %v719_v29 = vrot.slane %v709_v19, %v12228_v31  ;;  %v726_v30 = vrot.slane %v10241_v20, %v12228_v31  ;;  %v10995_v15 = vld [vmem:[#allocation5 + $0x138] ss:$48 sps:$4 sm:$0xff]  }
 0x118   :  { %v12251_v22 = vcombine.low %v692_v9, %v706_v13  ;;  %v12253_v23 = vcombine.low %v685_v10, %v699_v14  ;;  %v383_v37 = vrot.slane %v10232_v16, %v12228_v31  ;;  %v406_v50 = vrot.slane %v10233_v36, %v12228_v31  ;;  %v10992_v14 = vld [vmem:[#allocation5 + $0x130] ss:$48 sps:$4 sm:$0xff]   ;;  %p11921_p3 = por %p11920_p2, %p11919_p1 }
 0x119   :  { %1633 = vmatpush1.bf16.msra.mxu0 %v10960_v32  ;;  %1726 = vmatpush1.bf16.msra.mxu1 %v10961_v33  ;;  %v366_v32 = vrot.slane %v352_v12, %v12228_v31  ;;  %v376_v33 = vcombine.high %v10232_v16, %v10232_v16  ;;  %v742_v39 = vcombine.high %v719_v29, %v726_v30  ;;  %v10235_v12 = vld.sshfl [vmem:[#allocation2 + $0x40] sm:$0xff pattern:$0x75316420]  ;;  %vm5383_vm10 = vcmask 1043459  }
 0x11a   :  { %1634 = vmatprep.subr.bf16.mxu0 %v10962_v34  ;;  %1727 = vmatprep.subr.bf16.mxu1 %v10964_v35  ;;  %v733_v34 = vrot.slane %v711_v25, %v12228_v31  ;;  %v740_v35 = vrot.slane %v10242_v27, %v12228_v31  ;;  %v391_v46 = vcombine.high %v383_v37, %v383_v37  ;;  %v11003_v25 = vld [vmem:[#allocation5 + $0x19c] ss:$48 sps:$4 sm:$0xff]   ;;  %vm5388_vm11 = vcmask 1045509   ;;  %p11922_p4 = pnand %p11921_p3, %p11915_p0 }
 0x11b   :  { %10353 = vmatprep.mubr.msk.bf16.mxu0 %vm1564_vm1, %v12251_v22  ;;  %10360 = vmatprep.mubr.msk.bf16.mxu1 %vm1564_vm1, %v12251_v22  ;;  %v390_v41 = vrot.slane %v376_v33, %v12228_v31  ;;  %v758_v47 = vrot.slane %v742_v39, %v12228_v31  ;;  %v775_v53 = vcombine.low %v359_v21, %v366_v32  ;;  %v11001_v33 = vld [vmem:[#allocation5 + $0x198] ss:$48 sps:$4 sm:$0xff]   ;;  %vm5393_vm12 = vcmask 1047559  }
 0x11c   :  { %v10243_v54 = vcombine.high %v359_v21, %v366_v32  ;;  %v778_v57 = vcombine.low %v391_v46, %v406_v50  ;;  %v399_v59 = vcombine.high %v10233_v36, %v10233_v36  ;;  %v414_v60 = vcombine.high %v406_v50, %v406_v50  ;;  %v11000_v21 = vld [vmem:[#allocation5 + $0x194] ss:$48 sps:$4 sm:$0xff]   ;;  %v10998_v32 = vld [vmem:[#allocation5 + $0x190] ss:$48 sps:$4 sm:$0xff]  }
 0x11d   :  { %1635 = vmatpush1.bf16.msra.mxu0 %v10966_v40  ;;  %1728 = vmatpush1.bf16.msra.mxu1 %v10967_v43  ;;  %v741_v40 = vcombine.low %v719_v29, %v726_v30  ;;  %v744_v43 = vcombine.high %v733_v34, %v740_v35  ;;  %v777_v56 = vcombine.low %v383_v37, %v390_v41  ;;  %v11006_v36 = vld [vmem:[#allocation5 + $0x1f4] ss:$48 sps:$4 sm:$0xff]   ;;  %v11009_v41 = vld [vmem:[#allocation5 + $0x1fc] ss:$48 sps:$4 sm:$0xff]   ;;  %vm11980_vm13 = vmmov 0  }
 0x11e   :  { %10352 = vmatprep.subr.msk.bf16.mxu0 %vm1583_vm0, %v10968_v44  ;;  %10359 = vmatprep.subr.msk.bf16.mxu1 %vm1583_vm0, %v10970_v45  ;;  %v743_v44 = vcombine.low %v733_v34, %v740_v35  ;;  %v10988_v45 = vld [vmem:[#allocation5 + $0xd4] ss:$48 sps:$4 sm:$0xff]   ;;  %v785_v0 = vrot.slane %v775_v53, %v12228_v31  ;;  %v792_v1 = vrot.slane %v10243_v54, %v12228_v31  ;;  %vm10191_vm14 = vcmask 25600  }
 0x11f   :  { %v751_v48 = vrot.slane %v741_v40, %v12228_v31  ;;  %v772_v51 = vrot.slane %v744_v43, %v12228_v31  ;;  %v806_v3 = vrot.slane %v778_v57, %v12228_v31  ;;  %v413_v6 = vrot.slane %v399_v59, %v12228_v31  ;;  %v10237_v53 = vld.sshfl [vmem:[#allocation2 + $0x50] sm:$0xff pattern:$0x75316420] }
 0x120   :  { %v765_v52 = vrot.slane %v743_v44, %v12228_v31  ;;  %v808_v9 = vcombine.high %v785_v0, %v792_v1  ;;  %v807_v11 = vcombine.low %v785_v0, %v792_v1  ;;  %v454_v29 = vrot.slane %v10235_v12, %v12228_v31  ;;  %v10236_v44 = vld.sshfl [vmem:[#allocation2 + $0x48] sm:$0xff pattern:$0x75316420] }
 0x121   :  { %1637 = vmatpush1.bf16.msra.mxu0 %v1585_v58  ;;  %1730 = vmatpush1.bf16.msra.mxu1 %v1591_v63  ;;  %v10234_v58 = vld.sshfl [vmem:[#allocation2 + $0x38] sm:$0xff pattern:$0x75316420]  ;;  %v415_v16 = vcombine.high %v413_v6, %v413_v6  ;;  %v841_v34 = vcombine.low %v413_v6, %v414_v60  ;;  %v447_v37 = vcombine.high %v10235_v12, %v10235_v12 }
 0x122   :  { %1806 = vmatprep.subr.bf16.mxu0 %v10976_v61  ;;  %1899 = vmatprep.subr.bf16.mxu1 %v10979_v2  ;;  %v12273_v61 = vcombine.low %v758_v47, %v772_v51  ;;  %v12275_v62 = vcombine.low %v751_v48, %v765_v52  ;;  %v10989_v63 = vld [vmem:[#allocation5 + $0xd8] ss:$48 sps:$4 sm:$0xff]   ;;  %v799_v2 = vrot.slane %v777_v56, %v12228_v31  ;;  %v11004_v48 = vld [vmem:[#allocation5 + $0x1f0] ss:$48 sps:$4 sm:$0xff]   ;;  %v11015_v0 = vld [vmem:[#allocation5 + $0x25c] ss:$48 sps:$4 sm:$0xff]  }
 0x123   :  { %v423_v7 = vcombine.high %v10234_v58, %v10234_v58  ;;  %v430_v8 = vrot.slane %v10234_v58, %v12228_v31  ;;  %v817_v20 = vrot.slane %v807_v11, %v12228_v31  ;;  %v11007_v52 = vld [vmem:[#allocation5 + $0x1f8] ss:$48 sps:$4 sm:$0xff]   ;;  %v471_v57 = vcombine.high %v10236_v44, %v10236_v44  ;;  %v11012_v58 = vld [vmem:[#allocation5 + $0x254] ss:$48 sps:$4 sm:$0xff]  }
 0x124   :  { %1653 = vmatmul.mubr.bf16.vlgmr.msra.gmra.mrb[0].mxu0 %v12253_v23  ;;  %1746 = vmatmul.mubr.bf16.vlgmr.msra.gmra.mrb[0].mxu1 %v12253_v23  ;;  %v810_v10 = vcombine.high %v799_v2, %v806_v3  ;;  %v809_v13 = vcombine.low %v799_v2, %v806_v3  ;;  %v495_v11 = vcombine.high %v10237_v53, %v10237_v53 }
 0x125   :  { %1807 = vmatpush1.bf16.msra.mxu0 %v10974_v17  ;;  %1900 = vmatpush1.bf16.msra.mxu1 %v10977_v18  ;;  %v437_v17 = vrot.slane %v423_v7, %v12228_v31  ;;  %v824_v18 = vrot.slane %v808_v9, %v12228_v31  ;;  %v438_v27 = vcombine.high %v430_v8, %v430_v8  ;;  %v11013_v9 = vld [vmem:[#allocation5 + $0x258] ss:$48 sps:$4 sm:$0xff]  }
 0x126   :  { %1808 = vmatprep.subr.bf16.mxu0 %v10982_v24  ;;  %1901 = vmatprep.subr.bf16.mxu1 %v10985_v28  ;;  %v838_v19 = vrot.slane %v810_v10, %v12228_v31  ;;  %v831_v24 = vrot.slane %v809_v13, %v12228_v31  ;;  %v842_v35 = vcombine.low %v415_v16, %v430_v8  ;;  %v11018_v10 = vld [vmem:[#allocation5 + $0x2b4] ss:$48 sps:$4 sm:$0xff]  }
 0x127   :  { %10354 = vmatprep.mubr.msk.bf16.mxu0 %vm1564_vm1, %v12273_v61  ;;  %10361 = vmatprep.mubr.msk.bf16.mxu1 %vm1564_vm1, %v12273_v61  ;;  %v439_v28 = vcombine.high %v437_v17, %v437_v17  ;;  %v843_v39 = vcombine.low %v437_v17, %v438_v27  ;;  %v485_v3 = vrot.slane %v471_v57, %v12228_v31 }
 0x128   :  { %v12295_v30 = vcombine.low %v824_v18, %v838_v19  ;;  %v858_v43 = vrot.slane %v842_v35, %v12228_v31  ;;  %v10238_v19 = vld.sshfl [vmem:[#allocation2 + $0x58] sm:$0x5f pattern:$0x75316420] }
 0x129   :  { %1809 = vmatpush1.bf16.msra.mxu0 %v10980_v38  ;;  %1902 = vmatpush1.bf16.msra.mxu1 %v10983_v42  ;;  %v12297_v38 = vcombine.low %v817_v20, %v831_v24  ;;  %v844_v40 = vcombine.low %v439_v28, %v454_v29  ;;  %v851_v42 = vrot.slane %v841_v34, %v12228_v31 }
 0x12a   :  { %1810 = vmatprep.subr.bf16.mxu0 %v10988_v45  ;;  %1903 = vmatprep.subr.bf16.mxu1 %v10991_v49  ;;  %v461_v45 = vrot.slane %v447_v37, %v12228_v31  ;;  %v865_v46 = vrot.slane %v843_v39, %v12228_v31  ;;  %v462_v49 = vcombine.high %v454_v29, %v454_v29  ;;  %v11016_v29 = vld [vmem:[#allocation5 + $0x2b0] ss:$48 sps:$4 sm:$0xff]  }
 0x12b   :  { %v872_v47 = vrot.slane %v844_v40, %v12228_v31  ;;  %v874_v50 = vcombine.high %v851_v42, %v858_v43  ;;  %v873_v51 = vcombine.low %v851_v42, %v858_v43  ;;  %v519_v35 = vcombine.high %v10238_v19, %v10238_v19 }
 0x12c   :  { %1663 = vmatmul.mubr.bf16.gmra.mrb[4].mxu0 %v12275_v62  ;;  %1756 = vmatmul.mubr.bf16.gmra.mrb[4].mxu1 %v12275_v62  ;;  %v463_v54 = vcombine.high %v461_v45, %v461_v45  ;;  %v907_v7 = vcombine.low %v461_v45, %v462_v49  ;;  %v526_v40 = vrot.slane %v10238_v19, %v12228_v31  ;;  %v11027_v49 = vld [vmem:[#allocation5 + $0x318] ss:$48 sps:$4 sm:$0x1f]  }
 0x12d   :  { %1811 = vmatpush1.bf16.msra.mxu0 %v10986_v55  ;;  %1904 = vmatpush1.bf16.msra.mxu1 %v10989_v63  ;;  %v876_v55 = vcombine.high %v865_v46, %v872_v47  ;;  %v875_v56 = vcombine.low %v865_v46, %v872_v47  ;;  %v890_v59 = vrot.slane %v874_v50, %v12228_v31  ;;  %v11026_v46 = vld [vmem:[#allocation5 + $0x310] ss:$48 sps:$4 sm:$0x1f]   ;;  %v11043_v19 = vld [vmem:[#allocation5 + $0xe8] ss:$48 sps:$4 sm:$0xff]  }
 0x12e   :  { %1812 = vmatprep.subr.bf16.mxu0 %v10994_v4  ;;  %1905 = vmatprep.subr.bf16.mxu1 %v10997_v5  ;;  %v883_v60 = vrot.slane %v873_v51, %v12228_v31  ;;  %v478_v63 = vrot.slane %v10236_v44, %v12228_v31  ;;  %v502_v4 = vrot.slane %v10237_v53, %v12228_v31  ;;  %v11010_v5 = vld [vmem:[#allocation5 + $0x250] ss:$48 sps:$4 sm:$0xff]   ;;  %v1597_v57 = vsel %vm1583_vm0, %v11026_v46, 0  ;;  %v11076_v46 = vld [vmem:[#allocation5 + $0x324] ss:$48 sps:$4 sm:$0x1f]  }
 0x12f   :  { %10355 = vmatprep.mubr.msk.bf16.mxu0 %vm1564_vm1, %v12295_v30  ;;  %10362 = vmatprep.mubr.msk.bf16.mxu1 %vm1564_vm1, %v12295_v30  ;;  %v904_v1 = vrot.slane %v876_v55, %v12228_v31  ;;  %v897_v2 = vrot.slane %v875_v56, %v12228_v31  ;;  %v917_v17 = vrot.slane %v907_v7, %v12228_v31 }
 0x130   :  { %v486_v6 = vcombine.high %v478_v63, %v478_v63  ;;  %v908_v8 = vcombine.low %v463_v54, %v478_v63  ;;  %v510_v24 = vcombine.high %v502_v4, %v502_v4  ;;  %v533_v44 = vrot.slane %v519_v35, %v12228_v31  ;;  %v11058_v35 = vld [vmem:[#allocation5 + $0x200] ss:$48 sps:$4 sm:$0xff]  }
 0x131   :  { %1813 = vmatpush1.bf16.msra.mxu0 %v10992_v14  ;;  %1906 = vmatpush1.bf16.msra.mxu1 %v10995_v15  ;;  %v12317_v12 = vcombine.low %v890_v59, %v904_v1  ;;  %v12319_v13 = vcombine.low %v883_v60, %v897_v2  ;;  %v487_v14 = vcombine.high %v485_v3, %v485_v3  ;;  %v11021_v15 = vld [vmem:[#allocation5 + $0x2bc] ss:$48 sps:$4 sm:$0xff]   ;;  %v1603_v63 = vsel %vm1583_vm0, %v11027_v49, 0  ;;  %v11081_v49 = vld [vmem:[#allocation5 + $0x328] ss:$48 sps:$4 sm:$0x1f]  }
 0x132   :  { %1814 = vmatprep.subr.bf16.mxu0 %v11000_v21  ;;  %1907 = vmatprep.subr.bf16.mxu1 %v11003_v25  ;;  %v909_v16 = vcombine.low %v485_v3, %v486_v6  ;;  %v924_v18 = vrot.slane %v908_v8, %v12228_v31  ;;  %v509_v21 = vrot.slane %v495_v11, %v12228_v31  ;;  %v11033_v1 = vld [vmem:[#allocation5 + $0x2c] ss:$48 sps:$4 sm:$0xff]  }
 0x133   :  { %v910_v20 = vcombine.low %v487_v14, %v502_v4  ;;  %v534_v47 = vcombine.high %v526_v40, %v526_v40  ;;  %v11039_v11 = vld [vmem:[#allocation5 + $0x8c] ss:$48 sps:$4 sm:$0xff]   ;;  %v11034_v14 = vld [vmem:[#allocation5 + $0x80] ss:$48 sps:$4 sm:$0xff]  }
 0x134   :  { %1673 = vmatmul.mubr.bf16.gmra.mrb[8].mxu0 %v12297_v38  ;;  %1766 = vmatmul.mubr.bf16.gmra.mrb[8].mxu1 %v12297_v38  ;;  %v931_v25 = vrot.slane %v909_v16, %v12228_v31  ;;  %v940_v27 = vcombine.high %v917_v17, %v924_v18  ;;  %v939_v28 = vcombine.low %v917_v17, %v924_v18  ;;  %v11042_v16 = vld [vmem:[#allocation5 + $0xe4] ss:$48 sps:$4 sm:$0xff]   ;;  %v11045_v17 = vld [vmem:[#allocation5 + $0xec] ss:$48 sps:$4 sm:$0xff]   ;;  %v11040_v18 = vld [vmem:[#allocation5 + $0xe0] ss:$48 sps:$4 sm:$0xff]  }
 0x135   :  { %1815 = vmatpush1.bf16.msra.mxu0 %v10998_v32  ;;  %1908 = vmatpush1.bf16.msra.mxu1 %v11001_v33  ;;  %v11019_v32 = vld [vmem:[#allocation5 + $0x2b8] ss:$48 sps:$4 sm:$0xff]   ;;  %v938_v33 = vrot.slane %v910_v20, %v12228_v31  ;;  %v511_v34 = vcombine.high %v509_v21, %v509_v21  ;;  %v973_v45 = vcombine.low %v509_v21, %v510_v24  ;;  %v11048_v20 = vld [vmem:[#allocation5 + $0x144] ss:$48 sps:$4 sm:$0xff]   ;;  %v11051_v21 = vld [vmem:[#allocation5 + $0x14c] ss:$48 sps:$4 sm:$0xff]  }
 0x136   :  { %1816 = vmatprep.subr.bf16.mxu0 %v11006_v36  ;;  %1909 = vmatprep.subr.bf16.mxu1 %v11009_v41  ;;  %v11022_v36 = vld [vmem:[#allocation5 + $0x314] ss:$48 sps:$4 sm:$0x1f]   ;;  %v956_v37 = vrot.slane %v940_v27, %v12228_v31  ;;  %v949_v39 = vrot.slane %v939_v28, %v12228_v31  ;;  %v11024_v41 = vld [vmem:[#allocation5 + $0x31c] ss:$48 sps:$4 sm:$0x1f]   ;;  %v975_v53 = vcombine.low %v533_v44, %v534_v47 }
 0x137   :  { %10356 = vmatprep.mubr.msk.bf16.mxu0 %vm1564_vm1, %v12317_v12  ;;  %10363 = vmatprep.mubr.msk.bf16.mxu1 %vm1564_vm1, %v12317_v12  ;;  %v942_v42 = vcombine.high %v931_v25, %v938_v33  ;;  %v941_v43 = vcombine.low %v931_v25, %v938_v33  ;;  %v11046_v24 = vld [vmem:[#allocation5 + $0x140] ss:$48 sps:$4 sm:$0xff]   ;;  %v11049_v25 = vld [vmem:[#allocation5 + $0x148] ss:$48 sps:$4 sm:$0xff]   ;;  %v11054_v27 = vld [vmem:[#allocation5 + $0x1a4] ss:$48 sps:$4 sm:$0xff]  }
 0x138   :  { %v11057_v28 = vld [vmem:[#allocation5 + $0x1ac] ss:$48 sps:$4 sm:$0xff]   ;;  %v11060_v33 = vld [vmem:[#allocation5 + $0x204] ss:$48 sps:$4 sm:$0xff]   ;;  %v11070_v44 = vld [vmem:[#allocation5 + $0x2c0] ss:$48 sps:$4 sm:$0xff]  }
 0x139   :  { %1817 = vmatpush1.bf16.msra.mxu0 %v11004_v48  ;;  %1910 = vmatpush1.bf16.msra.mxu1 %v11007_v52  ;;  %v974_v48 = vcombine.low %v511_v34, %v526_v40  ;;  %v970_v50 = vrot.slane %v942_v42, %v12228_v31  ;;  %v963_v51 = vrot.slane %v941_v43, %v12228_v31  ;;  %v11063_v34 = vld [vmem:[#allocation5 + $0x20c] ss:$48 sps:$4 sm:$0xff]   ;;  %v11064_v40 = vld [vmem:[#allocation5 + $0x260] ss:$48 sps:$4 sm:$0xff]   ;;  %v11072_v42 = vld [vmem:[#allocation5 + $0x2c4] ss:$48 sps:$4 sm:$0xff]  }
 0x13a   :  { %1818 = vmatprep.subr.bf16.mxu0 %v11012_v58  ;;  %1911 = vmatprep.subr.bf16.mxu1 %v11015_v0  ;;  %v982_v52 = vrot.slane %v973_v45, %v12228_v31  ;;  %v996_v58 = vrot.slane %v975_v53, %v12228_v31  ;;  %v11030_v0 = vld [vmem:[#allocation5 + $0x24] ss:$48 sps:$4 sm:$0xff]   ;;  %v11075_v43 = vld [vmem:[#allocation5 + $0x2cc] ss:$48 sps:$4 sm:$0xff]   ;;  %v11073_v45 = vld [vmem:[#allocation5 + $0x2c8] ss:$48 sps:$4 sm:$0xff]  }
 0x13b   :  { %v989_v54 = vrot.slane %v974_v48, %v12228_v31  ;;  %v12342_v55 = vcombine.low %v956_v37, %v970_v50  ;;  %v12344_v56 = vcombine.low %v949_v39, %v963_v51  ;;  %v11066_v37 = vld [vmem:[#allocation5 + $0x264] ss:$48 sps:$4 sm:$0xff]   ;;  %v11069_v39 = vld [vmem:[#allocation5 + $0x26c] ss:$48 sps:$4 sm:$0xff]   ;;  %v1615_v51 = vsel %vm1583_vm0, %v11081_v49, 0 }
 0x13c   :  { %1683 = vmatmul.mubr.bf16.gmra.mrb[12].mxu0 %v12319_v13  ;;  %1776 = vmatmul.mubr.bf16.gmra.mrb[12].mxu1 %v12319_v13  ;;  %v999_v2 = vcombine.high %v996_v58, %v996_v58  ;;  %v11078_v47 = vld [vmem:[#allocation5 + $0x32c] ss:$48 sps:$4 sm:$0x1f]   ;;  %v11080_v48 = vld [vmem:[#allocation5 + $0x320] ss:$48 sps:$4 sm:$0x1f]  }
 0x13d   :  { %1819 = vmatpush1.bf16.msra.mxu0 %v11010_v5  ;;  %1912 = vmatpush1.bf16.msra.mxu1 %v11013_v9  ;;  %v998_v59 = vcombine.high %v982_v52, %v989_v54  ;;  %v997_v60 = vcombine.low %v982_v52, %v989_v54  ;;  %v1020_v5 = vrot.slane %v996_v58, %v12228_v31  ;;  %v11031_v9 = vld [vmem:[#allocation5 + $0x28] ss:$48 sps:$4 sm:$0xff]   ;;  %v1609_v50 = vsel %vm1583_vm0, %v11080_v48, 0  ;;  %v11099_v53 = vld [vmem:[#allocation8 + $0xcc] ss:$48 sps:$4 sm:$0xff]  }
 0x13e   :  { %1820 = vmatprep.subr.bf16.mxu0 %v11018_v10  ;;  %1913 = vmatprep.subr.bf16.mxu1 %v11021_v15  ;;  %v1027_v6 = vrot.slane %v999_v2, %v12228_v31  ;;  %v11036_v10 = vld [vmem:[#allocation5 + $0x84] ss:$48 sps:$4 sm:$0xff]   ;;  %v11037_v15 = vld [vmem:[#allocation5 + $0x88] ss:$48 sps:$4 sm:$0xff]  }
 0x13f   :  { %10357 = vmatprep.mubr.msk.bf16.mxu0 %vm1564_vm1, %v12342_v55  ;;  %10364 = vmatprep.mubr.msk.bf16.mxu1 %vm1564_vm1, %v12342_v55  ;;  %v1013_v3 = vrot.slane %v998_v59, %v12228_v31  ;;  %v1006_v4 = vrot.slane %v997_v60, %v12228_v31  ;;  %v11028_v31 = vld [vmem:[#allocation5 + $0x20] ss:$48 sps:$4 sm:$0xff]   ;;  %v11096_v52 = vld [vmem:[#allocation8 + $0xc4] ss:$48 sps:$4 sm:$0xff]   ;;  %v11103_v59 = vld [vmem:[#allocation8 + $0x128] ss:$48 sps:$4 sm:$0xff]  }
 0x140   :  { %v11094_v54 = vld [vmem:[#allocation8 + $0xc0] ss:$48 sps:$4 sm:$0xff]   ;;  %v11977_v60 = vmov 1983009808  }
 0x141   :  { %1821 = vmatpush1.bf16.msra.mxu0 %v11016_v29  ;;  %1914 = vmatpush1.bf16.msra.mxu1 %v11019_v32  ;;  %v12359_v7 = vcombine.low %v1013_v3, %v1027_v6  ;;  %v12361_v8 = vcombine.low %v1006_v4, %v1020_v5  ;;  %v11052_v29 = vld [vmem:[#allocation5 + $0x1a0] ss:$48 sps:$4 sm:$0xff]   ;;  %v11055_v32 = vld [vmem:[#allocation5 + $0x1a8] ss:$48 sps:$4 sm:$0xff]  }
 0x142   :  { %10366 = vmatprep.subr.msk.bf16.mxu0 %vm1583_vm0, %v11022_v36  ;;  %10373 = vmatprep.subr.msk.bf16.mxu1 %vm1583_vm0, %v11024_v41  ;;  %v11061_v36 = vld [vmem:[#allocation5 + $0x208] ss:$48 sps:$4 sm:$0xff]   ;;  %v11100_v58 = vld [vmem:[#allocation8 + $0x120] ss:$48 sps:$4 sm:$0xff]  }
 0x143   :  { %v11067_v41 = vld [vmem:[#allocation5 + $0x268] ss:$48 sps:$4 sm:$0xff]  }
 0x144   :  { %1693 = vmatmul.mubr.bf16.gmra.mrb[16].mxu0 %v12344_v56  ;;  %1786 = vmatmul.mubr.bf16.gmra.mrb[16].mxu1 %v12344_v56 }
 0x145   :  { %1823 = vmatpush1.bf16.msra.mxu0 %v1597_v57  ;;  %1916 = vmatpush1.bf16.msra.mxu1 %v1603_v63  ;;  %v11105_v57 = vld [vmem:[#allocation8 + $0x12c] ss:$48 sps:$4 sm:$0xff]   ;;  %v2327_v63 = vunpack.c.l.s4 %v11977_v60 }
 0x146   :  { %1992 = vmatprep.subr.bf16.mxu0 %v11030_v0  ;;  %2085 = vmatprep.subr.bf16.mxu1 %v11033_v1 }
 0x147   :  { %10358 = vmatprep.mubr.msk.bf16.mxu0 %vm1564_vm1, %v12359_v7  ;;  %10365 = vmatprep.mubr.msk.bf16.mxu1 %vm1564_vm1, %v12359_v7  ;;  %v2328_v0 = vunpack.c.0.s8 %v2327_v63 }
 0x149   :  { %v12446_v1 = vsub.s32 %v2328_v0, %v12225_v26 }
 0x14c   :  { %1703 = vmatmul.mubr.bf16.gmra.mrb[20].mxu0 %v12361_v8  ;;  %1796 = vmatmul.mubr.bf16.gmra.mrb[20].mxu1 %v12361_v8 }
 0x14d   :  { %10367 = vmatprep.mubr.msk.bf16.mxu0 %vm1564_vm1, %v12251_v22  ;;  %10374 = vmatprep.mubr.msk.bf16.mxu1 %vm1564_vm1, %v12251_v22 }
 0x154   :  { %1839 = vmatmul.mubr.bf16.vlgmr.msra.gmra.mrb[24].mxu0 %v12253_v23  ;;  %1932 = vmatmul.mubr.bf16.vlgmr.msra.gmra.mrb[24].mxu1 %v12253_v23 }
 0x155   :  { %1993 = vmatpush1.bf16.msra.mxu0 %v11028_v31  ;;  %2086 = vmatpush1.bf16.msra.mxu1 %v11031_v9 }
 0x156   :  { %1994 = vmatprep.subr.bf16.mxu0 %v11036_v10  ;;  %2087 = vmatprep.subr.bf16.mxu1 %v11039_v11 }
 0x157   :  { %10368 = vmatprep.mubr.msk.bf16.mxu0 %vm1564_vm1, %v12273_v61  ;;  %10375 = vmatprep.mubr.msk.bf16.mxu1 %vm1564_vm1, %v12273_v61 }
 0x159   :  { %1995 = vmatpush1.bf16.msra.mxu0 %v11034_v14  ;;  %2088 = vmatpush1.bf16.msra.mxu1 %v11037_v15 }
 0x15a   :  { %1996 = vmatprep.subr.bf16.mxu0 %v11042_v16  ;;  %2089 = vmatprep.subr.bf16.mxu1 %v11045_v17 }
 0x15c   :  { %1849 = vmatmul.mubr.bf16.gmra.mrb[28].mxu0 %v12275_v62  ;;  %1942 = vmatmul.mubr.bf16.gmra.mrb[28].mxu1 %v12275_v62 }
 0x15d   :  { %1997 = vmatpush1.bf16.msra.mxu0 %v11040_v18  ;;  %2090 = vmatpush1.bf16.msra.mxu1 %v11043_v19 }
 0x15e   :  { %10369 = vmatprep.mubr.msk.bf16.mxu0 %vm1564_vm1, %v12295_v30  ;;  %10376 = vmatprep.mubr.msk.bf16.mxu1 %vm1564_vm1, %v12295_v30 }
 0x15f   :  { %1998 = vmatprep.subr.bf16.mxu0 %v11048_v20  ;;  %2091 = vmatprep.subr.bf16.mxu1 %v11051_v21 }
 0x161   :  { %1999 = vmatpush1.bf16.msra.mxu0 %v11046_v24  ;;  %2092 = vmatpush1.bf16.msra.mxu1 %v11049_v25 }
 0x162   :  { %2000 = vmatprep.subr.bf16.mxu0 %v11054_v27  ;;  %2093 = vmatprep.subr.bf16.mxu1 %v11057_v28 }
 0x164   :  { %1859 = vmatmul.mubr.bf16.gmra.mrb[32].mxu0 %v12297_v38  ;;  %1952 = vmatmul.mubr.bf16.gmra.mrb[32].mxu1 %v12297_v38 }
 0x165   :  { %10370 = vmatprep.mubr.msk.bf16.mxu0 %vm1564_vm1, %v12317_v12  ;;  %10377 = vmatprep.mubr.msk.bf16.mxu1 %vm1564_vm1, %v12317_v12 }
 0x166   :  { %2001 = vmatpush1.bf16.msra.mxu0 %v11052_v29  ;;  %2094 = vmatpush1.bf16.msra.mxu1 %v11055_v32 }
 0x167   :  { %2002 = vmatprep.subr.bf16.mxu0 %v11060_v33  ;;  %2095 = vmatprep.subr.bf16.mxu1 %v11063_v34 }
 0x16a   :  { %2003 = vmatpush1.bf16.msra.mxu0 %v11058_v35  ;;  %2096 = vmatpush1.bf16.msra.mxu1 %v11061_v36 }
 0x16b   :  { %2004 = vmatprep.subr.bf16.mxu0 %v11066_v37  ;;  %2097 = vmatprep.subr.bf16.mxu1 %v11069_v39 }
 0x16c   :  { %1869 = vmatmul.mubr.bf16.gmra.mrb[36].mxu0 %v12319_v13  ;;  %1962 = vmatmul.mubr.bf16.gmra.mrb[36].mxu1 %v12319_v13 }
 0x16d   :  { %10371 = vmatprep.mubr.msk.bf16.mxu0 %vm1564_vm1, %v12342_v55  ;;  %10378 = vmatprep.mubr.msk.bf16.mxu1 %vm1564_vm1, %v12342_v55 }
 0x16e   :  { %2005 = vmatpush1.bf16.msra.mxu0 %v11064_v40  ;;  %2098 = vmatpush1.bf16.msra.mxu1 %v11067_v41 }
 0x16f   :  { %2006 = vmatprep.subr.bf16.mxu0 %v11072_v42  ;;  %2099 = vmatprep.subr.bf16.mxu1 %v11075_v43 }
 0x172   :  { %2007 = vmatpush1.bf16.msra.mxu0 %v11070_v44  ;;  %2100 = vmatpush1.bf16.msra.mxu1 %v11073_v45 }
 0x173   :  { %10380 = vmatprep.subr.msk.bf16.mxu0 %vm1583_vm0, %v11076_v46  ;;  %10387 = vmatprep.subr.msk.bf16.mxu1 %vm1583_vm0, %v11078_v47 }
 0x174   :  { %1879 = vmatmul.mubr.bf16.gmra.mrb[40].mxu0 %v12344_v56  ;;  %1972 = vmatmul.mubr.bf16.gmra.mrb[40].mxu1 %v12344_v56 }
 0x175   :  { %10372 = vmatprep.mubr.msk.bf16.mxu0 %vm1564_vm1, %v12359_v7  ;;  %10379 = vmatprep.mubr.msk.bf16.mxu1 %vm1564_vm1, %v12359_v7 }
 0x176   :  { %2009 = vmatpush1.bf16.msra.mxu0 %v1609_v50  ;;  %2102 = vmatpush1.bf16.msra.mxu1 %v1615_v51  ;;  %v11106_v51 = vld [vmem:[#allocation8 + $0x180] ss:$48 sps:$4 sm:$0xff]  }
 0x17c   :  { %1889 = vmatmul.mubr.bf16.gmra.mrb[44].mxu0 %v12361_v8  ;;  %1982 = vmatmul.mubr.bf16.gmra.mrb[44].mxu1 %v12361_v8 }
 0x17d   :  { %10381 = vmatprep.mubr.msk.bf16.mxu0 %vm1564_vm1, %v12251_v22  ;;  %10388 = vmatprep.mubr.msk.bf16.mxu1 %vm1564_vm1, %v12251_v22  ;;  %v11084_v22 = vld [vmem:[#allocation8 + $0x4] ss:$48 sps:$4 sm:$0xff]  }
 0x17e   :  { %6505 = vmatprep.subr.bf16.mxu0 %v11084_v22  ;;  %v11108_v22 = vld [vmem:[#allocation8 + $0x184] ss:$48 sps:$4 sm:$0xff]  }
 0x184   :  { %2025 = vmatmul.mubr.bf16.vlgmr.msra.gmra.mrb[48].mxu0 %v12253_v23  ;;  %2118 = vmatmul.mubr.bf16.vlgmr.msra.gmra.mrb[48].mxu1 %v12253_v23  ;;  %v11087_v23 = vld [vmem:[#allocation8 + $0xc] ss:$48 sps:$4 sm:$0xff]  }
 0x185   :  { %10382 = vmatprep.mubr.msk.bf16.mxu0 %vm1564_vm1, %v12273_v61  ;;  %10389 = vmatprep.mubr.msk.bf16.mxu1 %vm1564_vm1, %v12273_v61  ;;  %v11082_v61 = vld [vmem:[#allocation8] ss:$48 sps:$4 sm:$0xff]  }
 0x186   :  { %6568 = vmatprep.subr.bf16.mxu1 %v11087_v23  ;;  %6506 = vmatpush1.bf16.msra.mxu0 %v11082_v61 }
 0x18c   :  { %2035 = vmatmul.mubr.bf16.gmra.mrb[52].mxu0 %v12275_v62  ;;  %2128 = vmatmul.mubr.bf16.gmra.mrb[52].mxu1 %v12275_v62  ;;  %v11085_v62 = vld [vmem:[#allocation8 + $0x8] ss:$48 sps:$4 sm:$0xff]  }
 0x18d   :  { %10383 = vmatprep.mubr.msk.bf16.mxu0 %vm1564_vm1, %v12295_v30  ;;  %10390 = vmatprep.mubr.msk.bf16.mxu1 %vm1564_vm1, %v12295_v30  ;;  %v11090_v30 = vld [vmem:[#allocation8 + $0x64] ss:$48 sps:$4 sm:$0xff]  }
 0x18e   :  { %6569 = vmatpush1.bf16.msra.mxu1 %v11085_v62  ;;  %6507 = vmatprep.subr.bf16.mxu0 %v11090_v30  ;;  %v11109_v62 = vld [vmem:[#allocation8 + $0x188] ss:$48 sps:$4 sm:$0xff]   ;;  %v11111_v30 = vld [vmem:[#allocation8 + $0x18c] ss:$48 sps:$4 sm:$0xff]  }
 0x194   :  { %2045 = vmatmul.mubr.bf16.gmra.mrb[56].mxu0 %v12297_v38  ;;  %2138 = vmatmul.mubr.bf16.gmra.mrb[56].mxu1 %v12297_v38  ;;  %v11093_v38 = vld [vmem:[#allocation8 + $0x6c] ss:$48 sps:$4 sm:$0xff]  }
 0x195   :  { %10384 = vmatprep.mubr.msk.bf16.mxu0 %vm1564_vm1, %v12317_v12  ;;  %10391 = vmatprep.mubr.msk.bf16.mxu1 %vm1564_vm1, %v12317_v12  ;;  %v11088_v12 = vld [vmem:[#allocation8 + $0x60] ss:$48 sps:$4 sm:$0xff]  }
 0x196   :  { %6570 = vmatprep.subr.bf16.mxu1 %v11093_v38  ;;  %6508 = vmatpush1.bf16.msra.mxu0 %v11088_v12 }
 0x197   :  { %6509 = vmatprep.subr.bf16.mxu0 %v11096_v52 }
 0x19a   :  { %6510 = vmatpush1.bf16.msra.mxu0 %v11094_v54 }
 0x19c   :  { %2055 = vmatmul.mubr.bf16.gmra.mrb[60].mxu0 %v12319_v13  ;;  %2148 = vmatmul.mubr.bf16.gmra.mrb[60].mxu1 %v12319_v13  ;;  %v11091_v13 = vld [vmem:[#allocation8 + $0x68] ss:$48 sps:$4 sm:$0xff]  }
 0x19d   :  { %10385 = vmatprep.mubr.msk.bf16.mxu0 %vm1564_vm1, %v12342_v55  ;;  %10392 = vmatprep.mubr.msk.bf16.mxu1 %vm1564_vm1, %v12342_v55  ;;  %v11097_v55 = vld [vmem:[#allocation8 + $0xc8] ss:$48 sps:$4 sm:$0xff]  }
 0x19e   :  { %6571 = vmatpush1.bf16.msra.mxu1 %v11091_v13 }
 0x19f   :  { %6572 = vmatprep.subr.bf16.mxu1 %v11099_v53 }
 0x1a2   :  { %6573 = vmatpush1.bf16.msra.mxu1 %v11097_v55 }
 0x1a3   :  { %6574 = vmatprep.subr.bf16.mxu1 %v11105_v57 }
 0x1a4   :  { %2065 = vmatmul.mubr.bf16.gmra.mrb[64].mxu0 %v12344_v56  ;;  %2158 = vmatmul.mubr.bf16.gmra.mrb[64].mxu1 %v12344_v56  ;;  %v11102_v56 = vld [vmem:[#allocation8 + $0x124] ss:$48 sps:$4 sm:$0xff]  }
 0x1a5   :  { %10386 = vmatprep.mubr.msk.bf16.mxu0 %vm1564_vm1, %v12359_v7  ;;  %10393 = vmatprep.mubr.msk.bf16.mxu1 %vm1564_vm1, %v12359_v7 }
 0x1a6   :  { %6511 = vmatprep.subr.bf16.mxu0 %v11102_v56  ;;  %6575 = vmatpush1.bf16.msra.mxu1 %v11103_v59 }
 0x1a7   :  { %6512 = vmatpush1.bf16.msra.mxu0 %v11100_v58  ;;  %6576 = vmatprep.subr.bf16.mxu1 %v11111_v30 }
 0x1a8   :  { %6513 = vmatprep.subr.bf16.mxu0 %v11108_v22  ;;  %v11114_v22 = vld [vmem:[#allocation8 + $0x1e4] ss:$48 sps:$4 sm:$0xff]  }
 0x1aa   :  { %6577 = vmatpush1.bf16.msra.mxu1 %v11109_v62 }
 0x1ab   :  { %6514 = vmatpush1.bf16.msra.mxu0 %v11106_v51  ;;  %v11112_v51 = vld [vmem:[#allocation8 + $0x1e0] ss:$48 sps:$4 sm:$0xff]  }
 0x1ac   :  { %2075 = vmatmul.mubr.bf16.gmra.mrb[68].mxu0 %v12361_v8  ;;  %2168 = vmatmul.mubr.bf16.gmra.mrb[68].mxu1 %v12361_v8 }
 0x1ad   :  { %6515 = vmatprep.subr.bf16.mxu0 %v11114_v22 }
 0x1af   :  { %6516 = vmatpush1.bf16.msra.mxu0 %v11112_v51 }
 0x1f7   :  { %v1654_v2 = vpop.f32.mrb[0].mxu0  ;;  %v1747_v3 = vpop.f32.mrb[0].mxu1 }
 0x1f8   :  { %v1656_v4 = vpop.f32.mrb[1].mxu0  ;;  %v1749_v5 = vpop.f32.mrb[1].mxu1 }
 0x1f9   :  { %v2322_v6 = vcombine.low %v1654_v2, %v1656_v4  ;;  %v2323_v7 = vcombine.high %v1654_v2, %v1656_v4  ;;  %v2324_v8 = vcombine.low %v1747_v3, %v1749_v5  ;;  %v2325_v31 = vcombine.high %v1747_v3, %v1749_v5  ;;  %v1658_v9 = vpop.f32.mrb[2].mxu0  ;;  %v1751_v10 = vpop.f32.mrb[2].mxu1 }
 0x1fa   :  { %v1660_v11 = vpop.f32.mrb[3].mxu0  ;;  %v1753_v14 = vpop.f32.mrb[3].mxu1 }
 0x1fb   :  { %v12449_v15 = vrot.slane %v2322_v6, %v12446_v1  ;;  %v12452_v16 = vrot.slane %v2323_v7, %v12446_v1  ;;  %v12455_v17 = vrot.slane %v2324_v8, %v12446_v1  ;;  %v12458_v18 = vrot.slane %v2325_v31, %v12446_v1 }
 0x1fc   :  { %v2429_v19 = vcombine.low %v1658_v9, %v1660_v11  ;;  %v2430_v20 = vcombine.high %v1658_v9, %v1660_v11  ;;  %v2431_v21 = vcombine.low %v1751_v10, %v1753_v14  ;;  %v2432_v24 = vcombine.high %v1751_v10, %v1753_v14 }
 0x1fe   :  { %v12469_v32 = vrot.slane %v2429_v19, %v12446_v1  ;;  %v12472_v33 = vrot.slane %v2430_v20, %v12446_v1  ;;  %v12475_v34 = vrot.slane %v2431_v21, %v12446_v1  ;;  %v12478_v35 = vrot.slane %v2432_v24, %v12446_v1 }
 0x1ff   :  { %v1664_v36 = vpop.f32.mrb[4].mxu0  ;;  %v1757_v37 = vpop.f32.mrb[4].mxu1 }
 0x200   :  { %v1666_v43 = vpop.f32.mrb[5].mxu0  ;;  %v1759_v44 = vpop.f32.mrb[5].mxu1 }
 0x201   :  { %v2537_v45 = vcombine.low %v1664_v36, %v1666_v43  ;;  %v2538_v46 = vcombine.high %v1664_v36, %v1666_v43  ;;  %v2539_v47 = vcombine.low %v1757_v37, %v1759_v44  ;;  %v2540_v48 = vcombine.high %v1757_v37, %v1759_v44  ;;  %v1668_v49 = vpop.f32.mrb[6].mxu0  ;;  %v1761_v50 = vpop.f32.mrb[6].mxu1 }
 0x202   :  { %v1670_v23 = vpop.f32.mrb[7].mxu0  ;;  %v1763_v61 = vpop.f32.mrb[7].mxu1 }
 0x203   :  { %v12489_v38 = vrot.slane %v2537_v45, %v12446_v1  ;;  %v12492_v12 = vrot.slane %v2538_v46, %v12446_v1  ;;  %v12495_v13 = vrot.slane %v2539_v47, %v12446_v1  ;;  %v12498_v52 = vrot.slane %v2540_v48, %v12446_v1 }
 0x204   :  { %v2645_v53 = vcombine.low %v1668_v49, %v1670_v23  ;;  %v2646_v54 = vcombine.high %v1668_v49, %v1670_v23  ;;  %v2647_v55 = vcombine.low %v1761_v50, %v1763_v61  ;;  %v2648_v56 = vcombine.high %v1761_v50, %v1763_v61  ;;  %v11115_v23 = vld [vmem:[#allocation8 + $0x1e8] ss:$48 sps:$4 sm:$0xff]  }
 0x206   :  { %v12509_v63 = vrot.slane %v2645_v53, %v12446_v1  ;;  %v12512_v0 = vrot.slane %v2646_v54, %v12446_v1  ;;  %v12515_v2 = vrot.slane %v2647_v55, %v12446_v1  ;;  %v12518_v3 = vrot.slane %v2648_v56, %v12446_v1  ;;  %v11117_v54 = vld [vmem:[#allocation8 + $0x1ec] ss:$48 sps:$4 sm:$0xff]  }
 0x207   :  { %v1674_v4 = vpop.f32.mrb[8].mxu0  ;;  %v1767_v5 = vpop.f32.mrb[8].mxu1  ;;  %6578 = vmatprep.subr.bf16.mxu1 %v11117_v54 }
 0x208   :  { %14914 = vst [vmem:[#allocation36_spill] sm:$0xff] %v12509_v63  ;;  %14915 = vst [vmem:[#allocation37_spill] sm:$0xff] %v12512_v0  ;;  %v1676_v9 = vpop.f32.mrb[9].mxu0  ;;  %v1769_v10 = vpop.f32.mrb[9].mxu1  ;;  %6579 = vmatpush1.bf16.msra.mxu1 %v11115_v23 }
 0x209   :  { %14916 = vst [vmem:[#allocation38_spill] sm:$0xff] %v12515_v2  ;;  %14917 = vst [vmem:[#allocation39_spill] sm:$0xff] %v12518_v3  ;;  %v2753_v11 = vcombine.low %v1674_v4, %v1676_v9  ;;  %v2754_v14 = vcombine.high %v1674_v4, %v1676_v9  ;;  %v2755_v19 = vcombine.low %v1767_v5, %v1769_v10  ;;  %v1678_v21 = vpop.f32.mrb[10].mxu0  ;;  %v1771_v24 = vpop.f32.mrb[10].mxu1 }
 0x20a   :  { %v2756_v20 = vcombine.high %v1767_v5, %v1769_v10  ;;  %v1680_v36 = vpop.f32.mrb[11].mxu0  ;;  %v1773_v37 = vpop.f32.mrb[11].mxu1 }
 0x20b   :  { %v12529_v43 = vrot.slane %v2753_v11, %v12446_v1  ;;  %v12532_v44 = vrot.slane %v2754_v14, %v12446_v1  ;;  %v12535_v45 = vrot.slane %v2755_v19, %v12446_v1  ;;  %v2861_v47 = vcombine.low %v1678_v21, %v1680_v36 }
 0x20c   :  { %v12538_v46 = vrot.slane %v2756_v20, %v12446_v1  ;;  %v2862_v48 = vcombine.high %v1678_v21, %v1680_v36  ;;  %v2863_v49 = vcombine.low %v1771_v24, %v1773_v37  ;;  %v2864_v50 = vcombine.high %v1771_v24, %v1773_v37 }
 0x20d   :  { %14918 = vst [vmem:[#allocation40_spill] sm:$0xff] %v12529_v43  ;;  %14919 = vst [vmem:[#allocation41_spill] sm:$0xff] %v12532_v44  ;;  %v12549_v55 = vrot.slane %v2861_v47, %v12446_v1 }
 0x20e   :  { %14920 = vst [vmem:[#allocation42_spill] sm:$0xff] %v12535_v45  ;;  %14921 = vst [vmem:[#allocation43_spill] sm:$0xff] %v12538_v46  ;;  %v12552_v56 = vrot.slane %v2862_v48, %v12446_v1  ;;  %v12555_v4 = vrot.slane %v2863_v49, %v12446_v1  ;;  %v12558_v5 = vrot.slane %v2864_v50, %v12446_v1 }
 0x20f   :  { %14922 = vst [vmem:[#allocation44_spill] sm:$0xff] %v12549_v55  ;;  %v1684_v9 = vpop.f32.mrb[12].mxu0  ;;  %v1777_v10 = vpop.f32.mrb[12].mxu1 }
 0x210   :  { %14923 = vst [vmem:[#allocation45_spill] sm:$0xff] %v12552_v56  ;;  %14924 = vst [vmem:[#allocation46_spill] sm:$0xff] %v12555_v4  ;;  %v1686_v20 = vpop.f32.mrb[13].mxu0  ;;  %v1779_v21 = vpop.f32.mrb[13].mxu1 }
 0x211   :  { %14925 = vst [vmem:[#allocation47_spill] sm:$0xff] %v12558_v5  ;;  %v2967_v24 = vcombine.low %v1684_v9, %v1686_v20  ;;  %v2968_v36 = vcombine.high %v1684_v9, %v1686_v20  ;;  %v2969_v37 = vcombine.low %v1777_v10, %v1779_v21  ;;  %v2970_v47 = vcombine.high %v1777_v10, %v1779_v21  ;;  %v1688_v48 = vpop.f32.mrb[14].mxu0  ;;  %v1781_v49 = vpop.f32.mrb[14].mxu1 }
 0x212   :  { %v1690_v50 = vpop.f32.mrb[15].mxu0  ;;  %v1783_v51 = vpop.f32.mrb[15].mxu1 }
 0x213   :  { %v12567_v22 = vrot.slane %v2967_v24, %v12446_v1  ;;  %v12570_v54 = vrot.slane %v2968_v36, %v12446_v1  ;;  %v12573_v14 = vrot.slane %v2969_v37, %v12446_v1  ;;  %v12576_v19 = vrot.slane %v2970_v47, %v12446_v1  ;;  %v4097_v24 = vld [vmem:[#allocation7] sm:$0x3] }
 0x214   :  { %v3075_v23 = vcombine.low %v1688_v48, %v1690_v50  ;;  %v3076_v9 = vcombine.high %v1688_v48, %v1690_v50  ;;  %v3077_v20 = vcombine.low %v1781_v49, %v1783_v51  ;;  %v3078_v10 = vcombine.high %v1781_v49, %v1783_v51 }
 0x215   :  { %14926 = vst [vmem:[#allocation48_spill] sm:$0xff] %v12567_v22  ;;  %14927 = vst [vmem:[#allocation49_spill] sm:$0xff] %v12570_v54  ;;  %v12599_v50 = vsub.s32 0, %v12225_v26  ;;  %v14760_v51 = vsub.s32 1, %v12225_v26 }
 0x216   :  { %14928 = vst [vmem:[#allocation50_spill] sm:$0xff] %v12573_v14  ;;  %14929 = vst [vmem:[#allocation51_spill] sm:$0xff] %v12576_v19  ;;  %v12587_v11 = vrot.slane %v3075_v23, %v12446_v1  ;;  %v12590_v47 = vrot.slane %v3076_v9, %v12446_v1  ;;  %v12593_v48 = vrot.slane %v3077_v20, %v12446_v1 }
 0x217   :  { %v12596_v49 = vrot.slane %v3078_v10, %v12446_v1  ;;  %14934 = vst [vmem:[#allocation56_spill] sm:$0xff] %v12599_v50  ;;  %v1694_v36 = vpop.f32.mrb[16].mxu0  ;;  %v1787_v10 = vpop.f32.mrb[16].mxu1  ;;  %v4102_v23 = vrot.slane %v4097_v24, %v12599_v50  ;;  %v4106_v9 = vrot.slane %v4097_v24, %v14760_v51 }
 0x218   :  { %14930 = vst [vmem:[#allocation52_spill] sm:$0xff] %v12587_v11  ;;  %14931 = vst [vmem:[#allocation53_spill] sm:$0xff] %v12590_v47  ;;  %v1696_v21 = vpop.f32.mrb[17].mxu0  ;;  %v1789_v53 = vpop.f32.mrb[17].mxu1 }
 0x219   :  { %14932 = vst [vmem:[#allocation54_spill] sm:$0xff] %v12593_v48  ;;  %14933 = vst [vmem:[#allocation55_spill] sm:$0xff] %v12596_v49  ;;  %v3183_v30 = vcombine.low %v1694_v36, %v1696_v21  ;;  %v3184_v62 = vcombine.high %v1694_v36, %v1696_v21  ;;  %v3185_v61 = vcombine.low %v1787_v10, %v1789_v53  ;;  %v1698_v8 = vpop.f32.mrb[18].mxu0  ;;  %v1791_v37 = vpop.f32.mrb[18].mxu1  ;;  %v11127_v48 = vld [vmem:[#allocation8 + $0x2a8] ss:$48 sps:$4 sm:$0xff]  }
 0x21a   :  { %v3186_v31 = vcombine.high %v1787_v10, %v1789_v53  ;;  %v1700_v7 = vpop.f32.mrb[19].mxu0  ;;  %v1793_v6 = vpop.f32.mrb[19].mxu1  ;;  %v4107_v51 = vcombine.low %v4102_v23, %v4106_v9  ;;  %v4108_v28 = vcombine.high %v4102_v23, %v4106_v9  ;;  %v11123_v23 = vld [vmem:[#allocation8 + $0x24c] ss:$48 sps:$4 sm:$0xff]  }
 0x21b   :  { %v12614_v20 = vrot.slane %v3183_v30, %v12446_v1  ;;  %v12617_v60 = vrot.slane %v3184_v62, %v12446_v1  ;;  %v12620_v59 = vrot.slane %v3185_v61, %v12446_v1  ;;  %v3291_v21 = vcombine.low %v1698_v8, %v1700_v7  ;;  %6580 = vmatprep.subr.bf16.mxu1 %v11123_v23 }
 0x21c   :  { %v12623_v53 = vrot.slane %v3186_v31, %v12446_v1  ;;  %v3292_v36 = vcombine.high %v1698_v8, %v1700_v7  ;;  %v3293_v10 = vcombine.low %v1791_v37, %v1793_v6  ;;  %v3294_v58 = vcombine.high %v1791_v37, %v1793_v6 }
 0x21d   :  { %14935 = vst [vmem:[#allocation57_spill] sm:$0xff] %v12614_v20  ;;  %14936 = vst [vmem:[#allocation58_spill] sm:$0xff] %v12617_v60  ;;  %v12634_v24 = vrot.slane %v3291_v21, %v12446_v1 }
 0x21e   :  { %14937 = vst [vmem:[#allocation59_spill] sm:$0xff] %v12620_v59  ;;  %14938 = vst [vmem:[#allocation60_spill] sm:$0xff] %v12623_v53  ;;  %v12637_v31 = vrot.slane %v3292_v36, %v12446_v1  ;;  %v12640_v6 = vrot.slane %v3293_v10, %v12446_v1  ;;  %v12643_v7 = vrot.slane %v3294_v58, %v12446_v1 }
 0x21f   :  { %14939 = vst [vmem:[#allocation61_spill] sm:$0xff] %v12634_v24  ;;  %v1704_v8 = vpop.f32.mrb[20].mxu0  ;;  %v1797_v37 = vpop.f32.mrb[20].mxu1 }
 0x220   :  { %14940 = vst [vmem:[#allocation62_spill] sm:$0xff] %v12637_v31  ;;  %14941 = vst [vmem:[#allocation63_spill] sm:$0xff] %v12640_v6  ;;  %v1706_v62 = vpop.f32.mrb[21].mxu0  ;;  %v1799_v10 = vpop.f32.mrb[21].mxu1 }
 0x221   :  { %14942 = vst [vmem:[#allocation64_spill] sm:$0xff] %v12643_v7  ;;  %v3399_v30 = vcombine.low %v1704_v8, %v1706_v62  ;;  %v3400_v57 = vcombine.high %v1704_v8, %v1706_v62  ;;  %v3401_v58 = vcombine.low %v1797_v37, %v1799_v10  ;;  %v3402_v42 = vcombine.high %v1797_v37, %v1799_v10  ;;  %v1708_v41 = vpop.f32.mrb[22].mxu0  ;;  %v1801_v40 = vpop.f32.mrb[22].mxu1  ;;  %v11121_v10 = vld [vmem:[#allocation8 + $0x248] ss:$48 sps:$4 sm:$0xff]  }
 0x222   :  { %v1710_v39 = vpop.f32.mrb[23].mxu0  ;;  %v1803_v29 = vpop.f32.mrb[23].mxu1  ;;  %6581 = vmatpush1.bf16.msra.mxu1 %v11121_v10 }
 0x223   :  { %v12654_v61 = vrot.slane %v3399_v30, %v12446_v1  ;;  %v12657_v21 = vrot.slane %v3400_v57, %v12446_v1  ;;  %v12660_v36 = vrot.slane %v3401_v58, %v12446_v1  ;;  %v12663_v27 = vrot.slane %v3402_v42, %v12446_v1 }
 0x224   :  { %v3507_v62 = vcombine.low %v1708_v41, %v1710_v39  ;;  %v3508_v8 = vcombine.low %v1801_v40, %v1803_v29  ;;  %v12680_v29 = vrot.slane %v4107_v51, %v12446_v1  ;;  %v12683_v39 = vrot.slane %v4108_v28, %v12446_v1  ;;  %v11118_v40 = vld [vmem:[#allocation8 + $0x240] ss:$48 sps:$4 sm:$0xff]   ;;  %v11120_v41 = vld [vmem:[#allocation8 + $0x244] ss:$48 sps:$4 sm:$0xff]  }
 0x225   :  { %14943 = vst [vmem:[#allocation65_spill] sm:$0xff] %v12654_v61  ;;  %14944 = vst [vmem:[#allocation66_spill] sm:$0xff] %v12657_v21  ;;  %6517 = vmatprep.subr.bf16.mxu0 %v11120_v41  ;;  %v12692_v57 = vsub.s32 2, %v12225_v26 }
 0x226   :  { %14945 = vst [vmem:[#allocation67_spill] sm:$0xff] %v12660_v36  ;;  %14946 = vst [vmem:[#allocation68_spill] sm:$0xff] %v12663_v27  ;;  %v12674_v30 = vrot.slane %v3507_v62, %v12446_v1  ;;  %v12677_v42 = vrot.slane %v3508_v8, %v12446_v1  ;;  %v12689_v7 = vcombine.high %v12680_v29, %v12680_v29  ;;  %6518 = vmatpush1.bf16.msra.mxu0 %v11118_v40 }
 0x227   :  { %v1840_v58 = vpop.f32.mrb[24].mxu0  ;;  %v1933_v9 = vpop.f32.mrb[24].mxu1  ;;  %14949 = vst [vmem:[#allocation71_spill] sm:$0xff] %v12692_v57  ;;  %v12696_v41 = vcombine.high %v12683_v39, %v12683_v39 }
 0x228   :  { %14947 = vst [vmem:[#allocation69_spill] sm:$0xff] %v12674_v30  ;;  %14948 = vst [vmem:[#allocation70_spill] sm:$0xff] %v12677_v42  ;;  %v1842_v62 = vpop.f32.mrb[25].mxu0  ;;  %v1935_v37 = vpop.f32.mrb[25].mxu1 }
 0x229   :  { %v2358_v51 = vcombine.low %v1840_v58, %v1842_v62  ;;  %v2359_v8 = vcombine.high %v1840_v58, %v1842_v62  ;;  %v2360_v25 = vcombine.low %v1933_v9, %v1935_v37  ;;  %v2361_v28 = vcombine.high %v1933_v9, %v1935_v37  ;;  %v1844_v27 = vpop.f32.mrb[26].mxu0  ;;  %v1937_v21 = vpop.f32.mrb[26].mxu1 }
 0x22a   :  { %v1846_v36 = vpop.f32.mrb[27].mxu0  ;;  %v1939_v61 = vpop.f32.mrb[27].mxu1 }
 0x22b   :  { %v2368_v37 = vrot.slane %v2358_v51, %v12446_v1  ;;  %v2375_v23 = vrot.slane %v2359_v8, %v12446_v1  ;;  %v2382_v9 = vrot.slane %v2360_v25, %v12446_v1  ;;  %v2389_v58 = vrot.slane %v2361_v28, %v12446_v1 }
 0x22c   :  { %v2465_v62 = vcombine.low %v1844_v27, %v1846_v36  ;;  %v2466_v42 = vcombine.high %v1844_v27, %v1846_v36  ;;  %v2467_v30 = vcombine.low %v1937_v21, %v1939_v61  ;;  %v2468_v31 = vcombine.high %v1937_v21, %v1939_v61 }
 0x22d   :  { %v2390_v26 = vcombine.low %v2368_v37, %v2382_v9  ;;  %v2391_v6 = vcombine.high %v2368_v37, %v2382_v9  ;;  %v2392_v24 = vcombine.low %v2375_v23, %v2389_v58  ;;  %v2393_v53 = vcombine.high %v2375_v23, %v2389_v58 }
 0x22e   :  { %v2475_v10 = vrot.slane %v2465_v62, %v12446_v1  ;;  %v2482_v25 = vrot.slane %v2466_v42, %v12446_v1  ;;  %v2489_v51 = vrot.slane %v2467_v30, %v12446_v1  ;;  %v2496_v27 = vrot.slane %v2468_v31, %v12446_v1 }
 0x22f   :  { %v12712_v36 = vrot.slane %v2390_v26, 9  ;;  %v12714_v61 = vrot.slane %v2391_v6, 7  ;;  %v12716_v21 = vrot.slane %v2392_v24, 7  ;;  %v12718_v8 = vrot.slane %v2393_v53, 7  ;;  %v1850_v28 = vpop.f32.mrb[28].mxu0  ;;  %v1943_v37 = vpop.f32.mrb[28].mxu1 }
 0x230   :  { %v2497_v23 = vcombine.low %v2475_v10, %v2489_v51  ;;  %v2498_v9 = vcombine.high %v2475_v10, %v2489_v51  ;;  %v2499_v58 = vcombine.low %v2482_v25, %v2496_v27  ;;  %v2500_v62 = vcombine.high %v2482_v25, %v2496_v27  ;;  %v1852_v60 = vpop.f32.mrb[29].mxu0  ;;  %v1945_v42 = vpop.f32.mrb[29].mxu1  ;;  %v11124_v26 = vld [vmem:[#allocation8 + $0x2a0] ss:$48 sps:$4 sm:$0xff]  }
 0x231   :  { %v2573_v6 = vcombine.low %v1850_v28, %v1852_v60  ;;  %v1854_v30 = vpop.f32.mrb[30].mxu0  ;;  %v1947_v10 = vpop.f32.mrb[30].mxu1  ;;  %v2574_v49 = vcombine.high %v1850_v28, %v1852_v60  ;;  %v2575_v47 = vcombine.low %v1943_v37, %v1945_v42  ;;  %v2576_v53 = vcombine.high %v1943_v37, %v1945_v42 }
 0x232   :  { %v12730_v51 = vrot.slane %v2497_v23, 7  ;;  %v12732_v25 = vrot.slane %v2498_v9, 7  ;;  %v12734_v27 = vrot.slane %v2499_v58, 7  ;;  %v12736_v40 = vrot.slane %v2500_v62, 7  ;;  %v1856_v59 = vpop.f32.mrb[31].mxu0  ;;  %v1949_v20 = vpop.f32.mrb[31].mxu1 }
 0x233   :  { %v2583_v24 = vrot.slane %v2573_v6, %v12446_v1  ;;  %v14954_v31 = vmov 0  ;;  %v2590_v60 = vrot.slane %v2574_v49, %v12446_v1  ;;  %v2597_v28 = vrot.slane %v2575_v47, %v12446_v1  ;;  %v11126_v6 = vld [vmem:[#allocation8 + $0x2a4] ss:$48 sps:$4 sm:$0xff]   ;;  %v11129_v9 = vld [vmem:[#allocation8 + $0x2ac] ss:$48 sps:$4 sm:$0xff]  }
 0x234   :  { %v14955_v31 = vsel %vm12742_vm8, 4294967295, %v14954_v31  ;;  %v2604_v37 = vrot.slane %v2576_v53, %v12446_v1  ;;  %v2681_v42 = vcombine.low %v1854_v30, %v1856_v59  ;;  %v2682_v11 = vcombine.high %v1854_v30, %v1856_v59  ;;  %6519 = vmatprep.subr.bf16.mxu0 %v11126_v6  ;;  %6582 = vmatprep.subr.bf16.mxu1 %v11129_v9 }
 0x235   :  { %14956 = vst [vmem:[#allocation72_spill] sm:$0xff] %v14955_v31  ;;  %v2683_v19 = vcombine.low %v1947_v10, %v1949_v20  ;;  %v2684_v54 = vcombine.high %v1947_v10, %v1949_v20  ;;  %v2605_v62 = vcombine.low %v2583_v24, %v2597_v28  ;;  %v2606_v23 = vcombine.high %v2583_v24, %v2597_v28 }
 0x236   :  { %v2607_v49 = vcombine.low %v2590_v60, %v2604_v37  ;;  %v2608_v14 = vcombine.high %v2590_v60, %v2604_v37  ;;  %v2691_v53 = vrot.slane %v2681_v42, %v12446_v1  ;;  %v2698_v5 = vrot.slane %v2682_v11, %v12446_v1  ;;  %6520 = vmatpush1.bf16.msra.mxu0 %v11124_v26 }
 0x237   :  { %v1860_v47 = vpop.f32.mrb[32].mxu0  ;;  %v1953_v22 = vpop.f32.mrb[32].mxu1  ;;  %v2705_v59 = vrot.slane %v2683_v19, %v12446_v1  ;;  %v2712_v20 = vrot.slane %v2684_v54, %v12446_v1  ;;  %v12761_v58 = vrot.slane %v2605_v62, 7  ;;  %v12763_v56 = vrot.slane %v2606_v23, 7  ;;  %6583 = vmatpush1.bf16.msra.mxu1 %v11127_v48 }
 0x238   :  { %v1862_v30 = vpop.f32.mrb[33].mxu0  ;;  %v1955_v10 = vpop.f32.mrb[33].mxu1  ;;  %v12765_v24 = vrot.slane %v2607_v49, 7  ;;  %v12767_v60 = vrot.slane %v2608_v14, 7 }
 0x239   :  { %v1864_v28 = vpop.f32.mrb[34].mxu0  ;;  %v1957_v37 = vpop.f32.mrb[34].mxu1  ;;  %v2713_v11 = vcombine.low %v2691_v53, %v2705_v59  ;;  %v2714_v42 = vcombine.high %v2691_v53, %v2705_v59  ;;  %v2715_v19 = vcombine.low %v2698_v5, %v2712_v20  ;;  %v2716_v6 = vcombine.high %v2698_v5, %v2712_v20 }
 0x23a   :  { %v1866_v54 = vpop.f32.mrb[35].mxu0  ;;  %v1959_v4 = vpop.f32.mrb[35].mxu1  ;;  %v2789_v53 = vcombine.low %v1860_v47, %v1862_v30  ;;  %v2790_v5 = vcombine.high %v1860_v47, %v1862_v30  ;;  %v2791_v59 = vcombine.low %v1953_v22, %v1955_v10  ;;  %v2792_v20 = vcombine.high %v1953_v22, %v1955_v10 }
 0x23b   :  { %v12773_v14 = vrot.slane %v2713_v11, 7  ;;  %v12775_v55 = vrot.slane %v2714_v42, 7  ;;  %v12777_v26 = vrot.slane %v2715_v19, 7  ;;  %v12779_v48 = vrot.slane %v2716_v6, 7 }
 0x23c   :  { %v2799_v11 = vrot.slane %v2789_v53, %v12446_v1  ;;  %v2806_v42 = vrot.slane %v2790_v5, %v12446_v1  ;;  %v2813_v19 = vrot.slane %v2791_v59, %v12446_v1  ;;  %v2820_v6 = vrot.slane %v2792_v20, %v12446_v1 }
 0x23d   :  { %14957 = vst [vmem:[#allocation73_spill] sm:$0xff] %v12773_v14  ;;  %14958 = vst [vmem:[#allocation74_spill] sm:$0xff] %v12775_v55  ;;  %v2896_v30 = vcombine.low %v1864_v28, %v1866_v54  ;;  %v2897_v22 = vcombine.high %v1864_v28, %v1866_v54  ;;  %v2898_v10 = vcombine.low %v1957_v37, %v1959_v4 }
 0x23e   :  { %14959 = vst [vmem:[#allocation75_spill] sm:$0xff] %v12777_v26  ;;  %14960 = vst [vmem:[#allocation76_spill] sm:$0xff] %v12779_v48  ;;  %v2899_v9 = vcombine.high %v1957_v37, %v1959_v4  ;;  %v2821_v45 = vcombine.low %v2799_v11, %v2813_v19  ;;  %v2822_v23 = vcombine.high %v2799_v11, %v2813_v19 }
 0x23f   :  { %v1870_v46 = vpop.f32.mrb[36].mxu0  ;;  %v1963_v47 = vpop.f32.mrb[36].mxu1  ;;  %v2823_v43 = vcombine.low %v2806_v42, %v2820_v6  ;;  %v2824_v49 = vcombine.high %v2806_v42, %v2820_v6  ;;  %v2906_v5 = vrot.slane %v2896_v30, %v12446_v1  ;;  %v2913_v59 = vrot.slane %v2897_v22, %v12446_v1 }
 0x240   :  { %v1872_v44 = vpop.f32.mrb[37].mxu0  ;;  %v1965_v62 = vpop.f32.mrb[37].mxu1  ;;  %v2920_v20 = vrot.slane %v2898_v10, %v12446_v1  ;;  %v2927_v0 = vrot.slane %v2899_v9, %v12446_v1  ;;  %v12793_v54 = vrot.slane %v2821_v45, 7  ;;  %v12795_v4 = vrot.slane %v2822_v23, 7 }
 0x241   :  { %v1874_v3 = vpop.f32.mrb[38].mxu0  ;;  %v1967_v53 = vpop.f32.mrb[38].mxu1  ;;  %v12797_v37 = vrot.slane %v2823_v43, 7  ;;  %v12799_v11 = vrot.slane %v2824_v49, 7  ;;  %v3003_v48 = vcombine.low %v1870_v46, %v1872_v44 }
 0x242   :  { %v1876_v2 = vpop.f32.mrb[39].mxu0  ;;  %v1969_v28 = vpop.f32.mrb[39].mxu1  ;;  %14961 = vst [vmem:[#allocation77_spill] sm:$0xff] %v12793_v54  ;;  %14962 = vst [vmem:[#allocation78_spill] sm:$0xff] %v12795_v4  ;;  %v2928_v42 = vcombine.low %v2906_v5, %v2920_v20  ;;  %v2929_v19 = vcombine.high %v2906_v5, %v2920_v20  ;;  %v2930_v6 = vcombine.low %v2913_v59, %v2927_v0 }
 0x243   :  { %14963 = vst [vmem:[#allocation79_spill] sm:$0xff] %v12797_v37  ;;  %14964 = vst [vmem:[#allocation80_spill] sm:$0xff] %v12799_v11  ;;  %v2931_v30 = vcombine.high %v2913_v59, %v2927_v0  ;;  %v3004_v5 = vcombine.high %v1870_v46, %v1872_v44  ;;  %v3005_v20 = vcombine.low %v1963_v47, %v1965_v62 }
 0x244   :  { %v12805_v45 = vrot.slane %v2928_v42, 7  ;;  %v12807_v23 = vrot.slane %v2929_v19, 7  ;;  %v12809_v43 = vrot.slane %v2930_v6, 7  ;;  %v3006_v0 = vcombine.high %v1963_v47, %v1965_v62 }
 0x245   :  { %v12811_v49 = vrot.slane %v2931_v30, 9  ;;  %v3111_v63 = vcombine.low %v1874_v3, %v1876_v2  ;;  %v3112_v42 = vcombine.high %v1874_v3, %v1876_v2  ;;  %v3013_v6 = vrot.slane %v3003_v48, %v12446_v1 }
 0x246   :  { %14965 = vst [vmem:[#allocation81_spill] sm:$0xff] %v12805_v45  ;;  %14966 = vst [vmem:[#allocation82_spill] sm:$0xff] %v12807_v23  ;;  %v3020_v30 = vrot.slane %v3004_v5, %v12446_v1  ;;  %v3034_v44 = vrot.slane %v3006_v0, %v12446_v1  ;;  %v3113_v10 = vcombine.low %v1967_v53, %v1969_v28 }
 0x247   :  { %14967 = vst [vmem:[#allocation83_spill] sm:$0xff] %v12809_v43  ;;  %14968 = vst [vmem:[#allocation84_spill] sm:$0xff] %v12811_v49  ;;  %v1880_v59 = vpop.f32.mrb[40].mxu0  ;;  %v12813_v22 = vpop.f32.mrb[40].mxu1  ;;  %v3027_v49 = vrot.slane %v3005_v20, %v12446_v1  ;;  %v3121_v47 = vrot.slane %v3111_v63, %v12446_v1  ;;  %v3128_v9 = vrot.slane %v3112_v42, %v12446_v1 }
 0x248   :  { %v1882_v11 = vpop.f32.mrb[41].mxu0  ;;  %v1975_v19 = vpop.f32.mrb[41].mxu1  ;;  %v3114_v2 = vcombine.high %v1967_v53, %v1969_v28  ;;  %v3037_v23 = vcombine.low %v3020_v30, %v3034_v44  ;;  %v3038_v20 = vcombine.high %v3020_v30, %v3034_v44  ;;  %v3135_v0 = vrot.slane %v3113_v10, %v12446_v1  ;;  %v11132_v30 = vld [vmem:[#allocation8 + $0x304] ss:$48 sps:$4 sm:$0xff]   ;;  %v11133_v10 = vld [vmem:[#allocation8 + $0x308] ss:$48 sps:$4 sm:$0xff]  }
 0x249   :  { %v12821_v46 = vpop.f32.mrb[42].mxu0  ;;  %v12823_v62 = vpop.f32.mrb[42].mxu1  ;;  %v3035_v48 = vcombine.low %v3013_v6, %v3027_v49  ;;  %v3036_v5 = vcombine.high %v3013_v6, %v3027_v49  ;;  %v3219_v37 = vcombine.low %v1880_v59, %v1882_v11  ;;  %v3220_v4 = vcombine.high %v1880_v59, %v1882_v11  ;;  %6521 = vmatprep.subr.bf16.mxu0 %v11132_v30 }
 0x24a   :  { %v12827_v3 = vpop.f32.mrb[43].mxu0  ;;  %v12829_v43 = vpop.f32.mrb[43].mxu1  ;;  %v3142_v45 = vrot.slane %v3114_v2, %v12446_v1  ;;  %v12837_v42 = vrot.slane %v3037_v23, 7  ;;  %v12839_v53 = vrot.slane %v3038_v20, 7  ;;  %v3143_v28 = vcombine.low %v3121_v47, %v3135_v0 }
 0x24b   :  { %v12833_v54 = vrot.slane %v3035_v48, 7  ;;  %v12835_v63 = vrot.slane %v3036_v5, 7  ;;  %v3144_v26 = vcombine.high %v3121_v47, %v3135_v0  ;;  %v3229_v5 = vrot.slane %v3219_v37, %v12446_v1 }
 0x24c   :  { %14971 = vst [vmem:[#allocation87_spill] sm:$0xff] %v12837_v42  ;;  %14972 = vst [vmem:[#allocation88_spill] sm:$0xff] %v12839_v53  ;;  %v3145_v55 = vcombine.low %v3128_v9, %v3142_v45  ;;  %v3146_v49 = vcombine.high %v3128_v9, %v3142_v45  ;;  %v12849_v23 = vrot.slane %v3143_v28, 7  ;;  %v3236_v20 = vrot.slane %v3220_v4, %v12446_v1 }
 0x24d   :  { %14969 = vst [vmem:[#allocation85_spill] sm:$0xff] %v12833_v54  ;;  %14970 = vst [vmem:[#allocation86_spill] sm:$0xff] %v12835_v63  ;;  %v12851_v2 = vrot.slane %v3144_v26, 7  ;;  %v3221_v0 = vcombine.low %v12813_v22, %v1975_v19  ;;  %v3222_v11 = vcombine.high %v12813_v22, %v1975_v19  ;;  %v3327_v42 = vcombine.low %v12821_v46, %v12827_v3 }
 0x24e   :  { %14973 = vst [vmem:[#allocation89_spill] sm:$0xff] %v12849_v23  ;;  %v12853_v48 = vrot.slane %v3145_v55, 7  ;;  %v12855_v47 = vrot.slane %v3146_v49, 7  ;;  %v11130_v55 = vld [vmem:[#allocation8 + $0x300] ss:$48 sps:$4 sm:$0xff]   ;;  %v3328_v49 = vcombine.high %v12821_v46, %v12827_v3  ;;  %v3329_v37 = vcombine.low %v12823_v62, %v12829_v43 }
 0x24f   :  { %v12845_v59 = vpop.f32.mrb[44].mxu0  ;;  %v12847_v44 = vpop.f32.mrb[44].mxu1  ;;  %14974 = vst [vmem:[#allocation90_spill] sm:$0xff] %v12851_v2  ;;  %v3243_v22 = vrot.slane %v3221_v0, %v12446_v1  ;;  %v3250_v19 = vrot.slane %v3222_v11, %v12446_v1  ;;  %v11135_v2 = vld [vmem:[#allocation8 + $0x30c] ss:$48 sps:$4 sm:$0xff]   ;;  %v3330_v6 = vcombine.high %v12823_v62, %v12829_v43  ;;  %6522 = vmatpush1.bf16.msra.mxu0 %v11130_v55 }
 0x250   :  { %14975 = vst [vmem:[#allocation91_spill] sm:$0xff] %v12853_v48  ;;  %14976 = vst [vmem:[#allocation92_spill] sm:$0xff] %v12855_v47  ;;  %v12857_v9 = vpop.f32.mrb[45].mxu0  ;;  %v12859_v45 = vpop.f32.mrb[45].mxu1  ;;  %6584 = vmatprep.subr.bf16.mxu1 %v11135_v2  ;;  %v3337_v3 = vrot.slane %v3327_v42, %v12446_v1  ;;  %v3344_v30 = vrot.slane %v3328_v49, %v12446_v1  ;;  %v3351_v63 = vrot.slane %v3329_v37, %v12446_v1 }
 0x251   :  { %v12865_v28 = vpop.f32.mrb[46].mxu0  ;;  %v12867_v26 = vpop.f32.mrb[46].mxu1  ;;  %v3435_v0 = vcombine.low %v12845_v59, %v12857_v9  ;;  %v3436_v11 = vcombine.high %v12845_v59, %v12857_v9  ;;  %v3251_v47 = vcombine.low %v3229_v5, %v3243_v22  ;;  %v3252_v48 = vcombine.high %v3229_v5, %v3243_v22  ;;  %6585 = vmatpush1.bf16.msra.mxu1 %v11133_v10 }
 0x252   :  { %v12873_v53 = vpop.f32.mrb[47].mxu0  ;;  %v12875_v4 = vpop.f32.mrb[47].mxu1  ;;  %v3253_v23 = vcombine.low %v3236_v20, %v3250_v19  ;;  %v3254_v46 = vcombine.high %v3236_v20, %v3250_v19  ;;  %v3358_v43 = vrot.slane %v3330_v6, %v12446_v1  ;;  %v3359_v2 = vcombine.low %v3337_v3, %v3351_v63 }
 0x253   :  { %v12895_v62 = vrot.slane %v3251_v47, 7  ;;  %v12897_v54 = vrot.slane %v3252_v48, 7  ;;  %v3360_v42 = vcombine.high %v3337_v3, %v3351_v63  ;;  %v3445_v48 = vrot.slane %v3435_v0, %v12446_v1 }
 0x254   :  { %v12899_v59 = vrot.slane %v3253_v23, 7  ;;  %v12901_v9 = vrot.slane %v3254_v46, 7  ;;  %v3361_v55 = vcombine.low %v3344_v30, %v3358_v43  ;;  %v3362_v49 = vcombine.high %v3344_v30, %v3358_v43 }
 0x255   :  { %14977 = vst [vmem:[#allocation93_spill] sm:$0xff] %v12895_v62  ;;  %14978 = vst [vmem:[#allocation94_spill] sm:$0xff] %v12897_v54  ;;  %v12913_v46 = vrot.slane %v3359_v2, 7  ;;  %v12915_v14 = vrot.slane %v3360_v42, 7  ;;  %v3452_v23 = vrot.slane %v3436_v11, %v12446_v1  ;;  %v3437_v10 = vcombine.low %v12847_v44, %v12859_v45  ;;  %v11136_v42 = vld [vmem:[#allocation8 + $0x360] ss:$48 sps:$4 sm:$0xff]  }
 0x256   :  { %14979 = vst [vmem:[#allocation95_spill] sm:$0xff] %v12899_v59  ;;  %14980 = vst [vmem:[#allocation96_spill] sm:$0xff] %v12901_v9  ;;  %v12917_v63 = vrot.slane %v3361_v55, 7  ;;  %v12919_v3 = vrot.slane %v3362_v49, 7  ;;  %v3438_v2 = vcombine.high %v12847_v44, %v12859_v45  ;;  %v3524_v11 = vcombine.low %v12865_v28, %v12873_v53  ;;  %v11138_v49 = vld [vmem:[#allocation8 + $0x364] ss:$48 sps:$4 sm:$0xff]  }
 0x257   :  { %v2026_v5 = vpop.f32.mrb[48].mxu0  ;;  %v12903_v20 = vpop.f32.mrb[48].mxu1  ;;  %14981 = vst [vmem:[#allocation97_spill] sm:$0xff] %v12913_v46  ;;  %14982 = vst [vmem:[#allocation98_spill] sm:$0xff] %v12915_v14  ;;  %v3459_v9 = vrot.slane %v3437_v10, %v12446_v1  ;;  %v3525_v59 = vcombine.low %v12867_v26, %v12875_v4  ;;  %v11141_v53 = vld [vmem:[#allocation8 + $0x36c] ss:$48 sps:$4 sm:$0xff]   ;;  %6523 = vmatprep.subr.bf16.mxu0 %v11138_v49 }
 0x258   :  { %v2028_v22 = vpop.f32.mrb[49].mxu0  ;;  %v2121_v37 = vpop.f32.mrb[49].mxu1  ;;  %14983 = vst [vmem:[#allocation99_spill] sm:$0xff] %v12917_v63  ;;  %14984 = vst [vmem:[#allocation100_spill] sm:$0xff] %v12919_v3  ;;  %v3466_v0 = vrot.slane %v3438_v2, %v12446_v1  ;;  %v11139_v63 = vld [vmem:[#allocation8 + $0x368] ss:$48 sps:$4 sm:$0xff]   ;;  %v3532_v28 = vrot.slane %v3524_v11, %v12446_v1  ;;  %6586 = vmatprep.subr.bf16.mxu1 %v11141_v53  ;;  %6524 = vmatpush1.bf16.msra.mxu0 %v11136_v42 }
 0x259   :  { %v12909_v47 = vpop.f32.mrb[50].mxu0  ;;  %v12911_v19 = vpop.f32.mrb[50].mxu1  ;;  %v2394_v54 = vcombine.low %v2026_v5, %v2028_v22  ;;  %v2395_v44 = vcombine.high %v2026_v5, %v2028_v22  ;;  %v2396_v45 = vcombine.low %v12903_v20, %v2121_v37  ;;  %v2397_v55 = vcombine.high %v12903_v20, %v2121_v37  ;;  %6587 = vmatpush1.bf16.msra.mxu1 %v11139_v63 }
 0x25a   :  { %v12921_v30 = vpop.f32.mrb[51].mxu0  ;;  %v12923_v43 = vpop.f32.mrb[51].mxu1  ;;  %v3467_v6 = vcombine.low %v3445_v48, %v3459_v9  ;;  %v3468_v3 = vcombine.high %v3445_v48, %v3459_v9  ;;  %v3469_v10 = vcombine.low %v3452_v23, %v3466_v0  ;;  %v3470_v14 = vcombine.high %v3452_v23, %v3466_v0 }
 0x25b   :  { %v3539_v26 = vrot.slane %v3525_v59, %v12446_v1  ;;  %v2404_v4 = vrot.slane %v2394_v54, %v12446_v1  ;;  %v2411_v5 = vrot.slane %v2395_v44, %v12446_v1  ;;  %v2418_v44 = vrot.slane %v2396_v45, %v12446_v1 }
 0x25c   :  { %v12955_v9 = vrot.slane %v3467_v6, 7  ;;  %v12957_v37 = vrot.slane %v3468_v3, 7  ;;  %v12959_v48 = vrot.slane %v3469_v10, 7  ;;  %v12961_v23 = vrot.slane %v3470_v14, 7 }
 0x25d   :  { %v3540_v54 = vcombine.low %v3532_v28, %v3539_v26  ;;  %v3541_v11 = vcombine.high %v3532_v28, %v3539_v26  ;;  %v2425_v49 = vrot.slane %v2397_v55, %v12446_v1  ;;  %v2426_v45 = vcombine.high %v2404_v4, %v2418_v44 }
 0x25e   :  { %14985 = vst [vmem:[#allocation101_spill] sm:$0xff] %v12955_v9  ;;  %14986 = vst [vmem:[#allocation102_spill] sm:$0xff] %v12957_v37  ;;  %v14993_v10 = vrot.slane %v12716_v21, 2  ;;  %v14995_v4 = vsel %vm12742_vm8, %v12712_v36, %v12714_v61  ;;  %v2502_v14 = vcombine.high %v12909_v47, %v12921_v30  ;;  %v2503_v36 = vcombine.low %v12911_v19, %v12923_v43 }
 0x25f   :  { %v12943_v2 = vpop.f32.mrb[52].mxu0  ;;  %v12945_v46 = vpop.f32.mrb[52].mxu1  ;;  %14987 = vst [vmem:[#allocation103_spill] sm:$0xff] %v12959_v48  ;;  %14988 = vst [vmem:[#allocation104_spill] sm:$0xff] %v12961_v23  ;;  %v12977_v42 = vrot.slane %v3540_v54, 7  ;;  %v12979_v28 = vrot.slane %v3541_v11, 7  ;;  %v2427_v26 = vcombine.low %v2411_v5, %v2425_v49  ;;  %v2428_v55 = vcombine.high %v2411_v5, %v2425_v49 }
 0x260   :  { %v12951_v20 = vpop.f32.mrb[53].mxu0  ;;  %v12953_v22 = vpop.f32.mrb[53].mxu1  ;;  %v3664_v62 = vsel %vm12742_vm8, %v14993_v10, %v12718_v8  ;;  %v14994_v54 = vcombine.low %v12449_v15, %v12455_v17  ;;  %v2501_v10 = vcombine.low %v12909_v47, %v12921_v30 }
 0x261   :  { %v12963_v0 = vpop.f32.mrb[54].mxu0  ;;  %v12965_v59 = vpop.f32.mrb[54].mxu1  ;;  %14990 = vst [vmem:[#allocation106_spill] sm:$0xff] %v12977_v42  ;;  %14991 = vst [vmem:[#allocation107_spill] sm:$0xff] %v12979_v28 }
 0x262   :  { %14989 = vst [vmem:[#allocation105_spill] sm:$0xff] %v12965_v59  ;;  %v12969_v6 = vpop.f32.mrb[55].mxu0  ;;  %v12971_v3 = vpop.f32.mrb[55].mxu1  ;;  %v14992_v59 = vrot.slane %v12714_v61, 2  ;;  %v3833_v5 = vadd.f32 %v14995_v4, %v14994_v54  ;;  %v2504_v61 = vcombine.high %v12911_v19, %v12923_v43  ;;  %v2518_v19 = vrot.slane %v2502_v14, %v12446_v1 }
 0x263   :  { %v2525_v43 = vrot.slane %v2503_v36, %v12446_v1 }
 0x264   :  { %v3661_v63 = vsel %vm12742_vm8, %v14992_v59, %v12716_v21  ;;  %v14996_v59 = vcombine.high %v12449_v15, %v12455_v17  ;;  %v14997_v21 = vcombine.low %v12452_v16, %v12458_v18  ;;  %v3877_v53 = vadd.f32 %v3833_v5, %v2426_v45 }
 0x265   :  { %v14998_v45 = vrot.slane %v12718_v8, 2 }
 0x266   :  { %v3834_v44 = vadd.f32 %v3661_v63, %v14996_v59  ;;  %v3835_v49 = vadd.f32 %v3664_v62, %v14997_v21  ;;  %v2511_v62 = vrot.slane %v2501_v10, %v12446_v1  ;;  %v3965_v5 = vrot.slane %v3877_v53, 4 }
 0x267   :  { %v13014_v54 = vpop.f32.mrb[56].mxu0  ;;  %v13016_v15 = vpop.f32.mrb[56].mxu1  ;;  %v3667_v47 = vsel %vm12742_vm8, %v14998_v45, %v12730_v51  ;;  %v14999_v21 = vrot.slane %v12730_v51, 2  ;;  %v15000_v10 = vrot.slane %v12732_v25, 2 }
 0x268   :  { %v3878_v17 = vadd.f32 %v3834_v44, %v2427_v26  ;;  %v3879_v63 = vadd.f32 %v3835_v49, %v2428_v55  ;;  %v13024_v30 = vpop.f32.mrb[57].mxu0  ;;  %v13026_v4 = vpop.f32.mrb[57].mxu1  ;;  %v2532_v26 = vrot.slane %v2504_v61, %v12446_v1  ;;  %v4053_v45 = vmax.f32 %v3877_v53, %v3965_v5 }
 0x269   :  { %v13031_v55 = vpop.f32.mrb[58].mxu0  ;;  %v13033_v59 = vpop.f32.mrb[58].mxu1  ;;  %v3670_v49 = vsel %vm12742_vm8, %v14999_v21, %v12732_v25  ;;  %v3673_v14 = vsel %vm12742_vm8, %v15000_v10, %v12734_v27  ;;  %v2533_v11 = vcombine.low %v2511_v62, %v2525_v43  ;;  %v2534_v28 = vcombine.high %v2511_v62, %v2525_v43 }
 0x26a   :  { %v3966_v44 = vrot.slane %v3878_v17, 4  ;;  %v3967_v8 = vrot.slane %v3879_v63, 4  ;;  %v13045_v36 = vpop.f32.mrb[59].mxu0  ;;  %v13047_v61 = vpop.f32.mrb[59].mxu1  ;;  %v2535_v42 = vcombine.low %v2518_v19, %v2532_v26  ;;  %v2536_v51 = vcombine.high %v2518_v19, %v2532_v26 }
 0x26b   :  { %v15001_v21 = vrot.slane %v12734_v27, 2  ;;  %v4129_v37 = vadd.f32 %v12680_v29, %v4053_v45  ;;  %v15002_v10 = vcombine.high %v12452_v16, %v12458_v18  ;;  %v15003_v53 = vcombine.low %v12469_v32, %v12475_v34 }
 0x26c   :  { %v4054_v23 = vmax.f32 %v3878_v17, %v3966_v44  ;;  %v4055_v48 = vmax.f32 %v3879_v63, %v3967_v8  ;;  %v15004_v17 = vcombine.high %v12469_v32, %v12475_v34  ;;  %v15005_v19 = vcombine.low %v12472_v33, %v12478_v35 }
 0x26d   :  { %v3676_v25 = vsel %vm12742_vm8, %v15001_v21, %v12736_v40  ;;  %v3836_v9 = vadd.f32 %v3667_v47, %v15002_v10  ;;  %v3837_v62 = vadd.f32 %v3670_v49, %v15003_v53  ;;  %v2609_v16 = vcombine.low %v12943_v2, %v12951_v20 }
 0x26e   :  { %v3838_v63 = vadd.f32 %v3673_v14, %v15004_v17  ;;  %v4130_v5 = vadd.f32 %v12689_v7, %v4054_v23  ;;  %v4131_v27 = vadd.f32 %v12683_v39, %v4055_v48  ;;  %v3839_v43 = vadd.f32 %v3676_v25, %v15005_v19 }
 0x26f   :  { %v4173_v18 = vmax.f32 %v4129_v37, 0.0  ;;  %v3880_v47 = vadd.f32 %v3836_v9, %v2533_v11  ;;  %v3881_v26 = vadd.f32 %v3837_v62, %v2534_v28  ;;  %v13071_v8 = vpop.f32.mrb[60].mxu0  ;;  %v13073_v49 = vpop.f32.mrb[60].mxu1  ;;  %v2610_v48 = vcombine.high %v12943_v2, %v12951_v20  ;;  %v11142_v28 = vld [vmem:[#allocation8 + $0x3c0] ss:$48 sps:$4 sm:$0xff]  }
 0x270   :  { %v3882_v44 = vadd.f32 %v3838_v63, %v2535_v42  ;;  %15006 = vst [vmem:[#allocation108_spill] sm:$0xff] %v13071_v8  ;;  %15007 = vst [vmem:[#allocation109_spill] sm:$0xff] %v13073_v49  ;;  %v4174_v32 = vmax.f32 %v4130_v5, 0.0  ;;  %v4175_v34 = vmax.f32 %v4131_v27, 0.0  ;;  %v3883_v23 = vadd.f32 %v3839_v43, %v2536_v51  ;;  %v13077_v14 = vpop.f32.mrb[61].mxu0  ;;  %v13079_v45 = vpop.f32.mrb[61].mxu1 }
 0x271   :  { %15008 = vst [vmem:[#allocation110_spill] sm:$0xff] %v13077_v14  ;;  %15009 = vst [vmem:[#allocation111_spill] sm:$0xff] %v13079_v45  ;;  %v10396_v21 = vrot.slane %v4173_v18, 9  ;;  %v3968_v25 = vrot.slane %v3880_v47, 4  ;;  %v3969_v37 = vrot.slane %v3881_v26, 4  ;;  %v13082_v53 = vrot.slane %v2609_v16, %v12446_v1  ;;  %v13084_v51 = vpop.f32.mrb[62].mxu0 }
 0x272   :  { %v3970_v9 = vrot.slane %v3882_v44, 4  ;;  %v10397_v42 = vrot.slane %v4174_v32, 9  ;;  %v10398_v11 = vrot.slane %v4175_v34, 9  ;;  %v3971_v10 = vrot.slane %v3883_v23, 4  ;;  %v11144_v62 = vld [vmem:[#allocation8 + $0x3c4] ss:$48 sps:$4 sm:$0xff]  }
 0x273   :  { %15010 = vst [vmem:[#allocation112_spill] sm:$0xff] %v13084_v51  ;;  %v4393_v17 = vmax.f32 %v4173_v18, %v10396_v21  ;;  %v4056_v2 = vmax.f32 %v3880_v47, %v3968_v25  ;;  %v4057_v20 = vmax.f32 %v3881_v26, %v3969_v37  ;;  %v11145_v5 = vld [vmem:[#allocation8 + $0x3c8] ss:$48 sps:$4 sm:$0xff]   ;;  %v11147_v27 = vld [vmem:[#allocation8 + $0x3cc] ss:$48 sps:$4 sm:$0xff]   ;;  %v13086_v19 = vpop.f32.mrb[62].mxu1  ;;  %v13091_v16 = vrot.slane %v2610_v48, %v12446_v1 }
 0x274   :  { %v4058_v63 = vmax.f32 %v3882_v44, %v3970_v9  ;;  %15011 = vst [vmem:[#allocation113_spill] sm:$0xff] %v13086_v19  ;;  %v13088_v43 = vpop.f32.mrb[63].mxu0  ;;  %v4394_v49 = vmax.f32 %v4174_v32, %v10397_v42  ;;  %v4395_v45 = vmax.f32 %v4175_v34, %v10398_v11  ;;  %v4059_v8 = vmax.f32 %v3883_v23, %v3971_v10  ;;  %v13093_v14 = vpop.f32.mrb[63].mxu1 }
 0x275   :  { %15012 = vst [vmem:[#allocation114_spill] sm:$0xff] %v13088_v43  ;;  %6525 = vmatprep.subr.bf16.mxu0 %v11144_v62  ;;  %15013 = vst [vmem:[#allocation115_spill] sm:$0xff] %v13093_v14  ;;  %v4484_v18 = vrot.slane %v4393_v17, %v12599_v50  ;;  %v4488_v47 = vrot.slane %v4393_v17, %v12692_v57  ;;  %v4132_v26 = vadd.f32 %v12696_v41, %v4056_v2 }
 0x276   :  { %v4133_v44 = vadd.f32 %v12680_v29, %v4057_v20  ;;  %6588 = vmatprep.subr.bf16.mxu1 %v11147_v27  ;;  %v4492_v21 = vrot.slane %v4394_v49, %v12599_v50  ;;  %v4496_v32 = vrot.slane %v4394_v49, %v12692_v57  ;;  %v4500_v34 = vrot.slane %v4395_v45, %v12599_v50 }
 0x277   :  { %v4504_v23 = vrot.slane %v4395_v45, %v12692_v57  ;;  %6526 = vmatpush1.bf16.msra.mxu0 %v11142_v28  ;;  %v4921_v48 = vpack.c.bf16 %v4484_v18, %v4484_v18  ;;  %v4922_v25 = vpack.c.bf16 %v4488_v47, %v4488_v47  ;;  %v4134_v37 = vadd.f32 %v12689_v7, %v4058_v63 }
 0x278   :  { %v4135_v9 = vadd.f32 %v12683_v39, %v4059_v8  ;;  %6589 = vmatpush1.bf16.msra.mxu1 %v11145_v5  ;;  %v4923_v42 = vpack.c.bf16 %v4492_v21, %v4492_v21  ;;  %v4924_v11 = vpack.c.bf16 %v4496_v32, %v4496_v32  ;;  %v4925_v10 = vpack.c.bf16 %v4500_v34, %v4500_v34 }
 0x279   :  { %v4926_v62 = vpack.c.bf16 %v4504_v23, %v4504_v23  ;;  %v5289_v17 = vunpack.c.l.b16 %v4921_v48  ;;  %v5290_v2 = vunpack.c.l.b16 %v4922_v25  ;;  %v4176_v20 = vmax.f32 %v4132_v26, 0.0 }
 0x27a   :  { %v4177_v49 = vmax.f32 %v4133_v44, 0.0  ;;  %v5291_v27 = vunpack.c.l.b16 %v4923_v42  ;;  %v5292_v19 = vunpack.c.l.b16 %v4924_v11  ;;  %v5293_v14 = vunpack.c.l.b16 %v4925_v10 }
 0x27b   :  { %v5294_v45 = vunpack.c.l.b16 %v4926_v62  ;;  %v4178_v28 = vmax.f32 %v4134_v37, 0.0  ;;  %v4179_v18 = vmax.f32 %v4135_v9, 0.0  ;;  %v10399_v47 = vrot.slane %v4176_v20, 9 }
 0x27c   :  { %v10400_v51 = vrot.slane %v4177_v49, 9  ;;  %v5377_v63 = vrot.slane %v5291_v27, 7  ;;  %v5380_v43 = vrot.slane %v5293_v14, 6  ;;  %v5395_v8 = vrot.slane %v5292_v19, 7 }
 0x27d   :  { %v5397_v5 = vrot.slane %v5294_v45, 6  ;;  %v10401_v21 = vrot.slane %v4178_v28, 9  ;;  %v10402_v32 = vrot.slane %v4179_v18, 9  ;;  %v4396_v34 = vmax.f32 %v4176_v20, %v10399_v47 }
 0x27e   :  { %v4397_v23 = vmax.f32 %v4177_v49, %v10400_v51  ;;  %v5379_v26 = vsel %vm5378_vm9, %v5377_v63, %v5289_v17  ;;  %v5396_v44 = vsel %vm5378_vm9, %v5395_v8, %v5290_v2  ;;  %v2611_v48 = vcombine.low %v12945_v46, %v12953_v22 }
 0x27f   :  { %v2612_v25 = vcombine.high %v12945_v46, %v12953_v22  ;;  %v5381_v37 = vsel %vm3649_vm3, %v5380_v43, %v5379_v26  ;;  %v5398_v14 = vsel %vm3649_vm3, %v5397_v5, %v5396_v44  ;;  %v4398_v19 = vmax.f32 %v4178_v28, %v10401_v21 }
 0x280   :  { %v4399_v9 = vmax.f32 %v4179_v18, %v10402_v32  ;;  %v4508_v51 = vrot.slane %v4396_v34, %v12599_v50  ;;  %v4512_v42 = vrot.slane %v4396_v34, %v12692_v57  ;;  %v4516_v11 = vrot.slane %v4397_v23, %v12599_v50 }
 0x281   :  { %v4520_v10 = vrot.slane %v4397_v23, %v12692_v57  ;;  %v4524_v62 = vrot.slane %v4398_v19, %v12599_v50  ;;  %v4528_v17 = vrot.slane %v4398_v19, %v12692_v57 }
 0x282   :  { %v4532_v46 = vrot.slane %v4399_v9, %v12599_v50  ;;  %v4536_v22 = vrot.slane %v4399_v9, %v12692_v57  ;;  %v4927_v43 = vpack.c.bf16 %v4508_v51, %v4508_v51  ;;  %v4928_v2 = vpack.c.bf16 %v4512_v42, %v4512_v42 }
 0x283   :  { %v4929_v20 = vpack.c.bf16 %v4516_v11, %v4516_v11  ;;  %v4930_v49 = vpack.c.bf16 %v4520_v10, %v4520_v10  ;;  %v4931_v27 = vpack.c.bf16 %v4524_v62, %v4524_v62  ;;  %v4932_v45 = vpack.c.bf16 %v4528_v17, %v4528_v17 }
 0x284   :  { %v4933_v28 = vpack.c.bf16 %v4532_v46, %v4532_v46  ;;  %v4934_v18 = vpack.c.bf16 %v4536_v22, %v4536_v22  ;;  %v5295_v47 = vunpack.c.l.b16 %v4927_v43  ;;  %v5296_v63 = vunpack.c.l.b16 %v4928_v2 }
 0x285   :  { %v5297_v8 = vunpack.c.l.b16 %v4929_v20  ;;  %v5298_v5 = vunpack.c.l.b16 %v4930_v49  ;;  %v5299_v21 = vunpack.c.l.b16 %v4931_v27  ;;  %v5300_v32 = vunpack.c.l.b16 %v4932_v45 }
 0x286   :  { %v13121_v34 = vunpack.c.l.b16 %v4933_v28  ;;  %v13123_v23 = vunpack.c.l.b16 %v4934_v18  ;;  %v5382_v26 = vrot.slane %v5295_v47, 5  ;;  %v5399_v19 = vrot.slane %v5296_v63, 5  ;;  %v11151_v18 = vld [vmem:[#allocation8 + $0x428] ss:$48 sps:$4 sm:$0xff]   ;;  %v11153_v47 = vld [vmem:[#allocation8 + $0x42c] ss:$48 sps:$4 sm:$0xff]  }
 0x287   :  { %v5385_v44 = vrot.slane %v5297_v8, 4  ;;  %v5401_v9 = vrot.slane %v5298_v5, 4  ;;  %v5387_v51 = vrot.slane %v5299_v21, 3  ;;  %v5403_v11 = vrot.slane %v5300_v32, 3  ;;  %v13151_v63 = vpop.f32.mrb[64].mxu0  ;;  %6590 = vmatprep.subr.bf16.mxu1 %v11153_v47 }
 0x288   :  { %15014 = vst [vmem:[#allocation116_spill] sm:$0xff] %v13121_v34  ;;  %15015 = vst [vmem:[#allocation117_spill] sm:$0xff] %v13123_v23  ;;  %v5384_v62 = vsel %vm5383_vm10, %v5382_v26, %v5381_v37  ;;  %v5400_v17 = vsel %vm5383_vm10, %v5399_v19, %v5398_v14  ;;  %v2633_v46 = vrot.slane %v2611_v48, %v12446_v1  ;;  %v15016_v20 = vrot.slane %v12736_v40, 2  ;;  %v11148_v14 = vld [vmem:[#allocation8 + $0x420] ss:$48 sps:$4 sm:$0xff]  }
 0x289   :  { %v2640_v22 = vrot.slane %v2612_v25, %v12446_v1  ;;  %v5386_v43 = vsel %vm3651_vm4, %v5385_v44, %v5384_v62  ;;  %v5402_v2 = vsel %vm3651_vm4, %v5401_v9, %v5400_v17  ;;  %v15017_v27 = vrot.slane %v12761_v58, 2  ;;  %v11150_v48 = vld [vmem:[#allocation8 + $0x424] ss:$48 sps:$4 sm:$0xff]   ;;  %v13167_v44 = vpop.f32.mrb[65].mxu0  ;;  %6591 = vmatpush1.bf16.msra.mxu1 %v11151_v18 }
 0x28a   :  { %v3679_v49 = vsel %vm12742_vm8, %v15016_v20, %v12761_v58  ;;  %v13144_v25 = vsel %vm5388_vm11, %v5387_v51, %v5386_v43  ;;  %v13147_v45 = vsel %vm5388_vm11, %v5403_v11, %v5402_v2  ;;  %v2641_v28 = vcombine.low %v13082_v53, %v2633_v46  ;;  %v13153_v58 = vpop.f32.mrb[64].mxu1  ;;  %6527 = vmatprep.subr.bf16.mxu0 %v11150_v48 }
 0x28b   :  { %v3682_v37 = vsel %vm12742_vm8, %v15017_v27, %v12763_v56  ;;  %15018 = vst [vmem:[#allocation118_spill] sm:$0xff] %v13144_v25  ;;  %15019 = vst [vmem:[#allocation119_spill] sm:$0xff] %v13147_v45  ;;  %v2642_v40 = vcombine.high %v13082_v53, %v2633_v46  ;;  %v2643_v8 = vcombine.low %v13091_v16, %v2640_v22  ;;  %v15020_v21 = vrot.slane %v12763_v56, 2  ;;  %v13169_v19 = vpop.f32.mrb[65].mxu1  ;;  %v11180_v25 = vld [vmem:[#allocation8 + $0x14] ss:$48 sps:$4 sm:$0xff]  }
 0x28c   :  { %v2644_v5 = vcombine.high %v13091_v16, %v2640_v22  ;;  %v15021_v26 = vrot.slane %v12765_v24, 2  ;;  %v15022_v16 = vcombine.high %v12472_v33, %v12478_v35  ;;  %v15023_v56 = vcombine.low %v12489_v38, %v12495_v13  ;;  %v15026_v35 = vld [vmem:[#allocation105_spill] sm:$0xff]  ;;  %6528 = vmatpush1.bf16.msra.mxu0 %v11148_v14 }
 0x28d   :  { %v3685_v32 = vsel %vm12742_vm8, %v15020_v21, %v12765_v24  ;;  %v15024_v11 = vcombine.high %v12489_v38, %v12495_v13  ;;  %v15025_v62 = vcombine.low %v12492_v12, %v12498_v52  ;;  %v2717_v46 = vcombine.low %v12963_v0, %v12969_v6 }
 0x28e   :  { %v3688_v53 = vsel %vm12742_vm8, %v15021_v26, %v12767_v60  ;;  %v3840_v9 = vadd.f32 %v3679_v49, %v15022_v16  ;;  %v3841_v51 = vadd.f32 %v3682_v37, %v15023_v56  ;;  %v2718_v33 = vcombine.high %v12963_v0, %v12969_v6  ;;  %v15027_v26 = vld [vmem:[#allocation73_spill] sm:$0xff] }
 0x28f   :  { %v3842_v24 = vadd.f32 %v3685_v32, %v15024_v11  ;;  %v3843_v17 = vadd.f32 %v3688_v53, %v15025_v62  ;;  %v2719_v22 = vcombine.low %v15026_v35, %v12971_v3  ;;  %v2720_v43 = vcombine.high %v15026_v35, %v12971_v3  ;;  %v15031_v11 = vld [vmem:[#allocation75_spill] sm:$0xff] }
 0x290   :  { %v3884_v38 = vadd.f32 %v3840_v9, %v2641_v28  ;;  %v3885_v13 = vadd.f32 %v3841_v51, %v2642_v40  ;;  %v2727_v49 = vrot.slane %v2717_v46, %v12446_v1  ;;  %v2734_v27 = vrot.slane %v2718_v33, %v12446_v1  ;;  %v15029_v9 = vld [vmem:[#allocation74_spill] sm:$0xff] }
 0x291   :  { %v3886_v2 = vadd.f32 %v3842_v24, %v2643_v8  ;;  %v3887_v20 = vadd.f32 %v3843_v17, %v2644_v5  ;;  %v2741_v37 = vrot.slane %v2719_v22, %v12446_v1  ;;  %v2748_v0 = vrot.slane %v2720_v43, %v12446_v1  ;;  %v15033_v17 = vld [vmem:[#allocation76_spill] sm:$0xff] }
 0x292   :  { %v3972_v6 = vrot.slane %v3884_v38, 4  ;;  %v3973_v48 = vrot.slane %v3885_v13, 4  ;;  %v15028_v53 = vrot.slane %v12767_v60, 2  ;;  %v15030_v56 = vrot.slane %v15027_v26, 2 }
 0x293   :  { %v3974_v47 = vrot.slane %v3886_v2, 4  ;;  %v3975_v21 = vrot.slane %v3887_v20, 4  ;;  %v2749_v32 = vcombine.low %v2727_v49, %v2741_v37  ;;  %v2750_v3 = vcombine.high %v2727_v49, %v2741_v37 }
 0x294   :  { %v2751_v14 = vcombine.low %v2734_v27, %v2748_v0  ;;  %v2752_v28 = vcombine.high %v2734_v27, %v2748_v0  ;;  %v4060_v40 = vmax.f32 %v3884_v38, %v3972_v6  ;;  %v4061_v8 = vmax.f32 %v3885_v13, %v3973_v48  ;;  %v15040_v6 = vld [vmem:[#allocation37_spill] sm:$0xff]  ;;  %v15041_v48 = vld [vmem:[#allocation39_spill] sm:$0xff] }
 0x295   :  { %v4062_v5 = vmax.f32 %v3886_v2, %v3974_v47  ;;  %v4063_v18 = vmax.f32 %v3887_v20, %v3975_v21  ;;  %v3691_v16 = vsel %vm12742_vm8, %v15028_v53, %v15027_v26  ;;  %v3694_v51 = vsel %vm12742_vm8, %v15030_v56, %v15029_v9  ;;  %v15036_v2 = vld [vmem:[#allocation36_spill] sm:$0xff]  ;;  %v15037_v20 = vld [vmem:[#allocation38_spill] sm:$0xff] }
 0x296   :  { %v15032_v24 = vrot.slane %v15029_v9, 2  ;;  %v15034_v46 = vrot.slane %v15031_v11, 2  ;;  %v4136_v33 = vadd.f32 %v12696_v41, %v4060_v40  ;;  %v4137_v35 = vadd.f32 %v12680_v29, %v4061_v8 }
 0x297   :  { %v4138_v22 = vadd.f32 %v12689_v7, %v4062_v5  ;;  %v4139_v43 = vadd.f32 %v12683_v39, %v4063_v18  ;;  %v15035_v38 = vcombine.high %v12492_v12, %v12498_v52  ;;  %v15038_v49 = vcombine.low %v15036_v2, %v15037_v20 }
 0x298   :  { %v3697_v62 = vsel %vm12742_vm8, %v15032_v24, %v15031_v11  ;;  %v3700_v60 = vsel %vm12742_vm8, %v15034_v46, %v15033_v17  ;;  %v15039_v37 = vcombine.high %v15036_v2, %v15037_v20  ;;  %v15042_v47 = vcombine.low %v15040_v6, %v15041_v48 }
 0x299   :  { %v3844_v13 = vadd.f32 %v3691_v16, %v15035_v38  ;;  %v3845_v27 = vadd.f32 %v3694_v51, %v15038_v49  ;;  %v4180_v40 = vmax.f32 %v4136_v33, 0.0  ;;  %v4181_v8 = vmax.f32 %v4137_v35, 0.0  ;;  %v11154_v33 = vld [vmem:[#allocation8 + $0x480] ss:$48 sps:$4 sm:$0xff]   ;;  %v11156_v35 = vld [vmem:[#allocation8 + $0x484] ss:$48 sps:$4 sm:$0xff]  }
 0x29a   :  { %v3846_v0 = vadd.f32 %v3697_v62, %v15039_v37  ;;  %v3847_v21 = vadd.f32 %v3700_v60, %v15042_v47  ;;  %v4182_v5 = vmax.f32 %v4138_v22, 0.0  ;;  %v4183_v18 = vmax.f32 %v4139_v43, 0.0  ;;  %6529 = vmatprep.subr.bf16.mxu0 %v11156_v35 }
 0x29b   :  { %v3888_v26 = vadd.f32 %v3844_v13, %v2749_v32  ;;  %v3889_v53 = vadd.f32 %v3845_v27, %v2750_v3  ;;  %v10403_v16 = vrot.slane %v4180_v40, 9  ;;  %v10404_v9 = vrot.slane %v4181_v8, 9  ;;  %v11157_v3 = vld [vmem:[#allocation8 + $0x488] ss:$48 sps:$4 sm:$0xff]   ;;  %v13233_v13 = vpop.f32.mrb[66].mxu1  ;;  %6530 = vmatpush1.bf16.msra.mxu0 %v11154_v33 }
 0x29c   :  { %v3890_v12 = vadd.f32 %v3846_v0, %v2751_v14  ;;  %v3891_v52 = vadd.f32 %v3847_v21, %v2752_v28  ;;  %v10405_v56 = vrot.slane %v4182_v5, 9  ;;  %v10406_v51 = vrot.slane %v4183_v18, 9  ;;  %v11159_v14 = vld [vmem:[#allocation8 + $0x48c] ss:$48 sps:$4 sm:$0xff]   ;;  %v13231_v28 = vpop.f32.mrb[66].mxu0  ;;  %v13241_v21 = vpop.f32.mrb[67].mxu1 }
 0x29d   :  { %v3976_v11 = vrot.slane %v3888_v26, 4  ;;  %v3977_v24 = vrot.slane %v3889_v53, 4  ;;  %v4400_v38 = vmax.f32 %v4180_v40, %v10403_v16  ;;  %v4401_v2 = vmax.f32 %v4181_v8, %v10404_v9  ;;  %v13239_v47 = vpop.f32.mrb[67].mxu0  ;;  %6592 = vmatprep.subr.bf16.mxu1 %v11159_v14 }
 0x29e   :  { %v3978_v46 = vrot.slane %v3890_v12, 4  ;;  %v3979_v62 = vrot.slane %v3891_v52, 4  ;;  %v4402_v20 = vmax.f32 %v4182_v5, %v10405_v56  ;;  %v4403_v60 = vmax.f32 %v4183_v18, %v10406_v51  ;;  %6593 = vmatpush1.bf16.msra.mxu1 %v11157_v3 }
 0x29f   :  { %v4064_v22 = vmax.f32 %v3888_v26, %v3976_v11  ;;  %v4065_v43 = vmax.f32 %v3889_v53, %v3977_v24  ;;  %v4540_v49 = vrot.slane %v4400_v38, %v12599_v50  ;;  %v4544_v27 = vrot.slane %v4400_v38, %v12692_v57 }
 0x2a0   :  { %v4066_v32 = vmax.f32 %v3890_v12, %v3978_v46  ;;  %v4548_v37 = vrot.slane %v4401_v2, %v12599_v50  ;;  %v4552_v0 = vrot.slane %v4401_v2, %v12692_v57  ;;  %v4556_v40 = vrot.slane %v4402_v20, %v12599_v50 }
 0x2a1   :  { %v4560_v8 = vrot.slane %v4402_v20, %v12692_v57  ;;  %v4564_v5 = vrot.slane %v4403_v60, %v12599_v50  ;;  %v4568_v18 = vrot.slane %v4403_v60, %v12692_v57  ;;  %v4935_v26 = vpack.c.bf16 %v4540_v49, %v4540_v49 }
 0x2a2   :  { %v4936_v53 = vpack.c.bf16 %v4544_v27, %v4544_v27  ;;  %v4937_v12 = vpack.c.bf16 %v4548_v37, %v4548_v37  ;;  %v4938_v16 = vpack.c.bf16 %v4552_v0, %v4552_v0  ;;  %v4939_v9 = vpack.c.bf16 %v4556_v40, %v4556_v40 }
 0x2a3   :  { %v4940_v56 = vpack.c.bf16 %v4560_v8, %v4560_v8  ;;  %v4941_v51 = vpack.c.bf16 %v4564_v5, %v4564_v5  ;;  %v4942_v11 = vpack.c.bf16 %v4568_v18, %v4568_v18  ;;  %v13247_v24 = vunpack.c.l.b16 %v4935_v26 }
 0x2a4   :  { %v13249_v46 = vunpack.c.l.b16 %v4936_v53  ;;  %v5305_v38 = vunpack.c.l.b16 %v4937_v12  ;;  %v4067_v2 = vmax.f32 %v3891_v52, %v3979_v62  ;;  %v5307_v20 = vunpack.c.l.b16 %v4939_v9 }
 0x2a5   :  { %15043 = vst [vmem:[#allocation105_spill] sm:$0xff] %v13247_v24  ;;  %v5308_v35 = vunpack.c.l.b16 %v4940_v56  ;;  %v5309_v60 = vunpack.c.l.b16 %v4941_v51  ;;  %v5310_v14 = vunpack.c.l.b16 %v4942_v11  ;;  %v5306_v49 = vunpack.c.l.b16 %v4938_v16 }
 0x2a6   :  { %15044 = vst [vmem:[#allocation73_spill] sm:$0xff] %v13249_v46  ;;  %v4140_v33 = vadd.f32 %v12696_v41, %v4064_v22  ;;  %v4141_v37 = vadd.f32 %v12680_v29, %v4065_v43  ;;  %v5409_v0 = vrot.slane %v5307_v20, 7  ;;  %v4142_v5 = vadd.f32 %v12689_v7, %v4066_v32 }
 0x2a7   :  { %v5411_v40 = vrot.slane %v5309_v60, 6  ;;  %v5423_v3 = vrot.slane %v5308_v35, 7  ;;  %v5425_v8 = vrot.slane %v5310_v14, 6  ;;  %v4143_v18 = vadd.f32 %v12683_v39, %v4067_v2  ;;  %v15045_v14 = vld [vmem:[#allocation77_spill] sm:$0xff] }
 0x2a8   :  { %v4184_v52 = vmax.f32 %v4140_v33, 0.0  ;;  %v4185_v62 = vmax.f32 %v4141_v37, 0.0  ;;  %v5410_v26 = vsel %vm5378_vm9, %v5409_v0, %v5305_v38  ;;  %v2825_v12 = vcombine.low %v13014_v54, %v13024_v30  ;;  %v15047_v37 = vld [vmem:[#allocation78_spill] sm:$0xff] }
 0x2a9   :  { %v5424_v53 = vsel %vm5378_vm9, %v5423_v3, %v5306_v49  ;;  %v2826_v22 = vcombine.high %v13014_v54, %v13024_v30  ;;  %v5412_v43 = vsel %vm3649_vm3, %v5411_v40, %v5410_v26  ;;  %v4186_v9 = vmax.f32 %v4142_v5, 0.0 }
 0x2aa   :  { %v5426_v16 = vsel %vm3649_vm3, %v5425_v8, %v5424_v53  ;;  %v4187_v32 = vmax.f32 %v4143_v18, 0.0  ;;  %v10407_v51 = vrot.slane %v4184_v52, 9  ;;  %v10408_v11 = vrot.slane %v4185_v62, 9 }
 0x2ab   :  { %v13266_v38 = vrot.slane %v2825_v12, %v12446_v1  ;;  %v10409_v2 = vrot.slane %v4186_v9, 9  ;;  %v2827_v35 = vcombine.low %v13016_v15, %v13026_v4  ;;  %v2828_v54 = vcombine.high %v13016_v15, %v13026_v4 }
 0x2ac   :  { %v10410_v20 = vrot.slane %v4187_v32, 9  ;;  %v4404_v30 = vmax.f32 %v4184_v52, %v10407_v51  ;;  %v4405_v60 = vmax.f32 %v4185_v62, %v10408_v11  ;;  %v15046_v49 = vrot.slane %v15033_v17, 2 }
 0x2ad   :  { %v15048_v0 = vrot.slane %v15045_v14, 2  ;;  %v4406_v3 = vmax.f32 %v4186_v9, %v10409_v2  ;;  %v13283_v5 = vrot.slane %v2826_v22, %v12446_v1  ;;  %v13286_v15 = vrot.slane %v2827_v35, %v12446_v1 }
 0x2ae   :  { %v3703_v33 = vsel %vm12742_vm8, %v15046_v49, %v15045_v14  ;;  %v4407_v8 = vmax.f32 %v4187_v32, %v10410_v20  ;;  %v4572_v4 = vrot.slane %v4404_v30, %v12599_v50  ;;  %v4576_v17 = vrot.slane %v4404_v30, %v12692_v57 }
 0x2af   :  { %v3706_v40 = vsel %vm12742_vm8, %v15048_v0, %v15047_v37  ;;  %v4580_v18 = vrot.slane %v4405_v60, %v12599_v50  ;;  %v4584_v52 = vrot.slane %v4405_v60, %v12692_v57  ;;  %v4588_v62 = vrot.slane %v4406_v3, %v12599_v50 }
 0x2b0   :  { %v4592_v26 = vrot.slane %v4406_v3, %v12692_v57  ;;  %v4596_v53 = vrot.slane %v4407_v8, %v12599_v50  ;;  %v4600_v12 = vrot.slane %v4407_v8, %v12692_v57  ;;  %v4943_v22 = vpack.c.bf16 %v4572_v4, %v4572_v4 }
 0x2b1   :  { %v4944_v9 = vpack.c.bf16 %v4576_v17, %v4576_v17  ;;  %v4945_v32 = vpack.c.bf16 %v4580_v18, %v4580_v18  ;;  %v4946_v51 = vpack.c.bf16 %v4584_v52, %v4584_v52  ;;  %v4947_v11 = vpack.c.bf16 %v4588_v62, %v4588_v62 }
 0x2b2   :  { %v4948_v2 = vpack.c.bf16 %v4592_v26, %v4592_v26  ;;  %v4949_v20 = vpack.c.bf16 %v4596_v53, %v4596_v53  ;;  %v4950_v35 = vpack.c.bf16 %v4600_v12, %v4600_v12  ;;  %v5311_v30 = vunpack.c.l.b16 %v4943_v22 }
 0x2b3   :  { %v5312_v14 = vunpack.c.l.b16 %v4944_v9  ;;  %v5313_v49 = vunpack.c.l.b16 %v4945_v32  ;;  %v5314_v60 = vunpack.c.l.b16 %v4946_v51  ;;  %v5315_v0 = vunpack.c.l.b16 %v4947_v11 }
 0x2b4   :  { %v5316_v27 = vunpack.c.l.b16 %v4948_v2  ;;  %v13296_v56 = vunpack.c.l.b16 %v4949_v20  ;;  %v2856_v3 = vrot.slane %v2828_v54, %v12446_v1  ;;  %v5413_v42 = vrot.slane %v5311_v30, 5  ;;  %v11160_v2 = vld [vmem:[#allocation8 + $0x4e0] ss:$48 sps:$4 sm:$0xff]   ;;  %v11163_v30 = vld [vmem:[#allocation8 + $0x4e8] ss:$48 sps:$4 sm:$0xff]  }
 0x2b5   :  { %v5415_v8 = vrot.slane %v5313_v49, 4  ;;  %v5427_v4 = vrot.slane %v5312_v14, 5  ;;  %v5429_v17 = vrot.slane %v5314_v60, 4  ;;  %v13299_v18 = vunpack.c.l.b16 %v4950_v35  ;;  %v11165_v14 = vld [vmem:[#allocation8 + $0x4ec] ss:$48 sps:$4 sm:$0xff]   ;;  %v13328_v49 = vpop.f32.mrb[68].mxu0 }
 0x2b6   :  { %15049 = vst [vmem:[#allocation74_spill] sm:$0xff] %v13296_v56  ;;  %v5417_v52 = vrot.slane %v5315_v0, 3  ;;  %v5431_v26 = vrot.slane %v5316_v27, 3  ;;  %v5414_v53 = vsel %vm5383_vm10, %v5413_v42, %v5412_v43  ;;  %v2857_v22 = vcombine.low %v13266_v38, %v13286_v15  ;;  %v11162_v27 = vld [vmem:[#allocation8 + $0x4e4] ss:$48 sps:$4 sm:$0xff]   ;;  %v13330_v60 = vpop.f32.mrb[68].mxu1  ;;  %6594 = vmatprep.subr.bf16.mxu1 %v11165_v14 }
 0x2b7   :  { %15050 = vst [vmem:[#allocation75_spill] sm:$0xff] %v13299_v18  ;;  %v5428_v12 = vsel %vm5383_vm10, %v5427_v4, %v5426_v16  ;;  %v2858_v54 = vcombine.high %v13266_v38, %v13286_v15  ;;  %v5416_v9 = vsel %vm3651_vm4, %v5415_v8, %v5414_v53  ;;  %v2859_v51 = vcombine.low %v13283_v5, %v2856_v3  ;;  %v15053_v16 = vld [vmem:[#allocation79_spill] sm:$0xff]  ;;  %v15055_v15 = vld [vmem:[#allocation80_spill] sm:$0xff]  ;;  %v15059_v8 = vld [vmem:[#allocation42_spill] sm:$0xff] }
 0x2b8   :  { %v5430_v32 = vsel %vm3651_vm4, %v5429_v17, %v5428_v12  ;;  %v2860_v11 = vcombine.high %v13283_v5, %v2856_v3  ;;  %v13313_v42 = vsel %vm5388_vm11, %v5417_v52, %v5416_v9  ;;  %v15054_v20 = vrot.slane %v15047_v37, 2  ;;  %v15058_v37 = vld [vmem:[#allocation40_spill] sm:$0xff]  ;;  %v15062_v53 = vld [vmem:[#allocation41_spill] sm:$0xff]  ;;  %v15063_v12 = vld [vmem:[#allocation43_spill] sm:$0xff]  ;;  %6531 = vmatprep.subr.bf16.mxu0 %v11162_v27  ;;  %6595 = vmatpush1.bf16.msra.mxu1 %v11163_v30 }
 0x2b9   :  { %15051 = vst [vmem:[#allocation76_spill] sm:$0xff] %v13313_v42  ;;  %v13316_v43 = vsel %vm5388_vm11, %v5431_v26, %v5430_v32  ;;  %v15056_v35 = vrot.slane %v15053_v16, 2  ;;  %v15057_v0 = vcombine.high %v15040_v6, %v15041_v48  ;;  %v15060_v4 = vcombine.low %v15058_v37, %v15059_v8  ;;  %6532 = vmatpush1.bf16.msra.mxu0 %v11160_v2 }
 0x2ba   :  { %15052 = vst [vmem:[#allocation36_spill] sm:$0xff] %v13316_v43  ;;  %v3709_v38 = vsel %vm12742_vm8, %v15054_v20, %v15053_v16  ;;  %v15061_v52 = vcombine.high %v15058_v37, %v15059_v8  ;;  %v15064_v9 = vcombine.low %v15062_v53, %v15063_v12  ;;  %v13344_v16 = vpop.f32.mrb[69].mxu0  ;;  %v13346_v20 = vpop.f32.mrb[69].mxu1  ;;  %v2932_v6 = vcombine.low %v13031_v55, %v13045_v36 }
 0x2bb   :  { %v3712_v5 = vsel %vm12742_vm8, %v15056_v35, %v15055_v15  ;;  %v3848_v3 = vadd.f32 %v3703_v33, %v15057_v0  ;;  %v3849_v17 = vadd.f32 %v3706_v40, %v15060_v4  ;;  %v2933_v48 = vcombine.high %v13031_v55, %v13045_v36 }
 0x2bc   :  { %v3850_v26 = vadd.f32 %v3709_v38, %v15061_v52  ;;  %v3851_v32 = vadd.f32 %v3712_v5, %v15064_v9  ;;  %v2934_v33 = vcombine.low %v13033_v59, %v13047_v61  ;;  %v2935_v40 = vcombine.high %v13033_v59, %v13047_v61 }
 0x2bd   :  { %v3892_v38 = vadd.f32 %v3848_v3, %v2857_v22  ;;  %v3893_v35 = vadd.f32 %v3849_v17, %v2858_v54  ;;  %v2942_v0 = vrot.slane %v2932_v6, %v12446_v1  ;;  %v2949_v37 = vrot.slane %v2933_v48, %v12446_v1  ;;  %v15065_v54 = vld [vmem:[#allocation81_spill] sm:$0xff]  ;;  %v15069_v6 = vld [vmem:[#allocation83_spill] sm:$0xff] }
 0x2be   :  { %v3894_v27 = vadd.f32 %v3850_v26, %v2859_v51  ;;  %v3895_v5 = vadd.f32 %v3851_v32, %v2860_v11  ;;  %v2956_v8 = vrot.slane %v2934_v33, %v12446_v1  ;;  %v2963_v55 = vrot.slane %v2935_v40, %v12446_v1  ;;  %v15067_v26 = vld [vmem:[#allocation82_spill] sm:$0xff] }
 0x2bf   :  { %v3980_v36 = vrot.slane %v3892_v38, 4  ;;  %v3981_v4 = vrot.slane %v3893_v35, 4  ;;  %v15066_v51 = vrot.slane %v15055_v15, 2  ;;  %v15068_v30 = vrot.slane %v15065_v54, 2 }
 0x2c0   :  { %v3982_v52 = vrot.slane %v3894_v27, 4  ;;  %v3983_v9 = vrot.slane %v3895_v5, 4  ;;  %v2964_v59 = vcombine.low %v2942_v0, %v2956_v8  ;;  %v2965_v61 = vcombine.high %v2942_v0, %v2956_v8 }
 0x2c1   :  { %v2966_v22 = vcombine.low %v2949_v37, %v2963_v55  ;;  %v3715_v11 = vsel %vm12742_vm8, %v15066_v51, %v15065_v54  ;;  %v4068_v2 = vmax.f32 %v3892_v38, %v3980_v36  ;;  %v4069_v14 = vmax.f32 %v3893_v35, %v3981_v4  ;;  %v15072_v38 = vld [vmem:[#allocation110_spill] sm:$0xff]  ;;  %v15073_v35 = vld [vmem:[#allocation108_spill] sm:$0xff] }
 0x2c2   :  { %v4070_v3 = vmax.f32 %v3894_v27, %v3982_v52  ;;  %v4071_v17 = vmax.f32 %v3895_v5, %v3983_v9  ;;  %v3718_v32 = vsel %vm12742_vm8, %v15068_v30, %v15067_v26  ;;  %v15070_v48 = vrot.slane %v15067_v26, 2  ;;  %v15074_v55 = vld [vmem:[#allocation44_spill] sm:$0xff]  ;;  %v15075_v36 = vld [vmem:[#allocation46_spill] sm:$0xff] }
 0x2c3   :  { %v15071_v15 = vcombine.high %v15062_v53, %v15063_v12  ;;  %v3039_v27 = vcombine.low %v15073_v35, %v15072_v38  ;;  %v4144_v5 = vadd.f32 %v12696_v41, %v4068_v2  ;;  %v4145_v0 = vadd.f32 %v12680_v29, %v4069_v14 }
 0x2c4   :  { %v3721_v33 = vsel %vm12742_vm8, %v15070_v48, %v15069_v6  ;;  %v4146_v37 = vadd.f32 %v12689_v7, %v4070_v3  ;;  %v4147_v8 = vadd.f32 %v12683_v39, %v4071_v17  ;;  %v15076_v4 = vcombine.low %v15074_v55, %v15075_v36 }
 0x2c5   :  { %v3852_v40 = vadd.f32 %v3715_v11, %v15071_v15  ;;  %v15077_v9 = vcombine.high %v15074_v55, %v15075_v36  ;;  %v3040_v54 = vcombine.high %v15073_v35, %v15072_v38  ;;  %v4188_v51 = vmax.f32 %v4144_v5, 0.0  ;;  %v11168_v38 = vld [vmem:[#allocation8 + $0x544] ss:$48 sps:$4 sm:$0xff]   ;;  %v13398_v36 = vpop.f32.mrb[70].mxu1 }
 0x2c6   :  { %v3853_v52 = vadd.f32 %v3718_v32, %v15076_v4  ;;  %v4189_v11 = vmax.f32 %v4145_v0, 0.0  ;;  %v4190_v2 = vmax.f32 %v4146_v37, 0.0  ;;  %v4191_v14 = vmax.f32 %v4147_v8, 0.0  ;;  %v11169_v8 = vld [vmem:[#allocation8 + $0x548] ss:$48 sps:$4 sm:$0xff]   ;;  %6533 = vmatprep.subr.bf16.mxu0 %v11168_v38 }
 0x2c7   :  { %v3854_v53 = vadd.f32 %v3721_v33, %v15077_v9  ;;  %v3896_v12 = vadd.f32 %v3852_v40, %v2964_v59  ;;  %v10411_v6 = vrot.slane %v4188_v51, 9  ;;  %v13394_v59 = vrot.slane %v3039_v27, %v12446_v1  ;;  %v11166_v40 = vld [vmem:[#allocation8 + $0x540] ss:$48 sps:$4 sm:$0xff]  }
 0x2c8   :  { %v3897_v26 = vadd.f32 %v3853_v52, %v2965_v61  ;;  %v10412_v48 = vrot.slane %v4189_v11, 9  ;;  %v10413_v32 = vrot.slane %v4190_v2, 9  ;;  %v10414_v15 = vrot.slane %v4191_v14, 9  ;;  %v11171_v61 = vld [vmem:[#allocation8 + $0x54c] ss:$48 sps:$4 sm:$0xff]   ;;  %6534 = vmatpush1.bf16.msra.mxu0 %v11166_v40 }
 0x2c9   :  { %v3898_v17 = vadd.f32 %v3854_v53, %v2966_v22  ;;  %v3984_v30 = vrot.slane %v3896_v12, 4  ;;  %v4408_v35 = vmax.f32 %v4188_v51, %v10411_v6  ;;  %v13396_v22 = vpop.f32.mrb[70].mxu0  ;;  %v13401_v53 = vrot.slane %v3040_v54, %v12446_v1  ;;  %v15079_v27 = vld [vmem:[#allocation109_spill] sm:$0xff]  ;;  %v13407_v51 = vpop.f32.mrb[71].mxu1  ;;  %6596 = vmatprep.subr.bf16.mxu1 %v11171_v61 }
 0x2ca   :  { %v3985_v4 = vrot.slane %v3897_v26, 4  ;;  %v4409_v5 = vmax.f32 %v4189_v11, %v10412_v48  ;;  %v4410_v0 = vmax.f32 %v4190_v2, %v10413_v32  ;;  %v4411_v37 = vmax.f32 %v4191_v14, %v10414_v15  ;;  %v13405_v62 = vpop.f32.mrb[71].mxu0  ;;  %6597 = vmatpush1.bf16.msra.mxu1 %v11169_v8 }
 0x2cb   :  { %v3986_v55 = vrot.slane %v3898_v17, 4  ;;  %v4072_v33 = vmax.f32 %v3896_v12, %v3984_v30  ;;  %v15078_v12 = vld [vmem:[#allocation111_spill] sm:$0xff]  ;;  %v4604_v11 = vrot.slane %v4408_v35, %v12599_v50  ;;  %v4608_v2 = vrot.slane %v4408_v35, %v12692_v57 }
 0x2cc   :  { %v4073_v52 = vmax.f32 %v3897_v26, %v3985_v4  ;;  %v3041_v30 = vcombine.low %v15079_v27, %v15078_v12  ;;  %v4612_v14 = vrot.slane %v4409_v5, %v12599_v50  ;;  %v4616_v26 = vrot.slane %v4409_v5, %v12692_v57 }
 0x2cd   :  { %v4074_v9 = vmax.f32 %v3898_v17, %v3986_v55  ;;  %v4620_v54 = vrot.slane %v4410_v0, %v12599_v50  ;;  %v4624_v17 = vrot.slane %v4410_v0, %v12692_v57  ;;  %v4628_v6 = vrot.slane %v4411_v37, %v12599_v50 }
 0x2ce   :  { %v4632_v48 = vrot.slane %v4411_v37, %v12692_v57  ;;  %v4951_v32 = vpack.c.bf16 %v4604_v11, %v4604_v11  ;;  %v4952_v15 = vpack.c.bf16 %v4608_v2, %v4608_v2  ;;  %v4953_v4 = vpack.c.bf16 %v4612_v14, %v4612_v14  ;;  %v11175_v2 = vld [vmem:[#allocation8 + $0x5a8] ss:$48 sps:$4 sm:$0xff]  }
 0x2cf   :  { %v4954_v55 = vpack.c.bf16 %v4616_v26, %v4616_v26  ;;  %v4955_v38 = vpack.c.bf16 %v4620_v54, %v4620_v54  ;;  %v4956_v35 = vpack.c.bf16 %v4624_v17, %v4624_v17  ;;  %v4957_v3 = vpack.c.bf16 %v4628_v6, %v4628_v6 }
 0x2d0   :  { %v4958_v10 = vpack.c.bf16 %v4632_v48, %v4632_v48  ;;  %v13417_v5 = vunpack.c.l.b16 %v4951_v32  ;;  %v13419_v61 = vunpack.c.l.b16 %v4952_v15  ;;  %v5321_v56 = vunpack.c.l.b16 %v4953_v4 }
 0x2d1   :  { %v4148_v0 = vadd.f32 %v12696_v41, %v4072_v33  ;;  %v5323_v42 = vunpack.c.l.b16 %v4955_v38  ;;  %v5324_v24 = vunpack.c.l.b16 %v4956_v35  ;;  %v5325_v37 = vunpack.c.l.b16 %v4957_v3 }
 0x2d2   :  { %15080 = vst [vmem:[#allocation38_spill] sm:$0xff] %v13417_v5  ;;  %v5326_v40 = vunpack.c.l.b16 %v4958_v10  ;;  %v5322_v11 = vunpack.c.l.b16 %v4954_v55  ;;  %v4149_v8 = vadd.f32 %v12680_v29, %v4073_v52  ;;  %v4150_v14 = vadd.f32 %v12689_v7, %v4074_v9  ;;  %v15081_v55 = vld [vmem:[#allocation85_spill] sm:$0xff]  ;;  %v15082_v52 = vld [vmem:[#allocation84_spill] sm:$0xff] }
 0x2d3   :  { %v5437_v26 = vrot.slane %v5323_v42, 7  ;;  %v5439_v54 = vrot.slane %v5325_v37, 6  ;;  %v5451_v17 = vrot.slane %v5324_v24, 7  ;;  %v4192_v48 = vmax.f32 %v4148_v0, 0.0 }
 0x2d4   :  { %v5453_v6 = vrot.slane %v5326_v40, 6  ;;  %v4193_v32 = vmax.f32 %v4149_v8, 0.0  ;;  %v4194_v15 = vmax.f32 %v4150_v14, 0.0  ;;  %v3042_v33 = vcombine.high %v15079_v27, %v15078_v12  ;;  %v15083_v40 = vld [vmem:[#allocation86_spill] sm:$0xff]  ;;  %v15085_v14 = vld [vmem:[#allocation87_spill] sm:$0xff] }
 0x2d5   :  { %v5438_v3 = vsel %vm5378_vm9, %v5437_v26, %v5321_v56  ;;  %v5452_v10 = vsel %vm5378_vm9, %v5451_v17, %v5322_v11  ;;  %v3063_v4 = vrot.slane %v3041_v30, %v12446_v1  ;;  %v3725_v42 = vsel %vm12742_vm8, %v15082_v52, %v15081_v55 }
 0x2d6   :  { %v5440_v24 = vsel %vm3649_vm3, %v5439_v54, %v5438_v3  ;;  %v5454_v9 = vsel %vm3649_vm3, %v5453_v6, %v5452_v10  ;;  %v10415_v38 = vrot.slane %v4192_v48, 9  ;;  %v10416_v35 = vrot.slane %v4193_v32, 9 }
 0x2d7   :  { %v10417_v0 = vrot.slane %v4194_v15, 9  ;;  %v3070_v12 = vrot.slane %v3042_v33, %v12446_v1  ;;  %v3071_v56 = vcombine.low %v13394_v59, %v3063_v4  ;;  %v3072_v27 = vcombine.high %v13394_v59, %v3063_v4  ;;  %v15087_v59 = vld [vmem:[#allocation88_spill] sm:$0xff] }
 0x2d8   :  { %v4412_v37 = vmax.f32 %v4192_v48, %v10415_v38  ;;  %v4413_v30 = vmax.f32 %v4193_v32, %v10416_v35  ;;  %v15084_v11 = vrot.slane %v15081_v55, 2  ;;  %v15086_v26 = vrot.slane %v15083_v40, 2  ;;  %v15089_v38 = vld [vmem:[#allocation45_spill] sm:$0xff] }
 0x2d9   :  { %v4414_v17 = vmax.f32 %v4194_v15, %v10417_v0  ;;  %v3073_v6 = vcombine.low %v13401_v53, %v3070_v12  ;;  %v3074_v33 = vcombine.high %v13401_v53, %v3070_v12  ;;  %v15088_v48 = vrot.slane %v15085_v14, 2  ;;  %v15090_v53 = vld [vmem:[#allocation47_spill] sm:$0xff]  ;;  %v15092_v12 = vld [vmem:[#allocation48_spill] sm:$0xff] }
 0x2da   :  { %v3728_v8 = vsel %vm12742_vm8, %v15084_v11, %v15083_v40  ;;  %v3731_v54 = vsel %vm12742_vm8, %v15086_v26, %v15085_v14  ;;  %v4636_v3 = vrot.slane %v4412_v37, %v12599_v50  ;;  %v4640_v10 = vrot.slane %v4412_v37, %v12692_v57  ;;  %v15093_v40 = vld [vmem:[#allocation50_spill] sm:$0xff]  ;;  %v11172_v26 = vld [vmem:[#allocation8 + $0x5a0] ss:$48 sps:$4 sm:$0xff]  }
 0x2db   :  { %v3734_v32 = vsel %vm12742_vm8, %v15088_v48, %v15087_v59  ;;  %v4644_v4 = vrot.slane %v4413_v30, %v12599_v50  ;;  %v4648_v55 = vrot.slane %v4413_v30, %v12692_v57  ;;  %v4652_v15 = vrot.slane %v4414_v17, %v12599_v50  ;;  %v11174_v48 = vld [vmem:[#allocation8 + $0x5a4] ss:$48 sps:$4 sm:$0xff]   ;;  %v11177_v30 = vld [vmem:[#allocation8 + $0x5ac] ss:$48 sps:$4 sm:$0xff]  }
 0x2dc   :  { %v4656_v52 = vrot.slane %v4414_v17, %v12692_v57  ;;  %v15091_v35 = vcombine.high %v15089_v38, %v15090_v53  ;;  %v15094_v11 = vcombine.low %v15092_v12, %v15093_v40  ;;  %v4959_v37 = vpack.c.bf16 %v4636_v3, %v4636_v3  ;;  %v15097_v53 = vld [vmem:[#allocation51_spill] sm:$0xff]  ;;  %6535 = vmatprep.subr.bf16.mxu0 %v11174_v48 }
 0x2dd   :  { %v4960_v5 = vpack.c.bf16 %v4640_v10, %v4640_v10  ;;  %v4961_v46 = vpack.c.bf16 %v4644_v4, %v4644_v4  ;;  %v4962_v34 = vpack.c.bf16 %v4648_v55, %v4648_v55  ;;  %v4963_v18 = vpack.c.bf16 %v4652_v15, %v4652_v15  ;;  %6598 = vmatprep.subr.bf16.mxu1 %v11177_v30 }
 0x2de   :  { %v3855_v0 = vadd.f32 %v3725_v42, %v15091_v35  ;;  %v3856_v14 = vadd.f32 %v3728_v8, %v15094_v11  ;;  %v4964_v43 = vpack.c.bf16 %v4656_v52, %v4656_v52  ;;  %v15095_v17 = vcombine.high %v15092_v12, %v15093_v40  ;;  %v15096_v42 = vld [vmem:[#allocation49_spill] sm:$0xff]  ;;  %6536 = vmatpush1.bf16.msra.mxu0 %v11172_v26 }
 0x2df   :  { %v15098_v35 = vcombine.low %v15096_v42, %v15097_v53  ;;  %v11183_v8 = vld [vmem:[#allocation8 + $0x1c] ss:$48 sps:$4 sm:$0xff]   ;;  %v5327_v11 = vunpack.c.l.b16 %v4959_v37  ;;  %v5328_v45 = vunpack.c.l.b16 %v4960_v5  ;;  %v5329_v3 = vunpack.c.l.b16 %v4961_v46  ;;  %6599 = vmatpush1.bf16.msra.mxu1 %v11175_v2  ;;  %6631 = vmatprep.subr.bf16.mxu0 %v11180_v25 }
 0x2e0   :  { %v3857_v38 = vadd.f32 %v3731_v54, %v15095_v17  ;;  %v5330_v10 = vunpack.c.l.b16 %v4962_v34  ;;  %v5331_v4 = vunpack.c.l.b16 %v4963_v18  ;;  %v5332_v55 = vunpack.c.l.b16 %v4964_v43  ;;  %6694 = vmatprep.subr.bf16.mxu1 %v11183_v8  ;;  %v15101_v8 = vld [vmem:[#allocation115_spill] sm:$0xff] }
 0x2e1   :  { %v3858_v23 = vadd.f32 %v3734_v32, %v15098_v35  ;;  %v3899_v15 = vadd.f32 %v3855_v0, %v3071_v56  ;;  %v3900_v52 = vadd.f32 %v3856_v14, %v3072_v27  ;;  %v5441_v12 = vrot.slane %v5327_v11, 5  ;;  %v15099_v0 = vld [vmem:[#allocation114_spill] sm:$0xff]  ;;  %v15102_v11 = vld [vmem:[#allocation113_spill] sm:$0xff] }
 0x2e2   :  { %v5443_v54 = vrot.slane %v5329_v3, 4  ;;  %v5455_v40 = vrot.slane %v5328_v45, 5  ;;  %v5457_v17 = vrot.slane %v5330_v10, 4  ;;  %v5445_v32 = vrot.slane %v5331_v4, 3 }
 0x2e3   :  { %v5459_v48 = vrot.slane %v5332_v55, 3  ;;  %v3901_v35 = vadd.f32 %v3857_v38, %v3073_v6  ;;  %v3902_v37 = vadd.f32 %v3858_v23, %v3074_v33  ;;  %v5442_v46 = vsel %vm5383_vm10, %v5441_v12, %v5440_v24 }
 0x2e4   :  { %v5456_v34 = vsel %vm5383_vm10, %v5455_v40, %v5454_v9  ;;  %v3987_v5 = vrot.slane %v3899_v15, 4  ;;  %v3988_v18 = vrot.slane %v3900_v52, 4  ;;  %v5444_v43 = vsel %vm3651_vm4, %v5443_v54, %v5442_v46  ;;  %v15100_v9 = vld [vmem:[#allocation112_spill] sm:$0xff] }
 0x2e5   :  { %v5458_v2 = vsel %vm3651_vm4, %v5457_v17, %v5456_v34  ;;  %v3989_v25 = vrot.slane %v3901_v35, 4  ;;  %v3990_v56 = vrot.slane %v3902_v37, 4  ;;  %v13479_v45 = vsel %vm5388_vm11, %v5445_v32, %v5444_v43  ;;  %v15105_v34 = vld [vmem:[#allocation90_spill] sm:$0xff] }
 0x2e6   :  { %v13482_v27 = vsel %vm5388_vm11, %v5459_v48, %v5458_v2  ;;  %v4075_v6 = vmax.f32 %v3899_v15, %v3987_v5  ;;  %v4076_v23 = vmax.f32 %v3900_v52, %v3988_v18  ;;  %v3147_v14 = vcombine.low %v15100_v9, %v15099_v0 }
 0x2e7   :  { %v4077_v33 = vmax.f32 %v3901_v35, %v3989_v25  ;;  %v4078_v24 = vmax.f32 %v3902_v37, %v3990_v56  ;;  %v3148_v26 = vcombine.high %v15100_v9, %v15099_v0  ;;  %v3149_v3 = vcombine.low %v15102_v11, %v15101_v8  ;;  %v15103_v35 = vld [vmem:[#allocation89_spill] sm:$0xff]  ;;  %v15107_v9 = vld [vmem:[#allocation91_spill] sm:$0xff] }
 0x2e8   :  { %v4151_v30 = vadd.f32 %v12680_v29, %v4075_v6  ;;  %v4152_v38 = vadd.f32 %v12689_v7, %v4076_v23  ;;  %v3150_v10 = vcombine.high %v15102_v11, %v15101_v8  ;;  %v3157_v15 = vrot.slane %v3147_v14, %v12446_v1 }
 0x2e9   :  { %v4153_v4 = vadd.f32 %v12683_v39, %v4077_v33  ;;  %v4154_v55 = vadd.f32 %v12696_v41, %v4078_v24  ;;  %v13498_v52 = vrot.slane %v3148_v26, %v12446_v1  ;;  %v3171_v40 = vrot.slane %v3149_v3, %v12446_v1 }
 0x2ea   :  { %v4195_v12 = vmax.f32 %v4151_v30, 0.0  ;;  %v4196_v54 = vmax.f32 %v4152_v38, 0.0  ;;  %v3178_v17 = vrot.slane %v3150_v10, %v12446_v1  ;;  %v15104_v37 = vrot.slane %v15087_v59, 2  ;;  %v15109_v30 = vld [vmem:[#allocation92_spill] sm:$0xff] }
 0x2eb   :  { %v4197_v32 = vmax.f32 %v4153_v4, 0.0  ;;  %v4198_v48 = vmax.f32 %v4154_v55, 0.0  ;;  %v15106_v5 = vrot.slane %v15103_v35, 2  ;;  %v3179_v25 = vcombine.low %v3157_v15, %v3171_v40  ;;  %v15112_v55 = vld [vmem:[#allocation52_spill] sm:$0xff] }
 0x2ec   :  { %v3737_v46 = vsel %vm12742_vm8, %v15104_v37, %v15103_v35  ;;  %v10418_v43 = vrot.slane %v4195_v12, 9  ;;  %v10419_v2 = vrot.slane %v4196_v54, 9  ;;  %v3180_v56 = vcombine.high %v3157_v15, %v3171_v40  ;;  %v15113_v15 = vld [vmem:[#allocation54_spill] sm:$0xff] }
 0x2ed   :  { %v3740_v18 = vsel %vm12742_vm8, %v15106_v5, %v15105_v34  ;;  %v10420_v6 = vrot.slane %v4197_v32, 9  ;;  %v10421_v23 = vrot.slane %v4198_v48, 9  ;;  %v3181_v33 = vcombine.low %v13498_v52, %v3178_v17 }
 0x2ee   :  { %v3182_v24 = vcombine.high %v13498_v52, %v3178_v17  ;;  %v4415_v59 = vmax.f32 %v4195_v12, %v10418_v43  ;;  %v4416_v0 = vmax.f32 %v4196_v54, %v10419_v2  ;;  %v15108_v14 = vrot.slane %v15105_v34, 2 }
 0x2ef   :  { %v15110_v38 = vrot.slane %v15107_v9, 2  ;;  %v4417_v11 = vmax.f32 %v4197_v32, %v10420_v6  ;;  %v4418_v3 = vmax.f32 %v4198_v48, %v10421_v23  ;;  %v15111_v10 = vcombine.high %v15096_v42, %v15097_v53 }
 0x2f0   :  { %v3743_v26 = vsel %vm12742_vm8, %v15108_v14, %v15107_v9  ;;  %v15114_v52 = vcombine.low %v15112_v55, %v15113_v15  ;;  %v4660_v54 = vrot.slane %v4415_v59, %v12599_v50  ;;  %v4664_v40 = vrot.slane %v4415_v59, %v12692_v57 }
 0x2f1   :  { %v3746_v8 = vsel %vm12742_vm8, %v15110_v38, %v15109_v30  ;;  %v3859_v4 = vadd.f32 %v3737_v46, %v15111_v10  ;;  %v4668_v17 = vrot.slane %v4416_v0, %v12599_v50  ;;  %v4672_v35 = vrot.slane %v4416_v0, %v12692_v57 }
 0x2f2   :  { %v3860_v12 = vadd.f32 %v3740_v18, %v15114_v52  ;;  %v4676_v37 = vrot.slane %v4417_v11, %v12599_v50  ;;  %v4680_v32 = vrot.slane %v4417_v11, %v12692_v57  ;;  %v4684_v48 = vrot.slane %v4418_v3, %v12599_v50 }
 0x2f3   :  { %v4688_v42 = vrot.slane %v4418_v3, %v12692_v57  ;;  %v4965_v53 = vpack.c.bf16 %v4660_v54, %v4660_v54  ;;  %v4966_v46 = vpack.c.bf16 %v4664_v40, %v4664_v40  ;;  %v4967_v34 = vpack.c.bf16 %v4668_v17, %v4668_v17 }
 0x2f4   :  { %v4968_v5 = vpack.c.bf16 %v4672_v35, %v4672_v35  ;;  %v4969_v18 = vpack.c.bf16 %v4676_v37, %v4676_v37  ;;  %v4970_v43 = vpack.c.bf16 %v4680_v32, %v4680_v32  ;;  %v4971_v2 = vpack.c.bf16 %v4684_v48, %v4684_v48  ;;  %v15118_v48 = vld [vmem:[#allocation53_spill] sm:$0xff] }
 0x2f5   :  { %v4972_v6 = vpack.c.bf16 %v4688_v42, %v4688_v42  ;;  %v13539_v59 = vunpack.c.l.b16 %v4965_v53  ;;  %v13541_v0 = vunpack.c.l.b16 %v4966_v46  ;;  %v13543_v9 = vunpack.c.l.b16 %v4967_v34  ;;  %v15119_v42 = vld [vmem:[#allocation55_spill] sm:$0xff] }
 0x2f6   :  { %v13545_v14 = vunpack.c.l.b16 %v4968_v5  ;;  %v5337_v38 = vunpack.c.l.b16 %v4969_v18  ;;  %v5339_v11 = vunpack.c.l.b16 %v4971_v2  ;;  %v5338_v10 = vunpack.c.l.b16 %v4970_v43 }
 0x2f7   :  { %15115 = vst [vmem:[#allocation37_spill] sm:$0xff] %v13539_v59  ;;  %15116 = vst [vmem:[#allocation39_spill] sm:$0xff] %v13543_v9  ;;  %v5340_v3 = vunpack.c.l.b16 %v4972_v6  ;;  %v15117_v37 = vcombine.high %v15112_v55, %v15113_v15  ;;  %v15120_v53 = vcombine.low %v15118_v48, %v15119_v42  ;;  %v3903_v34 = vadd.f32 %v3859_v4, %v3179_v25 }
 0x2f8   :  { %v5465_v17 = vrot.slane %v5339_v11, 7  ;;  %v3904_v5 = vadd.f32 %v3860_v12, %v3180_v56  ;;  %v3255_v18 = vcombine.low %v13151_v63, %v13167_v44  ;;  %v3256_v43 = vcombine.high %v13151_v63, %v13167_v44 }
 0x2f9   :  { %v5479_v35 = vrot.slane %v5340_v3, 7  ;;  %v3861_v32 = vadd.f32 %v3743_v26, %v15117_v37  ;;  %v3862_v46 = vadd.f32 %v3746_v8, %v15120_v53  ;;  %v3991_v15 = vrot.slane %v3903_v34, 4  ;;  %v15121_v3 = vld [vmem:[#allocation93_spill] sm:$0xff] }
 0x2fa   :  { %v13561_v2 = vsel %vm5378_vm9, %v5465_v17, %v5337_v38  ;;  %v3992_v11 = vrot.slane %v3904_v5, 4  ;;  %v3265_v8 = vrot.slane %v3255_v18, %v12446_v1  ;;  %v3272_v25 = vrot.slane %v3256_v43, %v12446_v1  ;;  %v15127_v18 = vld [vmem:[#allocation96_spill] sm:$0xff] }
 0x2fb   :  { %v13564_v6 = vsel %vm5378_vm9, %v5479_v35, %v5338_v10  ;;  %v3905_v55 = vadd.f32 %v3861_v32, %v3181_v33  ;;  %v3906_v26 = vadd.f32 %v3862_v46, %v3182_v24  ;;  %v3257_v12 = vcombine.low %v13153_v58, %v13169_v19  ;;  %v15123_v10 = vld [vmem:[#allocation94_spill] sm:$0xff] }
 0x2fc   :  { %v3258_v63 = vcombine.high %v13153_v58, %v13169_v19  ;;  %v4079_v44 = vmax.f32 %v3903_v34, %v3991_v15  ;;  %v4080_v38 = vmax.f32 %v3904_v5, %v3992_v11  ;;  %v15122_v33 = vrot.slane %v15109_v30, 2  ;;  %v15125_v30 = vld [vmem:[#allocation95_spill] sm:$0xff] }
 0x2fd   :  { %v3993_v56 = vrot.slane %v3905_v55, 4  ;;  %v3994_v4 = vrot.slane %v3906_v26, 4  ;;  %v15124_v17 = vrot.slane %v15121_v3, 2  ;;  %v3279_v53 = vrot.slane %v3257_v12, %v12446_v1 }
 0x2fe   :  { %v3749_v24 = vsel %vm12742_vm8, %v15122_v33, %v15121_v3  ;;  %v3286_v58 = vrot.slane %v3258_v63, %v12446_v1  ;;  %v4155_v19 = vadd.f32 %v12680_v29, %v4079_v44  ;;  %v4156_v46 = vadd.f32 %v12689_v7, %v4080_v38 }
 0x2ff   :  { %v3752_v35 = vsel %vm12742_vm8, %v15124_v17, %v15123_v10  ;;  %v4081_v37 = vmax.f32 %v3905_v55, %v3993_v56  ;;  %v4082_v32 = vmax.f32 %v3906_v26, %v3994_v4  ;;  %v15126_v34 = vrot.slane %v15123_v10, 2  ;;  %v15130_v17 = vld [vmem:[#allocation57_spill] sm:$0xff] }
 0x300   :  { %v15128_v43 = vrot.slane %v15125_v30, 2  ;;  %v3287_v11 = vcombine.low %v3265_v8, %v3279_v53  ;;  %v3288_v56 = vcombine.high %v3265_v8, %v3279_v53  ;;  %v4199_v4 = vmax.f32 %v4155_v19, 0.0  ;;  %v15134_v53 = vld [vmem:[#allocation58_spill] sm:$0xff]  ;;  %v15135_v19 = vld [vmem:[#allocation60_spill] sm:$0xff] }
 0x301   :  { %v3755_v5 = vsel %vm12742_vm8, %v15126_v34, %v15125_v30  ;;  %v4157_v26 = vadd.f32 %v12683_v39, %v4081_v37  ;;  %v4158_v15 = vadd.f32 %v12696_v41, %v4082_v32  ;;  %v4200_v12 = vmax.f32 %v4156_v46, 0.0  ;;  %v15131_v30 = vld [vmem:[#allocation59_spill] sm:$0xff] }
 0x302   :  { %v3758_v55 = vsel %vm12742_vm8, %v15128_v43, %v15127_v18  ;;  %v3289_v63 = vcombine.low %v3272_v25, %v3286_v58  ;;  %v3290_v44 = vcombine.high %v3272_v25, %v3286_v58  ;;  %v15129_v33 = vcombine.high %v15118_v48, %v15119_v42 }
 0x303   :  { %v4201_v38 = vmax.f32 %v4157_v26, 0.0  ;;  %v4202_v3 = vmax.f32 %v4158_v15, 0.0  ;;  %v15132_v34 = vcombine.low %v15130_v17, %v15131_v30  ;;  %v10422_v54 = vrot.slane %v4199_v4, 9 }
 0x304   :  { %v3863_v10 = vadd.f32 %v3749_v24, %v15129_v33  ;;  %v10423_v37 = vrot.slane %v4200_v12, 9  ;;  %v15133_v32 = vcombine.high %v15130_v17, %v15131_v30  ;;  %v15136_v46 = vcombine.low %v15134_v53, %v15135_v19 }
 0x305   :  { %v3864_v43 = vadd.f32 %v3752_v35, %v15132_v34  ;;  %v10424_v58 = vrot.slane %v4201_v38, 9  ;;  %v10425_v26 = vrot.slane %v4202_v3, 9  ;;  %v4419_v48 = vmax.f32 %v4199_v4, %v10422_v54 }
 0x306   :  { %v3865_v8 = vadd.f32 %v3755_v5, %v15133_v32  ;;  %v3866_v25 = vadd.f32 %v3758_v55, %v15136_v46  ;;  %v3907_v15 = vadd.f32 %v3863_v10, %v3287_v11  ;;  %v4420_v42 = vmax.f32 %v4200_v12, %v10423_v37 }
 0x307   :  { %v3908_v52 = vadd.f32 %v3864_v43, %v3288_v56  ;;  %v4421_v40 = vmax.f32 %v4201_v38, %v10424_v58  ;;  %v4422_v35 = vmax.f32 %v4202_v3, %v10425_v26  ;;  %v4692_v9 = vrot.slane %v4419_v48, %v12599_v50 }
 0x308   :  { %v3909_v24 = vadd.f32 %v3865_v8, %v3289_v63  ;;  %v3910_v33 = vadd.f32 %v3866_v25, %v3290_v44  ;;  %v3995_v34 = vrot.slane %v3907_v15, 4  ;;  %v4696_v5 = vrot.slane %v4419_v48, %v12692_v57 }
 0x309   :  { %v3996_v23 = vrot.slane %v3908_v52, 4  ;;  %v4700_v17 = vrot.slane %v4420_v42, %v12599_v50  ;;  %v4704_v55 = vrot.slane %v4420_v42, %v12692_v57  ;;  %v4708_v30 = vrot.slane %v4421_v40, %v12599_v50 }
 0x30a   :  { %v4712_v11 = vrot.slane %v4421_v40, %v12692_v57  ;;  %v4716_v54 = vrot.slane %v4422_v35, %v12599_v50  ;;  %v4720_v56 = vrot.slane %v4422_v35, %v12692_v57  ;;  %v4973_v4 = vpack.c.bf16 %v4692_v9, %v4692_v9 }
 0x30b   :  { %v4974_v12 = vpack.c.bf16 %v4696_v5, %v4696_v5  ;;  %v4975_v63 = vpack.c.bf16 %v4700_v17, %v4700_v17  ;;  %v4976_v44 = vpack.c.bf16 %v4704_v55, %v4704_v55  ;;  %v4977_v38 = vpack.c.bf16 %v4708_v30, %v4708_v30 }
 0x30c   :  { %v4978_v3 = vpack.c.bf16 %v4712_v11, %v4712_v11  ;;  %v4979_v10 = vpack.c.bf16 %v4716_v54, %v4716_v54  ;;  %v4980_v43 = vpack.c.bf16 %v4720_v56, %v4720_v56  ;;  %v5341_v37 = vunpack.c.l.b16 %v4973_v4 }
 0x30d   :  { %v5342_v32 = vunpack.c.l.b16 %v4974_v12  ;;  %v5343_v8 = vunpack.c.l.b16 %v4975_v63  ;;  %v5344_v46 = vunpack.c.l.b16 %v4976_v44  ;;  %v5345_v25 = vunpack.c.l.b16 %v4977_v38 }
 0x30e   :  { %v5346_v58 = vunpack.c.l.b16 %v4978_v3  ;;  %v5347_v26 = vunpack.c.l.b16 %v4979_v10  ;;  %v5348_v40 = vunpack.c.l.b16 %v4980_v43  ;;  %v5467_v48 = vrot.slane %v5341_v37, 6 }
 0x30f   :  { %v5469_v42 = vrot.slane %v5343_v8, 5  ;;  %v5481_v59 = vrot.slane %v5342_v32, 6  ;;  %v5483_v35 = vrot.slane %v5344_v46, 5  ;;  %v5471_v9 = vrot.slane %v5345_v25, 4 }
 0x310   :  { %v5473_v5 = vrot.slane %v5347_v26, 3  ;;  %v5485_v17 = vrot.slane %v5346_v58, 4  ;;  %v5487_v55 = vrot.slane %v5348_v40, 3  ;;  %v5468_v30 = vsel %vm3649_vm3, %v5467_v48, %v13561_v2 }
 0x311   :  { %v5482_v11 = vsel %vm3649_vm3, %v5481_v59, %v13564_v6  ;;  %v3997_v54 = vrot.slane %v3909_v24, 4  ;;  %v3998_v56 = vrot.slane %v3910_v33, 4  ;;  %v5470_v4 = vsel %vm5383_vm10, %v5469_v42, %v5468_v30 }
 0x312   :  { %v5484_v12 = vsel %vm5383_vm10, %v5483_v35, %v5482_v11  ;;  %v4083_v63 = vmax.f32 %v3907_v15, %v3995_v34  ;;  %v4084_v44 = vmax.f32 %v3908_v52, %v3996_v23  ;;  %v5472_v38 = vsel %vm3651_vm4, %v5471_v9, %v5470_v4  ;;  %v15137_v9 = vld [vmem:[#allocation97_spill] sm:$0xff] }
 0x313   :  { %v5486_v3 = vsel %vm3651_vm4, %v5485_v17, %v5484_v12  ;;  %v4085_v10 = vmax.f32 %v3909_v24, %v3997_v54  ;;  %v4086_v43 = vmax.f32 %v3910_v33, %v3998_v56  ;;  %v13627_v37 = vsel %vm5388_vm11, %v5473_v5, %v5472_v38 }
 0x314   :  { %v13630_v2 = vsel %vm5388_vm11, %v5487_v55, %v5486_v3  ;;  %v4159_v59 = vadd.f32 %v12680_v29, %v4083_v63  ;;  %v4160_v6 = vadd.f32 %v12689_v7, %v4084_v44  ;;  %v3363_v52 = vcombine.low %v13231_v28, %v13239_v47 }
 0x315   :  { %v4161_v32 = vadd.f32 %v12683_v39, %v4085_v10  ;;  %v4162_v23 = vadd.f32 %v12696_v41, %v4086_v43  ;;  %v3364_v15 = vcombine.high %v13231_v28, %v13239_v47  ;;  %v3365_v34 = vcombine.low %v13233_v13, %v13241_v21 }
 0x316   :  { %v4203_v24 = vmax.f32 %v4159_v59, 0.0  ;;  %v4204_v33 = vmax.f32 %v4160_v6, 0.0  ;;  %v3366_v8 = vcombine.high %v13233_v13, %v13241_v21  ;;  %v3373_v58 = vrot.slane %v3363_v52, %v12446_v1  ;;  %v15139_v21 = vld [vmem:[#allocation98_spill] sm:$0xff] }
 0x317   :  { %v4205_v46 = vmax.f32 %v4161_v32, 0.0  ;;  %v4206_v25 = vmax.f32 %v4162_v23, 0.0  ;;  %v3380_v26 = vrot.slane %v3364_v15, %v12446_v1  ;;  %v3387_v42 = vrot.slane %v3365_v34, %v12446_v1 }
 0x318   :  { %v10426_v40 = vrot.slane %v4203_v24, 9  ;;  %v10427_v48 = vrot.slane %v4204_v33, 9  ;;  %v3394_v28 = vrot.slane %v3366_v8, %v12446_v1  ;;  %v15138_v5 = vrot.slane %v15127_v18, 2 }
 0x319   :  { %v10428_v47 = vrot.slane %v4205_v46, 9  ;;  %v10429_v35 = vrot.slane %v4206_v25, 9  ;;  %v15140_v17 = vrot.slane %v15137_v9, 2  ;;  %v3395_v54 = vcombine.low %v3373_v58, %v3387_v42 }
 0x31a   :  { %v3761_v13 = vsel %vm12742_vm8, %v15138_v5, %v15137_v9  ;;  %v4423_v30 = vmax.f32 %v4203_v24, %v10426_v40  ;;  %v4424_v11 = vmax.f32 %v4204_v33, %v10427_v48  ;;  %v3396_v56 = vcombine.high %v3373_v58, %v3387_v42 }
 0x31b   :  { %v3764_v55 = vsel %vm12742_vm8, %v15140_v17, %v15139_v21  ;;  %v4425_v4 = vmax.f32 %v4205_v46, %v10428_v47  ;;  %v4426_v12 = vmax.f32 %v4206_v25, %v10429_v35  ;;  %v3397_v63 = vcombine.low %v3380_v26, %v3394_v28 }
 0x31c   :  { %v3398_v44 = vcombine.high %v3380_v26, %v3394_v28  ;;  %v4724_v38 = vrot.slane %v4423_v30, %v12599_v50  ;;  %v4728_v18 = vrot.slane %v4423_v30, %v12692_v57  ;;  %v4732_v3 = vrot.slane %v4424_v11, %v12599_v50 }
 0x31d   :  { %v4736_v10 = vrot.slane %v4424_v11, %v12692_v57  ;;  %v4740_v43 = vrot.slane %v4425_v4, %v12599_v50  ;;  %v4744_v59 = vrot.slane %v4425_v4, %v12692_v57  ;;  %v4748_v6 = vrot.slane %v4426_v12, %v12599_v50  ;;  %v15141_v4 = vld [vmem:[#allocation99_spill] sm:$0xff] }
 0x31e   :  { %v4752_v32 = vrot.slane %v4426_v12, %v12692_v57  ;;  %v4981_v23 = vpack.c.bf16 %v4724_v38, %v4724_v38  ;;  %v4982_v52 = vpack.c.bf16 %v4728_v18, %v4728_v18  ;;  %v4983_v15 = vpack.c.bf16 %v4732_v3, %v4732_v3  ;;  %v15143_v18 = vld [vmem:[#allocation100_spill] sm:$0xff] }
 0x31f   :  { %v4984_v24 = vpack.c.bf16 %v4736_v10, %v4736_v10  ;;  %v4985_v33 = vpack.c.bf16 %v4740_v43, %v4740_v43  ;;  %v4986_v34 = vpack.c.bf16 %v4744_v59, %v4744_v59  ;;  %v4987_v8 = vpack.c.bf16 %v4748_v6, %v4748_v6  ;;  %v15146_v6 = vld [vmem:[#allocation61_spill] sm:$0xff] }
 0x320   :  { %v4988_v46 = vpack.c.bf16 %v4752_v32, %v4752_v32  ;;  %v5463_v25 = vrot.slane %v13545_v14, 1  ;;  %v13667_v58 = vunpack.c.l.b16 %v4981_v23  ;;  %v13669_v26 = vunpack.c.l.b16 %v4982_v52  ;;  %v15147_v32 = vld [vmem:[#allocation63_spill] sm:$0xff] }
 0x321   :  { %v13671_v40 = vunpack.c.l.b16 %v4983_v15  ;;  %v13673_v48 = vunpack.c.l.b16 %v4984_v24  ;;  %v5353_v42 = vunpack.c.l.b16 %v4985_v33  ;;  %v5355_v28 = vunpack.c.l.b16 %v4987_v8  ;;  %v15150_v24 = vld [vmem:[#allocation62_spill] sm:$0xff]  ;;  %v15151_v33 = vld [vmem:[#allocation64_spill] sm:$0xff]  ;;  %v11184_v14 = vld [vmem:[#allocation8 + $0x70] ss:$48 sps:$4 sm:$0xff]  }
 0x322   :  { %v5356_v47 = vunpack.c.l.b16 %v4988_v46  ;;  %v5354_v35 = vunpack.c.l.b16 %v4986_v34  ;;  %v5489_v17 = vrot.slane %v13669_v26, 2  ;;  %v15142_v12 = vrot.slane %v15139_v21, 2 }
 0x323   :  { %v5493_v30 = vrot.slane %v5355_v28, 7  ;;  %v15144_v3 = vrot.slane %v15141_v4, 2  ;;  %v15145_v43 = vcombine.high %v15134_v53, %v15135_v19  ;;  %v15148_v23 = vcombine.low %v15146_v6, %v15147_v32 }
 0x324   :  { %v5507_v11 = vrot.slane %v5356_v47, 7  ;;  %v3767_v38 = vsel %vm12742_vm8, %v15142_v12, %v15141_v4  ;;  %v15149_v21 = vcombine.high %v15146_v6, %v15147_v32  ;;  %v15152_v34 = vcombine.low %v15150_v24, %v15151_v33 }
 0x325   :  { %v3770_v10 = vsel %vm12742_vm8, %v15144_v3, %v15143_v18  ;;  %v3867_v59 = vadd.f32 %v3761_v13, %v15145_v43  ;;  %v3868_v52 = vadd.f32 %v3764_v55, %v15148_v23  ;;  %v13701_v46 = vsel %vm5378_vm9, %v5493_v30, %v5353_v42 }
 0x326   :  { %v3869_v15 = vadd.f32 %v3767_v38, %v15149_v21  ;;  %v3870_v8 = vadd.f32 %v3770_v10, %v15152_v34  ;;  %v13704_v28 = vsel %vm5378_vm9, %v5507_v11, %v5354_v35  ;;  %v3471_v53 = vcombine.low %v13328_v49, %v13344_v16 }
 0x327   :  { %v3472_v19 = vcombine.high %v13328_v49, %v13344_v16  ;;  %v3911_v13 = vadd.f32 %v3867_v59, %v3395_v54  ;;  %v3912_v55 = vadd.f32 %v3868_v52, %v3396_v56  ;;  %v3473_v42 = vcombine.low %v13330_v60, %v13346_v20  ;;  %v15153_v54 = vld [vmem:[#allocation101_spill] sm:$0xff] }
 0x328   :  { %v3913_v47 = vadd.f32 %v3869_v15, %v3397_v63  ;;  %v3914_v4 = vadd.f32 %v3870_v8, %v3398_v44  ;;  %v3481_v12 = vrot.slane %v3471_v53, %v12446_v1  ;;  %v3474_v35 = vcombine.high %v13330_v60, %v13346_v20  ;;  %v15155_v44 = vld [vmem:[#allocation102_spill] sm:$0xff] }
 0x329   :  { %v3488_v38 = vrot.slane %v3472_v19, %v12446_v1  ;;  %v3999_v30 = vrot.slane %v3911_v13, 4  ;;  %v4000_v11 = vrot.slane %v3912_v55, 4  ;;  %v3495_v49 = vrot.slane %v3473_v42, %v12446_v1  ;;  %v15157_v19 = vld [vmem:[#allocation103_spill] sm:$0xff] }
 0x32a   :  { %v4001_v3 = vrot.slane %v3913_v47, 4  ;;  %v4002_v10 = vrot.slane %v3914_v4, 4  ;;  %v3502_v16 = vrot.slane %v3474_v35, %v12446_v1  ;;  %v15154_v56 = vrot.slane %v15143_v18, 2  ;;  %v15162_v35 = vld [vmem:[#allocation65_spill] sm:$0xff] }
 0x32b   :  { %v15156_v43 = vrot.slane %v15153_v54, 2  ;;  %v4087_v20 = vmax.f32 %v3911_v13, %v3999_v30  ;;  %v4088_v59 = vmax.f32 %v3912_v55, %v4000_v11  ;;  %v3503_v23 = vcombine.low %v3481_v12, %v3495_v49  ;;  %v15159_v55 = vld [vmem:[#allocation104_spill] sm:$0xff]  ;;  %v15163_v30 = vld [vmem:[#allocation67_spill] sm:$0xff] }
 0x32c   :  { %v3773_v63 = vsel %vm12742_vm8, %v15154_v56, %v15153_v54  ;;  %v4089_v6 = vmax.f32 %v3913_v47, %v4001_v3  ;;  %v4090_v32 = vmax.f32 %v3914_v4, %v4002_v10  ;;  %v3504_v52 = vcombine.high %v3481_v12, %v3495_v49 }
 0x32d   :  { %v3776_v60 = vsel %vm12742_vm8, %v15156_v43, %v15155_v44  ;;  %v3505_v21 = vcombine.low %v3488_v38, %v3502_v16  ;;  %v3506_v15 = vcombine.high %v3488_v38, %v3502_v16  ;;  %v4163_v34 = vadd.f32 %v12680_v29, %v4087_v20  ;;  %v15166_v43 = vld [vmem:[#allocation66_spill] sm:$0xff]  ;;  %v15167_v20 = vld [vmem:[#allocation68_spill] sm:$0xff] }
 0x32e   :  { %v4164_v18 = vadd.f32 %v12689_v7, %v4088_v59  ;;  %v4165_v8 = vadd.f32 %v12683_v39, %v4089_v6  ;;  %v4166_v53 = vadd.f32 %v12696_v41, %v4090_v32  ;;  %v15158_v42 = vrot.slane %v15155_v44, 2 }
 0x32f   :  { %v15160_v47 = vrot.slane %v15157_v19, 2  ;;  %v15161_v12 = vcombine.high %v15150_v24, %v15151_v33  ;;  %v15164_v11 = vcombine.low %v15162_v35, %v15163_v30  ;;  %v4207_v10 = vmax.f32 %v4163_v34, 0.0 }
 0x330   :  { %v3779_v13 = vsel %vm12742_vm8, %v15158_v42, %v15157_v19  ;;  %v4208_v49 = vmax.f32 %v4164_v18, 0.0  ;;  %v4209_v16 = vmax.f32 %v4165_v8, 0.0  ;;  %v4210_v54 = vmax.f32 %v4166_v53, 0.0 }
 0x331   :  { %v3782_v4 = vsel %vm12742_vm8, %v15160_v47, %v15159_v55  ;;  %v3871_v38 = vadd.f32 %v3773_v63, %v15161_v12  ;;  %v3872_v3 = vadd.f32 %v3776_v60, %v15164_v11  ;;  %v15165_v56 = vcombine.high %v15162_v35, %v15163_v30 }
 0x332   :  { %v15168_v59 = vcombine.low %v15166_v43, %v15167_v20  ;;  %v10430_v24 = vrot.slane %v4207_v10, 9  ;;  %v10431_v33 = vrot.slane %v4208_v49, 9  ;;  %v10432_v63 = vrot.slane %v4209_v16, 9 }
 0x333   :  { %v3873_v44 = vadd.f32 %v3779_v13, %v15165_v56  ;;  %v3915_v32 = vadd.f32 %v3871_v38, %v3503_v23  ;;  %v3916_v19 = vadd.f32 %v3872_v3, %v3504_v52  ;;  %v10433_v42 = vrot.slane %v4210_v54, 9 }
 0x334   :  { %v3874_v6 = vadd.f32 %v3782_v4, %v15168_v59  ;;  %v4427_v8 = vmax.f32 %v4207_v10, %v10430_v24  ;;  %v4428_v53 = vmax.f32 %v4208_v49, %v10431_v33  ;;  %v4429_v12 = vmax.f32 %v4209_v16, %v10432_v63 }
 0x335   :  { %v3917_v47 = vadd.f32 %v3873_v44, %v3505_v21  ;;  %v4003_v34 = vrot.slane %v3915_v32, 4  ;;  %v4004_v18 = vrot.slane %v3916_v19, 4  ;;  %v4430_v11 = vmax.f32 %v4210_v54, %v10433_v42 }
 0x336   :  { %v3918_v60 = vadd.f32 %v3874_v6, %v3506_v15  ;;  %v4756_v4 = vrot.slane %v4427_v8, %v12599_v50  ;;  %v4760_v23 = vrot.slane %v4427_v8, %v12692_v57  ;;  %v4764_v52 = vrot.slane %v4428_v53, %v12599_v50 }
 0x337   :  { %v4005_v35 = vrot.slane %v3917_v47, 4  ;;  %v4091_v30 = vmax.f32 %v3915_v32, %v4003_v34  ;;  %v4092_v56 = vmax.f32 %v3916_v19, %v4004_v18  ;;  %v4768_v38 = vrot.slane %v4428_v53, %v12692_v57 }
 0x338   :  { %v4006_v13 = vrot.slane %v3918_v60, 4  ;;  %v4772_v21 = vrot.slane %v4429_v12, %v12599_v50  ;;  %v4776_v15 = vrot.slane %v4429_v12, %v12692_v57  ;;  %v4780_v3 = vrot.slane %v4430_v11, %v12599_v50 }
 0x339   :  { %v4784_v10 = vrot.slane %v4430_v11, %v12692_v57  ;;  %v4989_v49 = vpack.c.bf16 %v4756_v4, %v4756_v4  ;;  %v4990_v16 = vpack.c.bf16 %v4760_v23, %v4760_v23  ;;  %v4991_v54 = vpack.c.bf16 %v4764_v52, %v4764_v52 }
 0x33a   :  { %v4992_v44 = vpack.c.bf16 %v4768_v38, %v4768_v38  ;;  %v4993_v59 = vpack.c.bf16 %v4772_v21, %v4772_v21  ;;  %v4994_v6 = vpack.c.bf16 %v4776_v15, %v4776_v15  ;;  %v4995_v32 = vpack.c.bf16 %v4780_v3, %v4780_v3 }
 0x33b   :  { %v4996_v19 = vpack.c.bf16 %v4784_v10, %v4784_v10  ;;  %v5357_v24 = vunpack.c.l.b16 %v4989_v49  ;;  %v5358_v33 = vunpack.c.l.b16 %v4990_v16  ;;  %v5359_v63 = vunpack.c.l.b16 %v4991_v54 }
 0x33c   :  { %v5360_v42 = vunpack.c.l.b16 %v4992_v44  ;;  %v5361_v34 = vunpack.c.l.b16 %v4993_v59  ;;  %v5362_v18 = vunpack.c.l.b16 %v4994_v6  ;;  %v5363_v8 = vunpack.c.l.b16 %v4995_v32 }
 0x33d   :  { %v5364_v53 = vunpack.c.l.b16 %v4996_v19  ;;  %v5495_v12 = vrot.slane %v5357_v24, 6  ;;  %v5497_v5 = vrot.slane %v5359_v63, 5  ;;  %v5509_v9 = vrot.slane %v5358_v33, 6  ;;  %v15169_v19 = vld [vmem:[#allocation106_spill] sm:$0xff]  ;;  %v15171_v33 = vld [vmem:[#allocation107_spill] sm:$0xff] }
 0x33e   :  { %v5511_v11 = vrot.slane %v5360_v42, 5  ;;  %v5499_v4 = vrot.slane %v5361_v34, 4  ;;  %v5501_v23 = vrot.slane %v5363_v8, 3  ;;  %v5513_v52 = vrot.slane %v5362_v18, 4 }
 0x33f   :  { %v5515_v38 = vrot.slane %v5364_v53, 3  ;;  %v5496_v21 = vsel %vm3649_vm3, %v5495_v12, %v13701_v46  ;;  %v5510_v15 = vsel %vm3649_vm3, %v5509_v9, %v13704_v28  ;;  %v4093_v3 = vmax.f32 %v3917_v47, %v4005_v35  ;;  %v15174_v53 = vld [vmem:[#allocation69_spill] sm:$0xff]  ;;  %v15175_v12 = vld [vmem:[#allocation70_spill] sm:$0xff] }
 0x340   :  { %v4094_v10 = vmax.f32 %v3918_v60, %v4006_v13  ;;  %v5498_v49 = vsel %vm5383_vm10, %v5497_v5, %v5496_v21  ;;  %v5512_v16 = vsel %vm5383_vm10, %v5511_v11, %v5510_v15  ;;  %v4167_v54 = vadd.f32 %v12680_v29, %v4091_v30 }
 0x341   :  { %v4168_v44 = vadd.f32 %v12689_v7, %v4092_v56  ;;  %v5500_v59 = vsel %vm3651_vm4, %v5499_v4, %v5498_v49  ;;  %v5514_v6 = vsel %vm3651_vm4, %v5513_v52, %v5512_v16  ;;  %v4169_v32 = vadd.f32 %v12683_v39, %v4093_v3 }
 0x342   :  { %v4170_v46 = vadd.f32 %v12696_v41, %v4094_v10  ;;  %v13775_v9 = vsel %vm5388_vm11, %v5501_v23, %v5500_v59  ;;  %v13778_v28 = vsel %vm5388_vm11, %v5515_v38, %v5514_v6  ;;  %v4211_v5 = vmax.f32 %v4167_v54, 0.0 }
 0x343   :  { %v4212_v47 = vmax.f32 %v4168_v44, 0.0  ;;  %v4213_v60 = vmax.f32 %v4169_v32, 0.0  ;;  %v3542_v13 = vcombine.low %v13396_v22, %v13405_v62  ;;  %v3543_v30 = vcombine.low %v13398_v36, %v13407_v51 }
 0x344   :  { %v4214_v35 = vmax.f32 %v4170_v46, 0.0  ;;  %v10434_v56 = vrot.slane %v4211_v5, 9  ;;  %v15170_v41 = vrot.slane %v15159_v55, 2  ;;  %v15172_v63 = vrot.slane %v15169_v19, 2 }
 0x345   :  { %v10435_v39 = vrot.slane %v4212_v47, 9  ;;  %v10436_v34 = vrot.slane %v4213_v60, 9  ;;  %v3550_v62 = vrot.slane %v3542_v13, %v12446_v1  ;;  %v3557_v22 = vrot.slane %v3543_v30, %v12446_v1 }
 0x346   :  { %v3785_v24 = vsel %vm12742_vm8, %v15170_v41, %v15169_v19  ;;  %v3788_v42 = vsel %vm12742_vm8, %v15172_v63, %v15171_v33  ;;  %v10437_v18 = vrot.slane %v4214_v35, 9  ;;  %v4431_v36 = vmax.f32 %v4211_v5, %v10434_v56 }
 0x347   :  { %v4432_v51 = vmax.f32 %v4212_v47, %v10435_v39  ;;  %v15173_v55 = vcombine.high %v15166_v43, %v15167_v20  ;;  %v15176_v11 = vcombine.low %v15174_v53, %v15175_v12  ;;  %v4433_v23 = vmax.f32 %v4213_v60, %v10436_v34  ;;  %v15180_v12 = vld [vmem:[#allocation36_spill] sm:$0xff] }
 0x348   :  { %v4434_v52 = vmax.f32 %v4214_v35, %v10437_v18  ;;  %v3558_v38 = vcombine.low %v3550_v62, %v3557_v22  ;;  %v3559_v21 = vcombine.high %v3550_v62, %v3557_v22  ;;  %v4788_v15 = vrot.slane %v4431_v36, %v12599_v50 }
 0x349   :  { %v3875_v8 = vadd.f32 %v3785_v24, %v15173_v55  ;;  %v3876_v4 = vadd.f32 %v3788_v42, %v15176_v11  ;;  %v4792_v3 = vrot.slane %v4431_v36, %v12692_v57  ;;  %v4796_v10 = vrot.slane %v4432_v51, %v12599_v50  ;;  %v15177_v36 = vld [vmem:[#allocation119_spill] sm:$0xff] }
 0x34a   :  { %v4800_v49 = vrot.slane %v4432_v51, %v12692_v57  ;;  %v4804_v16 = vrot.slane %v4433_v23, %v12599_v50  ;;  %v4808_v43 = vrot.slane %v4433_v23, %v12692_v57  ;;  %v4812_v20 = vrot.slane %v4434_v52, %v12599_v50  ;;  %v15178_v51 = vld [vmem:[#allocation117_spill] sm:$0xff]  ;;  %v15181_v11 = vld [vmem:[#allocation75_spill] sm:$0xff] }
 0x34b   :  { %v4816_v54 = vrot.slane %v4434_v52, %v12692_v57  ;;  %v4997_v44 = vpack.c.bf16 %v4788_v15, %v4788_v15  ;;  %v4998_v59 = vpack.c.bf16 %v4792_v3, %v4792_v3  ;;  %v4999_v6 = vpack.c.bf16 %v4796_v10, %v4796_v10  ;;  %v15183_v15 = vld [vmem:[#allocation118_spill] sm:$0xff]  ;;  %v15184_v3 = vld [vmem:[#allocation116_spill] sm:$0xff] }
 0x34c   :  { %v5000_v32 = vpack.c.bf16 %v4800_v49, %v4800_v49  ;;  %v5001_v46 = vpack.c.bf16 %v4804_v16, %v4804_v16  ;;  %v5002_v5 = vpack.c.bf16 %v4808_v43, %v4808_v43  ;;  %v5003_v47 = vpack.c.bf16 %v4812_v20, %v4812_v20 }
 0x34d   :  { %v5004_v60 = vpack.c.bf16 %v4816_v54, %v4816_v54  ;;  %v5491_v35 = vrot.slane %v13673_v48, 1  ;;  %v13811_v13 = vunpack.c.l.b16 %v4997_v44  ;;  %v13813_v30 = vunpack.c.l.b16 %v4998_v59  ;;  %v15189_v59 = vld [vmem:[#allocation105_spill] sm:$0xff] }
 0x34e   :  { %v13815_v56 = vunpack.c.l.b16 %v4999_v6  ;;  %v13817_v39 = vunpack.c.l.b16 %v5000_v32  ;;  %v5369_v19 = vunpack.c.l.b16 %v5001_v46  ;;  %v5371_v41 = vunpack.c.l.b16 %v5003_v47  ;;  %v15191_v46 = vld [vmem:[#allocation76_spill] sm:$0xff] }
 0x34f   :  { %v5372_v24 = vunpack.c.l.b16 %v5004_v60  ;;  %v5370_v33 = vunpack.c.l.b16 %v5002_v5  ;;  %v5503_v63 = vrot.slane %v13811_v13, 2  ;;  %v5517_v34 = vrot.slane %v13813_v30, 2  ;;  %v15192_v5 = vld [vmem:[#allocation74_spill] sm:$0xff] }
 0x350   :  { %v5505_v42 = vrot.slane %v13815_v56, 1  ;;  %v5521_v18 = vrot.slane %v5371_v41, 7  ;;  %v3919_v62 = vadd.f32 %v3875_v8, %v3558_v38  ;;  %v3920_v22 = vadd.f32 %v3876_v4, %v3559_v21  ;;  %v15186_v21 = vld [vmem:[#allocation73_spill] sm:$0xff]  ;;  %v11181_v41 = vld [vmem:[#allocation8 + $0x18] ss:$48 sps:$4 sm:$0xff]  }
 0x351   :  { %v5527_v48 = vrot.slane %v5372_v24, 7  ;;  %v15179_v55 = vrot.slane %v15178_v51, 2  ;;  %v15182_v23 = vrot.slane %v15181_v11, 2  ;;  %v15185_v10 = vrot.slane %v15184_v3, 2  ;;  %v15194_v24 = vld [vmem:[#allocation38_spill] sm:$0xff] }
 0x352   :  { %v13835_v16 = vsel %vm5378_vm9, %v5521_v18, %v5369_v19  ;;  %v4007_v4 = vrot.slane %v3919_v62, 4  ;;  %v4008_v38 = vrot.slane %v3920_v22, 4  ;;  %v15187_v43 = vrot.slane %v15186_v21, 1  ;;  %v11178_v19 = vld [vmem:[#allocation8 + $0x10] ss:$48 sps:$4 sm:$0xff]  }
 0x353   :  { %v5406_v53 = vsel %vm3653_vm5, %v15179_v55, %v15177_v36  ;;  %v5434_v52 = vsel %vm3653_vm5, %v15182_v23, %v15180_v12  ;;  %v5391_v49 = vsel %vm3653_vm5, %v15185_v10, %v15183_v15  ;;  %v13838_v8 = vsel %vm5378_vm9, %v5527_v48, %v5370_v33  ;;  %v11186_v48 = vld [vmem:[#allocation8 + $0x74] ss:$48 sps:$4 sm:$0xff]   ;;  %v11189_v36 = vld [vmem:[#allocation8 + $0x7c] ss:$48 sps:$4 sm:$0xff]  }
 0x354   :  { %v5408_v20 = vsel %vm5393_vm12, %v15187_v43, %v5406_v53  ;;  %v15188_v54 = vrot.slane %v13419_v61, 1  ;;  %v15190_v6 = vrot.slane %v15189_v59, 1  ;;  %v15193_v47 = vrot.slane %v15192_v5, 2  ;;  %v11192_v10 = vld [vmem:[#allocation8 + $0xd4] ss:$48 sps:$4 sm:$0xff]  }
 0x355   :  { %v4095_v13 = vmax.f32 %v3919_v62, %v4007_v4  ;;  %v4096_v30 = vmax.f32 %v3920_v22, %v4008_v38  ;;  %v15195_v33 = vrot.slane %v15194_v24, 1  ;;  %v15196_v51 = vrot.slane %v13541_v0, 2  ;;  %v15197_v22 = vld [vmem:[#allocation37_spill] sm:$0xff]  ;;  %v15199_v0 = vld [vmem:[#allocation39_spill] sm:$0xff] }
 0x356   :  { %v5436_v44 = vsel %vm5393_vm12, %v15188_v54, %v5434_v52  ;;  %v5394_v32 = vsel %vm5393_vm12, %v15190_v6, %v5391_v49  ;;  %v5420_v60 = vsel %vm3653_vm5, %v15193_v47, %v15191_v46  ;;  %v5490_v62 = vsel %vm3653_vm5, %v5489_v17, %v13630_v2  ;;  %v11195_v49 = vld [vmem:[#allocation8 + $0xdc] ss:$48 sps:$4 sm:$0xff]  }
 0x357   :  { %v13853_v56 = vpack.c.b16 %v5436_v44, %v5408_v20  ;;  %v5422_v61 = vsel %vm5393_vm12, %v15195_v33, %v5420_v60  ;;  %v5462_v55 = vsel %vm3653_vm5, %v15196_v51, %v13482_v27  ;;  %v15198_v53 = vrot.slane %v15197_v22, 2  ;;  %v11190_v44 = vld [vmem:[#allocation8 + $0xd0] ss:$48 sps:$4 sm:$0xff]   ;;  %v11205_v22 = vld [vmem:[#allocation8 + $0x198] ss:$48 sps:$4 sm:$0xff]  }
 0x358   :  { %v13858_v18 = vpack.c.b16 %v5422_v61, %v5394_v32  ;;  %v5519_v11 = vrot.slane %v13817_v39, 1  ;;  %v4171_v23 = vadd.f32 %v12680_v29, %v4095_v13  ;;  %v4172_v52 = vadd.f32 %v12689_v7, %v4096_v30  ;;  %v11201_v32 = vld [vmem:[#allocation8 + $0x13c] ss:$48 sps:$4 sm:$0xff]   ;;  %v11196_v60 = vld [vmem:[#allocation8 + $0x130] ss:$48 sps:$4 sm:$0xff]  }
 0x359   :  { %v5448_v12 = vsel %vm3653_vm5, %v15198_v53, %v13479_v45  ;;  %6537 = vmatprep.mubr.bf16.mxu0 %v13853_v56  ;;  %6600 = vmatprep.mubr.bf16.mxu1 %v13853_v56  ;;  %v5464_v27 = vsel %vm5393_vm12, %v5463_v25, %v5462_v55  ;;  %v5492_v45 = vsel %vm5393_vm12, %v5491_v35, %v5490_v62  ;;  %v15200_v2 = vrot.slane %v15199_v0, 1  ;;  %v11187_v25 = vld [vmem:[#allocation8 + $0x78] ss:$48 sps:$4 sm:$0xff]   ;;  %v11204_v30 = vld [vmem:[#allocation8 + $0x194] ss:$48 sps:$4 sm:$0xff]  }
 0x35a   :  { %6538 = vmatmul.mubr.bf16.vlgmr.msra.gmra.mrb[72].mxu0 %v13858_v18  ;;  %6601 = vmatmul.mubr.bf16.vlgmr.msra.gmra.mrb[72].mxu1 %v13858_v18  ;;  %v15201_v7 = vrot.slane %v13667_v58, 2  ;;  %v4215_v17 = vmax.f32 %v4171_v23, 0.0  ;;  %v4216_v39 = vmax.f32 %v4172_v52, 0.0  ;;  %v13890_v15 = vpack.c.b16 %v5492_v45, %v5464_v27  ;;  %v11199_v13 = vld [vmem:[#allocation8 + $0x138] ss:$48 sps:$4 sm:$0xff]  }
 0x35b   :  { %v5450_v29 = vsel %vm5393_vm12, %v15200_v2, %v5448_v12  ;;  %6632 = vmatpush1.bf16.msra.mxu0 %v11178_v19  ;;  %6695 = vmatpush1.bf16.msra.mxu1 %v11181_v41  ;;  %v15202_v3 = vrot.slane %v13671_v40, 1  ;;  %v5504_v58 = vsel %vm3653_vm5, %v5503_v63, %v13775_v9  ;;  %v11207_v61 = vld [vmem:[#allocation8 + $0x19c] ss:$48 sps:$4 sm:$0xff]   ;;  %v11202_v62 = vld [vmem:[#allocation8 + $0x190] ss:$48 sps:$4 sm:$0xff]  }
 0x35c   :  { %v5476_v26 = vsel %vm3653_vm5, %v15201_v7, %v13627_v37  ;;  %6633 = vmatprep.subr.bf16.mxu0 %v11186_v48  ;;  %6696 = vmatprep.subr.bf16.mxu1 %v11189_v36  ;;  %v5518_v37 = vsel %vm3653_vm5, %v5517_v34, %v13778_v28  ;;  %v10438_v38 = vrot.slane %v4215_v17, 9  ;;  %v10439_v21 = vrot.slane %v4216_v39, 9  ;;  %v11193_v28 = vld [vmem:[#allocation8 + $0xd8] ss:$48 sps:$4 sm:$0xff]   ;;  %v11198_v34 = vld [vmem:[#allocation8 + $0x134] ss:$48 sps:$4 sm:$0xff]  }
 0x35d   :  { %v5478_v35 = vsel %vm5393_vm12, %v15202_v3, %v5476_v26  ;;  %6547 = vmatprep.mubr.bf16.mxu0 %v13890_v15  ;;  %6610 = vmatprep.mubr.bf16.mxu1 %v13890_v15  ;;  %v5520_v40 = vsel %vm5393_vm12, %v5519_v11, %v5518_v37  ;;  %v5506_v43 = vsel %vm5393_vm12, %v5505_v42, %v5504_v58  ;;  %v11210_v53 = vld [vmem:[#allocation8 + $0x1f4] ss:$48 sps:$4 sm:$0xff]   ;;  %v11213_v12 = vld [vmem:[#allocation8 + $0x1fc] ss:$48 sps:$4 sm:$0xff]   ;;  %v11208_v45 = vld [vmem:[#allocation8 + $0x1f0] ss:$48 sps:$4 sm:$0xff]  }
 0x35e   :  { %v13895_v4 = vpack.c.b16 %v5478_v35, %v5450_v29  ;;  %v4435_v20 = vmax.f32 %v4215_v17, %v10438_v38  ;;  %v4436_v54 = vmax.f32 %v4216_v39, %v10439_v21  ;;  %v11211_v29 = vld [vmem:[#allocation8 + $0x1f8] ss:$48 sps:$4 sm:$0xff]   ;;  %v11216_v7 = vld [vmem:[#allocation8 + $0x254] ss:$48 sps:$4 sm:$0xff]   ;;  %v11219_v26 = vld [vmem:[#allocation8 + $0x25c] ss:$48 sps:$4 sm:$0xff]  }
 0x35f   :  { %6634 = vmatpush1.bf16.msra.mxu0 %v11184_v14  ;;  %6697 = vmatpush1.bf16.msra.mxu1 %v11187_v25  ;;  %v11222_v17 = vld [vmem:[#allocation8 + $0x2b4] ss:$48 sps:$4 sm:$0xff]   ;;  %v11225_v39 = vld [vmem:[#allocation8 + $0x2bc] ss:$48 sps:$4 sm:$0xff]   ;;  %v11220_v14 = vld [vmem:[#allocation8 + $0x2b0] ss:$48 sps:$4 sm:$0xff]  }
 0x360   :  { %6635 = vmatprep.subr.bf16.mxu0 %v11192_v10  ;;  %6698 = vmatprep.subr.bf16.mxu1 %v11195_v49  ;;  %v4820_v9 = vrot.slane %v4435_v20, %v12599_v50  ;;  %v4824_v63 = vrot.slane %v4435_v20, %v12692_v57  ;;  %v4828_v59 = vrot.slane %v4436_v54, %v12599_v50  ;;  %v11223_v25 = vld [vmem:[#allocation8 + $0x2b8] ss:$48 sps:$4 sm:$0xff]   ;;  %v11228_v3 = vld [vmem:[#allocation8 + $0x314] ss:$48 sps:$4 sm:$0xff]   ;;  %v11231_v35 = vld [vmem:[#allocation8 + $0x31c] ss:$48 sps:$4 sm:$0xff]  }
 0x361   :  { %v4832_v6 = vrot.slane %v4436_v54, %v12692_v57  ;;  %v11226_v10 = vld [vmem:[#allocation8 + $0x310] ss:$48 sps:$4 sm:$0xff]   ;;  %v11229_v49 = vld [vmem:[#allocation8 + $0x318] ss:$48 sps:$4 sm:$0xff]   ;;  %v11234_v37 = vld [vmem:[#allocation8 + $0x374] ss:$48 sps:$4 sm:$0xff]  }
 0x362   :  { %6548 = vmatmul.mubr.bf16.gmra.mrb[76].mxu0 %v13895_v4  ;;  %6611 = vmatmul.mubr.bf16.gmra.mrb[76].mxu1 %v13895_v4  ;;  %v5005_v42 = vpack.c.bf16 %v4820_v9, %v4820_v9  ;;  %v5006_v46 = vpack.c.bf16 %v4824_v63, %v4824_v63  ;;  %v5007_v5 = vpack.c.bf16 %v4828_v59, %v4828_v59  ;;  %v11237_v58 = vld [vmem:[#allocation8 + $0x37c] ss:$48 sps:$4 sm:$0xff]   ;;  %v11232_v38 = vld [vmem:[#allocation8 + $0x370] ss:$48 sps:$4 sm:$0xff]   ;;  %v11235_v21 = vld [vmem:[#allocation8 + $0x378] ss:$48 sps:$4 sm:$0xff]  }
 0x363   :  { %v5008_v47 = vpack.c.bf16 %v4832_v6, %v4832_v6  ;;  %6636 = vmatpush1.bf16.msra.mxu0 %v11190_v44  ;;  %6699 = vmatpush1.bf16.msra.mxu1 %v11193_v28  ;;  %v11238_v20 = vld [vmem:[#allocation8 + $0x3d0] ss:$48 sps:$4 sm:$0xff]   ;;  %v11241_v54 = vld [vmem:[#allocation8 + $0x3d8] ss:$48 sps:$4 sm:$0xff]   ;;  %v11246_v44 = vld [vmem:[#allocation8 + $0x434] ss:$48 sps:$4 sm:$0xff]  }
 0x364   :  { %6637 = vmatprep.subr.bf16.mxu0 %v11198_v34  ;;  %v5373_v19 = vunpack.c.l.b16 %v5005_v42  ;;  %v5374_v41 = vunpack.c.l.b16 %v5006_v46  ;;  %v5375_v24 = vunpack.c.l.b16 %v5007_v5  ;;  %6700 = vmatprep.subr.bf16.mxu1 %v11201_v32  ;;  %v11249_v28 = vld [vmem:[#allocation8 + $0x43c] ss:$48 sps:$4 sm:$0xff]   ;;  %v11244_v34 = vld [vmem:[#allocation8 + $0x430] ss:$48 sps:$4 sm:$0xff]   ;;  %v11247_v9 = vld [vmem:[#allocation8 + $0x438] ss:$48 sps:$4 sm:$0xff]  }
 0x365   :  { %v5376_v33 = vunpack.c.l.b16 %v5008_v47  ;;  %v11252_v63 = vld [vmem:[#allocation8 + $0x494] ss:$48 sps:$4 sm:$0xff]   ;;  %v11255_v59 = vld [vmem:[#allocation8 + $0x49c] ss:$48 sps:$4 sm:$0xff]   ;;  %v11250_v6 = vld [vmem:[#allocation8 + $0x490] ss:$48 sps:$4 sm:$0xff]  }
 0x366   :  { %v5523_v48 = vrot.slane %v5373_v19, 6  ;;  %v5525_v36 = vrot.slane %v5375_v24, 5  ;;  %v5529_v51 = vrot.slane %v5374_v41, 6  ;;  %v11253_v32 = vld [vmem:[#allocation8 + $0x498] ss:$48 sps:$4 sm:$0xff]  }
 0x367   :  { %v5531_v55 = vrot.slane %v5376_v33, 5  ;;  %6638 = vmatpush1.bf16.msra.mxu0 %v11196_v60  ;;  %6701 = vmatpush1.bf16.msra.mxu1 %v11199_v13  ;;  %v11258_v42 = vld [vmem:[#allocation8 + $0x4f4] ss:$48 sps:$4 sm:$0xff]   ;;  %v11261_v46 = vld [vmem:[#allocation8 + $0x4fc] ss:$48 sps:$4 sm:$0xff]  }
 0x368   :  { %6639 = vmatprep.subr.bf16.mxu0 %v11204_v30  ;;  %6702 = vmatprep.subr.bf16.mxu1 %v11207_v61  ;;  %v5530_v11 = vsel %vm3649_vm3, %v5529_v51, %v13838_v8  ;;  %v5524_v23 = vsel %vm3649_vm3, %v5523_v48, %v13835_v16  ;;  %v11214_v16 = vld [vmem:[#allocation8 + $0x250] ss:$48 sps:$4 sm:$0xff]   ;;  %v11217_v8 = vld [vmem:[#allocation8 + $0x258] ss:$48 sps:$4 sm:$0xff]   ;;  %v11264_v60 = vld [vmem:[#allocation8 + $0x554] ss:$48 sps:$4 sm:$0xff]  }
 0x369   :  { %v5532_v52 = vsel %vm5383_vm10, %v5531_v55, %v5530_v11  ;;  %v5526_v27 = vsel %vm5383_vm10, %v5525_v36, %v5524_v23  ;;  %v11256_v5 = vld [vmem:[#allocation8 + $0x4f0] ss:$48 sps:$4 sm:$0xff]   ;;  %v11259_v47 = vld [vmem:[#allocation8 + $0x4f8] ss:$48 sps:$4 sm:$0xff]   ;;  %v11267_v13 = vld [vmem:[#allocation8 + $0x55c] ss:$48 sps:$4 sm:$0xff]  }
 0x36a   :  { %v13917_v0 = vpack.c.b16 %v5532_v52, %v5520_v40  ;;  %v13919_v2 = vpack.c.b16 %v5526_v27, %v5506_v43  ;;  %v11240_v40 = vld [vmem:[#allocation8 + $0x3d4] ss:$48 sps:$4 sm:$0xff]   ;;  %v11243_v43 = vld [vmem:[#allocation8 + $0x3dc] ss:$48 sps:$4 sm:$0xff]   ;;  %v11262_v30 = vld [vmem:[#allocation8 + $0x550] ss:$48 sps:$4 sm:$0xff]  }
 0x36b   :  { %6640 = vmatpush1.bf16.msra.mxu0 %v11202_v62  ;;  %6703 = vmatpush1.bf16.msra.mxu1 %v11205_v22  ;;  %v11265_v19 = vld [vmem:[#allocation8 + $0x558] ss:$48 sps:$4 sm:$0xff]   ;;  %v11270_v41 = vld [vmem:[#allocation8 + $0x5b4] ss:$48 sps:$4 sm:$0xff]   ;;  %v11273_v24 = vld [vmem:[#allocation8 + $0x5bc] ss:$48 sps:$4 sm:$0xff]  }
 0x36c   :  { %6641 = vmatprep.subr.bf16.mxu0 %v11210_v53  ;;  %6704 = vmatprep.subr.bf16.mxu1 %v11213_v12  ;;  %v11268_v33 = vld [vmem:[#allocation8 + $0x5b0] ss:$48 sps:$4 sm:$0xff]   ;;  %v11271_v61 = vld [vmem:[#allocation8 + $0x5b8] ss:$48 sps:$4 sm:$0xff]   ;;  %v11276_v48 = vld [vmem:[#allocation8 + $0x24] ss:$48 sps:$4 sm:$0xff]  }
 0x36d   :  { %6557 = vmatprep.mubr.bf16.mxu0 %v13917_v0  ;;  %6620 = vmatprep.mubr.bf16.mxu1 %v13917_v0  ;;  %v11279_v36 = vld [vmem:[#allocation8 + $0x2c] ss:$48 sps:$4 sm:$0xff]   ;;  %v11274_v51 = vld [vmem:[#allocation8 + $0x20] ss:$48 sps:$4 sm:$0xff]   ;;  %v11277_v55 = vld [vmem:[#allocation8 + $0x28] ss:$48 sps:$4 sm:$0xff]  }
 0x36e   :  { %6558 = vmatmul.mubr.bf16.gmra.mrb[80].mxu0 %v13919_v2  ;;  %6621 = vmatmul.mubr.bf16.gmra.mrb[80].mxu1 %v13919_v2  ;;  %v11282_v62 = vld [vmem:[#allocation8 + $0x84] ss:$48 sps:$4 sm:$0xff]   ;;  %v11285_v22 = vld [vmem:[#allocation8 + $0x8c] ss:$48 sps:$4 sm:$0xff]   ;;  %v11280_v53 = vld [vmem:[#allocation8 + $0x80] ss:$48 sps:$4 sm:$0xff]  }
 0x36f   :  { %6642 = vmatpush1.bf16.msra.mxu0 %v11208_v45  ;;  %6705 = vmatpush1.bf16.msra.mxu1 %v11211_v29  ;;  %v11283_v12 = vld [vmem:[#allocation8 + $0x88] ss:$48 sps:$4 sm:$0xff]   ;;  %v11288_v11 = vld [vmem:[#allocation8 + $0xe4] ss:$48 sps:$4 sm:$0xff]   ;;  %v11291_v23 = vld [vmem:[#allocation8 + $0xec] ss:$48 sps:$4 sm:$0xff]  }
 0x370   :  { %6643 = vmatprep.subr.bf16.mxu0 %v11216_v7  ;;  %6706 = vmatprep.subr.bf16.mxu1 %v11219_v26  ;;  %v11286_v52 = vld [vmem:[#allocation8 + $0xe0] ss:$48 sps:$4 sm:$0xff]   ;;  %v11289_v27 = vld [vmem:[#allocation8 + $0xe8] ss:$48 sps:$4 sm:$0xff]   ;;  %v11294_v45 = vld [vmem:[#allocation8 + $0x144] ss:$48 sps:$4 sm:$0xff]  }
 0x371   :  { %6663 = vmatprep.mubr.bf16.mxu0 %v13853_v56  ;;  %6726 = vmatprep.mubr.bf16.mxu1 %v13853_v56  ;;  %v11297_v29 = vld [vmem:[#allocation8 + $0x14c] ss:$48 sps:$4 sm:$0xff]   ;;  %v11292_v7 = vld [vmem:[#allocation8 + $0x140] ss:$48 sps:$4 sm:$0xff]   ;;  %v11295_v26 = vld [vmem:[#allocation8 + $0x148] ss:$48 sps:$4 sm:$0xff]  }
 0x373   :  { %6644 = vmatpush1.bf16.msra.mxu0 %v11214_v16  ;;  %6707 = vmatpush1.bf16.msra.mxu1 %v11217_v8  ;;  %v11300_v16 = vld [vmem:[#allocation8 + $0x1a4] ss:$48 sps:$4 sm:$0xff]   ;;  %v11303_v8 = vld [vmem:[#allocation8 + $0x1ac] ss:$48 sps:$4 sm:$0xff]  }
 0x374   :  { %6645 = vmatprep.subr.bf16.mxu0 %v11222_v17  ;;  %6708 = vmatprep.subr.bf16.mxu1 %v11225_v39  ;;  %v11298_v17 = vld [vmem:[#allocation8 + $0x1a0] ss:$48 sps:$4 sm:$0xff]   ;;  %v11301_v39 = vld [vmem:[#allocation8 + $0x1a8] ss:$48 sps:$4 sm:$0xff]  }
 0x377   :  { %6646 = vmatpush1.bf16.msra.mxu0 %v11220_v14  ;;  %6709 = vmatpush1.bf16.msra.mxu1 %v11223_v25  ;;  %v11306_v14 = vld [vmem:[#allocation8 + $0x204] ss:$48 sps:$4 sm:$0xff]   ;;  %v11309_v25 = vld [vmem:[#allocation8 + $0x20c] ss:$48 sps:$4 sm:$0xff]  }
 0x378   :  { %6647 = vmatprep.subr.bf16.mxu0 %v11228_v3  ;;  %6710 = vmatprep.subr.bf16.mxu1 %v11231_v35  ;;  %v11304_v3 = vld [vmem:[#allocation8 + $0x200] ss:$48 sps:$4 sm:$0xff]   ;;  %v11307_v35 = vld [vmem:[#allocation8 + $0x208] ss:$48 sps:$4 sm:$0xff]  }
 0x37b   :  { %6648 = vmatpush1.bf16.msra.mxu0 %v11226_v10  ;;  %6711 = vmatpush1.bf16.msra.mxu1 %v11229_v49  ;;  %v11312_v10 = vld [vmem:[#allocation8 + $0x264] ss:$48 sps:$4 sm:$0xff]   ;;  %v11315_v49 = vld [vmem:[#allocation8 + $0x26c] ss:$48 sps:$4 sm:$0xff]  }
 0x37c   :  { %6649 = vmatprep.subr.bf16.mxu0 %v11234_v37  ;;  %6712 = vmatprep.subr.bf16.mxu1 %v11237_v58  ;;  %v11310_v37 = vld [vmem:[#allocation8 + $0x260] ss:$48 sps:$4 sm:$0xff]   ;;  %v11313_v58 = vld [vmem:[#allocation8 + $0x268] ss:$48 sps:$4 sm:$0xff]  }
 0x37f   :  { %6650 = vmatpush1.bf16.msra.mxu0 %v11232_v38  ;;  %6713 = vmatpush1.bf16.msra.mxu1 %v11235_v21  ;;  %v11318_v38 = vld [vmem:[#allocation8 + $0x2c4] ss:$48 sps:$4 sm:$0xff]   ;;  %v11321_v21 = vld [vmem:[#allocation8 + $0x2cc] ss:$48 sps:$4 sm:$0xff]  }
 0x380   :  { %6651 = vmatprep.subr.bf16.mxu0 %v11240_v40  ;;  %6714 = vmatprep.subr.bf16.mxu1 %v11243_v43  ;;  %v11316_v40 = vld [vmem:[#allocation8 + $0x2c0] ss:$48 sps:$4 sm:$0xff]   ;;  %v11324_v43 = vld [vmem:[#allocation8 + $0x324] ss:$48 sps:$4 sm:$0xff]  }
 0x383   :  { %6652 = vmatpush1.bf16.msra.mxu0 %v11238_v20  ;;  %6715 = vmatpush1.bf16.msra.mxu1 %v11241_v54  ;;  %v11327_v20 = vld [vmem:[#allocation8 + $0x32c] ss:$48 sps:$4 sm:$0xff]   ;;  %v11322_v54 = vld [vmem:[#allocation8 + $0x320] ss:$48 sps:$4 sm:$0xff]  }
 0x384   :  { %6653 = vmatprep.subr.bf16.mxu0 %v11246_v44  ;;  %6716 = vmatprep.subr.bf16.mxu1 %v11249_v28  ;;  %v11325_v44 = vld [vmem:[#allocation8 + $0x328] ss:$48 sps:$4 sm:$0xff]   ;;  %v11330_v28 = vld [vmem:[#allocation8 + $0x384] ss:$48 sps:$4 sm:$0xff]  }
 0x387   :  { %6654 = vmatpush1.bf16.msra.mxu0 %v11244_v34  ;;  %6717 = vmatpush1.bf16.msra.mxu1 %v11247_v9  ;;  %v11333_v34 = vld [vmem:[#allocation8 + $0x38c] ss:$48 sps:$4 sm:$0xff]   ;;  %v11328_v9 = vld [vmem:[#allocation8 + $0x380] ss:$48 sps:$4 sm:$0xff]  }
 0x388   :  { %6655 = vmatprep.subr.bf16.mxu0 %v11252_v63  ;;  %6718 = vmatprep.subr.bf16.mxu1 %v11255_v59  ;;  %v11331_v63 = vld [vmem:[#allocation8 + $0x388] ss:$48 sps:$4 sm:$0xff]   ;;  %v11336_v59 = vld [vmem:[#allocation8 + $0x3e4] ss:$48 sps:$4 sm:$0xff]  }
 0x38b   :  { %6656 = vmatpush1.bf16.msra.mxu0 %v11250_v6  ;;  %6719 = vmatpush1.bf16.msra.mxu1 %v11253_v32  ;;  %v11339_v6 = vld [vmem:[#allocation8 + $0x3ec] ss:$48 sps:$4 sm:$0xff]   ;;  %v11334_v32 = vld [vmem:[#allocation8 + $0x3e0] ss:$48 sps:$4 sm:$0xff]  }
 0x38c   :  { %6657 = vmatprep.subr.bf16.mxu0 %v11258_v42  ;;  %6720 = vmatprep.subr.bf16.mxu1 %v11261_v46  ;;  %v11337_v42 = vld [vmem:[#allocation8 + $0x3e8] ss:$48 sps:$4 sm:$0xff]   ;;  %v11342_v46 = vld [vmem:[#allocation8 + $0x444] ss:$48 sps:$4 sm:$0xff]  }
 0x38f   :  { %6658 = vmatpush1.bf16.msra.mxu0 %v11256_v5  ;;  %6721 = vmatpush1.bf16.msra.mxu1 %v11259_v47  ;;  %v11345_v5 = vld [vmem:[#allocation8 + $0x44c] ss:$48 sps:$4 sm:$0xff]   ;;  %v11340_v47 = vld [vmem:[#allocation8 + $0x440] ss:$48 sps:$4 sm:$0xff]  }
 0x390   :  { %6659 = vmatprep.subr.bf16.mxu0 %v11264_v60  ;;  %6722 = vmatprep.subr.bf16.mxu1 %v11267_v13  ;;  %v11343_v60 = vld [vmem:[#allocation8 + $0x448] ss:$48 sps:$4 sm:$0xff]   ;;  %v11348_v13 = vld [vmem:[#allocation8 + $0x4a4] ss:$48 sps:$4 sm:$0xff]  }
 0x393   :  { %6660 = vmatpush1.bf16.msra.mxu0 %v11262_v30  ;;  %6723 = vmatpush1.bf16.msra.mxu1 %v11265_v19  ;;  %v11351_v30 = vld [vmem:[#allocation8 + $0x4ac] ss:$48 sps:$4 sm:$0xff]   ;;  %v11346_v19 = vld [vmem:[#allocation8 + $0x4a0] ss:$48 sps:$4 sm:$0xff]  }
 0x394   :  { %6661 = vmatprep.subr.bf16.mxu0 %v11270_v41  ;;  %6724 = vmatprep.subr.bf16.mxu1 %v11273_v24  ;;  %v11349_v41 = vld [vmem:[#allocation8 + $0x4a8] ss:$48 sps:$4 sm:$0xff]   ;;  %v11354_v24 = vld [vmem:[#allocation8 + $0x504] ss:$48 sps:$4 sm:$0xff]  }
 0x397   :  { %6662 = vmatpush1.bf16.msra.mxu0 %v11268_v33  ;;  %6725 = vmatpush1.bf16.msra.mxu1 %v11271_v61  ;;  %v11357_v33 = vld [vmem:[#allocation8 + $0x50c] ss:$48 sps:$4 sm:$0xff]   ;;  %v11352_v61 = vld [vmem:[#allocation8 + $0x500] ss:$48 sps:$4 sm:$0xff]  }
 0x398   :  { %6757 = vmatprep.subr.bf16.mxu0 %v11276_v48  ;;  %6820 = vmatprep.subr.bf16.mxu1 %v11279_v36  ;;  %v11355_v48 = vld [vmem:[#allocation8 + $0x508] ss:$48 sps:$4 sm:$0xff]   ;;  %v11360_v36 = vld [vmem:[#allocation8 + $0x564] ss:$48 sps:$4 sm:$0xff]  }
 0x39a   :  { %6664 = vmatmul.mubr.bf16.vlgmr.msra.gmra.mrb[84].mxu0 %v13858_v18  ;;  %6727 = vmatmul.mubr.bf16.vlgmr.msra.gmra.mrb[84].mxu1 %v13858_v18 }
 0x39b   :  { %6673 = vmatprep.mubr.bf16.mxu0 %v13890_v15  ;;  %6736 = vmatprep.mubr.bf16.mxu1 %v13890_v15 }
 0x39c   :  { %6758 = vmatpush1.bf16.msra.mxu0 %v11274_v51  ;;  %6821 = vmatpush1.bf16.msra.mxu1 %v11277_v55  ;;  %v11363_v51 = vld [vmem:[#allocation8 + $0x56c] ss:$48 sps:$4 sm:$0xff]   ;;  %v11358_v55 = vld [vmem:[#allocation8 + $0x560] ss:$48 sps:$4 sm:$0xff]  }
 0x39d   :  { %6759 = vmatprep.subr.bf16.mxu0 %v11282_v62  ;;  %6822 = vmatprep.subr.bf16.mxu1 %v11285_v22  ;;  %v11361_v62 = vld [vmem:[#allocation8 + $0x568] ss:$48 sps:$4 sm:$0xff]   ;;  %v11366_v22 = vld [vmem:[#allocation8 + $0x5c4] ss:$48 sps:$4 sm:$0xff]  }
 0x3a0   :  { %6760 = vmatpush1.bf16.msra.mxu0 %v11280_v53  ;;  %6823 = vmatpush1.bf16.msra.mxu1 %v11283_v12  ;;  %v11369_v53 = vld [vmem:[#allocation8 + $0x5cc] ss:$48 sps:$4 sm:$0xff]   ;;  %v11364_v12 = vld [vmem:[#allocation8 + $0x5c0] ss:$48 sps:$4 sm:$0xff]  }
 0x3a1   :  { %6761 = vmatprep.subr.bf16.mxu0 %v11288_v11  ;;  %6824 = vmatprep.subr.bf16.mxu1 %v11291_v23  ;;  %v11367_v11 = vld [vmem:[#allocation8 + $0x5c8] ss:$48 sps:$4 sm:$0xff]  }
 0x3a2   :  { %6674 = vmatmul.mubr.bf16.gmra.mrb[88].mxu0 %v13895_v4  ;;  %6737 = vmatmul.mubr.bf16.gmra.mrb[88].mxu1 %v13895_v4  ;;  %v11370_v23 = vld [vmem:[#allocation11] ss:$24 sps:$4 sm:$0xff]  }
 0x3a3   :  { %6683 = vmatprep.mubr.bf16.mxu0 %v13917_v0  ;;  %6746 = vmatprep.mubr.bf16.mxu1 %v13917_v0 }
 0x3a4   :  { %6762 = vmatpush1.bf16.msra.mxu0 %v11286_v52  ;;  %6825 = vmatpush1.bf16.msra.mxu1 %v11289_v27  ;;  %v11372_v52 = vld [vmem:[#allocation11 + $0x4] ss:$24 sps:$4 sm:$0xff]   ;;  %v11373_v27 = vld [vmem:[#allocation11 + $0x8] ss:$24 sps:$4 sm:$0xff]  }
 0x3a5   :  { %6763 = vmatprep.subr.bf16.mxu0 %v11294_v45  ;;  %6826 = vmatprep.subr.bf16.mxu1 %v11297_v29  ;;  %v11378_v45 = vld [vmem:[#allocation11 + $0x34] ss:$24 sps:$4 sm:$0xff]  }
 0x3a6   :  { %v11381_v29 = vld [vmem:[#allocation11 + $0x3c] ss:$24 sps:$4 sm:$0xff]  }
 0x3a8   :  { %6764 = vmatpush1.bf16.msra.mxu0 %v11292_v7  ;;  %6827 = vmatpush1.bf16.msra.mxu1 %v11295_v26  ;;  %v11384_v7 = vld [vmem:[#allocation11 + $0x64] ss:$24 sps:$4 sm:$0xff]   ;;  %v11382_v26 = vld [vmem:[#allocation11 + $0x60] ss:$24 sps:$4 sm:$0xff]  }
 0x3a9   :  { %6765 = vmatprep.subr.bf16.mxu0 %v11300_v16  ;;  %6828 = vmatprep.subr.bf16.mxu1 %v11303_v8  ;;  %v11390_v16 = vld [vmem:[#allocation11 + $0x94] ss:$24 sps:$4 sm:$0xff]  }
 0x3aa   :  { %6684 = vmatmul.mubr.bf16.gmra.mrb[92].mxu0 %v13919_v2  ;;  %6747 = vmatmul.mubr.bf16.gmra.mrb[92].mxu1 %v13919_v2  ;;  %v11393_v8 = vld [vmem:[#allocation11 + $0x9c] ss:$24 sps:$4 sm:$0xff]  }
 0x3ab   :  { %6789 = vmatprep.mubr.bf16.mxu0 %v13853_v56  ;;  %6852 = vmatprep.mubr.bf16.mxu1 %v13853_v56  ;;  %v11319_v56 = vld [vmem:[#allocation8 + $0x2c8] ss:$48 sps:$4 sm:$0xff]  }
 0x3ac   :  { %6766 = vmatpush1.bf16.msra.mxu0 %v11298_v17  ;;  %6829 = vmatpush1.bf16.msra.mxu1 %v11301_v39  ;;  %v11388_v17 = vld [vmem:[#allocation11 + $0x90] ss:$24 sps:$4 sm:$0xff]  }
 0x3ad   :  { %6767 = vmatprep.subr.bf16.mxu0 %v11306_v14  ;;  %6830 = vmatprep.subr.bf16.mxu1 %v11309_v25  ;;  %v11391_v39 = vld [vmem:[#allocation11 + $0x98] ss:$24 sps:$4 sm:$0xff]  }
 0x3b0   :  { %6768 = vmatpush1.bf16.msra.mxu0 %v11304_v3  ;;  %6831 = vmatpush1.bf16.msra.mxu1 %v11307_v35 }
 0x3b1   :  { %6769 = vmatprep.subr.bf16.mxu0 %v11312_v10  ;;  %6832 = vmatprep.subr.bf16.mxu1 %v11315_v49 }
 0x3b4   :  { %6770 = vmatpush1.bf16.msra.mxu0 %v11310_v37  ;;  %6833 = vmatpush1.bf16.msra.mxu1 %v11313_v58 }
 0x3b5   :  { %6771 = vmatprep.subr.bf16.mxu0 %v11318_v38  ;;  %6834 = vmatprep.subr.bf16.mxu1 %v11321_v21 }
 0x3b8   :  { %6772 = vmatpush1.bf16.msra.mxu0 %v11316_v40  ;;  %6835 = vmatpush1.bf16.msra.mxu1 %v11319_v56 }
 0x3b9   :  { %6773 = vmatprep.subr.bf16.mxu0 %v11324_v43  ;;  %6836 = vmatprep.subr.bf16.mxu1 %v11327_v20 }
 0x3bc   :  { %6774 = vmatpush1.bf16.msra.mxu0 %v11322_v54  ;;  %6837 = vmatpush1.bf16.msra.mxu1 %v11325_v44 }
 0x3bd   :  { %6775 = vmatprep.subr.bf16.mxu0 %v11330_v28  ;;  %6838 = vmatprep.subr.bf16.mxu1 %v11333_v34 }
 0x3c0   :  { %6776 = vmatpush1.bf16.msra.mxu0 %v11328_v9  ;;  %6839 = vmatpush1.bf16.msra.mxu1 %v11331_v63 }
 0x3c1   :  { %6777 = vmatprep.subr.bf16.mxu0 %v11336_v59  ;;  %6840 = vmatprep.subr.bf16.mxu1 %v11339_v6 }
 0x3c4   :  { %6778 = vmatpush1.bf16.msra.mxu0 %v11334_v32  ;;  %6841 = vmatpush1.bf16.msra.mxu1 %v11337_v42 }
 0x3c5   :  { %6779 = vmatprep.subr.bf16.mxu0 %v11342_v46  ;;  %6842 = vmatprep.subr.bf16.mxu1 %v11345_v5 }
 0x3c8   :  { %6780 = vmatpush1.bf16.msra.mxu0 %v11340_v47  ;;  %6843 = vmatpush1.bf16.msra.mxu1 %v11343_v60 }
 0x3c9   :  { %6781 = vmatprep.subr.bf16.mxu0 %v11348_v13  ;;  %6844 = vmatprep.subr.bf16.mxu1 %v11351_v30 }
 0x3cc   :  { %6782 = vmatpush1.bf16.msra.mxu0 %v11346_v19  ;;  %6845 = vmatpush1.bf16.msra.mxu1 %v11349_v41  ;;  %v11439_v41 = vld [vmem:[#allocation11 + $0x218] ss:$24 sps:$4 sm:$0xff]  }
 0x3cd   :  { %6783 = vmatprep.subr.bf16.mxu0 %v11354_v24  ;;  %6846 = vmatprep.subr.bf16.mxu1 %v11357_v33  ;;  %v11436_v33 = vld [vmem:[#allocation11 + $0x210] ss:$24 sps:$4 sm:$0xff]   ;;  %v11438_v24 = vld [vmem:[#allocation11 + $0x214] ss:$24 sps:$4 sm:$0xff]  }
 0x3d0   :  { %6784 = vmatpush1.bf16.msra.mxu0 %v11352_v61  ;;  %6847 = vmatpush1.bf16.msra.mxu1 %v11355_v48 }
 0x3d1   :  { %6785 = vmatprep.subr.bf16.mxu0 %v11360_v36  ;;  %6848 = vmatprep.subr.bf16.mxu1 %v11363_v51 }
 0x3d4   :  { %6786 = vmatpush1.bf16.msra.mxu0 %v11358_v55  ;;  %6849 = vmatpush1.bf16.msra.mxu1 %v11361_v62 }
 0x3d5   :  { %6787 = vmatprep.subr.bf16.mxu0 %v11366_v22  ;;  %6850 = vmatprep.subr.bf16.mxu1 %v11369_v53 }
 0x3d8   :  { %6788 = vmatpush1.bf16.msra.mxu0 %v11364_v12  ;;  %6851 = vmatpush1.bf16.msra.mxu1 %v11367_v11 }
 0x3d9   :  { %8951 = vmatprep.subr.bf16.mxu0 %v11372_v52 }
 0x3db   :  { %6790 = vmatmul.mubr.bf16.vlgmr.msra.gmra.mrb[96].mxu0 %v13858_v18  ;;  %6853 = vmatmul.mubr.bf16.vlgmr.msra.gmra.mrb[96].mxu1 %v13858_v18  ;;  %v11375_v18 = vld [vmem:[#allocation11 + $0xc] ss:$24 sps:$4 sm:$0xff]  }
 0x3dc   :  { %6799 = vmatprep.mubr.bf16.mxu0 %v13890_v15  ;;  %6862 = vmatprep.mubr.bf16.mxu1 %v13890_v15  ;;  %v11376_v15 = vld [vmem:[#allocation11 + $0x30] ss:$24 sps:$4 sm:$0xff]  }
 0x3dd   :  { %8952 = vmatpush1.bf16.msra.mxu0 %v11370_v23  ;;  %9002 = vmatprep.subr.bf16.mxu1 %v11375_v18 }
 0x3de   :  { %9003 = vmatpush1.bf16.msra.mxu1 %v11373_v27  ;;  %8953 = vmatprep.subr.bf16.mxu0 %v11378_v45 }
 0x3df   :  { %9004 = vmatprep.subr.bf16.mxu1 %v11381_v29 }
 0x3e1   :  { %8954 = vmatpush1.bf16.msra.mxu0 %v11376_v15 }
 0x3e2   :  { %8955 = vmatprep.subr.bf16.mxu0 %v11384_v7 }
 0x3e3   :  { %6800 = vmatmul.mubr.bf16.gmra.mrb[100].mxu0 %v13895_v4  ;;  %6863 = vmatmul.mubr.bf16.gmra.mrb[100].mxu1 %v13895_v4  ;;  %v11379_v4 = vld [vmem:[#allocation11 + $0x38] ss:$24 sps:$4 sm:$0xff]  }
 0x3e4   :  { %6809 = vmatprep.mubr.bf16.mxu0 %v13917_v0  ;;  %6872 = vmatprep.mubr.bf16.mxu1 %v13917_v0  ;;  %v11387_v0 = vld [vmem:[#allocation11 + $0x6c] ss:$24 sps:$4 sm:$0xff]  }
 0x3e5   :  { %9005 = vmatpush1.bf16.msra.mxu1 %v11379_v4  ;;  %8956 = vmatpush1.bf16.msra.mxu0 %v11382_v26 }
 0x3e6   :  { %9006 = vmatprep.subr.bf16.mxu1 %v11387_v0  ;;  %8957 = vmatprep.subr.bf16.mxu0 %v11390_v16 }
 0x3e9   :  { %8958 = vmatpush1.bf16.msra.mxu0 %v11388_v17 }
 0x3eb   :  { %6810 = vmatmul.mubr.bf16.gmra.mrb[104].mxu0 %v13919_v2  ;;  %6873 = vmatmul.mubr.bf16.gmra.mrb[104].mxu1 %v13919_v2  ;;  %v11385_v2 = vld [vmem:[#allocation11 + $0x68] ss:$24 sps:$4 sm:$0xff]  }
 0x3ec   :  { %9007 = vmatpush1.bf16.msra.mxu1 %v11385_v2 }
 0x3ed   :  { %9008 = vmatprep.subr.bf16.mxu1 %v11393_v8 }
 0x3f0   :  { %9009 = vmatpush1.bf16.msra.mxu1 %v11391_v39 }
 0x42d   :  { %v6539_v14 = vpop.f32.mrb[72].mxu0  ;;  %v6602_v25 = vpop.f32.mrb[72].mxu1 }
 0x42e   :  { %v6541_v3 = vpop.f32.mrb[73].mxu0  ;;  %v6604_v35 = vpop.f32.mrb[73].mxu1 }
 0x42f   :  { %v6955_v10 = vcombine.low %v6539_v14, %v6541_v3  ;;  %v6956_v49 = vcombine.high %v6539_v14, %v6541_v3  ;;  %v6957_v37 = vcombine.low %v6602_v25, %v6604_v35  ;;  %v6958_v58 = vcombine.high %v6602_v25, %v6604_v35  ;;  %v6543_v38 = vpop.f32.mrb[74].mxu0  ;;  %v6606_v21 = vpop.f32.mrb[74].mxu1  ;;  %v11433_v25 = vld [vmem:[#allocation11 + $0x1e8] ss:$24 sps:$4 sm:$0xff]  }
 0x430   :  { %v6545_v40 = vpop.f32.mrb[75].mxu0  ;;  %v6608_v56 = vpop.f32.mrb[75].mxu1 }
 0x431   :  { %v13950_v43 = vrot.slane %v6955_v10, %v12446_v1  ;;  %v13953_v20 = vrot.slane %v6956_v49, %v12446_v1  ;;  %v13956_v54 = vrot.slane %v6957_v37, %v12446_v1  ;;  %v13959_v44 = vrot.slane %v6958_v58, %v12446_v1 }
 0x432   :  { %v7062_v28 = vcombine.low %v6543_v38, %v6545_v40  ;;  %v7063_v34 = vcombine.high %v6543_v38, %v6545_v40  ;;  %v7064_v9 = vcombine.low %v6606_v21, %v6608_v56  ;;  %v7065_v63 = vcombine.high %v6606_v21, %v6608_v56 }
 0x434   :  { %v13970_v46 = vrot.slane %v7062_v28, %v12446_v1  ;;  %v13973_v5 = vrot.slane %v7063_v34, %v12446_v1  ;;  %v13976_v47 = vrot.slane %v7064_v9, %v12446_v1  ;;  %v13979_v60 = vrot.slane %v7065_v63, %v12446_v1 }
 0x435   :  { %v6549_v13 = vpop.f32.mrb[76].mxu0  ;;  %v6612_v30 = vpop.f32.mrb[76].mxu1 }
 0x436   :  { %v6551_v61 = vpop.f32.mrb[77].mxu0  ;;  %v6614_v48 = vpop.f32.mrb[77].mxu1 }
 0x437   :  { %v7170_v36 = vcombine.low %v6549_v13, %v6551_v61  ;;  %v7171_v51 = vcombine.high %v6549_v13, %v6551_v61  ;;  %v7172_v55 = vcombine.low %v6612_v30, %v6614_v48  ;;  %v7173_v62 = vcombine.high %v6612_v30, %v6614_v48  ;;  %v6553_v22 = vpop.f32.mrb[78].mxu0  ;;  %v6616_v53 = vpop.f32.mrb[78].mxu1 }
 0x438   :  { %v6555_v12 = vpop.f32.mrb[79].mxu0  ;;  %v6618_v11 = vpop.f32.mrb[79].mxu1 }
 0x439   :  { %v13990_v23 = vrot.slane %v7170_v36, %v12446_v1  ;;  %v13993_v52 = vrot.slane %v7171_v51, %v12446_v1  ;;  %v13996_v27 = vrot.slane %v7172_v55, %v12446_v1  ;;  %v13999_v18 = vrot.slane %v7173_v62, %v12446_v1  ;;  %v11432_v55 = vld [vmem:[#allocation11 + $0x1e4] ss:$24 sps:$4 sm:$0xff]  }
 0x43a   :  { %v7276_v45 = vcombine.low %v6553_v22, %v6555_v12  ;;  %v7277_v29 = vcombine.high %v6553_v22, %v6555_v12  ;;  %v7278_v15 = vcombine.low %v6616_v53, %v6618_v11  ;;  %v7279_v4 = vcombine.high %v6616_v53, %v6618_v11  ;;  %v11396_v11 = vld [vmem:[#allocation11 + $0xc4] ss:$24 sps:$4 sm:$0xff]   ;;  %v11424_v53 = vld [vmem:[#allocation11 + $0x1b0] ss:$24 sps:$4 sm:$0xff]  }
 0x43b   :  { %8959 = vmatprep.subr.bf16.mxu0 %v11396_v11  ;;  %v11429_v22 = vld [vmem:[#allocation11 + $0x1bc] ss:$24 sps:$4 sm:$0xff]  }
 0x43c   :  { %v14008_v2 = vrot.slane %v7276_v45, %v12446_v1  ;;  %v14011_v16 = vrot.slane %v7277_v29, %v12446_v1  ;;  %v14014_v8 = vrot.slane %v7278_v15, %v12446_v1  ;;  %v14017_v17 = vrot.slane %v7279_v4, %v12446_v1  ;;  %v11394_v45 = vld [vmem:[#allocation11 + $0xc0] ss:$24 sps:$4 sm:$0xff]   ;;  %v11399_v29 = vld [vmem:[#allocation11 + $0xcc] ss:$24 sps:$4 sm:$0xff]  }
 0x43d   :  { %v11397_v4 = vld [vmem:[#allocation11 + $0xc8] ss:$24 sps:$4 sm:$0xff]   ;;  %8960 = vmatpush1.bf16.msra.mxu0 %v11394_v45  ;;  %9010 = vmatprep.subr.bf16.mxu1 %v11399_v29  ;;  %v11423_v45 = vld [vmem:[#allocation11 + $0x18c] ss:$24 sps:$4 sm:$0xff]  }
 0x43e   :  { %9011 = vmatpush1.bf16.msra.mxu1 %v11397_v4 }
 0x441   :  { %v6559_v35 = vpop.f32.mrb[80].mxu0  ;;  %v6622_v10 = vpop.f32.mrb[80].mxu1 }
 0x442   :  { %v6561_v49 = vpop.f32.mrb[81].mxu0  ;;  %v6624_v38 = vpop.f32.mrb[81].mxu1 }
 0x443   :  { %v7384_v37 = vcombine.low %v6559_v35, %v6561_v49  ;;  %v7385_v58 = vcombine.high %v6559_v35, %v6561_v49  ;;  %v6563_v21 = vpop.f32.mrb[82].mxu0  ;;  %v7386_v40 = vcombine.low %v6622_v10, %v6624_v38  ;;  %v7387_v56 = vcombine.high %v6622_v10, %v6624_v38  ;;  %v6626_v28 = vpop.f32.mrb[82].mxu1  ;;  %v11402_v35 = vld [vmem:[#allocation11 + $0xf4] ss:$24 sps:$4 sm:$0xff]   ;;  %v11400_v10 = vld [vmem:[#allocation11 + $0xf0] ss:$24 sps:$4 sm:$0xff]  }
 0x444   :  { %v6565_v34 = vpop.f32.mrb[83].mxu0  ;;  %v6628_v30 = vpop.f32.mrb[83].mxu1  ;;  %v11405_v49 = vld [vmem:[#allocation11 + $0xfc] ss:$24 sps:$4 sm:$0xff]   ;;  %8961 = vmatprep.subr.bf16.mxu0 %v11402_v35  ;;  %v11406_v38 = vld [vmem:[#allocation11 + $0x120] ss:$24 sps:$4 sm:$0xff]  }
 0x445   :  { %v14028_v9 = vrot.slane %v7384_v37, %v12446_v1  ;;  %v14031_v63 = vrot.slane %v7385_v58, %v12446_v1  ;;  %v7492_v13 = vcombine.low %v6563_v21, %v6565_v34  ;;  %v14034_v61 = vrot.slane %v7386_v40, %v12446_v1  ;;  %v11403_v37 = vld [vmem:[#allocation11 + $0xf8] ss:$24 sps:$4 sm:$0xff]   ;;  %8962 = vmatpush1.bf16.msra.mxu0 %v11400_v10  ;;  %v11408_v58 = vld [vmem:[#allocation11 + $0x124] ss:$24 sps:$4 sm:$0xff]   ;;  %v11409_v40 = vld [vmem:[#allocation11 + $0x128] ss:$24 sps:$4 sm:$0xff]  }
 0x446   :  { %v14037_v48 = vrot.slane %v7387_v56, %v12446_v1  ;;  %v7493_v36 = vcombine.low %v6626_v28, %v6628_v30  ;;  %9012 = vmatprep.subr.bf16.mxu1 %v11405_v49  ;;  %v11411_v21 = vld [vmem:[#allocation11 + $0x12c] ss:$24 sps:$4 sm:$0xff]   ;;  %8963 = vmatprep.subr.bf16.mxu0 %v11408_v58  ;;  %v11412_v28 = vld [vmem:[#allocation11 + $0x150] ss:$24 sps:$4 sm:$0xff]   ;;  %v11417_v34 = vld [vmem:[#allocation11 + $0x15c] ss:$24 sps:$4 sm:$0xff]  }
 0x447   :  { %v14040_v51 = vrot.slane %v7492_v13, %v12446_v1  ;;  %9013 = vmatpush1.bf16.msra.mxu1 %v11403_v37  ;;  %v11414_v56 = vld [vmem:[#allocation11 + $0x154] ss:$24 sps:$4 sm:$0xff]   ;;  %v11415_v13 = vld [vmem:[#allocation11 + $0x158] ss:$24 sps:$4 sm:$0xff]   ;;  %v11420_v30 = vld [vmem:[#allocation11 + $0x184] ss:$24 sps:$4 sm:$0xff]  }
 0x448   :  { %v14051_v12 = vrot.slane %v7493_v36, %v12446_v1  ;;  %9014 = vmatprep.subr.bf16.mxu1 %v11411_v21  ;;  %v11418_v36 = vld [vmem:[#allocation11 + $0x180] ss:$24 sps:$4 sm:$0xff]  }
 0x449   :  { %8964 = vmatpush1.bf16.msra.mxu0 %v11406_v38  ;;  %v11421_v35 = vld [vmem:[#allocation11 + $0x188] ss:$24 sps:$4 sm:$0xff]  }
 0x44a   :  { %15203 = vst [vmem:[#allocation77_spill] sm:$0xff] %v14051_v12  ;;  %8965 = vmatprep.subr.bf16.mxu0 %v11414_v56 }
 0x44b   :  { %9015 = vmatpush1.bf16.msra.mxu1 %v11409_v40 }
 0x44c   :  { %9016 = vmatprep.subr.bf16.mxu1 %v11417_v34 }
 0x44d   :  { %8966 = vmatpush1.bf16.msra.mxu0 %v11412_v28  ;;  %v11426_v28 = vld [vmem:[#allocation11 + $0x1b4] ss:$24 sps:$4 sm:$0xff]  }
 0x44e   :  { %8967 = vmatprep.subr.bf16.mxu0 %v11420_v30 }
 0x44f   :  { %9017 = vmatpush1.bf16.msra.mxu1 %v11415_v13 }
 0x450   :  { %9018 = vmatprep.subr.bf16.mxu1 %v11423_v45 }
 0x451   :  { %8968 = vmatpush1.bf16.msra.mxu0 %v11418_v36 }
 0x452   :  { %8969 = vmatprep.subr.bf16.mxu0 %v11426_v28 }
 0x453   :  { %9019 = vmatpush1.bf16.msra.mxu1 %v11421_v35 }
 0x454   :  { %9020 = vmatprep.subr.bf16.mxu1 %v11429_v22 }
 0x455   :  { %8970 = vmatpush1.bf16.msra.mxu0 %v11424_v53 }
 0x456   :  { %8971 = vmatprep.subr.bf16.mxu0 %v11432_v55 }
 0x46d   :  { %v6665_v11 = vpop.f32.mrb[84].mxu0  ;;  %v6728_v29 = vpop.f32.mrb[84].mxu1 }
 0x46e   :  { %v6667_v4 = vpop.f32.mrb[85].mxu0  ;;  %v6730_v37 = vpop.f32.mrb[85].mxu1 }
 0x46f   :  { %v6991_v10 = vcombine.low %v6665_v11, %v6667_v4  ;;  %v6992_v49 = vcombine.high %v6665_v11, %v6667_v4  ;;  %v6669_v58 = vpop.f32.mrb[86].mxu0  ;;  %v6993_v38 = vcombine.low %v6728_v29, %v6730_v37  ;;  %v6994_v21 = vcombine.high %v6728_v29, %v6730_v37  ;;  %v6732_v40 = vpop.f32.mrb[86].mxu1  ;;  %v11427_v29 = vld [vmem:[#allocation11 + $0x1b8] ss:$24 sps:$4 sm:$0xff]  }
 0x470   :  { %v6671_v56 = vpop.f32.mrb[87].mxu0  ;;  %v6734_v15 = vpop.f32.mrb[87].mxu1  ;;  %9021 = vmatpush1.bf16.msra.mxu1 %v11427_v29 }
 0x471   :  { %v7001_v34 = vrot.slane %v6991_v10, %v12446_v1  ;;  %v7008_v13 = vrot.slane %v6992_v49, %v12446_v1  ;;  %v7098_v30 = vcombine.low %v6669_v58, %v6671_v56  ;;  %v7099_v36 = vcombine.high %v6669_v58, %v6671_v56 }
 0x472   :  { %v7015_v11 = vrot.slane %v6993_v38, %v12446_v1  ;;  %v7022_v4 = vrot.slane %v6994_v21, %v12446_v1  ;;  %v7100_v45 = vcombine.low %v6732_v40, %v6734_v15  ;;  %v7101_v62 = vcombine.high %v6732_v40, %v6734_v15  ;;  %v11430_v15 = vld [vmem:[#allocation11 + $0x1e0] ss:$24 sps:$4 sm:$0xff]   ;;  %v11435_v40 = vld [vmem:[#allocation11 + $0x1ec] ss:$24 sps:$4 sm:$0xff]  }
 0x473   :  { %v7108_v35 = vrot.slane %v7098_v30, %v12446_v1  ;;  %v7115_v37 = vrot.slane %v7099_v36, %v12446_v1  ;;  %8972 = vmatpush1.bf16.msra.mxu0 %v11430_v15  ;;  %9022 = vmatprep.subr.bf16.mxu1 %v11435_v40 }
 0x474   :  { %v7023_v10 = vcombine.low %v7001_v34, %v7015_v11  ;;  %v7024_v49 = vcombine.high %v7001_v34, %v7015_v11  ;;  %v7025_v58 = vcombine.low %v7008_v13, %v7022_v4  ;;  %v7026_v56 = vcombine.high %v7008_v13, %v7022_v4  ;;  %9023 = vmatpush1.bf16.msra.mxu1 %v11433_v25 }
 0x475   :  { %v7122_v38 = vrot.slane %v7100_v45, %v12446_v1  ;;  %v7129_v21 = vrot.slane %v7101_v62, %v12446_v1  ;;  %v6675_v3 = vpop.f32.mrb[88].mxu0  ;;  %v6738_v53 = vpop.f32.mrb[88].mxu1  ;;  %8973 = vmatprep.subr.bf16.mxu0 %v11438_v24 }
 0x476   :  { %v14063_v28 = vrot.slane %v7023_v10, 9  ;;  %v14065_v30 = vrot.slane %v7024_v49, 7  ;;  %v14067_v36 = vrot.slane %v7025_v58, 7  ;;  %v14069_v22 = vrot.slane %v7026_v56, 7  ;;  %v6677_v34 = vpop.f32.mrb[89].mxu0  ;;  %v6740_v29 = vpop.f32.mrb[89].mxu1 }
 0x477   :  { %v7130_v13 = vcombine.low %v7108_v35, %v7122_v38  ;;  %v7131_v11 = vcombine.high %v7108_v35, %v7122_v38  ;;  %v7132_v4 = vcombine.low %v7115_v37, %v7129_v21  ;;  %v7133_v45 = vcombine.high %v7115_v37, %v7129_v21  ;;  %v6679_v62 = vpop.f32.mrb[90].mxu0  ;;  %v6742_v56 = vpop.f32.mrb[90].mxu1  ;;  %8974 = vmatpush1.bf16.msra.mxu0 %v11436_v33  ;;  %v11445_v33 = vld [vmem:[#allocation11 + $0x248] ss:$24 sps:$4 sm:$0xff]   ;;  %v11450_v10 = vld [vmem:[#allocation11 + $0x274] ss:$24 sps:$4 sm:$0xff]  }
 0x478   :  { %v7205_v14 = vcombine.low %v6675_v3, %v6677_v34  ;;  %v6681_v39 = vpop.f32.mrb[91].mxu0  ;;  %v6744_v38 = vpop.f32.mrb[91].mxu1  ;;  %v7206_v21 = vcombine.high %v6675_v3, %v6677_v34  ;;  %v7207_v0 = vcombine.low %v6738_v53, %v6740_v29  ;;  %v7208_v7 = vcombine.high %v6738_v53, %v6740_v29  ;;  %v11444_v53 = vld [vmem:[#allocation11 + $0x244] ss:$24 sps:$4 sm:$0xff]  }
 0x479   :  { %v14074_v26 = vrot.slane %v7130_v13, 7  ;;  %v14076_v55 = vrot.slane %v7131_v11, 7  ;;  %v14078_v35 = vrot.slane %v7132_v4, 7  ;;  %v14080_v37 = vrot.slane %v7133_v45, 7  ;;  %v11441_v45 = vld [vmem:[#allocation11 + $0x21c] ss:$24 sps:$4 sm:$0xff]   ;;  %8975 = vmatprep.subr.bf16.mxu0 %v11444_v53 }
 0x47a   :  { %v7215_v15 = vrot.slane %v7205_v14, %v12446_v1  ;;  %v7222_v19 = vrot.slane %v7206_v21, %v12446_v1  ;;  %v7229_v25 = vrot.slane %v7207_v0, %v12446_v1  ;;  %v7236_v14 = vrot.slane %v7208_v7, %v12446_v1  ;;  %v11442_v4 = vld [vmem:[#allocation11 + $0x240] ss:$24 sps:$4 sm:$0xff]   ;;  %v11447_v13 = vld [vmem:[#allocation11 + $0x24c] ss:$24 sps:$4 sm:$0xff]   ;;  %9024 = vmatprep.subr.bf16.mxu1 %v11441_v45 }
 0x47b   :  { %v7312_v3 = vcombine.low %v6679_v62, %v6681_v39  ;;  %v7313_v34 = vcombine.high %v6679_v62, %v6681_v39  ;;  %v7314_v29 = vcombine.low %v6742_v56, %v6744_v38  ;;  %v7315_v42 = vcombine.high %v6742_v56, %v6744_v38  ;;  %9025 = vmatpush1.bf16.msra.mxu1 %v11439_v41  ;;  %v11448_v41 = vld [vmem:[#allocation11 + $0x270] ss:$24 sps:$4 sm:$0xff]  }
 0x47c   :  { %v7237_v21 = vcombine.low %v7215_v15, %v7229_v25  ;;  %v7238_v32 = vcombine.high %v7215_v15, %v7229_v25  ;;  %v7239_v0 = vcombine.low %v7222_v19, %v7236_v14  ;;  %v7240_v6 = vcombine.high %v7222_v19, %v7236_v14  ;;  %9026 = vmatprep.subr.bf16.mxu1 %v11447_v13 }
 0x47d   :  { %v6685_v40 = vpop.f32.mrb[92].mxu0  ;;  %v6748_v7 = vpop.f32.mrb[92].mxu1  ;;  %v7322_v24 = vrot.slane %v7312_v3, %v12446_v1  ;;  %v7329_v39 = vrot.slane %v7313_v34, %v12446_v1  ;;  %v7336_v62 = vrot.slane %v7314_v29, %v12446_v1  ;;  %v7343_v56 = vrot.slane %v7315_v42, %v12446_v1  ;;  %8976 = vmatpush1.bf16.msra.mxu0 %v11442_v4  ;;  %v11451_v4 = vld [vmem:[#allocation11 + $0x278] ss:$24 sps:$4 sm:$0xff]  }
 0x47e   :  { %v6687_v58 = vpop.f32.mrb[93].mxu0  ;;  %v6750_v38 = vpop.f32.mrb[93].mxu1  ;;  %v14100_v59 = vrot.slane %v7237_v21, 7  ;;  %v14102_v15 = vrot.slane %v7238_v32, 7  ;;  %v14104_v19 = vrot.slane %v7239_v0, 7  ;;  %v14106_v45 = vrot.slane %v7240_v6, 9  ;;  %8977 = vmatprep.subr.bf16.mxu0 %v11450_v10 }
 0x47f   :  { %v14098_v11 = vpop.f32.mrb[94].mxu0  ;;  %v6752_v25 = vpop.f32.mrb[94].mxu1  ;;  %v7344_v3 = vcombine.low %v7322_v24, %v7336_v62  ;;  %v7345_v34 = vcombine.high %v7322_v24, %v7336_v62  ;;  %v7346_v42 = vcombine.low %v7329_v39, %v7343_v56  ;;  %v7347_v29 = vcombine.high %v7329_v39, %v7343_v56  ;;  %v11453_v6 = vld [vmem:[#allocation11 + $0x27c] ss:$24 sps:$4 sm:$0xff]   ;;  %9027 = vmatpush1.bf16.msra.mxu1 %v11445_v33  ;;  %v11454_v10 = vld [vmem:[#allocation11 + $0x2a0] ss:$24 sps:$4 sm:$0xff]  }
 0x480   :  { %v6691_v14 = vpop.f32.mrb[95].mxu0  ;;  %v6754_v49 = vpop.f32.mrb[95].mxu1  ;;  %v7610_v21 = vrot.slane %v14100_v59, 2  ;;  %v7613_v32 = vrot.slane %v14102_v15, 2  ;;  %v7420_v0 = vcombine.low %v6685_v40, %v6687_v58  ;;  %v7421_v57 = vcombine.high %v6685_v40, %v6687_v58  ;;  %9028 = vmatprep.subr.bf16.mxu1 %v11453_v6  ;;  %v11456_v58 = vld [vmem:[#allocation11 + $0x2a4] ss:$24 sps:$4 sm:$0xff]  }
 0x481   :  { %v14110_v50 = vrot.slane %v7344_v3, 7  ;;  %v14112_v12 = vrot.slane %v7345_v34, 7  ;;  %v14114_v13 = vrot.slane %v7346_v42, 7  ;;  %v14116_v53 = vrot.slane %v7347_v29, 7  ;;  %v11459_v40 = vld [vmem:[#allocation11 + $0x2ac] ss:$24 sps:$4 sm:$0xff]   ;;  %8978 = vmatpush1.bf16.msra.mxu0 %v11448_v41 }
 0x482   :  { %v7430_v24 = vrot.slane %v7420_v0, %v12446_v1  ;;  %v7437_v39 = vrot.slane %v7421_v57, %v12446_v1  ;;  %v7422_v62 = vcombine.low %v6748_v7, %v6750_v38  ;;  %v7423_v56 = vcombine.high %v6748_v7, %v6750_v38  ;;  %8979 = vmatprep.subr.bf16.mxu0 %v11456_v58  ;;  %v11462_v38 = vld [vmem:[#allocation11 + $0x2d4] ss:$24 sps:$4 sm:$0xff]  }
 0x483   :  { %v7509_v57 = vcombine.low %v14098_v11, %v6691_v14  ;;  %v7510_v7 = vcombine.low %v6752_v25, %v6754_v49  ;;  %v15204_v6 = vrot.slane %v14065_v30, 2  ;;  %v15205_v29 = vrot.slane %v14067_v36, 2  ;;  %9029 = vmatpush1.bf16.msra.mxu1 %v11451_v4  ;;  %v11465_v42 = vld [vmem:[#allocation11 + $0x2dc] ss:$24 sps:$4 sm:$0xff]  }
 0x484   :  { %v7444_v33 = vrot.slane %v7422_v62, %v12446_v1  ;;  %v7451_v0 = vrot.slane %v7423_v56, %v12446_v1  ;;  %v15206_v62 = vcombine.low %v13950_v43, %v13956_v54  ;;  %v15207_v49 = vsel %vm12742_vm8, %v14063_v28, %v14065_v30  ;;  %9030 = vmatprep.subr.bf16.mxu1 %v11459_v40 }
 0x485   :  { %v7591_v34 = vsel %vm12742_vm8, %v15204_v6, %v14067_v36  ;;  %v7594_v41 = vsel %vm12742_vm8, %v15205_v29, %v14069_v22  ;;  %v15208_v25 = vrot.slane %v14069_v22, 2  ;;  %v11457_v36 = vld [vmem:[#allocation11 + $0x2a8] ss:$24 sps:$4 sm:$0xff]   ;;  %v7517_v3 = vrot.slane %v7509_v57, %v12446_v1  ;;  %8980 = vmatpush1.bf16.msra.mxu0 %v11454_v10  ;;  %v11463_v10 = vld [vmem:[#allocation11 + $0x2d8] ss:$24 sps:$4 sm:$0xff]  }
 0x486   :  { %v14145_v11 = vadd.f32 %v15207_v49, %v15206_v62  ;;  %v7452_v56 = vcombine.low %v7430_v24, %v7444_v33  ;;  %v7453_v58 = vcombine.high %v7430_v24, %v7444_v33  ;;  %v7454_v29 = vcombine.low %v7437_v39, %v7451_v0  ;;  %v11460_v24 = vld [vmem:[#allocation11 + $0x2d0] ss:$24 sps:$4 sm:$0xff]   ;;  %8981 = vmatprep.subr.bf16.mxu0 %v11462_v38 }
 0x487   :  { %v7597_v14 = vsel %vm12742_vm8, %v15208_v25, %v14074_v26  ;;  %v7455_v6 = vcombine.high %v7437_v39, %v7451_v0  ;;  %v7524_v28 = vrot.slane %v7510_v7, %v12446_v1  ;;  %v15209_v30 = vcombine.high %v13950_v43, %v13956_v54  ;;  %9031 = vmatpush1.bf16.msra.mxu1 %v11457_v36  ;;  %v11468_v36 = vld [vmem:[#allocation11 + $0x14] ss:$24 sps:$4 sm:$0xff]  }
 0x488   :  { %v15210_v22 = vcombine.low %v13953_v20, %v13959_v44  ;;  %v7630_v33 = vrot.slane %v7452_v56, 7  ;;  %v7633_v39 = vrot.slane %v7453_v58, 7  ;;  %v7636_v40 = vrot.slane %v7454_v29, 7  ;;  %9032 = vmatprep.subr.bf16.mxu1 %v11465_v42 }
 0x489   :  { %v14157_v62 = vadd.f32 %v7591_v34, %v15209_v30  ;;  %v7639_v0 = vrot.slane %v7455_v6, 7  ;;  %v7525_v57 = vcombine.low %v7517_v3, %v7524_v28  ;;  %v7526_v49 = vcombine.high %v7517_v3, %v7524_v28  ;;  %8982 = vmatpush1.bf16.msra.mxu0 %v11460_v24 }
 0x48a   :  { %v14162_v4 = vadd.f32 %v7594_v41, %v15210_v22  ;;  %v15211_v7 = vrot.slane %v14074_v26, 2  ;;  %v15212_v54 = vrot.slane %v14076_v55, 2  ;;  %v7632_v41 = vrot.slane %v7630_v33, 2  ;;  %9053 = vmatprep.subr.bf16.mxu0 %v11468_v36 }
 0x48b   :  { %v7635_v25 = vrot.slane %v7633_v39, 2  ;;  %v7638_v56 = vrot.slane %v7636_v40, 2  ;;  %v7641_v38 = vrot.slane %v7639_v0, 2  ;;  %v7642_v3 = vrot.slane %v7525_v57, 7  ;;  %9033 = vmatpush1.bf16.msra.mxu1 %v11463_v10 }
 0x48c   :  { %v7600_v43 = vsel %vm12742_vm8, %v15211_v7, %v14076_v55  ;;  %v7603_v34 = vsel %vm12742_vm8, %v15212_v54, %v14078_v35  ;;  %v7645_v58 = vrot.slane %v7526_v49, 7  ;;  %v15213_v26 = vrot.slane %v14078_v35, 2 }
 0x48d   :  { %v15214_v55 = vcombine.high %v13953_v20, %v13959_v44  ;;  %v15215_v28 = vcombine.low %v13970_v46, %v13976_v47  ;;  %v15216_v42 = vcombine.high %v13970_v46, %v13976_v47  ;;  %v15217_v35 = vcombine.low %v13973_v5, %v13979_v60 }
 0x48e   :  { %v7606_v29 = vsel %vm12742_vm8, %v15213_v26, %v14080_v37  ;;  %v15218_v20 = vrot.slane %v14080_v37, 2  ;;  %v7612_v46 = vsel %vm12742_vm8, %v7610_v21, %v14102_v15  ;;  %v7615_v47 = vsel %vm12742_vm8, %v7613_v32, %v14104_v19 }
 0x48f   :  { %v14182_v6 = vadd.f32 %v7597_v14, %v15214_v55  ;;  %v14187_v30 = vadd.f32 %v7600_v43, %v15215_v28  ;;  %v14192_v22 = vadd.f32 %v7603_v34, %v15216_v42  ;;  %v14197_v57 = vadd.f32 %v7606_v29, %v15217_v35  ;;  %v7787_v28 = vld [vmem:[#allocation10] sm:$0x3]  ;;  %v15239_v42 = vld [vmem:[#allocation56_spill] sm:$0xff] }
 0x490   :  { %v7609_v44 = vsel %vm12742_vm8, %v15218_v20, %v14100_v59  ;;  %v7644_v14 = vrot.slane %v7642_v3, 2  ;;  %v15219_v24 = vcombine.high %v13973_v5, %v13979_v60  ;;  %v15220_v49 = vcombine.low %v13990_v23, %v13996_v27  ;;  %v15240_v20 = vld [vmem:[#allocation35_spill] sm:$0xff] }
 0x491   :  { %v15221_v21 = vcombine.high %v13990_v23, %v13996_v27  ;;  %v7619_v15 = vsel %vm12742_vm8, %v14106_v45, %v14110_v50  ;;  %v15222_v5 = vrot.slane %v14110_v50, 2  ;;  %v15223_v19 = vrot.slane %v14112_v12, 2 }
 0x492   :  { %v14217_v37 = vadd.f32 %v7609_v44, %v15219_v24  ;;  %v14222_v59 = vadd.f32 %v7612_v46, %v15220_v49  ;;  %v15224_v23 = vrot.slane %v14114_v13, 2  ;;  %v15225_v45 = vcombine.high %v13993_v52, %v13999_v18 }
 0x493   :  { %v14227_v7 = vadd.f32 %v7615_v47, %v15221_v21  ;;  %v7622_v60 = vsel %vm12742_vm8, %v15222_v5, %v14112_v12  ;;  %v7625_v32 = vsel %vm12742_vm8, %v15223_v19, %v14114_v13  ;;  %v15226_v50 = vcombine.low %v14008_v2, %v14014_v8 }
 0x494   :  { %v7628_v27 = vsel %vm12742_vm8, %v15224_v23, %v14116_v53  ;;  %v14251_v43 = vadd.f32 %v7619_v15, %v15225_v45  ;;  %v15227_v12 = vcombine.high %v14008_v2, %v14014_v8  ;;  %v15228_v13 = vcombine.low %v14011_v16, %v14017_v17 }
 0x495   :  { %v14256_v54 = vadd.f32 %v7622_v60, %v15226_v50  ;;  %v15229_v26 = vrot.slane %v14116_v53, 2  ;;  %v7634_v18 = vsel %vm12742_vm8, %v7632_v41, %v7633_v39  ;;  %v7637_v29 = vsel %vm12742_vm8, %v7635_v25, %v7636_v40 }
 0x496   :  { %v14261_v34 = vadd.f32 %v7625_v32, %v15227_v12  ;;  %v14266_v10 = vadd.f32 %v7628_v27, %v15228_v13  ;;  %v7640_v2 = vsel %vm12742_vm8, %v7638_v56, %v7639_v0  ;;  %v15230_v8 = vcombine.high %v14011_v16, %v14017_v17 }
 0x497   :  { %v7631_v52 = vsel %vm12742_vm8, %v15229_v26, %v7630_v33  ;;  %v15231_v53 = vcombine.low %v14028_v9, %v14034_v61  ;;  %v15232_v33 = vcombine.high %v14028_v9, %v14034_v61  ;;  %v15233_v40 = vcombine.low %v14031_v63, %v14037_v48  ;;  %v15236_v9 = vld [vmem:[#allocation77_spill] sm:$0xff] }
 0x498   :  { %v14281_v55 = vadd.f32 %v7631_v52, %v15230_v8  ;;  %v7643_v16 = vsel %vm12742_vm8, %v7641_v38, %v7642_v3  ;;  %v7646_v17 = vsel %vm12742_vm8, %v7644_v14, %v7645_v58  ;;  %v15234_v0 = vcombine.high %v14031_v63, %v14037_v48 }
 0x499   :  { %v14286_v36 = vadd.f32 %v7634_v18, %v15231_v53  ;;  %v14291_v39 = vadd.f32 %v7637_v29, %v15232_v33  ;;  %v14296_v41 = vadd.f32 %v7640_v2, %v15233_v40  ;;  %v15237_v61 = vcombine.low %v14040_v51, %v15236_v9 }
 0x49a   :  { %v14305_v25 = vadd.f32 %v7643_v16, %v15234_v0  ;;  %v7792_v35 = vrot.slane %v7787_v28, %v15239_v42  ;;  %v15241_v44 = vsub.s32 1, %v15240_v20 }
 0x49b   :  { %v14310_v56 = vadd.f32 %v7646_v17, %v15237_v61 }
 0x49c   :  { %15235 = vst [vmem:[#allocation78_spill] sm:$0xff] %v14305_v25  ;;  %v7796_v46 = vrot.slane %v7787_v28, %v15241_v44 }
 0x49d   :  { %15238 = vst [vmem:[#allocation79_spill] sm:$0xff] %v14310_v56 }
 0x49e   :  { %v7797_v38 = vcombine.low %v7792_v35, %v7796_v46  ;;  %v7798_v3 = vcombine.high %v7792_v35, %v7796_v46 }
 0x4a0   :  { %v14316_v51 = vrot.slane %v7797_v38, %v12446_v1  ;;  %v14319_v5 = vrot.slane %v7798_v3, %v12446_v1 }
 0x4a2   :  { %v14330_v40 = vcombine.high %v14316_v51, %v14316_v51  ;;  %v14335_v17 = vcombine.high %v14319_v5, %v14319_v5 }
 0x4ae   :  { %v6791_v47 = vpop.f32.mrb[96].mxu0  ;;  %v6854_v58 = vpop.f32.mrb[96].mxu1 }
 0x4af   :  { %v6793_v14 = vpop.f32.mrb[97].mxu0  ;;  %v6856_v48 = vpop.f32.mrb[97].mxu1 }
 0x4b0   :  { %v7027_v24 = vcombine.low %v6791_v47, %v6793_v14  ;;  %v7028_v63 = vcombine.high %v6791_v47, %v6793_v14  ;;  %v6795_v49 = vpop.f32.mrb[98].mxu0  ;;  %v7029_v21 = vcombine.low %v6854_v58, %v6856_v48  ;;  %v7030_v15 = vcombine.high %v6854_v58, %v6856_v48  ;;  %v6858_v60 = vpop.f32.mrb[98].mxu1 }
 0x4b1   :  { %v6797_v19 = vpop.f32.mrb[99].mxu0  ;;  %v6860_v50 = vpop.f32.mrb[99].mxu1 }
 0x4b2   :  { %v7037_v32 = vrot.slane %v7027_v24, %v12446_v1  ;;  %v7044_v23 = vrot.slane %v7028_v63, %v12446_v1  ;;  %v7134_v27 = vcombine.low %v6795_v49, %v6797_v19  ;;  %v7135_v45 = vcombine.high %v6795_v49, %v6797_v19 }
 0x4b3   :  { %v7051_v12 = vrot.slane %v7029_v21, %v12446_v1  ;;  %v7058_v13 = vrot.slane %v7030_v15, %v12446_v1  ;;  %v7136_v26 = vcombine.low %v6858_v60, %v6860_v50  ;;  %v7137_v52 = vcombine.high %v6858_v60, %v6860_v50 }
 0x4b4   :  { %v7144_v18 = vrot.slane %v7134_v27, %v12446_v1  ;;  %v7151_v29 = vrot.slane %v7135_v45, %v12446_v1 }
 0x4b5   :  { %v7059_v2 = vcombine.high %v7037_v32, %v7051_v12  ;;  %v7060_v8 = vcombine.low %v7044_v23, %v7058_v13  ;;  %v7061_v53 = vcombine.high %v7044_v23, %v7058_v13  ;;  %v7158_v33 = vrot.slane %v7136_v26, %v12446_v1 }
 0x4b6   :  { %v7165_v16 = vrot.slane %v7137_v52, %v12446_v1  ;;  %v6801_v0 = vpop.f32.mrb[100].mxu0  ;;  %v14340_v20 = vpop.f32.mrb[100].mxu1 }
 0x4b7   :  { %v7687_v9 = vadd.f32 %v14145_v11, %v7059_v2  ;;  %v7688_v61 = vadd.f32 %v14157_v62, %v7060_v8  ;;  %v7689_v28 = vadd.f32 %v14162_v4, %v7061_v53  ;;  %v7166_v35 = vcombine.low %v7144_v18, %v7158_v33  ;;  %v6803_v44 = vpop.f32.mrb[101].mxu0  ;;  %v14342_v58 = vpop.f32.mrb[101].mxu1 }
 0x4b8   :  { %v7167_v46 = vcombine.high %v7144_v18, %v7158_v33  ;;  %v7168_v38 = vcombine.low %v7151_v29, %v7165_v16  ;;  %v7169_v3 = vcombine.high %v7151_v29, %v7165_v16  ;;  %v7241_v47 = vcombine.low %v6801_v0, %v6803_v44  ;;  %v14344_v14 = vpop.f32.mrb[102].mxu0  ;;  %v14347_v62 = vpop.f32.mrb[102].mxu1 }
 0x4b9   :  { %v7727_v24 = vrot.slane %v7687_v9, 4  ;;  %v7728_v63 = vrot.slane %v7688_v61, 4  ;;  %v7729_v48 = vrot.slane %v7689_v28, 4  ;;  %v7690_v11 = vadd.f32 %v14182_v6, %v7166_v35  ;;  %v14349_v4 = vpop.f32.mrb[103].mxu0  ;;  %v14354_v19 = vpop.f32.mrb[103].mxu1 }
 0x4ba   :  { %v7691_v49 = vadd.f32 %v14187_v30, %v7167_v46  ;;  %v7692_v21 = vadd.f32 %v14192_v22, %v7168_v38  ;;  %v7693_v15 = vadd.f32 %v14197_v57, %v7169_v3  ;;  %v7242_v60 = vcombine.high %v6801_v0, %v6803_v44 }
 0x4bb   :  { %v7767_v32 = vmax.f32 %v7687_v9, %v7727_v24  ;;  %v7768_v23 = vmax.f32 %v7688_v61, %v7728_v63  ;;  %v7769_v27 = vmax.f32 %v7689_v28, %v7729_v48  ;;  %v7730_v45 = vrot.slane %v7690_v11, 4 }
 0x4bc   :  { %v7731_v50 = vrot.slane %v7691_v49, 4  ;;  %v7732_v12 = vrot.slane %v7692_v21, 4  ;;  %v7733_v6 = vrot.slane %v7693_v15, 4  ;;  %v14357_v13 = vrot.slane %v7241_v47, %v12446_v1 }
 0x4bd   :  { %v7819_v26 = vadd.f32 %v14316_v51, %v7767_v32  ;;  %v7820_v30 = vadd.f32 %v14330_v40, %v7768_v23  ;;  %v7821_v22 = vadd.f32 %v14319_v5, %v7769_v27  ;;  %v7770_v57 = vmax.f32 %v7690_v11, %v7730_v45 }
 0x4be   :  { %v7771_v52 = vmax.f32 %v7691_v49, %v7731_v50  ;;  %v7772_v18 = vmax.f32 %v7692_v21, %v7732_v12  ;;  %v7773_v29 = vmax.f32 %v7693_v15, %v7733_v6  ;;  %v14363_v2 = vrot.slane %v7242_v60, %v12446_v1  ;;  %v14365_v8 = vpop.f32.mrb[104].mxu0  ;;  %v14368_v9 = vpop.f32.mrb[104].mxu1 }
 0x4bf   :  { %v7839_v53 = vmax.f32 %v7819_v26, 0.0  ;;  %v7840_v33 = vmax.f32 %v7820_v30, 0.0  ;;  %v7841_v16 = vmax.f32 %v7821_v22, 0.0  ;;  %v7822_v0 = vadd.f32 %v14335_v17, %v7770_v57  ;;  %v14370_v61 = vpop.f32.mrb[105].mxu0  ;;  %v14377_v38 = vpop.f32.mrb[105].mxu1 }
 0x4c0   :  { %v7823_v28 = vadd.f32 %v14316_v51, %v7771_v52  ;;  %v7824_v35 = vadd.f32 %v14330_v40, %v7772_v18  ;;  %v7825_v44 = vadd.f32 %v14319_v5, %v7773_v29  ;;  %v7243_v46 = vcombine.low %v14340_v20, %v14342_v58  ;;  %v14379_v3 = vpop.f32.mrb[106].mxu0  ;;  %v14381_v11 = vpop.f32.mrb[106].mxu1  ;;  %v15242_v52 = vld [vmem:[#allocation71_spill] sm:$0xff] }
 0x4c1   :  { %v10634_v47 = vrot.slane %v7839_v53, 9  ;;  %v10635_v24 = vrot.slane %v7840_v33, 9  ;;  %v10636_v63 = vrot.slane %v7841_v16, 9  ;;  %v7842_v48 = vmax.f32 %v7822_v0, 0.0  ;;  %v14383_v49 = vpop.f32.mrb[107].mxu0  ;;  %v14387_v23 = vpop.f32.mrb[107].mxu1 }
 0x4c2   :  { %v7843_v21 = vmax.f32 %v7823_v28, 0.0  ;;  %v7844_v15 = vmax.f32 %v7824_v35, 0.0  ;;  %v7845_v60 = vmax.f32 %v7825_v44, 0.0  ;;  %v7244_v32 = vcombine.high %v14340_v20, %v14342_v58 }
 0x4c3   :  { %v7939_v27 = vmax.f32 %v7839_v53, %v10634_v47  ;;  %v7940_v45 = vmax.f32 %v7840_v33, %v10635_v24  ;;  %v7941_v50 = vmax.f32 %v7841_v16, %v10636_v63  ;;  %v10637_v12 = vrot.slane %v7842_v48, 9 }
 0x4c4   :  { %v10638_v6 = vrot.slane %v7843_v21, 9  ;;  %v10639_v26 = vrot.slane %v7844_v15, 9  ;;  %v10640_v30 = vrot.slane %v7845_v60, 9  ;;  %v7265_v22 = vrot.slane %v7243_v46, %v12446_v1 }
 0x4c5   :  { %v7982_v57 = vrot.slane %v7939_v27, %v15239_v42  ;;  %v7986_v18 = vrot.slane %v7939_v27, %v15242_v52  ;;  %v7990_v29 = vrot.slane %v7940_v45, %v15239_v42  ;;  %v7994_v0 = vrot.slane %v7940_v45, %v15242_v52 }
 0x4c6   :  { %v7998_v20 = vrot.slane %v7941_v50, %v15239_v42  ;;  %v8002_v58 = vrot.slane %v7941_v50, %v15242_v52  ;;  %v7942_v53 = vmax.f32 %v7842_v48, %v10637_v12  ;;  %v7943_v33 = vmax.f32 %v7843_v21, %v10638_v6 }
 0x4c7   :  { %v8179_v16 = vpack.c.bf16 %v7982_v57, %v7982_v57  ;;  %v8180_v28 = vpack.c.bf16 %v7986_v18, %v7986_v18  ;;  %v8181_v35 = vpack.c.bf16 %v7990_v29, %v7990_v29  ;;  %v8182_v44 = vpack.c.bf16 %v7994_v0, %v7994_v0 }
 0x4c8   :  { %v8183_v47 = vpack.c.bf16 %v7998_v20, %v7998_v20  ;;  %v8184_v46 = vpack.c.bf16 %v8002_v58, %v8002_v58  ;;  %v14396_v24 = vmax.f32 %v7844_v15, %v10639_v26  ;;  %v14398_v63 = vmax.f32 %v7845_v60, %v10640_v30 }
 0x4c9   :  { %v8355_v27 = vunpack.c.l.b16 %v8179_v16  ;;  %v14400_v31 = vunpack.c.l.b16 %v8180_v28  ;;  %v8357_v45 = vunpack.c.l.b16 %v8181_v35  ;;  %v14402_v56 = vunpack.c.l.b16 %v8182_v44 }
 0x4ca   :  { %v8359_v25 = vunpack.c.l.b16 %v8183_v47  ;;  %v14404_v50 = vunpack.c.l.b16 %v8184_v46  ;;  %v8006_v48 = vrot.slane %v7942_v53, %v15239_v42  ;;  %v8010_v21 = vrot.slane %v7942_v53, %v15242_v52 }
 0x4cb   :  { %v8395_v12 = vrot.slane %v8357_v45, 7  ;;  %v8409_v6 = vrot.slane %v14402_v56, 7  ;;  %v8014_v15 = vrot.slane %v7943_v33, %v15239_v42  ;;  %v14411_v60 = vrot.slane %v7943_v33, %v15242_v52 }
 0x4cc   :  { %v8397_v26 = vrot.slane %v8359_v25, 6  ;;  %v8411_v30 = vrot.slane %v14404_v50, 6  ;;  %v8022_v57 = vrot.slane %v14396_v24, %v15239_v42  ;;  %v8030_v18 = vrot.slane %v14398_v63, %v15239_v42 }
 0x4cd   :  { %v8396_v29 = vsel %vm5378_vm9, %v8395_v12, %v8355_v27  ;;  %v8185_v0 = vpack.c.bf16 %v8006_v48, %v8006_v48  ;;  %v8186_v20 = vpack.c.bf16 %v8010_v21, %v8010_v21  ;;  %v8187_v58 = vpack.c.bf16 %v8014_v15, %v8014_v15 }
 0x4ce   :  { %v14420_v53 = vsel %vm3649_vm3, %v8397_v26, %v8396_v29  ;;  %v8188_v33 = vpack.c.bf16 %v14411_v60, %v14411_v60  ;;  %v8189_v25 = vpack.c.bf16 %v8022_v57, %v8022_v57  ;;  %v8191_v16 = vpack.c.bf16 %v8030_v18, %v8030_v18 }
 0x4cf   :  { %v14424_v28 = vunpack.c.l.b16 %v8185_v0  ;;  %v14426_v35 = vunpack.c.l.b16 %v8186_v20  ;;  %v14428_v44 = vunpack.c.l.b16 %v8187_v58  ;;  %v7272_v47 = vrot.slane %v7244_v32, %v12446_v1 }
 0x4d0   :  { %v14431_v46 = vunpack.c.l.b16 %v8189_v25  ;;  %v14433_v27 = vunpack.c.l.b16 %v8191_v16  ;;  %v7273_v45 = vcombine.low %v14357_v13, %v7265_v22  ;;  %v7274_v48 = vcombine.high %v14357_v13, %v7265_v22 }
 0x4d1   :  { %v8413_v15 = vrot.slane %v14426_v35, 5  ;;  %v7275_v26 = vcombine.low %v14363_v2, %v7272_v47  ;;  %v7348_v13 = vcombine.low %v14344_v14, %v14349_v4  ;;  %v7349_v22 = vcombine.high %v14344_v14, %v14349_v4 }
 0x4d2   :  { %v7694_v18 = vadd.f32 %v14217_v37, %v7273_v45  ;;  %v7695_v29 = vadd.f32 %v14222_v59, %v7274_v48  ;;  %v7350_v20 = vcombine.low %v14347_v62, %v14354_v19  ;;  %v7351_v25 = vcombine.high %v14347_v62, %v14354_v19 }
 0x4d3   :  { %v7696_v0 = vadd.f32 %v14227_v7, %v7275_v26  ;;  %v7456_v37 = vcombine.low %v14365_v8, %v14370_v61  ;;  %v7358_v7 = vrot.slane %v7348_v13, %v12446_v1  ;;  %v7365_v16 = vrot.slane %v7349_v22, %v12446_v1 }
 0x4d4   :  { %v7734_v2 = vrot.slane %v7694_v18, 4  ;;  %v7735_v58 = vrot.slane %v7695_v29, 4  ;;  %v7372_v47 = vrot.slane %v7350_v20, %v12446_v1  ;;  %v7379_v4 = vrot.slane %v7351_v25, %v12446_v1 }
 0x4d5   :  { %v7736_v59 = vrot.slane %v7696_v0, 4  ;;  %v7457_v48 = vcombine.high %v14365_v8, %v14370_v61  ;;  %v14463_v19 = vrot.slane %v7456_v37, %v12446_v1 }
 0x4d6   :  { %v7774_v45 = vmax.f32 %v7694_v18, %v7734_v2  ;;  %v7775_v14 = vmax.f32 %v7695_v29, %v7735_v58  ;;  %v7380_v32 = vcombine.low %v7358_v7, %v7372_v47  ;;  %v7381_v62 = vcombine.high %v7358_v7, %v7372_v47 }
 0x4d7   :  { %v7776_v26 = vmax.f32 %v7696_v0, %v7736_v59  ;;  %v7382_v22 = vcombine.low %v7365_v16, %v7379_v4  ;;  %v7383_v20 = vcombine.high %v7365_v16, %v7379_v4  ;;  %v14473_v8 = vrot.slane %v7457_v48, %v12446_v1 }
 0x4d8   :  { %v14466_v57 = vadd.f32 %v14335_v17, %v7774_v45  ;;  %v7827_v13 = vadd.f32 %v14316_v51, %v7775_v14  ;;  %v7697_v29 = vadd.f32 %v14251_v43, %v7380_v32  ;;  %v7698_v2 = vadd.f32 %v14256_v54, %v7381_v62 }
 0x4d9   :  { %v7828_v18 = vadd.f32 %v14330_v40, %v7776_v26  ;;  %v7699_v58 = vadd.f32 %v14261_v34, %v7382_v22  ;;  %v7700_v25 = vadd.f32 %v14266_v10, %v7383_v20  ;;  %v7458_v16 = vcombine.low %v14368_v9, %v14377_v38 }
 0x4da   :  { %v7846_v61 = vmax.f32 %v14466_v57, 0.0  ;;  %v7847_v0 = vmax.f32 %v7827_v13, 0.0  ;;  %v7737_v59 = vrot.slane %v7697_v29, 4  ;;  %v7738_v7 = vrot.slane %v7698_v2, 4 }
 0x4db   :  { %v7848_v37 = vmax.f32 %v7828_v18, 0.0  ;;  %v7739_v32 = vrot.slane %v7699_v58, 4  ;;  %v7740_v47 = vrot.slane %v7700_v25, 4  ;;  %v7459_v34 = vcombine.high %v14368_v9, %v14377_v38 }
 0x4dc   :  { %v14482_v43 = vrot.slane %v7846_v61, 9  ;;  %v10642_v54 = vrot.slane %v7847_v0, 9  ;;  %v7777_v14 = vmax.f32 %v7697_v29, %v7737_v59  ;;  %v7778_v4 = vmax.f32 %v7698_v2, %v7738_v7 }
 0x4dd   :  { %v10643_v45 = vrot.slane %v7848_v37, 9  ;;  %v7779_v48 = vmax.f32 %v7699_v58, %v7739_v32  ;;  %v7780_v26 = vmax.f32 %v7700_v25, %v7740_v47  ;;  %v14487_v62 = vrot.slane %v7458_v16, %v12446_v1 }
 0x4de   :  { %v7947_v10 = vmax.f32 %v7847_v0, %v10642_v54  ;;  %v7829_v22 = vadd.f32 %v14316_v51, %v7777_v14  ;;  %v7830_v20 = vadd.f32 %v14330_v40, %v7778_v4  ;;  %v14492_v18 = vrot.slane %v7459_v34, %v12446_v1 }
 0x4df   :  { %v7948_v13 = vmax.f32 %v7848_v37, %v10643_v45  ;;  %v7831_v9 = vadd.f32 %v14319_v5, %v7779_v48  ;;  %v7832_v38 = vadd.f32 %v14335_v17, %v7780_v26 }
 0x4e0   :  { %v8046_v29 = vrot.slane %v7947_v10, %v15239_v42  ;;  %v8050_v2 = vrot.slane %v7947_v10, %v15242_v52  ;;  %v7849_v25 = vmax.f32 %v7829_v22, 0.0  ;;  %v7850_v37 = vmax.f32 %v7830_v20, 0.0 }
 0x4e1   :  { %v8054_v0 = vrot.slane %v7948_v13, %v15239_v42  ;;  %v8058_v58 = vrot.slane %v7948_v13, %v15242_v52  ;;  %v7851_v16 = vmax.f32 %v7831_v9, 0.0  ;;  %v7852_v54 = vmax.f32 %v7832_v38, 0.0 }
 0x4e2   :  { %v8195_v59 = vpack.c.bf16 %v8046_v29, %v8046_v29  ;;  %v8196_v7 = vpack.c.bf16 %v8050_v2, %v8050_v2  ;;  %v10644_v45 = vrot.slane %v7849_v25, 9  ;;  %v10645_v14 = vrot.slane %v7850_v37, 9 }
 0x4e3   :  { %v8197_v32 = vpack.c.bf16 %v8054_v0, %v8054_v0  ;;  %v8198_v47 = vpack.c.bf16 %v8058_v58, %v8058_v58  ;;  %v10646_v10 = vrot.slane %v7851_v16, 9  ;;  %v10647_v48 = vrot.slane %v7852_v54, 9 }
 0x4e4   :  { %v8371_v4 = vunpack.c.l.b16 %v8195_v59  ;;  %v14500_v34 = vunpack.c.l.b16 %v8196_v7  ;;  %v7949_v21 = vmax.f32 %v7849_v25, %v10644_v45  ;;  %v7950_v13 = vmax.f32 %v7850_v37, %v10645_v14 }
 0x4e5   :  { %v8373_v26 = vunpack.c.l.b16 %v8197_v32  ;;  %v14502_v12 = vunpack.c.l.b16 %v8198_v47  ;;  %v7951_v22 = vmax.f32 %v7851_v16, %v10646_v10  ;;  %v7952_v20 = vmax.f32 %v7852_v54, %v10647_v48 }
 0x4e6   :  { %v7488_v29 = vcombine.low %v14463_v19, %v14487_v62  ;;  %v7489_v2 = vcombine.high %v14463_v19, %v14487_v62  ;;  %v8062_v0 = vrot.slane %v7949_v21, %v15239_v42  ;;  %v8066_v58 = vrot.slane %v7949_v21, %v15242_v52 }
 0x4e7   :  { %v8423_v9 = vrot.slane %v8373_v26, 7  ;;  %v8437_v38 = vrot.slane %v14502_v12, 7  ;;  %v8070_v59 = vrot.slane %v7950_v13, %v15239_v42  ;;  %v8074_v25 = vrot.slane %v7950_v13, %v15242_v52 }
 0x4e8   :  { %v8078_v37 = vrot.slane %v7951_v22, %v15239_v42  ;;  %v14515_v7 = vrot.slane %v7951_v22, %v15242_v52  ;;  %v8086_v19 = vrot.slane %v7952_v20, %v15239_v42  ;;  %v8199_v62 = vpack.c.bf16 %v8062_v0, %v8062_v0 }
 0x4e9   :  { %v8424_v16 = vsel %vm5378_vm9, %v8423_v9, %v8371_v4  ;;  %v8200_v54 = vpack.c.bf16 %v8066_v58, %v8066_v58  ;;  %v8201_v32 = vpack.c.bf16 %v8070_v59, %v8070_v59  ;;  %v8202_v47 = vpack.c.bf16 %v8074_v25, %v8074_v25 }
 0x4ea   :  { %v8203_v45 = vpack.c.bf16 %v8078_v37, %v8078_v37  ;;  %v8204_v21 = vpack.c.bf16 %v14515_v7, %v14515_v7  ;;  %v8205_v14 = vpack.c.bf16 %v8086_v19, %v8086_v19  ;;  %v8375_v10 = vunpack.c.l.b16 %v8199_v62 }
 0x4eb   :  { %v14521_v48 = vunpack.c.l.b16 %v8200_v54  ;;  %v7490_v26 = vcombine.low %v14473_v8, %v14492_v18  ;;  %v14525_v13 = vunpack.c.l.b16 %v8201_v32  ;;  %v14527_v4 = vunpack.c.l.b16 %v8202_v47 }
 0x4ec   :  { %v14529_v22 = vunpack.c.l.b16 %v8203_v45  ;;  %v7491_v9 = vcombine.high %v14473_v8, %v14492_v18  ;;  %v14533_v0 = vunpack.c.l.b16 %v8205_v14  ;;  %v8425_v58 = vrot.slane %v8375_v10, 6 }
 0x4ed   :  { %v8439_v59 = vrot.slane %v14521_v48, 6  ;;  %v7701_v25 = vadd.f32 %v14281_v55, %v7488_v29  ;;  %v8441_v62 = vrot.slane %v14527_v4, 5  ;;  %v7702_v54 = vadd.f32 %v14286_v36, %v7489_v2 }
 0x4ee   :  { %v14542_v32 = vsel %vm3649_vm3, %v8425_v58, %v8424_v16  ;;  %v7703_v18 = vadd.f32 %v14291_v39, %v7490_v26  ;;  %v7704_v47 = vadd.f32 %v14296_v41, %v7491_v9  ;;  %v7527_v55 = vcombine.low %v14379_v3, %v14383_v49 }
 0x4ef   :  { %v7741_v45 = vrot.slane %v7701_v25, 4  ;;  %v7742_v14 = vrot.slane %v7702_v54, 4  ;;  %v7528_v29 = vcombine.low %v14381_v11, %v14387_v23  ;;  %v7946_v36 = vmax.f32 %v7846_v61, %v14482_v43 }
 0x4f0   :  { %v7743_v10 = vrot.slane %v7703_v18, 4  ;;  %v7744_v19 = vrot.slane %v7704_v47, 4  ;;  %v8026_v2 = vrot.slane %v14396_v24, %v15242_v52  ;;  %v7535_v41 = vrot.slane %v7527_v55, %v12446_v1 }
 0x4f1   :  { %v7781_v39 = vmax.f32 %v7701_v25, %v7741_v45  ;;  %v7782_v16 = vmax.f32 %v7702_v54, %v7742_v14  ;;  %v7542_v26 = vrot.slane %v7528_v29, %v12446_v1  ;;  %v8034_v11 = vrot.slane %v14398_v63, %v15242_v52  ;;  %v15244_v45 = vld [vmem:[#allocation79_spill] sm:$0xff] }
 0x4f2   :  { %v7783_v9 = vmax.f32 %v7703_v18, %v7743_v10  ;;  %v7784_v3 = vmax.f32 %v7704_v47, %v7744_v19  ;;  %v8038_v49 = vrot.slane %v7946_v36, %v15239_v42  ;;  %v8042_v25 = vrot.slane %v7946_v36, %v15242_v52  ;;  %v15243_v47 = vld [vmem:[#allocation78_spill] sm:$0xff] }
 0x4f3   :  { %v7833_v23 = vadd.f32 %v14316_v51, %v7781_v39  ;;  %v7834_v57 = vadd.f32 %v14330_v40, %v7782_v16  ;;  %v7543_v61 = vcombine.low %v7535_v41, %v7542_v26  ;;  %v7544_v43 = vcombine.high %v7535_v41, %v7542_v26 }
 0x4f4   :  { %v7835_v24 = vadd.f32 %v14319_v5, %v7783_v9  ;;  %v7836_v58 = vadd.f32 %v14335_v17, %v7784_v3  ;;  %v8090_v54 = vrot.slane %v7952_v20, %v15242_v52  ;;  %v8190_v10 = vpack.c.bf16 %v8026_v2, %v8026_v2 }
 0x4f5   :  { %v7853_v19 = vmax.f32 %v7833_v23, 0.0  ;;  %v7854_v18 = vmax.f32 %v7834_v57, 0.0  ;;  %v7705_v63 = vadd.f32 %v15243_v47, %v7543_v61  ;;  %v7706_v14 = vadd.f32 %v15244_v45, %v7544_v43 }
 0x4f6   :  { %v7855_v55 = vmax.f32 %v7835_v24, 0.0  ;;  %v7856_v29 = vmax.f32 %v7836_v58, 0.0  ;;  %v8192_v39 = vpack.c.bf16 %v8034_v11, %v8034_v11  ;;  %v8193_v3 = vpack.c.bf16 %v8038_v49, %v8038_v49 }
 0x4f7   :  { %v10648_v16 = vrot.slane %v7853_v19, 9  ;;  %v10649_v41 = vrot.slane %v7854_v18, 9  ;;  %v7745_v26 = vrot.slane %v7705_v63, 4  ;;  %v7746_v5 = vrot.slane %v7706_v14, 4 }
 0x4f8   :  { %v10650_v9 = vrot.slane %v7855_v55, 9  ;;  %v10651_v17 = vrot.slane %v7856_v29, 9  ;;  %v8194_v36 = vpack.c.bf16 %v8042_v25, %v8042_v25  ;;  %v8206_v43 = vpack.c.bf16 %v8090_v54, %v8090_v54 }
 0x4f9   :  { %v7953_v8 = vmax.f32 %v7853_v19, %v10648_v16  ;;  %v7785_v20 = vmax.f32 %v7705_v63, %v7745_v26  ;;  %v7786_v23 = vmax.f32 %v7706_v14, %v7746_v5  ;;  %v7954_v57 = vmax.f32 %v7854_v18, %v10649_v41 }
 0x4fa   :  { %v14569_v37 = vmax.f32 %v7855_v55, %v10650_v9  ;;  %v14571_v61 = vmax.f32 %v7856_v29, %v10651_v17  ;;  %v8364_v2 = vunpack.c.l.b16 %v8188_v33  ;;  %v8366_v18 = vunpack.c.l.b16 %v8190_v10 }
 0x4fb   :  { %v8094_v11 = vrot.slane %v7953_v8, %v15239_v42  ;;  %v7837_v24 = vadd.f32 %v14316_v51, %v7785_v20  ;;  %v7838_v49 = vadd.f32 %v14330_v40, %v7786_v23  ;;  %v8098_v58 = vrot.slane %v7953_v8, %v15242_v52 }
 0x4fc   :  { %v8102_v25 = vrot.slane %v7954_v57, %v15239_v42  ;;  %v8106_v19 = vrot.slane %v7954_v57, %v15242_v52  ;;  %v8368_v47 = vunpack.c.l.b16 %v8192_v39  ;;  %v8369_v55 = vunpack.c.l.b16 %v8193_v3 }
 0x4fd   :  { %v8207_v63 = vpack.c.bf16 %v8094_v11, %v8094_v11  ;;  %v7857_v54 = vmax.f32 %v7837_v24, 0.0  ;;  %v7858_v45 = vmax.f32 %v7838_v49, 0.0  ;;  %v8208_v14 = vpack.c.bf16 %v8098_v58, %v8098_v58 }
 0x4fe   :  { %v8209_v60 = vpack.c.bf16 %v8102_v25, %v8102_v25  ;;  %v8210_v33 = vpack.c.bf16 %v8106_v19, %v8106_v19  ;;  %v8370_v29 = vunpack.c.l.b16 %v8194_v36  ;;  %v8380_v40 = vunpack.c.l.b16 %v8204_v21 }
 0x4ff   :  { %v8383_v16 = vunpack.c.l.b16 %v8207_v63  ;;  %v10652_v51 = vrot.slane %v7857_v54, 9  ;;  %v10653_v41 = vrot.slane %v7858_v45, 9  ;;  %v8382_v8 = vunpack.c.l.b16 %v8206_v43 }
 0x500   :  { %v8384_v26 = vunpack.c.l.b16 %v8208_v14  ;;  %v8385_v5 = vunpack.c.l.b16 %v8209_v60  ;;  %v8386_v10 = vunpack.c.l.b16 %v8210_v33  ;;  %v8407_v17 = vrot.slane %v8369_v55, 1 }
 0x501   :  { %v8433_v39 = vrot.slane %v8383_v16, 2  ;;  %v7957_v9 = vmax.f32 %v7857_v54, %v10652_v51  ;;  %v8410_v3 = vsel %vm5378_vm9, %v8409_v6, %v14400_v31  ;;  %v8415_v20 = vrot.slane %v8364_v2, 4  ;;  %v11471_v51 = vld [vmem:[#allocation11 + $0x44] ss:$24 sps:$4 sm:$0xff]  }
 0x502   :  { %v8412_v36 = vsel %vm3649_vm3, %v8411_v30, %v8410_v3  ;;  %v8417_v23 = vrot.slane %v8366_v18, 3  ;;  %v8419_v7 = vrot.slane %v8368_v47, 2  ;;  %v8421_v57 = vrot.slane %v8370_v29, 1 }
 0x503   :  { %v8414_v21 = vsel %vm5383_vm10, %v8413_v15, %v8412_v36  ;;  %v8435_v43 = vrot.slane %v8385_v5, 1  ;;  %v8438_v56 = vsel %vm5378_vm9, %v8437_v38, %v14500_v34  ;;  %v8443_v6 = vrot.slane %v8380_v40, 4 }
 0x504   :  { %v8416_v31 = vsel %vm3651_vm4, %v8415_v20, %v8414_v21  ;;  %v8440_v50 = vsel %vm3649_vm3, %v8439_v59, %v8438_v56  ;;  %v8445_v30 = vrot.slane %v8382_v8, 3  ;;  %v8447_v15 = vrot.slane %v8384_v26, 2 }
 0x505   :  { %v8418_v2 = vsel %vm5388_vm11, %v8417_v23, %v8416_v31  ;;  %v8442_v35 = vsel %vm5383_vm10, %v8441_v62, %v8440_v50  ;;  %v8449_v11 = vrot.slane %v8386_v10, 1  ;;  %v15245_v38 = vrot.slane %v14424_v28, 5  ;;  %v11474_v23 = vld [vmem:[#allocation11 + $0x74] ss:$24 sps:$4 sm:$0xff]  }
 0x506   :  { %v8420_v12 = vsel %vm3653_vm5, %v8419_v7, %v8418_v2  ;;  %v8444_v34 = vsel %vm3651_vm4, %v8443_v6, %v8442_v35  ;;  %v15246_v59 = vrot.slane %v14525_v13, 5  ;;  %v15247_v49 = vrot.slane %v14428_v44, 4  ;;  %v11472_v6 = vld [vmem:[#allocation11 + $0x70] ss:$24 sps:$4 sm:$0xff]  }
 0x507   :  { %v8400_v48 = vsel %vm5383_vm10, %v15245_v38, %v14420_v53  ;;  %v8422_v4 = vsel %vm5393_vm12, %v8421_v57, %v8420_v12  ;;  %v8446_v62 = vsel %vm5388_vm11, %v8445_v30, %v8444_v34  ;;  %v15248_v25 = vrot.slane %v14529_v22, 4  ;;  %v11477_v38 = vld [vmem:[#allocation11 + $0xa4] ss:$24 sps:$4 sm:$0xff]  }
 0x508   :  { %v8428_v24 = vsel %vm5383_vm10, %v15246_v59, %v14542_v32  ;;  %v8402_v58 = vsel %vm3651_vm4, %v15247_v49, %v8400_v48  ;;  %v8448_v28 = vsel %vm3653_vm5, %v8447_v15, %v8446_v62  ;;  %v15249_v53 = vrot.slane %v14431_v46, 3  ;;  %v11466_v46 = vld [vmem:[#allocation11 + $0x10] ss:$24 sps:$4 sm:$0xff]   ;;  %v11480_v49 = vld [vmem:[#allocation11 + $0xd4] ss:$24 sps:$4 sm:$0xff]  }
 0x509   :  { %v8430_v19 = vsel %vm3651_vm4, %v15248_v25, %v8428_v24  ;;  %v15250_v32 = vrot.slane %v14533_v0, 3  ;;  %v7958_v47 = vmax.f32 %v7858_v45, %v10653_v41  ;;  %v8450_v63 = vsel %vm5393_vm12, %v8449_v11, %v8448_v28  ;;  %v11483_v25 = vld [vmem:[#allocation11 + $0x104] ss:$24 sps:$4 sm:$0xff]   ;;  %v11486_v28 = vld [vmem:[#allocation11 + $0x134] ss:$24 sps:$4 sm:$0xff]  }
 0x50a   :  { %v8404_v13 = vsel %vm5388_vm11, %v15249_v53, %v8402_v58  ;;  %v15251_v44 = vrot.slane %v14433_v27, 2  ;;  %v8114_v14 = vrot.slane %v14569_v37, %v15242_v52  ;;  %v8464_v60 = vpack.c.b16 %v8450_v63, %v8422_v4  ;;  %v11475_v4 = vld [vmem:[#allocation11 + $0xa0] ss:$24 sps:$4 sm:$0xff]   ;;  %v11478_v58 = vld [vmem:[#allocation11 + $0xd0] ss:$24 sps:$4 sm:$0xff]  }
 0x50b   :  { %v8432_v18 = vsel %vm5388_vm11, %v15250_v32, %v8430_v19  ;;  %v8122_v45 = vrot.slane %v14571_v61, %v15242_v52  ;;  %v8130_v27 = vrot.slane %v7957_v9, %v15242_v52  ;;  %v8138_v29 = vrot.slane %v7958_v47, %v15242_v52  ;;  %v11481_v19 = vld [vmem:[#allocation11 + $0x100] ss:$24 sps:$4 sm:$0xff]   ;;  %v11484_v53 = vld [vmem:[#allocation11 + $0x130] ss:$24 sps:$4 sm:$0xff]   ;;  %v11495_v63 = vld [vmem:[#allocation11 + $0x1c4] ss:$24 sps:$4 sm:$0xff]  }
 0x50c   :  { %v8406_v54 = vsel %vm3653_vm5, %v15251_v44, %v8404_v13  ;;  %v8434_v22 = vsel %vm3653_vm5, %v8433_v39, %v8432_v18  ;;  %v8212_v16 = vpack.c.bf16 %v8114_v14, %v8114_v14  ;;  %8983 = vmatprep.mubr.bf16.mxu0 %v8464_v60  ;;  %9034 = vmatprep.mubr.bf16.mxu1 %v8464_v60  ;;  %v11469_v39 = vld [vmem:[#allocation11 + $0x40] ss:$24 sps:$4 sm:$0xff]   ;;  %v11489_v13 = vld [vmem:[#allocation11 + $0x164] ss:$24 sps:$4 sm:$0xff]   ;;  %v11492_v18 = vld [vmem:[#allocation11 + $0x194] ss:$24 sps:$4 sm:$0xff]  }
 0x50d   :  { %v8408_v33 = vsel %vm5393_vm12, %v8407_v17, %v8406_v54  ;;  %v8436_v0 = vsel %vm5393_vm12, %v8435_v43, %v8434_v22  ;;  %v8214_v41 = vpack.c.bf16 %v8122_v45, %v8122_v45  ;;  %v8110_v40 = vrot.slane %v14569_v37, %v15239_v42  ;;  %v11487_v32 = vld [vmem:[#allocation11 + $0x160] ss:$24 sps:$4 sm:$0xff]   ;;  %v11498_v54 = vld [vmem:[#allocation11 + $0x1f4] ss:$24 sps:$4 sm:$0xff]   ;;  %v11496_v22 = vld [vmem:[#allocation11 + $0x1f0] ss:$24 sps:$4 sm:$0xff]  }
 0x50e   :  { %v14643_v55 = vpack.c.b16 %v8436_v0, %v8408_v33  ;;  %v8118_v8 = vrot.slane %v14571_v61, %v15239_v42  ;;  %v8216_v26 = vpack.c.bf16 %v8130_v27, %v8130_v27  ;;  %v8218_v5 = vpack.c.bf16 %v8138_v29, %v8138_v29  ;;  %v11493_v44 = vld [vmem:[#allocation11 + $0x1c0] ss:$24 sps:$4 sm:$0xff]   ;;  %v11501_v14 = vld [vmem:[#allocation11 + $0x224] ss:$24 sps:$4 sm:$0xff]   ;;  %v11502_v33 = vld [vmem:[#allocation11 + $0x250] ss:$24 sps:$4 sm:$0xff]  }
 0x50f   :  { %v8126_v10 = vrot.slane %v7957_v9, %v15239_v42  ;;  %v8390_v52 = vunpack.c.l.b16 %v8214_v41  ;;  %v8134_v17 = vrot.slane %v7958_v47, %v15239_v42  ;;  %v8211_v3 = vpack.c.bf16 %v8110_v40, %v8110_v40  ;;  %v11490_v47 = vld [vmem:[#allocation11 + $0x190] ss:$24 sps:$4 sm:$0xff]   ;;  %v11507_v0 = vld [vmem:[#allocation11 + $0x284] ss:$24 sps:$4 sm:$0xff]   ;;  %v11505_v45 = vld [vmem:[#allocation11 + $0x280] ss:$24 sps:$4 sm:$0xff]  }
 0x510   :  { %8984 = vmatmul.mubr.bf16.vlgmr.msra.gmra.mrb[108].mxu0 %v14643_v55  ;;  %9035 = vmatmul.mubr.bf16.vlgmr.msra.gmra.mrb[108].mxu1 %v14643_v55  ;;  %v8213_v36 = vpack.c.bf16 %v8118_v8, %v8118_v8  ;;  %v8392_v20 = vunpack.c.l.b16 %v8216_v26  ;;  %v8394_v37 = vunpack.c.l.b16 %v8218_v5  ;;  %v8388_v7 = vunpack.c.l.b16 %v8212_v16  ;;  %v11510_v27 = vld [vmem:[#allocation11 + $0x2b4] ss:$24 sps:$4 sm:$0xff]   ;;  %v11508_v29 = vld [vmem:[#allocation11 + $0x2b0] ss:$24 sps:$4 sm:$0xff]   ;;  %v11513_v16 = vld [vmem:[#allocation11 + $0x2e4] ss:$24 sps:$4 sm:$0xff]  }
 0x511   :  { %9054 = vmatpush1.bf16.msra.mxu0 %v11466_v46  ;;  %v8215_v61 = vpack.c.bf16 %v8126_v10, %v8126_v10  ;;  %v8457_v21 = vrot.slane %v8390_v52, 7  ;;  %v8217_v57 = vpack.c.bf16 %v8134_v17, %v8134_v17  ;;  %v8387_v30 = vunpack.c.l.b16 %v8211_v3  ;;  %v11504_v46 = vld [vmem:[#allocation11 + $0x254] ss:$24 sps:$4 sm:$0xff]   ;;  %v11516_v41 = vld [vmem:[#allocation14 + $0x4] ss:$24 sps:$4 sm:$0xff]  }
 0x512   :  { %9055 = vmatprep.subr.bf16.mxu0 %v11471_v51  ;;  %v8389_v43 = vunpack.c.l.b16 %v8213_v36  ;;  %v8459_v56 = vrot.slane %v8392_v20, 6  ;;  %v8461_v31 = vrot.slane %v8394_v37, 5  ;;  %v11511_v51 = vld [vmem:[#allocation11 + $0x2e0] ss:$24 sps:$4 sm:$0xff]   ;;  %9773 = vmatprep.subr.bf16.mxu1 %v11516_v41  ;;  %v11517_v26 = vld [vmem:[#allocation14 + $0x10] ss:$24 sps:$4 sm:$0xff]  }
 0x513   :  { %v8391_v50 = vunpack.c.l.b16 %v8215_v61  ;;  %v8458_v9 = vsel %vm5378_vm9, %v8457_v21, %v8388_v7  ;;  %v8393_v42 = vunpack.c.l.b16 %v8217_v57  ;;  %v11514_v40 = vld [vmem:[#allocation14] ss:$24 sps:$4 sm:$0xff]   ;;  %v11519_v8 = vld [vmem:[#allocation14 + $0x14] ss:$24 sps:$4 sm:$0xff]   ;;  %v11520_v10 = vld [vmem:[#allocation14 + $0x30] ss:$24 sps:$4 sm:$0xff]  }
 0x514   :  { %v8451_v2 = vrot.slane %v8389_v43, 7  ;;  %v8460_v35 = vsel %vm3649_vm3, %v8459_v56, %v8458_v9  ;;  %9774 = vmatpush1.bf16.msra.mxu1 %v11514_v40  ;;  %v11522_v5 = vld [vmem:[#allocation14 + $0x34] ss:$24 sps:$4 sm:$0xff]   ;;  %v11525_v52 = vld [vmem:[#allocation14 + $0x44] ss:$24 sps:$4 sm:$0xff]  }
 0x515   :  { %9056 = vmatpush1.bf16.msra.mxu0 %v11469_v39  ;;  %v8453_v15 = vrot.slane %v8391_v50, 6  ;;  %v8462_v11 = vsel %vm5383_vm10, %v8461_v31, %v8460_v35  ;;  %v8455_v34 = vrot.slane %v8393_v42, 5  ;;  %9775 = vmatprep.subr.bf16.mxu1 %v11522_v5  ;;  %v11523_v39 = vld [vmem:[#allocation14 + $0x40] ss:$24 sps:$4 sm:$0xff]   ;;  %v11528_v17 = vld [vmem:[#allocation14 + $0x64] ss:$24 sps:$4 sm:$0xff]  }
 0x516   :  { %9057 = vmatprep.subr.bf16.mxu0 %v11474_v23  ;;  %v8452_v12 = vsel %vm5378_vm9, %v8451_v2, %v8387_v30  ;;  %v8466_v48 = vpack.c.b16 %v8462_v11, %v8462_v11  ;;  %v11531_v3 = vld [vmem:[#allocation14 + $0x74] ss:$24 sps:$4 sm:$0xff]   ;;  %v11529_v36 = vld [vmem:[#allocation14 + $0x70] ss:$24 sps:$4 sm:$0xff]   ;;  %v11537_v23 = vld [vmem:[#allocation14 + $0xa4] ss:$24 sps:$4 sm:$0xff]  }
 0x517   :  { %v8454_v59 = vsel %vm3649_vm3, %v8453_v15, %v8452_v12  ;;  %v11534_v20 = vld [vmem:[#allocation14 + $0x94] ss:$24 sps:$4 sm:$0xff]   ;;  %v11532_v37 = vld [vmem:[#allocation14 + $0x90] ss:$24 sps:$4 sm:$0xff]   ;;  %v11535_v61 = vld [vmem:[#allocation14 + $0xa0] ss:$24 sps:$4 sm:$0xff]  }
 0x518   :  { %v8456_v24 = vsel %vm5383_vm10, %v8455_v34, %v8454_v59  ;;  %8993 = vmatprep.mubr.bf16.mxu0 %v8466_v48  ;;  %9044 = vmatprep.mubr.bf16.mxu1 %v8466_v48  ;;  %v11540_v7 = vld [vmem:[#allocation14 + $0xc4] ss:$24 sps:$4 sm:$0xff]   ;;  %v11538_v21 = vld [vmem:[#allocation14 + $0xc0] ss:$24 sps:$4 sm:$0xff]   ;;  %v11543_v57 = vld [vmem:[#allocation14 + $0xd4] ss:$24 sps:$4 sm:$0xff]  }
 0x519   :  { %9058 = vmatpush1.bf16.msra.mxu0 %v11472_v6  ;;  %v8465_v62 = vpack.c.b16 %v8456_v24, %v8456_v24  ;;  %9776 = vmatpush1.bf16.msra.mxu1 %v11520_v10  ;;  %v11541_v43 = vld [vmem:[#allocation14 + $0xd0] ss:$24 sps:$4 sm:$0xff]   ;;  %v11546_v31 = vld [vmem:[#allocation14 + $0xf4] ss:$24 sps:$4 sm:$0xff]   ;;  %v11547_v50 = vld [vmem:[#allocation14 + $0x100] ss:$24 sps:$4 sm:$0xff]  }
 0x51a   :  { %9059 = vmatprep.subr.bf16.mxu0 %v11477_v38  ;;  %9777 = vmatprep.subr.bf16.mxu1 %v11528_v17  ;;  %v11544_v56 = vld [vmem:[#allocation14 + $0xf0] ss:$24 sps:$4 sm:$0xff]   ;;  %v11549_v9 = vld [vmem:[#allocation14 + $0x104] ss:$24 sps:$4 sm:$0xff]   ;;  %v11555_v30 = vld [vmem:[#allocation14 + $0x134] ss:$24 sps:$4 sm:$0xff]  }
 0x51b   :  { %8994 = vmatmul.mubr.bf16.gmra.mrb[112].mxu0 %v8465_v62  ;;  %9045 = vmatmul.mubr.bf16.gmra.mrb[112].mxu1 %v8465_v62  ;;  %v11552_v6 = vld [vmem:[#allocation14 + $0x124] ss:$24 sps:$4 sm:$0xff]   ;;  %v11550_v42 = vld [vmem:[#allocation14 + $0x120] ss:$24 sps:$4 sm:$0xff]   ;;  %v11553_v2 = vld [vmem:[#allocation14 + $0x130] ss:$24 sps:$4 sm:$0xff]  }
 0x51c   :  { %9085 = vmatprep.mubr.bf16.mxu0 %v8464_v60  ;;  %v11499_v60 = vld [vmem:[#allocation11 + $0x220] ss:$24 sps:$4 sm:$0xff]   ;;  %v11978_v11 = vmov 0   ;;  %v11556_v12 = vld [vmem:[#allocation14 + $0x150] ss:$24 sps:$4 sm:$0xff]  }
 0x51d   :  { %9060 = vmatpush1.bf16.msra.mxu0 %v11475_v4  ;;  %v11558_v35 = vld [vmem:[#allocation14 + $0x154] ss:$24 sps:$4 sm:$0xff]   ;;  %v11561_v15 = vld [vmem:[#allocation14 + $0x164] ss:$24 sps:$4 sm:$0xff]   ;;  %9805 = vmatprep.mubr.bf16.mxu1 %v11978_v11  ;;  %v11559_v34 = vld [vmem:[#allocation14 + $0x160] ss:$24 sps:$4 sm:$0xff]  }
 0x51e   :  { %9061 = vmatprep.subr.bf16.mxu0 %v11480_v49  ;;  %v11564_v38 = vld [vmem:[#allocation14 + $0xc] ss:$24 sps:$4 sm:$0xff]  }
 0x521   :  { %9062 = vmatpush1.bf16.msra.mxu0 %v11478_v58 }
 0x522   :  { %9063 = vmatprep.subr.bf16.mxu0 %v11483_v25 }
 0x525   :  { %9064 = vmatpush1.bf16.msra.mxu0 %v11481_v19 }
 0x526   :  { %9065 = vmatprep.subr.bf16.mxu0 %v11486_v28 }
 0x529   :  { %9066 = vmatpush1.bf16.msra.mxu0 %v11484_v53 }
 0x52a   :  { %9067 = vmatprep.subr.bf16.mxu0 %v11489_v13 }
 0x52d   :  { %9068 = vmatpush1.bf16.msra.mxu0 %v11487_v32 }
 0x52e   :  { %9069 = vmatprep.subr.bf16.mxu0 %v11492_v18 }
 0x531   :  { %9070 = vmatpush1.bf16.msra.mxu0 %v11490_v47 }
 0x532   :  { %9071 = vmatprep.subr.bf16.mxu0 %v11495_v63 }
 0x535   :  { %9072 = vmatpush1.bf16.msra.mxu0 %v11493_v44 }
 0x536   :  { %9073 = vmatprep.subr.bf16.mxu0 %v11498_v54 }
 0x539   :  { %9074 = vmatpush1.bf16.msra.mxu0 %v11496_v22 }
 0x53a   :  { %9075 = vmatprep.subr.bf16.mxu0 %v11501_v14 }
 0x53d   :  { %9076 = vmatpush1.bf16.msra.mxu0 %v11499_v60 }
 0x53e   :  { %9077 = vmatprep.subr.bf16.mxu0 %v11504_v46 }
 0x541   :  { %9078 = vmatpush1.bf16.msra.mxu0 %v11502_v33 }
 0x542   :  { %9079 = vmatprep.subr.bf16.mxu0 %v11507_v0 }
 0x545   :  { %9080 = vmatpush1.bf16.msra.mxu0 %v11505_v45 }
 0x546   :  { %9081 = vmatprep.subr.bf16.mxu0 %v11510_v27 }
 0x549   :  { %9082 = vmatpush1.bf16.msra.mxu0 %v11508_v29 }
 0x54a   :  { %9083 = vmatprep.subr.bf16.mxu0 %v11513_v16 }
 0x54d   :  { %9084 = vmatpush1.bf16.msra.mxu0 %v11511_v51 }
 0x54e   :  { %9855 = vmatprep.subr.bf16.mxu0 %v11519_v8 }
 0x550   :  { %9086 = vmatmul.mubr.bf16.vlgmr.msra.gmra.mrb[116].mxu0 %v14643_v55  ;;  %v11526_v55 = vld [vmem:[#allocation14 + $0x60] ss:$24 sps:$4 sm:$0xff]  }
 0x551   :  { %9095 = vmatprep.mubr.bf16.mxu0 %v8466_v48  ;;  %9856 = vmatpush1.bf16.msra.mxu0 %v11517_v26 }
 0x552   :  { %9857 = vmatprep.subr.bf16.mxu0 %v11525_v52  ;;  %9778 = vmatpush1.bf16.msra.mxu1 %v11526_v55 }
 0x553   :  { %9779 = vmatprep.subr.bf16.mxu1 %v11534_v20 }
 0x555   :  { %9858 = vmatpush1.bf16.msra.mxu0 %v11523_v39 }
 0x556   :  { %9859 = vmatprep.subr.bf16.mxu0 %v11531_v3  ;;  %9780 = vmatpush1.bf16.msra.mxu1 %v11532_v37 }
 0x557   :  { %9781 = vmatprep.subr.bf16.mxu1 %v11540_v7 }
 0x558   :  { %9096 = vmatmul.mubr.bf16.gmra.mrb[120].mxu0 %v8465_v62 }
 0x559   :  { %9860 = vmatpush1.bf16.msra.mxu0 %v11529_v36  ;;  %9887 = vmatprep.mubr.bf16.mxu0 %v11978_v11 }
 0x55a   :  { %9861 = vmatprep.subr.bf16.mxu0 %v11537_v23  ;;  %9782 = vmatpush1.bf16.msra.mxu1 %v11538_v21 }
 0x55b   :  { %9783 = vmatprep.subr.bf16.mxu1 %v11546_v31 }
 0x55d   :  { %9862 = vmatpush1.bf16.msra.mxu0 %v11535_v61 }
 0x55e   :  { %9863 = vmatprep.subr.bf16.mxu0 %v11543_v57  ;;  %9784 = vmatpush1.bf16.msra.mxu1 %v11544_v56 }
 0x55f   :  { %9785 = vmatprep.subr.bf16.mxu1 %v11552_v6 }
 0x561   :  { %9864 = vmatpush1.bf16.msra.mxu0 %v11541_v43 }
 0x562   :  { %9865 = vmatprep.subr.bf16.mxu0 %v11549_v9  ;;  %9786 = vmatpush1.bf16.msra.mxu1 %v11550_v42 }
 0x563   :  { %9787 = vmatprep.subr.bf16.mxu1 %v11558_v35 }
 0x565   :  { %9866 = vmatpush1.bf16.msra.mxu0 %v11547_v50 }
 0x566   :  { %9867 = vmatprep.subr.bf16.mxu0 %v11555_v30  ;;  %9788 = vmatpush1.bf16.msra.mxu1 %v11556_v12 }
 0x567   :  { %9814 = vmatprep.subr.bf16.mxu1 %v11564_v38 }
 0x569   :  { %9868 = vmatpush1.bf16.msra.mxu0 %v11553_v2 }
 0x56a   :  { %9869 = vmatprep.subr.bf16.mxu0 %v11561_v15 }
 0x56d   :  { %9870 = vmatpush1.bf16.msra.mxu0 %v11559_v34 }
 0x5e3   :  { %v8985_v48 = vpop.f32.mrb[108].mxu0  ;;  %v9036_v59 = vpop.f32.mrb[108].mxu1 }
 0x5e4   :  { %v8987_v24 = vpop.f32.mrb[109].mxu0  ;;  %v9038_v4 = vpop.f32.mrb[109].mxu1 }
 0x5e5   :  { %v9122_v62 = vcombine.low %v8985_v48, %v8987_v24  ;;  %v9123_v49 = vcombine.high %v8985_v48, %v8987_v24  ;;  %v9124_v58 = vcombine.low %v9036_v59, %v9038_v4  ;;  %v9125_v25 = vcombine.high %v9036_v59, %v9038_v4  ;;  %v8989_v19 = vpop.f32.mrb[110].mxu0  ;;  %v9040_v28 = vpop.f32.mrb[110].mxu1 }
 0x5e6   :  { %v8991_v53 = vpop.f32.mrb[111].mxu0  ;;  %v9042_v13 = vpop.f32.mrb[111].mxu1 }
 0x5e7   :  { %v9132_v32 = vrot.slane %v9122_v62, %v12446_v1  ;;  %v9139_v18 = vrot.slane %v9123_v49, %v12446_v1  ;;  %v9146_v47 = vrot.slane %v9124_v58, %v12446_v1  ;;  %v9153_v63 = vrot.slane %v9125_v25, %v12446_v1 }
 0x5e8   :  { %v9176_v44 = vcombine.low %v8989_v19, %v8991_v53  ;;  %v9177_v54 = vcombine.high %v8989_v19, %v8991_v53  ;;  %v9178_v22 = vcombine.low %v9040_v28, %v9042_v13  ;;  %v9179_v14 = vcombine.high %v9040_v28, %v9042_v13 }
 0x5e9   :  { %v9154_v60 = vcombine.low %v9132_v32, %v9146_v47  ;;  %v9155_v46 = vcombine.high %v9132_v32, %v9146_v47  ;;  %v9156_v33 = vcombine.low %v9139_v18, %v9153_v63  ;;  %v9157_v0 = vcombine.high %v9139_v18, %v9153_v63 }
 0x5ea   :  { %v9186_v45 = vrot.slane %v9176_v44, %v12446_v1  ;;  %v9193_v27 = vrot.slane %v9177_v54, %v12446_v1  ;;  %v9200_v29 = vrot.slane %v9178_v22, %v12446_v1  ;;  %v9207_v16 = vrot.slane %v9179_v14, %v12446_v1 }
 0x5eb   :  { %v10750_v51 = vrot.slane %v9154_v60, 9  ;;  %v9274_v41 = vrot.slane %v9155_v46, 7  ;;  %v9277_v40 = vrot.slane %v9156_v33, 7  ;;  %v9280_v8 = vrot.slane %v9157_v0, 7 }
 0x5ec   :  { %v9208_v26 = vcombine.low %v9186_v45, %v9200_v29  ;;  %v9209_v5 = vcombine.high %v9186_v45, %v9200_v29  ;;  %v9210_v10 = vcombine.low %v9193_v27, %v9207_v16  ;;  %v9211_v52 = vcombine.high %v9193_v27, %v9207_v16  ;;  %v10752_v29 = vld [vmem:[#allocation13] ss:$0 sm:$0xff] }
 0x5ed   :  { %v9275_v17 = vsel %vm12742_vm8, %v10750_v51, %v9274_v41  ;;  %v9276_v55 = vrot.slane %v9274_v41, 2  ;;  %v9279_v3 = vrot.slane %v9277_v40, 2  ;;  %v9282_v36 = vrot.slane %v9280_v8, 2 }
 0x5ee   :  { %v9298_v20 = vrot.slane %v9275_v17, 4  ;;  %v9283_v37 = vrot.slane %v9208_v26, 7  ;;  %v10751_v23 = vrot.slane %v9209_v5, 9  ;;  %v9287_v61 = vrot.slane %v9210_v10, 7  ;;  %v8995_v57 = vpop.f32.mrb[112].mxu0  ;;  %v9046_v43 = vpop.f32.mrb[112].mxu1 }
 0x5ef   :  { %v9281_v7 = vsel %vm12742_vm8, %v9279_v3, %v9280_v8  ;;  %v9290_v21 = vrot.slane %v9211_v52, 7  ;;  %v9278_v56 = vsel %vm12742_vm8, %v9276_v55, %v9277_v40  ;;  %v8997_v6 = vpop.f32.mrb[113].mxu0  ;;  %v9048_v30 = vpop.f32.mrb[113].mxu1  ;;  %v9368_v41 = vcombine.high %v10752_v29, %v10752_v29 }
 0x5f0   :  { %v9300_v31 = vrot.slane %v9281_v7, 4  ;;  %v9314_v50 = vadd.f32 %v9298_v20, %v9154_v60  ;;  %v9289_v9 = vrot.slane %v9287_v61, 2  ;;  %v9299_v42 = vrot.slane %v9278_v56, 4  ;;  %v8999_v15 = vpop.f32.mrb[114].mxu0  ;;  %v9050_v12 = vpop.f32.mrb[114].mxu1 }
 0x5f1   :  { %v9229_v2 = vcombine.low %v8995_v57, %v8997_v6  ;;  %v9230_v35 = vcombine.low %v9046_v43, %v9048_v30  ;;  %v9284_v34 = vsel %vm12742_vm8, %v9282_v36, %v9283_v37  ;;  %v9000_v59 = vpop.f32.mrb[115].mxu0  ;;  %v9051_v24 = vpop.f32.mrb[115].mxu1  ;;  %v9288_v62 = vsel %vm12742_vm8, %v10751_v23, %v9287_v61 }
 0x5f2   :  { %v9316_v38 = vadd.f32 %v9300_v31, %v9156_v33  ;;  %v9291_v48 = vsel %vm12742_vm8, %v9289_v9, %v9290_v21  ;;  %v9315_v4 = vadd.f32 %v9299_v42, %v9155_v46  ;;  %v9301_v19 = vrot.slane %v9284_v34, 4 }
 0x5f3   :  { %v9303_v49 = vrot.slane %v9291_v48, 4  ;;  %v9237_v58 = vrot.slane %v9229_v2, %v12446_v1  ;;  %v9244_v25 = vrot.slane %v9230_v35, %v12446_v1  ;;  %v9302_v28 = vrot.slane %v9288_v62, 4 }
 0x5f4   :  { %v9317_v18 = vadd.f32 %v9301_v19, %v9157_v0  ;;  %v9292_v63 = vrot.slane %v9290_v21, 2  ;;  %v9375_v26 = vrot.slane %v10752_v29, %v12446_v1  ;;  %v14694_v3 = vrot.slane %v9368_v41, %v12446_v1 }
 0x5f5   :  { %v9319_v53 = vadd.f32 %v9303_v49, %v9210_v10  ;;  %v9245_v13 = vcombine.low %v9237_v58, %v9244_v25  ;;  %v9246_v32 = vcombine.high %v9237_v58, %v9244_v25  ;;  %v9318_v47 = vadd.f32 %v9302_v28, %v9209_v5 }
 0x5f6   :  { %v9383_v23 = vcombine.high %v9375_v26, %v9375_v26  ;;  %v9384_v6 = vcombine.high %v14694_v3, %v14694_v3 }
 0x5f7   :  { %v9293_v44 = vrot.slane %v9245_v13, 7  ;;  %v9296_v22 = vrot.slane %v9246_v32, 7 }
 0x5f9   :  { %v9295_v54 = vrot.slane %v9293_v44, 2  ;;  %v9294_v14 = vsel %vm12742_vm8, %v9292_v63, %v9293_v44 }
 0x5fa   :  { %v9304_v60 = vrot.slane %v9294_v14, 4 }
 0x5fb   :  { %v9297_v46 = vsel %vm12742_vm8, %v9295_v54, %v9296_v22 }
 0x5fc   :  { %v9305_v33 = vrot.slane %v9297_v46, 4  ;;  %v9320_v45 = vadd.f32 %v9304_v60, %v9211_v52 }
 0x5fe   :  { %v9321_v27 = vadd.f32 %v9305_v33, %v9245_v13 }
 0x623   :  { %v9087_v16 = vpop.f32.mrb[116].mxu0 }
 0x624   :  { %v9089_v51 = vpop.f32.mrb[117].mxu0 }
 0x625   :  { %v9158_v0 = vcombine.low %v9087_v16, %v9089_v51  ;;  %v9159_v40 = vcombine.high %v9087_v16, %v9089_v51  ;;  %v9091_v8 = vpop.f32.mrb[118].mxu0 }
 0x626   :  { %v9093_v5 = vpop.f32.mrb[119].mxu0 }
 0x627   :  { %v9166_v10 = vrot.slane %v9158_v0, %v12446_v1  ;;  %v9173_v17 = vrot.slane %v9159_v40, %v12446_v1  ;;  %v9212_v55 = vcombine.low %v9091_v8, %v9093_v5  ;;  %v9213_v39 = vcombine.high %v9091_v8, %v9093_v5 }
 0x629   :  { %v9174_v52 = vcombine.high %v9166_v10, %v9166_v10  ;;  %v9175_v36 = vcombine.high %v9173_v17, %v9173_v17  ;;  %v9323_v20 = vadd.f32 %v9315_v4, %v9173_v17  ;;  %v9220_v37 = vrot.slane %v9212_v55, %v12446_v1 }
 0x62a   :  { %v9227_v61 = vrot.slane %v9213_v39, %v12446_v1 }
 0x62b   :  { %v9322_v7 = vadd.f32 %v9314_v50, %v9174_v52  ;;  %v9324_v21 = vadd.f32 %v9316_v38, %v9175_v36  ;;  %v9339_v57 = vrot.slane %v9323_v20, 2  ;;  %v9325_v43 = vadd.f32 %v9317_v18, %v9220_v37  ;;  %v9097_v56 = vpop.f32.mrb[120].mxu0 }
 0x62c   :  { %v9228_v31 = vcombine.high %v9227_v61, %v9227_v61  ;;  %v9326_v9 = vadd.f32 %v9318_v47, %v9227_v61  ;;  %v9099_v30 = vpop.f32.mrb[121].mxu0 }
 0x62d   :  { %v9338_v42 = vrot.slane %v9322_v7, 2  ;;  %v9340_v2 = vrot.slane %v9324_v21, 2  ;;  %v9355_v35 = vmax.f32 %v9323_v20, %v9339_v57  ;;  %v9341_v15 = vrot.slane %v9325_v43, 2  ;;  %v9101_v12 = vpop.f32.mrb[122].mxu0 }
 0x62e   :  { %v9327_v34 = vadd.f32 %v9319_v53, %v9228_v31  ;;  %v9342_v48 = vrot.slane %v9326_v9, 2  ;;  %v9247_v59 = vcombine.low %v9097_v56, %v9099_v30  ;;  %v9102_v24 = vpop.f32.mrb[123].mxu0 }
 0x62f   :  { %v9354_v50 = vmax.f32 %v9322_v7, %v9338_v42  ;;  %v9356_v38 = vmax.f32 %v9324_v21, %v9340_v2  ;;  %v9390_v4 = vadd.f32 %v9383_v23, %v9355_v35  ;;  %v9357_v62 = vmax.f32 %v9325_v43, %v9341_v15 }
 0x630   :  { %v9343_v49 = vrot.slane %v9327_v34, 2  ;;  %v9358_v58 = vmax.f32 %v9326_v9, %v9342_v48  ;;  %v9254_v25 = vrot.slane %v9247_v59, %v12446_v1 }
 0x631   :  { %v9389_v19 = vadd.f32 %v9375_v26, %v9354_v50  ;;  %v9391_v28 = vadd.f32 %v14694_v3, %v9356_v38  ;;  %v9398_v13 = vmax.f32 %v9390_v4, 0.0  ;;  %v9392_v32 = vadd.f32 %v9384_v6, %v9357_v62 }
 0x632   :  { %v9359_v18 = vmax.f32 %v9327_v34, %v9343_v49  ;;  %v9393_v47 = vadd.f32 %v9375_v26, %v9358_v58  ;;  %v9255_v63 = vcombine.high %v9254_v25, %v9254_v25  ;;  %v9328_v53 = vadd.f32 %v9320_v45, %v9254_v25 }
 0x633   :  { %v9397_v44 = vmax.f32 %v9389_v19, 0.0  ;;  %v9399_v54 = vmax.f32 %v9391_v28, 0.0  ;;  %v10754_v22 = vrot.slane %v9398_v13, 9  ;;  %v9400_v14 = vmax.f32 %v9392_v32, 0.0 }
 0x634   :  { %v9394_v60 = vadd.f32 %v9383_v23, %v9359_v18  ;;  %v9401_v46 = vmax.f32 %v9393_v47, 0.0  ;;  %v9329_v33 = vadd.f32 %v9321_v27, %v9255_v63  ;;  %v9344_v29 = vrot.slane %v9328_v53, 2  ;;  %v11562_v47 = vld [vmem:[#allocation14 + $0x8] ss:$24 sps:$4 sm:$0xff]  }
 0x635   :  { %v10753_v16 = vrot.slane %v9397_v44, 9  ;;  %v10755_v51 = vrot.slane %v9399_v54, 9  ;;  %v9438_v1 = vmax.f32 %v9398_v13, %v10754_v22  ;;  %v10756_v41 = vrot.slane %v9400_v14, 9  ;;  %v11570_v22 = vld [vmem:[#allocation14 + $0x6c] ss:$24 sps:$4 sm:$0xff]  }
 0x636   :  { %v9402_v0 = vmax.f32 %v9394_v60, 0.0  ;;  %v10757_v40 = vrot.slane %v9401_v46, 9  ;;  %v9345_v8 = vrot.slane %v9329_v33, 2  ;;  %v9360_v5 = vmax.f32 %v9328_v53, %v9344_v29  ;;  %v11573_v60 = vld [vmem:[#allocation14 + $0x9c] ss:$24 sps:$4 sm:$0xff]  }
 0x637   :  { %v9437_v10 = vmax.f32 %v9397_v44, %v10753_v16  ;;  %v9439_v26 = vmax.f32 %v9399_v54, %v10755_v51  ;;  %v9446_v17 = vpack.c.bf16 %v9438_v1, %v9438_v1  ;;  %v9440_v45 = vmax.f32 %v9400_v14, %v10756_v41  ;;  %v11567_v44 = vld [vmem:[#allocation14 + $0x3c] ss:$24 sps:$4 sm:$0xff]   ;;  %v11565_v54 = vld [vmem:[#allocation14 + $0x38] ss:$24 sps:$4 sm:$0xff]   ;;  %v11568_v14 = vld [vmem:[#allocation14 + $0x68] ss:$24 sps:$4 sm:$0xff]  }
 0x638   :  { %v10758_v55 = vrot.slane %v9402_v0, 9  ;;  %v9441_v39 = vmax.f32 %v9401_v46, %v10757_v40  ;;  %v9361_v52 = vmax.f32 %v9329_v33, %v9345_v8  ;;  %v9395_v36 = vadd.f32 %v14694_v3, %v9360_v5  ;;  %v11571_v46 = vld [vmem:[#allocation14 + $0x98] ss:$24 sps:$4 sm:$0xff]   ;;  %v11576_v33 = vld [vmem:[#allocation14 + $0xcc] ss:$24 sps:$4 sm:$0xff]  }
 0x639   :  { %v9445_v20 = vpack.c.bf16 %v9437_v10, %v9437_v10  ;;  %v9447_v27 = vpack.c.bf16 %v9439_v26, %v9439_v26  ;;  %v9510_v37 = vunpack.c.l.b16 %v9446_v17  ;;  %v9448_v23 = vpack.c.bf16 %v9440_v45, %v9440_v45  ;;  %v11574_v29 = vld [vmem:[#allocation14 + $0xc8] ss:$24 sps:$4 sm:$0xff]   ;;  %v11579_v16 = vld [vmem:[#allocation14 + $0xfc] ss:$24 sps:$4 sm:$0xff]   ;;  %v11577_v51 = vld [vmem:[#allocation14 + $0xf8] ss:$24 sps:$4 sm:$0xff]  }
 0x63a   :  { %v9442_v61 = vmax.f32 %v9402_v0, %v10758_v55  ;;  %v9449_v7 = vpack.c.bf16 %v9441_v39, %v9441_v39  ;;  %v9396_v21 = vadd.f32 %v9384_v6, %v9361_v52  ;;  %v9403_v57 = vmax.f32 %v9395_v36, 0.0  ;;  %v11582_v1 = vld [vmem:[#allocation14 + $0x12c] ss:$24 sps:$4 sm:$0xff]   ;;  %v11585_v41 = vld [vmem:[#allocation14 + $0x15c] ss:$24 sps:$4 sm:$0xff]  }
 0x63b   :  { %v9509_v43 = vunpack.c.l.b16 %v9445_v20  ;;  %v9511_v56 = vunpack.c.l.b16 %v9447_v27  ;;  %v9517_v31 = vrot.slane %v9510_v37, 7  ;;  %v9512_v9 = vunpack.c.l.b16 %v9448_v23  ;;  %v11583_v0 = vld [vmem:[#allocation14 + $0x158] ss:$24 sps:$4 sm:$0xff]   ;;  %v11586_v8 = vld [vmem:[#allocation17] sm:$0xff]  }
 0x63c   :  { %v9450_v30 = vpack.c.bf16 %v9442_v61, %v9442_v61  ;;  %v9513_v42 = vunpack.c.l.b16 %v9449_v7  ;;  %v9404_v2 = vmax.f32 %v9396_v21, 0.0  ;;  %v10759_v35 = vrot.slane %v9403_v57, 9  ;;  %v11587_v5 = vld [vmem:[#allocation17 + $0x8] sm:$0xff]   ;;  %v11588_v10 = vld [vmem:[#allocation17 + $0x10] sm:$0xff]   ;;  %v11589_v26 = vld [vmem:[#allocation17 + $0x18] sm:$0xff]  }
 0x63d   :  { %v9518_v15 = vsel %vm5378_vm9, %v9517_v31, %v9509_v43  ;;  %v9519_v12 = vrot.slane %v9511_v56, 6  ;;  %v9521_v3 = vrot.slane %v9512_v9, 5  ;;  %v11979_v40 = vmov 0.0   ;;  %v11590_v17 = vld [vmem:[#allocation17 + $0x20] sm:$0xff]   ;;  %v11591_v45 = vld [vmem:[#allocation17 + $0x28] sm:$0xff]   ;;  %v11592_v55 = vld [vmem:[#allocation17 + $0x30] sm:$0xff]  }
 0x63e   :  { %v9514_v34 = vunpack.c.l.b16 %v9450_v30  ;;  %v10760_v48 = vrot.slane %v9404_v2, 9  ;;  %v9443_v59 = vmax.f32 %v9403_v57, %v10759_v35  ;;  %v9523_v50 = vrot.slane %v9513_v42, 4  ;;  %10872 = vmatprep.subr.bf16.mxu0 %v11979_v40  ;;  %v11594_v39 = vld [vmem:[#allocation20] sm:$0xff]   ;;  %v11593_v52 = vld [vmem:[#allocation17 + $0x38] sm:$0xff]   ;;  %v11595_v36 = vld [vmem:[#allocation20 + $0x8] sm:$0xff]  }
 0x63f   :  { %v9520_v24 = vsel %vm3649_vm3, %v9519_v12, %v9518_v15  ;;  %v11596_v20 = vld [vmem:[#allocation20 + $0x10] sm:$0xff]   ;;  %v11597_v27 = vld [vmem:[#allocation20 + $0x18] sm:$0xff]   ;;  %v11598_v37 = vld [vmem:[#allocation20 + $0x20] sm:$0xff]  }
 0x640   :  { %v9522_v6 = vsel %vm5383_vm10, %v9521_v3, %v9520_v24  ;;  %v9525_v38 = vrot.slane %v9514_v34, 3  ;;  %v9444_v4 = vmax.f32 %v9404_v2, %v10760_v48  ;;  %v9451_v62 = vpack.c.bf16 %v9443_v59, %v9443_v59  ;;  %v11599_v23 = vld [vmem:[#allocation20 + $0x28] sm:$0xff]  }
 0x641   :  { %v9524_v49 = vsel %vm3651_vm4, %v9523_v50, %v9522_v6 }
 0x642   :  { %v9452_v58 = vpack.c.bf16 %v9444_v4, %v9444_v4  ;;  %v9515_v25 = vunpack.c.l.b16 %v9451_v62  ;;  %v9526_v19 = vsel %vm5388_vm11, %v9525_v38, %v9524_v49 }
 0x644   :  { %v9516_v28 = vunpack.c.l.b16 %v9452_v58  ;;  %v9527_v13 = vrot.slane %v9515_v25, 2 }
 0x646   :  { %v9529_v32 = vrot.slane %v9516_v28, 1  ;;  %v9528_v18 = vsel %vm3653_vm5, %v9527_v13, %v9526_v19  ;;  %v10813_v28 = vld [vmem:[#allocation16] ss:$0 sm:$0xff] }
 0x648   :  { %v9530_v63 = vsel %vm5393_vm12, %v9529_v32, %v9528_v18 }
 0x649   :  { %v9531_v53 = vpack.c.b16 %v9530_v63, %v9530_v63 }
 0x64b   :  { %9806 = vmatmul.mubr.bf16.vlgmr.msra.gmra.mrb[116].mxu1 %v9531_v53  ;;  %9888 = vmatmul.mubr.bf16.vlgmr.msra.gmra.mrb[124].mxu0 %v9531_v53 }
 0x64c   :  { %9815 = vmatpush1.bf16.msra.mxu1 %v11562_v47  ;;  %9846 = vmatprep.mubr.bf16.mxu1 %v11978_v11  ;;  %v11580_v11 = vld [vmem:[#allocation14 + $0x128] ss:$24 sps:$4 sm:$0xff]  }
 0x64d   :  { %9816 = vmatprep.subr.bf16.mxu1 %v11567_v44  ;;  %10888 = vmatprep.mubr.msk.bf16.mxu0 %vm11980_vm13, %v11979_v40 }
 0x64e   :  { %10873 = vmatpush3.bf16.msra.mxu0 %v11594_v39 }
 0x64f   :  { %10874 = vmatprep.subr.bf16.mxu0 %v11979_v40 }
 0x650   :  { %9817 = vmatpush1.bf16.msra.mxu1 %v11565_v54 }
 0x651   :  { %9818 = vmatprep.subr.bf16.mxu1 %v11570_v22 }
 0x652   :  { %10875 = vmatpush3.bf16.msra.mxu0 %v11595_v36  ;;  %v10825_v36 = vld [vmem:[#allocation22] ss:$0 sm:$0xff] }
 0x653   :  { %10876 = vmatprep.subr.bf16.mxu0 %v11979_v40 }
 0x654   :  { %9819 = vmatpush1.bf16.msra.mxu1 %v11568_v14 }
 0x655   :  { %9820 = vmatprep.subr.bf16.mxu1 %v11573_v60 }
 0x656   :  { %10877 = vmatpush3.bf16.msra.mxu0 %v11596_v20 }
 0x657   :  { %10878 = vmatprep.subr.bf16.mxu0 %v11979_v40 }
 0x658   :  { %9821 = vmatpush1.bf16.msra.mxu1 %v11571_v46 }
 0x659   :  { %9822 = vmatprep.subr.bf16.mxu1 %v11576_v33 }
 0x65a   :  { %10879 = vmatpush3.bf16.msra.mxu0 %v11597_v27 }
 0x65b   :  { %10880 = vmatprep.subr.bf16.mxu0 %v11979_v40 }
 0x65c   :  { %9823 = vmatpush1.bf16.msra.mxu1 %v11574_v29 }
 0x65d   :  { %9824 = vmatprep.subr.bf16.mxu1 %v11579_v16 }
 0x65e   :  { %10881 = vmatpush3.bf16.msra.mxu0 %v11598_v37 }
 0x65f   :  { %10882 = vmatprep.subr.bf16.mxu0 %v11979_v40 }
 0x660   :  { %9825 = vmatpush1.bf16.msra.mxu1 %v11577_v51 }
 0x661   :  { %9826 = vmatprep.subr.bf16.mxu1 %v11582_v1 }
 0x662   :  { %10883 = vmatpush3.bf16.msra.mxu0 %v11599_v23 }
 0x663   :  { %10884 = vmatprep.subr.bf16.mxu0 %v11979_v40 }
 0x664   :  { %9827 = vmatpush1.bf16.msra.mxu1 %v11580_v11  ;;  %v11600_v11 = vld [vmem:[#allocation20 + $0x30] sm:$0xff]  }
 0x665   :  { %9828 = vmatprep.subr.bf16.mxu1 %v11585_v41  ;;  %v11601_v41 = vld [vmem:[#allocation20 + $0x38] sm:$0xff]  }
 0x666   :  { %10885 = vmatpush3.bf16.msra.mxu0 %v11600_v11 }
 0x667   :  { %10886 = vmatprep.subr.bf16.mxu0 %v11979_v40 }
 0x668   :  { %9829 = vmatpush1.bf16.msra.mxu1 %v11583_v0  ;;  %v10816_v0 = vld [vmem:[#allocation19] ss:$0 sm:$0xff] }
 0x669   :  { %10852 = vmatprep.subr.bf16.mxu1 %v11979_v40 }
 0x66a   :  { %10887 = vmatpush3.bf16.msra.mxu0 %v11601_v41 }
 0x66b   :  { %9847 = vmatmul.mubr.bf16.vlgmr.msra.gmra.mrb[120].mxu1 %v9531_v53 }
 0x66c   :  { %10853 = vmatpush3.bf16.msra.mxu1 %v11586_v8  ;;  %10868 = vmatprep.mubr.msk.bf16.mxu1 %vm11980_vm13, %v11979_v40 }
 0x66d   :  { %10854 = vmatprep.subr.bf16.mxu1 %v11979_v40 }
 0x670   :  { %10855 = vmatpush3.bf16.msra.mxu1 %v11587_v5 }
 0x671   :  { %10856 = vmatprep.subr.bf16.mxu1 %v11979_v40 }
 0x674   :  { %10857 = vmatpush3.bf16.msra.mxu1 %v11588_v10 }
 0x675   :  { %10858 = vmatprep.subr.bf16.mxu1 %v11979_v40 }
 0x678   :  { %10859 = vmatpush3.bf16.msra.mxu1 %v11589_v26  ;;  %v10077_v26 = vld [vmem:[#allocation23] sm:$0x3] }
 0x679   :  { %10860 = vmatprep.subr.bf16.mxu1 %v11979_v40 }
 0x67c   :  { %10861 = vmatpush3.bf16.msra.mxu1 %v11590_v17 }
 0x67d   :  { %10862 = vmatprep.subr.bf16.mxu1 %v11979_v40 }
 0x680   :  { %10863 = vmatpush3.bf16.msra.mxu1 %v11591_v45 }
 0x681   :  { %10864 = vmatprep.subr.bf16.mxu1 %v11979_v40 }
 0x684   :  { %10865 = vmatpush3.bf16.msra.mxu1 %v11592_v55 }
 0x685   :  { %10866 = vmatprep.subr.bf16.mxu1 %v11979_v40 }
 0x688   :  { %10867 = vmatpush3.bf16.msra.mxu1 %v11593_v52 }
 0x71e   :  { %v9807_v61 = vpop.f32.mrb[116].mxu1  ;;  %v9889_v7 = vpop.f32.mrb[124].mxu0 }
 0x71f   :  { %v9809_v21 = vpop.f32.mrb[117].mxu1  ;;  %v9891_v57 = vpop.f32.mrb[125].mxu0 }
 0x720   :  { %v9902_v43 = vcombine.low %v9807_v61, %v9809_v21  ;;  %v9903_v56 = vcombine.high %v9807_v61, %v9809_v21  ;;  %v9906_v31 = vcombine.low %v9889_v7, %v9891_v57  ;;  %v9907_v9 = vcombine.high %v9889_v7, %v9891_v57  ;;  %v9811_v30 = vpop.f32.mrb[118].mxu1  ;;  %v9893_v42 = vpop.f32.mrb[126].mxu0 }
 0x721   :  { %v9812_v2 = vpop.f32.mrb[119].mxu1  ;;  %v9894_v35 = vpop.f32.mrb[127].mxu0 }
 0x722   :  { %v10811_v6 = vrot.slane %v9906_v31, 10  ;;  %v10812_v38 = vrot.slane %v9907_v9, 10 }
 0x73e   :  { %v9848_v15 = vpop.f32.mrb[120].mxu1 }
 0x73f   :  { %v9850_v12 = vpop.f32.mrb[121].mxu1 }
 0x740   :  { %v9904_v3 = vcombine.low %v9848_v15, %v9850_v12  ;;  %v9905_v34 = vcombine.high %v9848_v15, %v9850_v12  ;;  %v9852_v48 = vpop.f32.mrb[122].mxu1 }
 0x741   :  { %v9853_v59 = vpop.f32.mrb[123].mxu1 }
 0x742   :  { %v10809_v24 = vrot.slane %v9904_v3, 9  ;;  %v10810_v50 = vrot.slane %v9905_v34, 9 }
 0x744   :  { %v9916_v4 = vadd.f32 %v10809_v24, %v9902_v43  ;;  %v9917_v62 = vadd.f32 %v10810_v50, %v9903_v56 }
 0x746   :  { %v9924_v49 = vadd.f32 %v10811_v6, %v9916_v4  ;;  %v9925_v58 = vadd.f32 %v10812_v38, %v9917_v62 }
 0x748   :  { %v9928_v25 = vrot.slane %v9924_v49, 4  ;;  %v9929_v19 = vrot.slane %v9925_v58, 4 }
 0x74a   :  { %v9932_v13 = vmax.f32 %v9924_v49, %v9928_v25  ;;  %v9933_v32 = vmax.f32 %v9925_v58, %v9929_v19 }
 0x74c   :  { %v9941_v18 = vadd.f32 %v10813_v28, %v9932_v13  ;;  %v9942_v47 = vadd.f32 %v10813_v28, %v9933_v32 }
 0x74e   :  { %v9943_v63 = vmax.f32 %v9941_v18, 0.0  ;;  %v9944_v53 = vmax.f32 %v9942_v47, 0.0 }
 0x750   :  { %v10814_v44 = vrot.slane %v9943_v63, 9  ;;  %v10815_v54 = vrot.slane %v9944_v53, 9 }
 0x752   :  { %v9953_v22 = vmax.f32 %v9943_v63, %v10814_v44  ;;  %v9954_v14 = vmax.f32 %v9944_v53, %v10815_v54 }
 0x754   :  { %v9955_v60 = vpack.c.bf16 %v9953_v22, %v9953_v22  ;;  %v9956_v46 = vpack.c.bf16 %v9954_v14, %v9954_v14 }
 0x756   :  { %v9983_v33 = vunpack.c.l.b16 %v9956_v46  ;;  %v9982_v29 = vunpack.c.l.b16 %v9955_v60 }
 0x758   :  { %v9984_v16 = vrot.slane %v9983_v33, 7 }
 0x75a   :  { %v9985_v51 = vsel %vm5378_vm9, %v9984_v16, %v9982_v29 }
 0x75b   :  { %v9986_v1 = vpack.c.b16 %v9985_v51, %v9985_v51 }
 0x75d   :  { %10869 = vmatmul.mubr.bf16.vlgmr.msra.gmra.mrb[124].mxu1 %v9986_v1 }
 0x830   :  { %v10070_v8 = vpop.f32.mrb[124].mxu1 }
 0x831   :  { %v10071_v5 = vadd.f32 %v10816_v0, %v10070_v8  ;;  %v10870_v10 = vpop.f32.mrb[125].mxu1 }
 0x832   :  { %v10073_v17 = vpop.f32.mrb[126].mxu1 }
 0x833   :  { %v10076_v45 = vmax.f32 %v10071_v5, 0.0  ;;  %v10871_v55 = vpop.f32.mrb[127].mxu1 }
 0x835   :  { %v10078_v39 = vmul.f32 %v10077_v26, %v10076_v45 }
 0x837   :  { %v10079_v52 = vpack.c.bf16 %v10078_v39, %v10078_v39 }
 0x839   :  { %10889 = vmatmul.mubr.bf16.vlgmr.msra.gmra.mrb[128].mxu0 %v10079_v52 }
 0x90c   :  { %v10185_v20 = vpop.f32.mrb[128].mxu0 }
 0x90d   :  { %v10186_v27 = vadd.f32 %v10825_v36, %v10185_v20  ;;  %v10890_v37 = vpop.f32.mrb[129].mxu0 }
 0x90e   :  { %v10188_v23 = vpop.f32.mrb[130].mxu0 }
 0x90f   :  { %v10891_v61 = vpop.f32.mrb[131].mxu0  ;;  %v10192_v40 = vsel %vm10191_vm14, %v10186_v27, -inf }
 0x910   :  { %10193 = vmax.xlane.f32.xlu0 %v10192_v40 }
 0x99d   :  { %v10194_v7 = vpop.xlane.xlu0 %10193 }
 0x99e   :  { %v10195_v21 = vsub.f32 %v10186_v27, %v10194_v7 }
 0x9a0   :  { %v10196_v57 = vmul.f32 1.442695, %v10195_v21 }
 0x9a2   :  { %11602 = vpow2.f32 %v10196_v57 }
 0x9ac   :  { %v11603_v43 = vpop.eup %11602 }
 0x9ad   :  { %v10198_v56 = vsel %vm10191_vm14, %v11603_v43, 0.0 }
 0x9ae   :  { %10199 = vadd.xlane.f32.xlu0 %v10198_v56 }
 0xa3b   :  { %v10200_v31 = vpop.xlane.xlu0 %10199 }
 0xa3c   :  { %11604 = vlog2.f32 %v10200_v31 }
 0xa46   :  { %v11605_v9 = vpop.eup %11604 }
 0xa47   :  { %v10202_v30 = vmul.f32 0.6931472, %v11605_v9 }
 0xa49   :  { %v10203_v42 = vsub.f32 %v10195_v21, %v10202_v30 }
 0xa4b   :  { %10204 = vst.msk [vmem:[#allocation25] sm:$0x3] %vm10191_vm14, %v10203_v42 }
 0xa4c   :  { %11925 = shalt.err (!%p11922_p4)
}
 0xa4d   :  { %s11926_s24 = scalar_lea.hbm %s14759_s14, 32 }
 0xa4e   :  { %p11927_p5 = scmp.ne.s32.totalorder %s14759_s14, %s11926_s24  ;;  %p11930_p6 = scmp.lt.u32.totalorder %s11926_s24, %s14759_s14 }
 0xa50   :  { %p11932_p7 = pnand %p11930_p6, %p11927_p5 }
 0xa52   :  { %11935 = shalt.err (!%p11932_p7)
}
 0xa53   :  { %10214 = dma.vmem_to_hbm [thread:$0]  %s10212_s0, 32, %s14759_s14, [#allocation4]  }
 0xa54   :  { %11952 = dma.done.wait [#allocation4], 32  }
 0xa55   :  { %11953 = vsyncadd [#allocation4], 4294967264 }
 0xa56   :  { %10218 = vsyncpa [#allocation3], 1 }
 0xa57   :  { %10219 = vsyncpa [#allocation6], 1 }
 0xa58   :  { %10220 = vsyncpa [#allocation9], 1 }
 0xa59   :  { %10221 = vsyncpa [#allocation12], 1 }
 0xa5a   :  { %10222 = vsyncpa [#allocation15], 1 }
 0xa5b   :  { %10223 = vsyncpa [#allocation18], 1 }
 0xa5c   :  { %10224 = vsyncpa [#allocation21], 1 }
 0xa5d   :  { %10225 = vsyncpa [#allocation24], 1 }
 0xa5e   :  { %10226 = vsyncpa [#allocation4], 1 }

</bundles_post_ra>
